<compile_context>
chip_gen: v5e
topology: v5e:2x2
jax: 0.10.0
libtpu: 0.0.40
codegen_flags: <defaults>
</compile_context>

<pallas_src>
import numpy as np
import jax
import jax.numpy as jnp
from jax.experimental import pallas as pl
from jax.experimental.pallas import tpu as pltpu


KSIZE = 5
C1_KPAD = 32    # 5*5*1  = 25  -> 32
C2_KPAD = 512   # 5*5*20 = 500 -> 512
FC_NSPLIT = 2   # fc1 N-dim split (parallel grid axis)


# --------------------- fused conv + bias + maxpool + relu ---------------------

def _conv_pool_relu_kernel(a_ref, w_ref, b_ref, o_ref):
    # a_ref: (1, 4, Kp, Mp) pool-phase-decomposed transposed patches for one image
    # w_ref: (Cout, Kp), b_ref: (Cout, 1), o_ref: (1, Cout, Mp)
    w = w_ref[...]
    y = jnp.dot(w, a_ref[0, 0], preferred_element_type=jnp.float32)
    for p in range(1, 4):
        y = jnp.maximum(y, jnp.dot(w, a_ref[0, p], preferred_element_type=jnp.float32))
    # bias is identical for all 4 pool phases, and relu/maxpool commute:
    #   relu(maxpool(conv + b)) == relu(max_phases(conv_nobias) + b)
    o_ref[0] = jnp.maximum(y + b_ref[...], 0.0)


def conv_pool_relu(a, w, b):
    """Fused valid-conv(5x5) + bias + maxpool(2x2) + ReLU in a single Pallas kernel.

    a: (B, 4, Kp, Mp) pool-phase patch matrices, w: (Cout, Kp), b: (Cout, 1)
    -> (B, Cout, Mp), where column m is pooled position (m // Wp, m % Wp).
    """
    B, P, Kp, Mp = a.shape
    Cout = w.shape[0]
    return pl.pallas_call(
        _conv_pool_relu_kernel,
        out_shape=jax.ShapeDtypeStruct((B, Cout, Mp), jnp.float32),
        grid=(B,),
        in_specs=[
            pl.BlockSpec((1, P, Kp, Mp), lambda i: (i, 0, 0, 0)),
            pl.BlockSpec((Cout, Kp), lambda i: (0, 0)),
            pl.BlockSpec((Cout, 1), lambda i: (0, 0)),
        ],
        out_specs=pl.BlockSpec((1, Cout, Mp), lambda i: (i, 0, 0)),
        compiler_params=pltpu.CompilerParams(
            dimension_semantics=("parallel",),
            vmem_limit_bytes=32 * 1024 * 1024,
        ),
    )(a, w, b)


def phase_pool_im2col_t(x, kpad, k=KSIZE):
    """x: (B, C, H, W) NCHW -> (B, 4, kpad, Hp*Wp) transposed pool-phase patch matrix.

    A[b, phase=(dh,dw), ci*k*k + kh*k + kw, ph*Wp+pw] = x[b, ci, 2ph+dh+kh, 2pw+dw+kw],
    so the conv output column at pooled position (ph,pw) for phase (dh,dw) is one
    column of (Wmat @ A[phase]) and the 2x2 maxpool becomes an elementwise max over
    the 4 phases inside the kernel.  (Cheap XLA strided-slice glue on tiny tensors.)
    """
    B, C, H, W = x.shape
    Ho, Wo = H - k + 1, W - k + 1
    Hp, Wp = Ho // 2, Wo // 2
    K = k * k * C
    phases = []
    for dh in (0, 1):
        for dw in (0, 1):
            taps = []
            for kh in range(k):
                for kw in range(k):
                    h0, w0 = dh + kh, dw + kw
                    taps.append(
                        x[:, :, h0:h0 + 2 * Hp - 1:2, w0:w0 + 2 * Wp - 1:2]
                        .reshape(B, C, 1, Hp * Wp))
            # (B, C, k*k, Hp*Wp) -> (B, C*k*k, Hp*Wp): K index = ci*k*k + kh*k + kw
            phases.append(jnp.concatenate(taps, axis=2).reshape(B, K, Hp * Wp))
    a = jnp.stack(phases, axis=1)                       # (B, 4, K, Hp*Wp)
    if kpad > K:
        a = jnp.pad(a, ((0, 0), (0, 0), (0, kpad - K), (0, 0)))
    return a


# --------------------------- fused fc1 + relu + fc2 ---------------------------

def _fc1_relu_fc2_kernel(x_ref, w1_ref, b1_ref, w2_ref, o_ref):
    # x_ref: (B, 3380), w1_ref: (3380, nblk), b1_ref/w2_ref: (1, nblk), o_ref: (1, B, 1)
    h = jnp.dot(x_ref[...], w1_ref[...], preferred_element_type=jnp.float32)
    h = jnp.maximum(h + b1_ref[...], 0.0)                         # fc1 + ReLU (this N block)
    o_ref[0] = jnp.sum(h * w2_ref[...], axis=-1, keepdims=True)   # partial fc2 contribution


def fc1_relu_fc2(x, w1, b1, w2row, b2, n_split=FC_NSPLIT):
    """out = relu(x @ w1 + b1) @ w2row.T + b2, fused into one Pallas kernel.

    The fc1 output dim is split into `n_split` "parallel" grid blocks; each block
    streams its (3380, 512/n_split) weight slab and reduces its partial fc2 dot
    product.  The tiny (n_split, B, 1) partials are summed here (plus fc2 bias).
    """
    B, K = x.shape
    N = w1.shape[1]
    assert N % n_split == 0
    nblk = N // n_split
    partial = pl.pallas_call(
        _fc1_relu_fc2_kernel,
        out_shape=jax.ShapeDtypeStruct((n_split, B, 1), jnp.float32),
        grid=(n_split,),
        in_specs=[
            pl.BlockSpec((B, K), lambda j: (0, 0)),
            pl.BlockSpec((K, nblk), lambda j: (0, j)),
            pl.BlockSpec((1, nblk), lambda j: (0, j)),
            pl.BlockSpec((1, nblk), lambda j: (0, j)),
        ],
        out_specs=pl.BlockSpec((1, B, 1), lambda j: (j, 0, 0)),
        compiler_params=pltpu.CompilerParams(
            dimension_semantics=("parallel",),
            vmem_limit_bytes=32 * 1024 * 1024,
        ),
    )(x, w1, b1, w2row)
    return jnp.sum(partial, axis=0) + b2


# -------------------------------- parameters ----------------------------------

def init_params(key):
    # Deterministic synthetic init, PyTorch-default-style uniform(-1/sqrt(fan_in), +).
    ks = jax.random.split(key, 8)

    def u(k, shape, fan_in):
        bound = 1.0 / np.sqrt(fan_in)
        return jax.random.uniform(k, shape, jnp.float32, -bound, bound)

    return {
        "conv1_w": u(ks[0], (20, 1, 5, 5), 1 * 5 * 5),
        "conv1_b": u(ks[1], (20,), 1 * 5 * 5),
        "conv2_w": u(ks[2], (20, 20, 5, 5), 20 * 5 * 5),
        "conv2_b": u(ks[3], (20,), 20 * 5 * 5),
        "fc1_w":   u(ks[4], (512, 3380), 3380),
        "fc1_b":   u(ks[5], (512,), 3380),
        "fc2_w":   u(ks[6], (1, 512), 512),
        "fc2_b":   u(ks[7], (1,), 512),
    }


def prepare_params(p):
    """One-time offline layout prep (no per-call transposes in the jitted forward)."""
    def conv_prep(w, kpad):
        cout = w.shape[0]
        m = w.reshape(cout, -1)                       # (Cout, Cin*k*k): K = ci*k*k + kh*k + kw
        return jnp.pad(m, ((0, 0), (0, kpad - m.shape[1])))

    return {
        "w1": conv_prep(p["conv1_w"], C1_KPAD),       # (20, 32)
        "b1": p["conv1_b"].reshape(20, 1),
        "w2": conv_prep(p["conv2_w"], C2_KPAD),       # (20, 512)
        "b2": p["conv2_b"].reshape(20, 1),
        "fc1_w": jnp.transpose(p["fc1_w"]),           # (3380, 512); NCHW flatten = PyTorch order
        "fc1_b": p["fc1_b"].reshape(1, 512),
        "fc2_w": p["fc2_w"],                          # (1, 512)
        "fc2_b": p["fc2_b"].reshape(1, 1),
    }


# --------------------------------- forward ------------------------------------

@jax.jit
def net_forward(prepped, x_nchw):
    # x_nchw: (B, 1, 64, 64) float32  (64x64 is forced by fc1.in_features = 20*13*13).
    B, C, H, W = x_nchw.shape
    assert (C, H, W) == (1, 64, 64), x_nchw.shape
    a1 = phase_pool_im2col_t(x_nchw, kpad=C1_KPAD)                 # (B, 4, 32, 900)
    p1 = conv_pool_relu(a1, prepped["w1"], prepped["b1"])          # (B, 20, 900)
    a2 = phase_pool_im2col_t(p1.reshape(B, 20, 30, 30), kpad=C2_KPAD)  # (B, 4, 512, 169)
    # Dropout2d is identity in eval mode.
    p2 = conv_pool_relu(a2, prepped["w2"], prepped["b2"])          # (B, 20, 169)
    xf = p2.reshape(B, 20 * 13 * 13)                               # (c, h, w) flatten == PyTorch
    # F.dropout is identity in eval mode.
    return fc1_relu_fc2(xf, prepped["fc1_w"], prepped["fc1_b"],
                        prepped["fc2_w"], prepped["fc2_b"])        # (B, 1)


def net_reference(params, x_nchw):
    # Pure-JAX/XLA reference in the original PyTorch (NCHW) layout, for self-checking.
    def conv(x, w, b):
        y = jax.lax.conv_general_dilated(
            x, w, window_strides=(1, 1), padding="VALID",
            dimension_numbers=("NCHW", "OIHW", "NCHW"),
            precision=jax.lax.Precision.HIGHEST)
        return y + b.reshape(1, -1, 1, 1)

    def pool2(x):
        B, C, H, W = x.shape
        return x.reshape(B, C, H // 2, 2, W // 2, 2).max(axis=(3, 5))

    x = jax.nn.relu(pool2(conv(x_nchw, params["conv1_w"], params["conv1_b"])))
    x = jax.nn.relu(pool2(conv(x, params["conv2_w"], params["conv2_b"])))
    x = x.reshape(x.shape[0], -1)
    x = jax.nn.relu(jnp.dot(x, params["fc1_w"].T, precision=jax.lax.Precision.HIGHEST)
                    + params["fc1_b"])
    return jnp.dot(x, params["fc2_w"].T, precision=jax.lax.Precision.HIGHEST) + params["fc2_b"]


if __name__ == "__main__":
    key = jax.random.PRNGKey(0)
    pkey, xkey = jax.random.split(key)
    params = init_params(pkey)
    prepped = prepare_params(params)            # one-time offline layout prep
    x = jax.random.normal(xkey, (2, 1, 64, 64), jnp.float32)

    out = jax.block_until_ready(net_forward(prepped, x))
    assert out.shape == (2, 1), out.shape
    assert bool(jnp.all(jnp.isfinite(out)))

    ref = jax.block_until_ready(net_reference(params, x))
    err = float(jnp.max(jnp.abs(out - ref)))
    scale = float(jnp.max(jnp.abs(ref))) + 1e-6
    assert err <= 2e-2 * max(1.0, scale), f"mismatch vs reference: max|diff|={err}, scale={scale}"

    print("KERNEL_OK")
</pallas_src>

<mosaic_0001>
module attributes {stable_mosaic.version = 11 : i64} {
  func.func @_conv_pool_relu_kernel(%arg0: i32, %arg1: memref<1x4x32x900xf32, #tpu.memory_space<vmem>>, %arg2: memref<20x32xf32, #tpu.memory_space<vmem>>, %arg3: memref<20x1xf32, #tpu.memory_space<vmem>>, %arg4: memref<1x20x900xf32, #tpu.memory_space<vmem>>) attributes {dimension_semantics = [#tpu.dimension_semantics<parallel>], iteration_bounds = array<i64: 2>, scalar_prefetch = 0 : i64, scratch_operands = 0 : i64, tpu.core_type = #tpu.core_type<tc>, window_params = [{transform_indices = @transform_0, window_bounds = array<i64: 1, 4, 32, 900>}, {pipeline_mode = #tpu.pipeline_mode<synchronous>, transform_indices = @transform_1, window_bounds = array<i64: 20, 32>}, {pipeline_mode = #tpu.pipeline_mode<synchronous>, transform_indices = @transform_2, window_bounds = array<i64: 20, 1>}, {transform_indices = @transform_3, window_bounds = array<i64: 1, 20, 900>}]} {
    %c0 = arith.constant 0 : index
    %c0_0 = arith.constant 0 : index
    %0 = vector.load %arg2[%c0, %c0_0] : memref<20x32xf32, #tpu.memory_space<vmem>>, vector<20x32xf32>
    %c0_1 = arith.constant 0 : index
    %c0_2 = arith.constant 0 : index
    %c0_3 = arith.constant 0 : index
    %c0_4 = arith.constant 0 : index
    %1 = vector.load %arg1[%c0_1, %c0_2, %c0_3, %c0_4] : memref<1x4x32x900xf32, #tpu.memory_space<vmem>>, vector<1x1x32x900xf32>
    %2 = vector.shape_cast %1 : vector<1x1x32x900xf32> to vector<32x900xf32>
    %cst = arith.constant dense<0.000000e+00> : vector<20x900xf32>
    %3 = tpu.matmul %0, %2, %cst {dimension_numbers = #tpu.dot_dimension_numbers<[1], [0], [0], [1], [0, 0, 1, 1], [], []>} : vector<20x32xf32>, vector<32x900xf32>, vector<20x900xf32> -> vector<20x900xf32>
    %c0_5 = arith.constant 0 : index
    %c1 = arith.constant 1 : index
    %c0_6 = arith.constant 0 : index
    %c0_7 = arith.constant 0 : index
    %4 = vector.load %arg1[%c0_5, %c1, %c0_6, %c0_7] : memref<1x4x32x900xf32, #tpu.memory_space<vmem>>, vector<1x1x32x900xf32>
    %5 = vector.shape_cast %4 : vector<1x1x32x900xf32> to vector<32x900xf32>
    %cst_8 = arith.constant dense<0.000000e+00> : vector<20x900xf32>
    %6 = tpu.matmul %0, %5, %cst_8 {dimension_numbers = #tpu.dot_dimension_numbers<[1], [0], [0], [1], [0, 0, 1, 1], [], []>} : vector<20x32xf32>, vector<32x900xf32>, vector<20x900xf32> -> vector<20x900xf32>
    %7 = arith.maximumf %3, %6 : vector<20x900xf32>
    %c0_9 = arith.constant 0 : index
    %c2 = arith.constant 2 : index
    %c0_10 = arith.constant 0 : index
    %c0_11 = arith.constant 0 : index
    %8 = vector.load %arg1[%c0_9, %c2, %c0_10, %c0_11] : memref<1x4x32x900xf32, #tpu.memory_space<vmem>>, vector<1x1x32x900xf32>
    %9 = vector.shape_cast %8 : vector<1x1x32x900xf32> to vector<32x900xf32>
    %cst_12 = arith.constant dense<0.000000e+00> : vector<20x900xf32>
    %10 = tpu.matmul %0, %9, %cst_12 {dimension_numbers = #tpu.dot_dimension_numbers<[1], [0], [0], [1], [0, 0, 1, 1], [], []>} : vector<20x32xf32>, vector<32x900xf32>, vector<20x900xf32> -> vector<20x900xf32>
    %11 = arith.maximumf %7, %10 : vector<20x900xf32>
    %c0_13 = arith.constant 0 : index
    %c3 = arith.constant 3 : index
    %c0_14 = arith.constant 0 : index
    %c0_15 = arith.constant 0 : index
    %12 = vector.load %arg1[%c0_13, %c3, %c0_14, %c0_15] : memref<1x4x32x900xf32, #tpu.memory_space<vmem>>, vector<1x1x32x900xf32>
    %13 = vector.shape_cast %12 : vector<1x1x32x900xf32> to vector<32x900xf32>
    %cst_16 = arith.constant dense<0.000000e+00> : vector<20x900xf32>
    %14 = tpu.matmul %0, %13, %cst_16 {dimension_numbers = #tpu.dot_dimension_numbers<[1], [0], [0], [1], [0, 0, 1, 1], [], []>} : vector<20x32xf32>, vector<32x900xf32>, vector<20x900xf32> -> vector<20x900xf32>
    %15 = arith.maximumf %11, %14 : vector<20x900xf32>
    %c0_17 = arith.constant 0 : index
    %c0_18 = arith.constant 0 : index
    %16 = vector.load %arg3[%c0_17, %c0_18] : memref<20x1xf32, #tpu.memory_space<vmem>>, vector<20x1xf32>
    %17 = vector.broadcast %16 : vector<20x1xf32> to vector<20x900xf32>
    %18 = arith.addf %15, %17 : vector<20x900xf32>
    %cst_19 = arith.constant 0.000000e+00 : f32
    %19 = vector.broadcast %cst_19 : f32 to vector<20x900xf32>
    %20 = arith.maximumf %18, %19 : vector<20x900xf32>
    %c0_20 = arith.constant 0 : index
    %c0_21 = arith.constant 0 : index
    %c0_22 = arith.constant 0 : index
    %21 = vector.load %arg4[%c0_20, %c0_21, %c0_22] : memref<1x20x900xf32, #tpu.memory_space<vmem>>, vector<1x20x900xf32>
    %22 = vector.shape_cast %21 : vector<1x20x900xf32> to vector<20x900xf32>
    %23 = vector.shape_cast %20 : vector<20x900xf32> to vector<1x20x900xf32>
    tpu.vector_store %arg4[%c0_20, %c0_21, %c0_22], %23 {strides = array<i32>} : memref<1x20x900xf32, #tpu.memory_space<vmem>>, vector<1x20x900xf32>,
    return
  }
  func.func @transform_0(%arg0: i32) -> (i32, i32, i32, i32) {
    %c0_i32 = arith.constant 0 : i32
    %c0_i32_0 = arith.constant 0 : i32
    %c0_i32_1 = arith.constant 0 : i32
    %c0_i32_2 = arith.constant 0 : i32
    return %arg0, %c0_i32, %c0_i32_0, %c0_i32_1 : i32, i32, i32, i32
  }
  func.func @transform_1(%arg0: i32) -> (i32, i32) {
    %c0_i32 = arith.constant 0 : i32
    %c0_i32_0 = arith.constant 0 : i32
    %c0_i32_1 = arith.constant 0 : i32
    return %c0_i32, %c0_i32_0 : i32, i32
  }
  func.func @transform_2(%arg0: i32) -> (i32, i32) {
    %c0_i32 = arith.constant 0 : i32
    %c0_i32_0 = arith.constant 0 : i32
    %c0_i32_1 = arith.constant 0 : i32
    return %c0_i32, %c0_i32_0 : i32, i32
  }
  func.func @transform_3(%arg0: i32) -> (i32, i32, i32) {
    %c0_i32 = arith.constant 0 : i32
    %c0_i32_0 = arith.constant 0 : i32
    %c0_i32_1 = arith.constant 0 : i32
    return %arg0, %c0_i32, %c0_i32_0 : i32, i32, i32
  }
}

module attributes {stable_mosaic.version = 11 : i64} {
  func.func @_conv_pool_relu_kernel(%arg0: i32, %arg1: memref<1x4x512x169xf32, #tpu.memory_space<vmem>>, %arg2: memref<20x512xf32, #tpu.memory_space<vmem>>, %arg3: memref<20x1xf32, #tpu.memory_space<vmem>>, %arg4: memref<1x20x169xf32, #tpu.memory_space<vmem>>) attributes {dimension_semantics = [#tpu.dimension_semantics<parallel>], iteration_bounds = array<i64: 2>, scalar_prefetch = 0 : i64, scratch_operands = 0 : i64, tpu.core_type = #tpu.core_type<tc>, window_params = [{transform_indices = @transform_0, window_bounds = array<i64: 1, 4, 512, 169>}, {pipeline_mode = #tpu.pipeline_mode<synchronous>, transform_indices = @transform_1, window_bounds = array<i64: 20, 512>}, {pipeline_mode = #tpu.pipeline_mode<synchronous>, transform_indices = @transform_2, window_bounds = array<i64: 20, 1>}, {transform_indices = @transform_3, window_bounds = array<i64: 1, 20, 169>}]} {
    %c0 = arith.constant 0 : index
    %c0_0 = arith.constant 0 : index
    %0 = vector.load %arg2[%c0, %c0_0] : memref<20x512xf32, #tpu.memory_space<vmem>>, vector<20x512xf32>
    %c0_1 = arith.constant 0 : index
    %c0_2 = arith.constant 0 : index
    %c0_3 = arith.constant 0 : index
    %c0_4 = arith.constant 0 : index
    %1 = vector.load %arg1[%c0_1, %c0_2, %c0_3, %c0_4] : memref<1x4x512x169xf32, #tpu.memory_space<vmem>>, vector<1x1x512x169xf32>
    %2 = vector.shape_cast %1 : vector<1x1x512x169xf32> to vector<512x169xf32>
    %cst = arith.constant dense<0.000000e+00> : vector<20x169xf32>
    %3 = tpu.matmul %0, %2, %cst {dimension_numbers = #tpu.dot_dimension_numbers<[1], [0], [0], [1], [0, 0, 1, 1], [], []>} : vector<20x512xf32>, vector<512x169xf32>, vector<20x169xf32> -> vector<20x169xf32>
    %c0_5 = arith.constant 0 : index
    %c1 = arith.constant 1 : index
    %c0_6 = arith.constant 0 : index
    %c0_7 = arith.constant 0 : index
    %4 = vector.load %arg1[%c0_5, %c1, %c0_6, %c0_7] : memref<1x4x512x169xf32, #tpu.memory_space<vmem>>, vector<1x1x512x169xf32>
    %5 = vector.shape_cast %4 : vector<1x1x512x169xf32> to vector<512x169xf32>
    %cst_8 = arith.constant dense<0.000000e+00> : vector<20x169xf32>
    %6 = tpu.matmul %0, %5, %cst_8 {dimension_numbers = #tpu.dot_dimension_numbers<[1], [0], [0], [1], [0, 0, 1, 1], [], []>} : vector<20x512xf32>, vector<512x169xf32>, vector<20x169xf32> -> vector<20x169xf32>
    %7 = arith.maximumf %3, %6 : vector<20x169xf32>
    %c0_9 = arith.constant 0 : index
    %c2 = arith.constant 2 : index
    %c0_10 = arith.constant 0 : index
    %c0_11 = arith.constant 0 : index
    %8 = vector.load %arg1[%c0_9, %c2, %c0_10, %c0_11] : memref<1x4x512x169xf32, #tpu.memory_space<vmem>>, vector<1x1x512x169xf32>
    %9 = vector.shape_cast %8 : vector<1x1x512x169xf32> to vector<512x169xf32>
    %cst_12 = arith.constant dense<0.000000e+00> : vector<20x169xf32>
    %10 = tpu.matmul %0, %9, %cst_12 {dimension_numbers = #tpu.dot_dimension_numbers<[1], [0], [0], [1], [0, 0, 1, 1], [], []>} : vector<20x512xf32>, vector<512x169xf32>, vector<20x169xf32> -> vector<20x169xf32>
    %11 = arith.maximumf %7, %10 : vector<20x169xf32>
    %c0_13 = arith.constant 0 : index
    %c3 = arith.constant 3 : index
    %c0_14 = arith.constant 0 : index
    %c0_15 = arith.constant 0 : index
    %12 = vector.load %arg1[%c0_13, %c3, %c0_14, %c0_15] : memref<1x4x512x169xf32, #tpu.memory_space<vmem>>, vector<1x1x512x169xf32>
    %13 = vector.shape_cast %12 : vector<1x1x512x169xf32> to vector<512x169xf32>
    %cst_16 = arith.constant dense<0.000000e+00> : vector<20x169xf32>
    %14 = tpu.matmul %0, %13, %cst_16 {dimension_numbers = #tpu.dot_dimension_numbers<[1], [0], [0], [1], [0, 0, 1, 1], [], []>} : vector<20x512xf32>, vector<512x169xf32>, vector<20x169xf32> -> vector<20x169xf32>
    %15 = arith.maximumf %11, %14 : vector<20x169xf32>
    %c0_17 = arith.constant 0 : index
    %c0_18 = arith.constant 0 : index
    %16 = vector.load %arg3[%c0_17, %c0_18] : memref<20x1xf32, #tpu.memory_space<vmem>>, vector<20x1xf32>
    %17 = vector.broadcast %16 : vector<20x1xf32> to vector<20x169xf32>
    %18 = arith.addf %15, %17 : vector<20x169xf32>
    %cst_19 = arith.constant 0.000000e+00 : f32
    %19 = vector.broadcast %cst_19 : f32 to vector<20x169xf32>
    %20 = arith.maximumf %18, %19 : vector<20x169xf32>
    %c0_20 = arith.constant 0 : index
    %c0_21 = arith.constant 0 : index
    %c0_22 = arith.constant 0 : index
    %21 = vector.load %arg4[%c0_20, %c0_21, %c0_22] : memref<1x20x169xf32, #tpu.memory_space<vmem>>, vector<1x20x169xf32>
    %22 = vector.shape_cast %21 : vector<1x20x169xf32> to vector<20x169xf32>
    %23 = vector.shape_cast %20 : vector<20x169xf32> to vector<1x20x169xf32>
    tpu.vector_store %arg4[%c0_20, %c0_21, %c0_22], %23 {strides = array<i32>} : memref<1x20x169xf32, #tpu.memory_space<vmem>>, vector<1x20x169xf32>,
    return
  }
  func.func @transform_0(%arg0: i32) -> (i32, i32, i32, i32) {
    %c0_i32 = arith.constant 0 : i32
    %c0_i32_0 = arith.constant 0 : i32
    %c0_i32_1 = arith.constant 0 : i32
    %c0_i32_2 = arith.constant 0 : i32
    return %arg0, %c0_i32, %c0_i32_0, %c0_i32_1 : i32, i32, i32, i32
  }
  func.func @transform_1(%arg0: i32) -> (i32, i32) {
    %c0_i32 = arith.constant 0 : i32
    %c0_i32_0 = arith.constant 0 : i32
    %c0_i32_1 = arith.constant 0 : i32
    return %c0_i32, %c0_i32_0 : i32, i32
  }
  func.func @transform_2(%arg0: i32) -> (i32, i32) {
    %c0_i32 = arith.constant 0 : i32
    %c0_i32_0 = arith.constant 0 : i32
    %c0_i32_1 = arith.constant 0 : i32
    return %c0_i32, %c0_i32_0 : i32, i32
  }
  func.func @transform_3(%arg0: i32) -> (i32, i32, i32) {
    %c0_i32 = arith.constant 0 : i32
    %c0_i32_0 = arith.constant 0 : i32
    %c0_i32_1 = arith.constant 0 : i32
    return %arg0, %c0_i32, %c0_i32_0 : i32, i32, i32
  }
}

module attributes {stable_mosaic.version = 11 : i64} {
  func.func @_fc1_relu_fc2_kernel(%arg0: i32, %arg1: memref<2x3380xf32, #tpu.memory_space<vmem>>, %arg2: memref<3380x256xf32, #tpu.memory_space<vmem>>, %arg3: memref<1x256xf32, #tpu.memory_space<vmem>>, %arg4: memref<1x256xf32, #tpu.memory_space<vmem>>, %arg5: memref<1x2x1xf32, #tpu.memory_space<vmem>>) attributes {dimension_semantics = [#tpu.dimension_semantics<parallel>], iteration_bounds = array<i64: 2>, scalar_prefetch = 0 : i64, scratch_operands = 0 : i64, tpu.core_type = #tpu.core_type<tc>, window_params = [{pipeline_mode = #tpu.pipeline_mode<synchronous>, transform_indices = @transform_0, window_bounds = array<i64: 2, 3380>}, {transform_indices = @transform_1, window_bounds = array<i64: 3380, 256>}, {transform_indices = @transform_2, window_bounds = array<i64: 1, 256>}, {transform_indices = @transform_3, window_bounds = array<i64: 1, 256>}, {transform_indices = @transform_4, window_bounds = array<i64: 1, 2, 1>}]} {
    %c0 = arith.constant 0 : index
    %c0_0 = arith.constant 0 : index
    %0 = vector.load %arg1[%c0, %c0_0] : memref<2x3380xf32, #tpu.memory_space<vmem>>, vector<2x3380xf32>
    %c0_1 = arith.constant 0 : index
    %c0_2 = arith.constant 0 : index
    %1 = vector.load %arg2[%c0_1, %c0_2] : memref<3380x256xf32, #tpu.memory_space<vmem>>, vector<3380x256xf32>
    %cst = arith.constant dense<0.000000e+00> : vector<2x256xf32>
    %2 = tpu.matmul %0, %1, %cst {dimension_numbers = #tpu.dot_dimension_numbers<[1], [0], [0], [1], [0, 0, 1, 1], [], []>} : vector<2x3380xf32>, vector<3380x256xf32>, vector<2x256xf32> -> vector<2x256xf32>
    %c0_3 = arith.constant 0 : index
    %c0_4 = arith.constant 0 : index
    %3 = vector.load %arg3[%c0_3, %c0_4] : memref<1x256xf32, #tpu.memory_space<vmem>>, vector<1x256xf32>
    %4 = vector.broadcast %3 : vector<1x256xf32> to vector<2x256xf32>
    %5 = arith.addf %2, %4 : vector<2x256xf32>
    %cst_5 = arith.constant 0.000000e+00 : f32
    %6 = vector.broadcast %cst_5 : f32 to vector<2x256xf32>
    %7 = arith.maximumf %5, %6 : vector<2x256xf32>
    %c0_6 = arith.constant 0 : index
    %c0_7 = arith.constant 0 : index
    %8 = vector.load %arg4[%c0_6, %c0_7] : memref<1x256xf32, #tpu.memory_space<vmem>>, vector<1x256xf32>
    %9 = vector.broadcast %8 : vector<1x256xf32> to vector<2x256xf32>
    %10 = arith.mulf %7, %9 : vector<2x256xf32>
    %cst_8 = arith.constant dense<0.000000e+00> : vector<2xf32>
    %11 = vector.multi_reduction <add>, %10, %cst_8 [1] : vector<2x256xf32> to vector<2xf32>
    %12 = vector.shape_cast %11 : vector<2xf32> to vector<2x1xf32>
    %c0_9 = arith.constant 0 : index
    %c0_10 = arith.constant 0 : index
    %c0_11 = arith.constant 0 : index
    %13 = vector.load %arg5[%c0_9, %c0_10, %c0_11] : memref<1x2x1xf32, #tpu.memory_space<vmem>>, vector<1x2x1xf32>
    %14 = vector.shape_cast %13 : vector<1x2x1xf32> to vector<2x1xf32>
    %15 = vector.shape_cast %12 : vector<2x1xf32> to vector<1x2x1xf32>
    tpu.vector_store %arg5[%c0_9, %c0_10, %c0_11], %15 {strides = array<i32>} : memref<1x2x1xf32, #tpu.memory_space<vmem>>, vector<1x2x1xf32>,
    return
  }
  func.func @transform_0(%arg0: i32) -> (i32, i32) {
    %c0_i32 = arith.constant 0 : i32
    %c0_i32_0 = arith.constant 0 : i32
    %c0_i32_1 = arith.constant 0 : i32
    return %c0_i32, %c0_i32_0 : i32, i32
  }
  func.func @transform_1(%arg0: i32) -> (i32, i32) {
    %c0_i32 = arith.constant 0 : i32
    %c0_i32_0 = arith.constant 0 : i32
    return %c0_i32, %arg0 : i32, i32
  }
  func.func @transform_2(%arg0: i32) -> (i32, i32) {
    %c0_i32 = arith.constant 0 : i32
    %c0_i32_0 = arith.constant 0 : i32
    return %c0_i32, %arg0 : i32, i32
  }
  func.func @transform_3(%arg0: i32) -> (i32, i32) {
    %c0_i32 = arith.constant 0 : i32
    %c0_i32_0 = arith.constant 0 : i32
    return %c0_i32, %arg0 : i32, i32
  }
  func.func @transform_4(%arg0: i32) -> (i32, i32, i32) {
    %c0_i32 = arith.constant 0 : i32
    %c0_i32_0 = arith.constant 0 : i32
    %c0_i32_1 = arith.constant 0 : i32
    return %arg0, %c0_i32, %c0_i32_0 : i32, i32, i32
  }
}

</mosaic_0001>

<bundles_post_ra>
// kernel: net_forward.3
= control target key start
LH: loop header
LB: loop body
LE: loop exit
PB: predicated region body
PF: predicated region fallthrough
CT: control target
= control target key end

     0   :  { %s1610_s12 = smov 0   ;;  %s2293_s0 = inlined_call_operand.vmem [shape: f32[2,4,32,900], index: 0, kind: input, shape index: {}]   ;;  %s2294_s1 = inlined_call_operand.vmem [shape: f32[20,32], index: 1, kind: input, shape index: {}]   ;;  %s2295_s2 = inlined_call_operand.vmem [shape: f32[20,1], index: 2, kind: input, shape index: {}]   ;;  %s2296_s3 = inlined_call_operand.vmem [shape: f32[2,20,900], index: 3, kind: output, shape index: {}]  }
   0x1 LB: > { %s1366_s13 = sadd.s32 4294967295, %s1587_s12   ;;  %p1370_p0 = scmp.ge.s32.totalorder %s1587_s12, 1  ;;  %s1587_s12 = sphi %s1610_s12, %s13_s12  }
   0x2   : > { %p137_p1 = scmp.lt.s32.totalorder %s1587_s12, 3 }
   0x4   : > { %p138_p2 = pnand %p1370_p0, %p137_p1 }
   0x6   : > { %141 = sbr.rel (%p138_p2) target bundleno = 350 (0x15e), region = 32 }
   0xb   : > { %p161_p3 = scmp.lt.s32.totalorder %s1366_s13, 1  ;;  %v1645_v16 = vld [vmem:[%s2294_s1] sm:$0xff]  ;;  %vm206_vm0 = vcmask 261120   ;;  %v1670_v29 = vld [vmem:[%s2294_s1 + $0x8] sm:$0xff]  ;;  %v1695_v42 = vld [vmem:[%s2294_s1 + $0x10] sm:$0xf] }
   0xc   : > { %vm1292_vm1 = vcmask 31744   ;;  %vm1309_vm2 = vcmask 27648  }
   0xd   : > { %s2374_s13 = smov (!%p161_p3, %s1366_s13), 1 }
   0xe   : > { %s1568_s14 = sshll.u32 %s2374_s13, 10  ;;  %s1569_s30 = smul.u32 192, %s2374_s13 }
   0xf   : > { %s1624_s17 = scalar_lea.vmem %s2293_s0, %s1568_s14 }
  0x10   : > { %v198_v0 = vld [vmem:[%s1624_s17 + $0xc0] sm:$0xff]  ;;  %v199_v1 = vld [vmem:[%s1624_s17 + $0xc8] sm:$0xff]  ;;  %v200_v2 = vld [vmem:[%s1624_s17 + $0xd0] sm:$0xff]  ;;  %s2156_s6 = scalar_lea.vmem %s2296_s3, %s1569_s30 }
  0x11   : > { %228 = vmatpush.msra.mxu0 %v198_v0  ;;  %254 = vmatpush.msra.mxu1 %v199_v1  ;;  %v201_v3 = vld [vmem:[%s1624_s17 + $0xd8] sm:$0xff]  ;;  %v190_v4 = vld [vmem:[%s1624_s17 + $0x80] sm:$0xff]  ;;  %v191_v5 = vld [vmem:[%s1624_s17 + $0x88] sm:$0xff] }
  0x12   : > { %280 = vmatpush.msra.mxu2 %v200_v2  ;;  %306 = vmatpush.msra.mxu3 %v201_v3  ;;  %v192_v6 = vld [vmem:[%s1624_s17 + $0x90] sm:$0xff]  ;;  %v193_v7 = vld [vmem:[%s1624_s17 + $0x98] sm:$0xff]  ;;  %v182_v8 = vld [vmem:[%s1624_s17 + $0x40] sm:$0xff] }
  0x13   : > { %229 = vmatpush.msra.mxu0 %v190_v4  ;;  %255 = vmatpush.msra.mxu1 %v191_v5  ;;  %v183_v9 = vld [vmem:[%s1624_s17 + $0x48] sm:$0xff]  ;;  %v184_v10 = vld [vmem:[%s1624_s17 + $0x50] sm:$0xff]  ;;  %v185_v11 = vld [vmem:[%s1624_s17 + $0x58] sm:$0xff] }
  0x14   : > { %281 = vmatpush.msra.mxu2 %v192_v6  ;;  %307 = vmatpush.msra.mxu3 %v193_v7  ;;  %v174_v12 = vld [vmem:[%s1624_s17] sm:$0xff]  ;;  %v175_v13 = vld [vmem:[%s1624_s17 + $0x8] sm:$0xff]  ;;  %v176_v14 = vld [vmem:[%s1624_s17 + $0x10] sm:$0xff] }
  0x15   : > { %230 = vmatpush.msra.mxu0 %v182_v8  ;;  %256 = vmatpush.msra.mxu1 %v183_v9  ;;  %v177_v15 = vld [vmem:[%s1624_s17 + $0x18] sm:$0xff]  ;;  %v204_v17 = vld [vmem:[%s1624_s17 + $0xf0] sm:$0xff]  ;;  %v202_v19 = vld [vmem:[%s1624_s17 + $0xe0] sm:$0xff] }
  0x16   : > { %282 = vmatpush.msra.mxu2 %v184_v10  ;;  %308 = vmatpush.msra.mxu3 %v185_v11  ;;  %v205_v18 = vld [vmem:[%s1624_s17 + $0xf8] sm:$0xff]  ;;  %v203_v20 = vld [vmem:[%s1624_s17 + $0xe8] sm:$0xff]  ;;  %v196_v21 = vld [vmem:[%s1624_s17 + $0xb0] sm:$0xff] }
  0x17   : > { %231 = vmatpush.msra.mxu0 %v174_v12  ;;  %257 = vmatpush.msra.mxu1 %v175_v13  ;;  %v197_v22 = vld [vmem:[%s1624_s17 + $0xb8] sm:$0xff]  ;;  %v194_v23 = vld [vmem:[%s1624_s17 + $0xa0] sm:$0xff]  ;;  %v195_v24 = vld [vmem:[%s1624_s17 + $0xa8] sm:$0xff] }
  0x18   : > { %283 = vmatpush.msra.mxu2 %v176_v14  ;;  %309 = vmatpush.msra.mxu3 %v177_v15  ;;  %v188_v25 = vld [vmem:[%s1624_s17 + $0x70] sm:$0xff]  ;;  %v189_v26 = vld [vmem:[%s1624_s17 + $0x78] sm:$0xff]  ;;  %v186_v27 = vld [vmem:[%s1624_s17 + $0x60] sm:$0xff] }
  0x19   : > { %1374 = vmatmul.msk.f32.vlgmr.msra.gmra.mxu0 %vm206_vm0, %v1645_v16  ;;  %1377 = vmatmul.msk.f32.vlgmr.msra.gmra.mxu1 %vm206_vm0, %v1645_v16  ;;  %v187_v28 = vld [vmem:[%s1624_s17 + $0x68] sm:$0xff]  ;;  %v180_v30 = vld [vmem:[%s1624_s17 + $0x30] sm:$0xff]  ;;  %v181_v31 = vld [vmem:[%s1624_s17 + $0x38] sm:$0xff] }
  0x1a   : > { %1380 = vmatmul.msk.f32.vlgmr.msra.gmra.mxu2 %vm206_vm0, %v1645_v16  ;;  %1383 = vmatmul.msk.f32.vlgmr.msra.gmra.mxu3 %vm206_vm0, %v1645_v16  ;;  %v178_v32 = vld [vmem:[%s1624_s17 + $0x20] sm:$0xff]  ;;  %v179_v33 = vld [vmem:[%s1624_s17 + $0x28] sm:$0xff]  ;;  %v1424_v34 = vld [vmem:[%s1624_s17 + $0x1d0] sm:$0xff] }
  0x1b   : > { %384 = vmatpush.msrb.mxu2 %v204_v17  ;;  %410 = vmatpush.msrb.mxu3 %v205_v18  ;;  %v1425_v35 = vld [vmem:[%s1624_s17 + $0x1d8] sm:$0xff]  ;;  %v1422_v36 = vld [vmem:[%s1624_s17 + $0x1c0] sm:$0xff]  ;;  %v1423_v37 = vld [vmem:[%s1624_s17 + $0x1c8] sm:$0xff] }
  0x1c   : > { %332 = vmatpush.msrb.mxu0 %v202_v19  ;;  %358 = vmatpush.msrb.mxu1 %v203_v20  ;;  %v1416_v38 = vld [vmem:[%s1624_s17 + $0x190] sm:$0xff]  ;;  %v1417_v39 = vld [vmem:[%s1624_s17 + $0x198] sm:$0xff]  ;;  %v1414_v40 = vld [vmem:[%s1624_s17 + $0x180] sm:$0xff] }
  0x1d   : > { %385 = vmatpush.msrb.mxu2 %v196_v21  ;;  %411 = vmatpush.msrb.mxu3 %v197_v22  ;;  %v1415_v41 = vld [vmem:[%s1624_s17 + $0x188] sm:$0xff]  ;;  %v1408_v43 = vld [vmem:[%s1624_s17 + $0x150] sm:$0xff]  ;;  %v1409_v44 = vld [vmem:[%s1624_s17 + $0x158] sm:$0xff] }
  0x1e   : > { %333 = vmatpush.msrb.mxu0 %v194_v23  ;;  %359 = vmatpush.msrb.mxu1 %v195_v24  ;;  %v1406_v45 = vld [vmem:[%s1624_s17 + $0x140] sm:$0xff]  ;;  %v1407_v46 = vld [vmem:[%s1624_s17 + $0x148] sm:$0xff]  ;;  %v1400_v47 = vld [vmem:[%s1624_s17 + $0x110] sm:$0xff] }
  0x1f   : > { %386 = vmatpush.msrb.mxu2 %v188_v25  ;;  %412 = vmatpush.msrb.mxu3 %v189_v26  ;;  %v1401_v48 = vld [vmem:[%s1624_s17 + $0x118] sm:$0xff]  ;;  %v1398_v49 = vld [vmem:[%s1624_s17 + $0x100] sm:$0xff]  ;;  %v1399_v50 = vld [vmem:[%s1624_s17 + $0x108] sm:$0xff] }
  0x20   : > { %334 = vmatpush.msrb.mxu0 %v186_v27  ;;  %360 = vmatpush.msrb.mxu1 %v187_v28  ;;  %v1428_v51 = vld [vmem:[%s1624_s17 + $0x1f0] sm:$0xff]  ;;  %v1429_v52 = vld [vmem:[%s1624_s17 + $0x1f8] sm:$0xff]  ;;  %v1426_v53 = vld [vmem:[%s1624_s17 + $0x1e0] sm:$0xff] }
  0x21   : > { %1375 = vmatmul.msk.f32.gmra.mxu0 %vm206_vm0, %v1670_v29  ;;  %1378 = vmatmul.msk.f32.gmra.mxu1 %vm206_vm0, %v1670_v29  ;;  %v1427_v54 = vld [vmem:[%s1624_s17 + $0x1e8] sm:$0xff]  ;;  %v1420_v55 = vld [vmem:[%s1624_s17 + $0x1b0] sm:$0xff]  ;;  %v1421_v56 = vld [vmem:[%s1624_s17 + $0x1b8] sm:$0xff] }
  0x22   : > { %1381 = vmatmul.msk.f32.gmra.mxu2 %vm206_vm0, %v1670_v29  ;;  %1384 = vmatmul.msk.f32.gmra.mxu3 %vm206_vm0, %v1670_v29  ;;  %v1418_v57 = vld [vmem:[%s1624_s17 + $0x1a0] sm:$0xff]  ;;  %v1419_v58 = vld [vmem:[%s1624_s17 + $0x1a8] sm:$0xff]  ;;  %v1412_v59 = vld [vmem:[%s1624_s17 + $0x170] sm:$0xff] }
  0x23   : > { %387 = vmatpush.msrb.mxu2 %v180_v30  ;;  %413 = vmatpush.msrb.mxu3 %v181_v31  ;;  %v1413_v60 = vld [vmem:[%s1624_s17 + $0x178] sm:$0xff]  ;;  %v1410_v61 = vld [vmem:[%s1624_s17 + $0x160] sm:$0xff]  ;;  %v1411_v62 = vld [vmem:[%s1624_s17 + $0x168] sm:$0xff] }
  0x24   : > { %335 = vmatpush.msrb.mxu0 %v178_v32  ;;  %361 = vmatpush.msrb.mxu1 %v179_v33  ;;  %v1404_v63 = vld [vmem:[%s1624_s17 + $0x130] sm:$0xff]  ;;  %v1405_v0 = vld [vmem:[%s1624_s17 + $0x138] sm:$0xff]  ;;  %v1402_v1 = vld [vmem:[%s1624_s17 + $0x120] sm:$0xff] }
  0x25   : > { %521 = vmatpush.msra.mxu2 %v1424_v34  ;;  %547 = vmatpush.msra.mxu3 %v1425_v35  ;;  %v1403_v2 = vld [vmem:[%s1624_s17 + $0x128] sm:$0xff]  ;;  %v1480_v3 = vld [vmem:[%s1624_s17 + $0x2d0] sm:$0xff]  ;;  %v1481_v4 = vld [vmem:[%s1624_s17 + $0x2d8] sm:$0xff] }
  0x26   : > { %469 = vmatpush.msra.mxu0 %v1422_v36  ;;  %495 = vmatpush.msra.mxu1 %v1423_v37  ;;  %v1478_v5 = vld [vmem:[%s1624_s17 + $0x2c0] sm:$0xff]  ;;  %v1479_v6 = vld [vmem:[%s1624_s17 + $0x2c8] sm:$0xff]  ;;  %v1472_v7 = vld [vmem:[%s1624_s17 + $0x290] sm:$0xff] }
  0x27   : > { %522 = vmatpush.msra.mxu2 %v1416_v38  ;;  %548 = vmatpush.msra.mxu3 %v1417_v39  ;;  %v1473_v8 = vld [vmem:[%s1624_s17 + $0x298] sm:$0xff]  ;;  %v1470_v9 = vld [vmem:[%s1624_s17 + $0x280] sm:$0xff]  ;;  %v1471_v10 = vld [vmem:[%s1624_s17 + $0x288] sm:$0xff] }
  0x28   : > { %470 = vmatpush.msra.mxu0 %v1414_v40  ;;  %496 = vmatpush.msra.mxu1 %v1415_v41  ;;  %v1464_v11 = vld [vmem:[%s1624_s17 + $0x250] sm:$0xff]  ;;  %v1465_v12 = vld [vmem:[%s1624_s17 + $0x258] sm:$0xff]  ;;  %v1462_v13 = vld [vmem:[%s1624_s17 + $0x240] sm:$0xff] }
  0x29   : > { %1376 = vmatmul.msk.f32.gmra.mxu0 %vm206_vm0, %v1695_v42  ;;  %1379 = vmatmul.msk.f32.gmra.mxu1 %vm206_vm0, %v1695_v42  ;;  %v1463_v14 = vld [vmem:[%s1624_s17 + $0x248] sm:$0xff]  ;;  %v1456_v15 = vld [vmem:[%s1624_s17 + $0x210] sm:$0xff]  ;;  %v1457_v17 = vld [vmem:[%s1624_s17 + $0x218] sm:$0xff] }
  0x2a   : > { %1382 = vmatmul.msk.f32.gmra.mxu2 %vm206_vm0, %v1695_v42  ;;  %1385 = vmatmul.msk.f32.gmra.mxu3 %vm206_vm0, %v1695_v42  ;;  %v1454_v18 = vld [vmem:[%s1624_s17 + $0x200] sm:$0xff]  ;;  %v1455_v19 = vld [vmem:[%s1624_s17 + $0x208] sm:$0xff]  ;;  %v1484_v20 = vld [vmem:[%s1624_s17 + $0x2f0] sm:$0xff] }
  0x2b   : > { %523 = vmatpush.msra.mxu2 %v1408_v43  ;;  %549 = vmatpush.msra.mxu3 %v1409_v44  ;;  %v1485_v21 = vld [vmem:[%s1624_s17 + $0x2f8] sm:$0xff]  ;;  %v1482_v22 = vld [vmem:[%s1624_s17 + $0x2e0] sm:$0xff]  ;;  %v1483_v23 = vld [vmem:[%s1624_s17 + $0x2e8] sm:$0xff] }
  0x2c   : > { %471 = vmatpush.msra.mxu0 %v1406_v45  ;;  %497 = vmatpush.msra.mxu1 %v1407_v46  ;;  %v1476_v24 = vld [vmem:[%s1624_s17 + $0x2b0] sm:$0xff]  ;;  %v1477_v25 = vld [vmem:[%s1624_s17 + $0x2b8] sm:$0xff]  ;;  %v1474_v26 = vld [vmem:[%s1624_s17 + $0x2a0] sm:$0xff] }
  0x2d   : > { %524 = vmatpush.msra.mxu2 %v1400_v47  ;;  %550 = vmatpush.msra.mxu3 %v1401_v48  ;;  %v1475_v27 = vld [vmem:[%s1624_s17 + $0x2a8] sm:$0xff]  ;;  %v1468_v28 = vld [vmem:[%s1624_s17 + $0x270] sm:$0xff]  ;;  %v1469_v30 = vld [vmem:[%s1624_s17 + $0x278] sm:$0xff] }
  0x2e   : > { %472 = vmatpush.msra.mxu0 %v1398_v49  ;;  %498 = vmatpush.msra.mxu1 %v1399_v50  ;;  %v1466_v31 = vld [vmem:[%s1624_s17 + $0x260] sm:$0xff]  ;;  %v1467_v32 = vld [vmem:[%s1624_s17 + $0x268] sm:$0xff]  ;;  %v1460_v33 = vld [vmem:[%s1624_s17 + $0x230] sm:$0xff] }
  0x2f   : > { %v1461_v34 = vld [vmem:[%s1624_s17 + $0x238] sm:$0xff]  ;;  %v1458_v35 = vld [vmem:[%s1624_s17 + $0x220] sm:$0xff]  ;;  %v1459_v36 = vld [vmem:[%s1624_s17 + $0x228] sm:$0xff] }
  0x30   : > { %v1536_v37 = vld [vmem:[%s1624_s17 + $0x3d0] sm:$0xff]  ;;  %v1537_v38 = vld [vmem:[%s1624_s17 + $0x3d8] sm:$0xff]  ;;  %v1534_v39 = vld [vmem:[%s1624_s17 + $0x3c0] sm:$0xff] }
  0x31   : > { %1386 = vmatmul.msk.f32.vlgmr.msrb.gmra.mxu0 %vm206_vm0, %v1645_v16  ;;  %1389 = vmatmul.msk.f32.vlgmr.msrb.gmra.mxu1 %vm206_vm0, %v1645_v16  ;;  %v1535_v40 = vld [vmem:[%s1624_s17 + $0x3c8] sm:$0xff]  ;;  %v1528_v41 = vld [vmem:[%s1624_s17 + $0x390] sm:$0xff]  ;;  %v1529_v43 = vld [vmem:[%s1624_s17 + $0x398] sm:$0xff] }
  0x32   : > { %1392 = vmatmul.msk.f32.vlgmr.msrb.gmra.mxu2 %vm206_vm0, %v1645_v16  ;;  %1395 = vmatmul.msk.f32.vlgmr.msrb.gmra.mxu3 %vm206_vm0, %v1645_v16  ;;  %v1526_v44 = vld [vmem:[%s1624_s17 + $0x380] sm:$0xff]  ;;  %v1527_v45 = vld [vmem:[%s1624_s17 + $0x388] sm:$0xff]  ;;  %v1520_v46 = vld [vmem:[%s1624_s17 + $0x350] sm:$0xff] }
  0x33   : > { %625 = vmatpush.msrb.mxu2 %v1428_v51  ;;  %651 = vmatpush.msrb.mxu3 %v1429_v52  ;;  %v1521_v47 = vld [vmem:[%s1624_s17 + $0x358] sm:$0xff]  ;;  %v1518_v48 = vld [vmem:[%s1624_s17 + $0x340] sm:$0xff]  ;;  %v1519_v49 = vld [vmem:[%s1624_s17 + $0x348] sm:$0xff] }
  0x34   : > { %573 = vmatpush.msrb.mxu0 %v1426_v53  ;;  %599 = vmatpush.msrb.mxu1 %v1427_v54  ;;  %v1512_v50 = vld [vmem:[%s1624_s17 + $0x310] sm:$0xff]  ;;  %v1513_v51 = vld [vmem:[%s1624_s17 + $0x318] sm:$0xff]  ;;  %v1510_v52 = vld [vmem:[%s1624_s17 + $0x300] sm:$0xff] }
  0x35   : > { %626 = vmatpush.msrb.mxu2 %v1420_v55  ;;  %652 = vmatpush.msrb.mxu3 %v1421_v56  ;;  %v1511_v53 = vld [vmem:[%s1624_s17 + $0x308] sm:$0xff]  ;;  %v1540_v54 = vld [vmem:[%s1624_s17 + $0x3f0] sm:$0xff]  ;;  %v1541_v55 = vld [vmem:[%s1624_s17 + $0x3f8] sm:$0xff] }
  0x36   : > { %574 = vmatpush.msrb.mxu0 %v1418_v57  ;;  %600 = vmatpush.msrb.mxu1 %v1419_v58  ;;  %v1538_v56 = vld [vmem:[%s1624_s17 + $0x3e0] sm:$0xff]  ;;  %v1539_v57 = vld [vmem:[%s1624_s17 + $0x3e8] sm:$0xff]  ;;  %v1532_v58 = vld [vmem:[%s1624_s17 + $0x3b0] sm:$0xff] }
  0x37   : > { %627 = vmatpush.msrb.mxu2 %v1412_v59  ;;  %653 = vmatpush.msrb.mxu3 %v1413_v60  ;;  %v1533_v59 = vld [vmem:[%s1624_s17 + $0x3b8] sm:$0xff]  ;;  %v1530_v60 = vld [vmem:[%s1624_s17 + $0x3a0] sm:$0xff] }
  0x38   : > { %575 = vmatpush.msrb.mxu0 %v1410_v61  ;;  %601 = vmatpush.msrb.mxu1 %v1411_v62  ;;  %v1531_v61 = vld [vmem:[%s1624_s17 + $0x3a8] sm:$0xff]  ;;  %v1524_v62 = vld [vmem:[%s1624_s17 + $0x370] sm:$0xff] }
  0x39   : > { %1387 = vmatmul.msk.f32.gmra.mxu0 %vm206_vm0, %v1670_v29  ;;  %1390 = vmatmul.msk.f32.gmra.mxu1 %vm206_vm0, %v1670_v29 }
  0x3a   : > { %1393 = vmatmul.msk.f32.gmra.mxu2 %vm206_vm0, %v1670_v29  ;;  %1396 = vmatmul.msk.f32.gmra.mxu3 %vm206_vm0, %v1670_v29 }
  0x3b   : > { %628 = vmatpush.msrb.mxu2 %v1404_v63  ;;  %654 = vmatpush.msrb.mxu3 %v1405_v0 }
  0x3c   : > { %576 = vmatpush.msrb.mxu0 %v1402_v1  ;;  %602 = vmatpush.msrb.mxu1 %v1403_v2  ;;  %v1589_v1 = vmov 0   ;;  %v1525_v2 = vld [vmem:[%s1624_s17 + $0x378] sm:$0xff] }
  0x3d   : > { %1579 = vset.pattern.permute.xlu0 %v1589_v1  ;;  %1580 = vset.pattern.permute.xlu1 %v1589_v1 }
  0x41   : > { %1388 = vmatmul.msk.f32.gmra.mxu0 %vm206_vm0, %v1695_v42  ;;  %1391 = vmatmul.msk.f32.gmra.mxu1 %vm206_vm0, %v1695_v42 }
  0x42   : > { %1394 = vmatmul.msk.f32.gmra.mxu2 %vm206_vm0, %v1695_v42  ;;  %1397 = vmatmul.msk.f32.gmra.mxu3 %vm206_vm0, %v1695_v42 }
  0x49   : > { %1430 = vmatmul.msk.f32.vlgmr.msra.gmra.mxu0 %vm206_vm0, %v1645_v16  ;;  %1433 = vmatmul.msk.f32.vlgmr.msra.gmra.mxu1 %vm206_vm0, %v1645_v16 }
  0x4a   : > { %1436 = vmatmul.msk.f32.vlgmr.msra.gmra.mxu2 %vm206_vm0, %v1645_v16  ;;  %1439 = vmatmul.msk.f32.vlgmr.msra.gmra.mxu3 %vm206_vm0, %v1645_v16 }
  0x4b   : > { %786 = vmatpush.msra.mxu2 %v1480_v3  ;;  %812 = vmatpush.msra.mxu3 %v1481_v4  ;;  %v1219_v3 = vld [vmem:[%s2295_s2] sm:$0xff] }
  0x4c   : > { %734 = vmatpush.msra.mxu0 %v1478_v5  ;;  %760 = vmatpush.msra.mxu1 %v1479_v6  ;;  %v1522_v4 = vld [vmem:[%s1624_s17 + $0x360] sm:$0xff]  ;;  %v1523_v5 = vld [vmem:[%s1624_s17 + $0x368] sm:$0xff]  ;;  %v1516_v6 = vld [vmem:[%s1624_s17 + $0x330] sm:$0xff] }
  0x4d   : > { %787 = vmatpush.msra.mxu2 %v1472_v7  ;;  %813 = vmatpush.msra.mxu3 %v1473_v8  ;;  %v1517_v7 = vld [vmem:[%s1624_s17 + $0x338] sm:$0xff] }
  0x4e   : > { %735 = vmatpush.msra.mxu0 %v1470_v9  ;;  %761 = vmatpush.msra.mxu1 %v1471_v10  ;;  %v1220_v10 = vld [vmem:[%s2295_s2 + $0x8] sm:$0xff] }
  0x4f   : > { %788 = vmatpush.msra.mxu2 %v1464_v11  ;;  %814 = vmatpush.msra.mxu3 %v1465_v12 }
  0x50   : > { %736 = vmatpush.msra.mxu0 %v1462_v13  ;;  %762 = vmatpush.msra.mxu1 %v1463_v14  ;;  %v1514_v13 = vld [vmem:[%s1624_s17 + $0x320] sm:$0xff]  ;;  %v1515_v14 = vld [vmem:[%s1624_s17 + $0x328] sm:$0xff] }
  0x51   : > { %1431 = vmatmul.msk.f32.gmra.mxu0 %vm206_vm0, %v1670_v29  ;;  %1434 = vmatmul.msk.f32.gmra.mxu1 %vm206_vm0, %v1670_v29 }
  0x52   : > { %1437 = vmatmul.msk.f32.gmra.mxu2 %vm206_vm0, %v1670_v29  ;;  %1440 = vmatmul.msk.f32.gmra.mxu3 %vm206_vm0, %v1670_v29 }
  0x53   : > { %789 = vmatpush.msra.mxu2 %v1456_v15  ;;  %815 = vmatpush.msra.mxu3 %v1457_v17 }
  0x54   : > { %737 = vmatpush.msra.mxu0 %v1454_v18  ;;  %763 = vmatpush.msra.mxu1 %v1455_v19  ;;  %v1221_v18 = vld [vmem:[%s2295_s2 + $0x10] sm:$0xf] }
  0x55   : > { %1224 = vperm.xlu0 %1579, %v1219_v3   ;;  %1234 = vperm.xlu1 %1580, %v1221_v18  }
  0x59   : > { %1432 = vmatmul.msk.f32.gmra.mxu0 %vm206_vm0, %v1695_v42  ;;  %1435 = vmatmul.msk.f32.gmra.mxu1 %vm206_vm0, %v1695_v42 }
  0x5a   : > { %1438 = vmatmul.msk.f32.gmra.mxu2 %vm206_vm0, %v1695_v42  ;;  %1441 = vmatmul.msk.f32.gmra.mxu3 %vm206_vm0, %v1695_v42 }
  0x5d   : > { %1229 = vperm.xlu0 %1579, %v1220_v10  }
  0x61   : > { %1442 = vmatmul.msk.f32.vlgmr.msrb.gmra.mxu0 %vm206_vm0, %v1645_v16  ;;  %1445 = vmatmul.msk.f32.vlgmr.msrb.gmra.mxu1 %vm206_vm0, %v1645_v16 }
  0x62   : > { %1448 = vmatmul.msk.f32.vlgmr.msrb.gmra.mxu2 %vm206_vm0, %v1645_v16  ;;  %1451 = vmatmul.msk.f32.vlgmr.msrb.gmra.mxu3 %vm206_vm0, %v1645_v16 }
  0x63   : > { %890 = vmatpush.msrb.mxu2 %v1484_v20  ;;  %916 = vmatpush.msrb.mxu3 %v1485_v21 }
  0x64   : > { %838 = vmatpush.msrb.mxu0 %v1482_v22  ;;  %864 = vmatpush.msrb.mxu1 %v1483_v23 }
  0x65   : > { %891 = vmatpush.msrb.mxu2 %v1476_v24  ;;  %917 = vmatpush.msrb.mxu3 %v1477_v25 }
  0x66   : > { %839 = vmatpush.msrb.mxu0 %v1474_v26  ;;  %865 = vmatpush.msrb.mxu1 %v1475_v27 }
  0x67   : > { %892 = vmatpush.msrb.mxu2 %v1468_v28  ;;  %918 = vmatpush.msrb.mxu3 %v1469_v30 }
  0x68   : > { %840 = vmatpush.msrb.mxu0 %v1466_v31  ;;  %866 = vmatpush.msrb.mxu1 %v1467_v32 }
  0x69   : > { %1443 = vmatmul.msk.f32.gmra.mxu0 %vm206_vm0, %v1670_v29  ;;  %1446 = vmatmul.msk.f32.gmra.mxu1 %vm206_vm0, %v1670_v29 }
  0x6a   : > { %1449 = vmatmul.msk.f32.gmra.mxu2 %vm206_vm0, %v1670_v29  ;;  %1452 = vmatmul.msk.f32.gmra.mxu3 %vm206_vm0, %v1670_v29 }
  0x6b   : > { %893 = vmatpush.msrb.mxu2 %v1460_v33  ;;  %919 = vmatpush.msrb.mxu3 %v1461_v34 }
  0x6c   : > { %841 = vmatpush.msrb.mxu0 %v1458_v35  ;;  %867 = vmatpush.msrb.mxu1 %v1459_v36 }
  0x71   : > { %1444 = vmatmul.msk.f32.gmra.mxu0 %vm206_vm0, %v1695_v42  ;;  %1447 = vmatmul.msk.f32.gmra.mxu1 %vm206_vm0, %v1695_v42 }
  0x72   : > { %1450 = vmatmul.msk.f32.gmra.mxu2 %vm206_vm0, %v1695_v42  ;;  %1453 = vmatmul.msk.f32.gmra.mxu3 %vm206_vm0, %v1695_v42 }
  0x79   : > { %1486 = vmatmul.msk.f32.vlgmr.msra.gmra.mxu0 %vm206_vm0, %v1645_v16  ;;  %1489 = vmatmul.msk.f32.vlgmr.msra.gmra.mxu1 %vm206_vm0, %v1645_v16 }
  0x7a   : > { %1492 = vmatmul.msk.f32.vlgmr.msra.gmra.mxu2 %vm206_vm0, %v1645_v16  ;;  %1495 = vmatmul.msk.f32.vlgmr.msra.gmra.mxu3 %vm206_vm0, %v1645_v16 }
  0x7b   : > { %1051 = vmatpush.msra.mxu2 %v1536_v37  ;;  %1077 = vmatpush.msra.mxu3 %v1537_v38 }
  0x7c   : > { %999 = vmatpush.msra.mxu0 %v1534_v39  ;;  %1025 = vmatpush.msra.mxu1 %v1535_v40 }
  0x7d   : > { %1052 = vmatpush.msra.mxu2 %v1528_v41  ;;  %1078 = vmatpush.msra.mxu3 %v1529_v43 }
  0x7e   : > { %1000 = vmatpush.msra.mxu0 %v1526_v44  ;;  %1026 = vmatpush.msra.mxu1 %v1527_v45 }
  0x7f   : > { %1053 = vmatpush.msra.mxu2 %v1520_v46  ;;  %1079 = vmatpush.msra.mxu3 %v1521_v47 }
  0x80   : > { %1001 = vmatpush.msra.mxu0 %v1518_v48  ;;  %1027 = vmatpush.msra.mxu1 %v1519_v49 }
  0x81   : > { %1487 = vmatmul.msk.f32.gmra.mxu0 %vm206_vm0, %v1670_v29  ;;  %1490 = vmatmul.msk.f32.gmra.mxu1 %vm206_vm0, %v1670_v29 }
  0x82   : > { %1493 = vmatmul.msk.f32.gmra.mxu2 %vm206_vm0, %v1670_v29  ;;  %1496 = vmatmul.msk.f32.gmra.mxu3 %vm206_vm0, %v1670_v29 }
  0x83   : > { %1054 = vmatpush.msra.mxu2 %v1512_v50  ;;  %1080 = vmatpush.msra.mxu3 %v1513_v51 }
  0x84   : > { %1002 = vmatpush.msra.mxu0 %v1510_v52  ;;  %1028 = vmatpush.msra.mxu1 %v1511_v53 }
  0x89   : > { %1488 = vmatmul.msk.f32.gmra.mxu0 %vm206_vm0, %v1695_v42  ;;  %1491 = vmatmul.msk.f32.gmra.mxu1 %vm206_vm0, %v1695_v42 }
  0x8a   : > { %1494 = vmatmul.msk.f32.gmra.mxu2 %vm206_vm0, %v1695_v42  ;;  %1497 = vmatmul.msk.f32.gmra.mxu3 %vm206_vm0, %v1695_v42 }
  0x91   : > { %1498 = vmatmul.msk.f32.vlgmr.msrb.gmra.mxu0 %vm206_vm0, %v1645_v16  ;;  %1501 = vmatmul.msk.f32.vlgmr.msrb.gmra.mxu1 %vm206_vm0, %v1645_v16 }
  0x92   : > { %1504 = vmatmul.msk.f32.vlgmr.msrb.gmra.mxu2 %vm206_vm0, %v1645_v16  ;;  %1507 = vmatmul.msk.f32.vlgmr.msrb.gmra.mxu3 %vm206_vm0, %v1645_v16 }
  0x93   : > { %1155 = vmatpush.msrb.mxu2 %v1540_v54  ;;  %1181 = vmatpush.msrb.mxu3 %v1541_v55 }
  0x94   : > { %1103 = vmatpush.msrb.mxu0 %v1538_v56  ;;  %1129 = vmatpush.msrb.mxu1 %v1539_v57 }
  0x95   : > { %1156 = vmatpush.msrb.mxu2 %v1532_v58  ;;  %1182 = vmatpush.msrb.mxu3 %v1533_v59 }
  0x96   : > { %v1890_v63 = vpop.f32.mrf.mxu0  ;;  %v1892_v0 = vpop.f32.mrf.mxu1  ;;  %1104 = vmatpush.msrb.mxu0 %v1530_v60  ;;  %1130 = vmatpush.msrb.mxu1 %v1531_v61 }
  0x97   : > { %1157 = vmatpush.msrb.mxu2 %v1524_v62  ;;  %1183 = vmatpush.msrb.mxu3 %v1525_v2 }
  0x98   : > { %1105 = vmatpush.msrb.mxu0 %v1522_v4  ;;  %1131 = vmatpush.msrb.mxu1 %v1523_v5 }
  0x99   : > { %1499 = vmatmul.msk.f32.gmra.mxu0 %vm206_vm0, %v1670_v29  ;;  %1502 = vmatmul.msk.f32.gmra.mxu1 %vm206_vm0, %v1670_v29 }
  0x9a   : > { %1505 = vmatmul.msk.f32.gmra.mxu2 %vm206_vm0, %v1670_v29  ;;  %1508 = vmatmul.msk.f32.gmra.mxu3 %vm206_vm0, %v1670_v29 }
  0x9b   : > { %1158 = vmatpush.msrb.mxu2 %v1516_v6  ;;  %1184 = vmatpush.msrb.mxu3 %v1517_v7 }
  0x9c   : > { %1106 = vmatpush.msrb.mxu0 %v1514_v13  ;;  %1132 = vmatpush.msrb.mxu1 %v1515_v14 }
  0x9d   : > { %v1910_v8 = vpop.f32.mrf.mxu2  ;;  %v1912_v9 = vpop.f32.mrf.mxu3 }
  0x9e   : > { %v1917_v11 = vpop.f32.mrf.mxu0  ;;  %v1919_v12 = vpop.f32.mrf.mxu1 }
  0xa1   : > { %1500 = vmatmul.msk.f32.gmra.mxu0 %vm206_vm0, %v1695_v42  ;;  %1503 = vmatmul.msk.f32.gmra.mxu1 %vm206_vm0, %v1695_v42 }
  0xa2   : > { %1506 = vmatmul.msk.f32.gmra.mxu2 %vm206_vm0, %v1695_v42  ;;  %1509 = vmatmul.msk.f32.gmra.mxu3 %vm206_vm0, %v1695_v42 }
  0xa5   : > { %v1931_v15 = vpop.f32.mrf.mxu2  ;;  %v1933_v17 = vpop.f32.mrf.mxu3 }
  0xa6   : > { %v1938_v19 = vpop.f32.mrf.mxu0  ;;  %v1940_v20 = vpop.f32.mrf.mxu1 }
  0xa9   : > { %1542 = vmatmul.msk.f32.vlgmr.msra.gmra.mxu0 %vm206_vm0, %v1645_v16  ;;  %1545 = vmatmul.msk.f32.vlgmr.msra.gmra.mxu1 %vm206_vm0, %v1645_v16 }
  0xaa   : > { %1548 = vmatmul.msk.f32.vlgmr.msra.gmra.mxu2 %vm206_vm0, %v1645_v16  ;;  %1551 = vmatmul.msk.f32.vlgmr.msra.gmra.mxu3 %vm206_vm0, %v1645_v16 }
  0xad   : > { %v1950_v21 = vpop.f32.mrf.mxu2  ;;  %v1952_v22 = vpop.f32.mrf.mxu3 }
  0xae   : > { %v1954_v23 = vpop.f32.mrf.mxu0  ;;  %v1956_v24 = vpop.f32.mrf.mxu1 }
  0xb1   : > { %1543 = vmatmul.msk.f32.gmra.mxu0 %vm206_vm0, %v1670_v29  ;;  %1546 = vmatmul.msk.f32.gmra.mxu1 %vm206_vm0, %v1670_v29 }
  0xb2   : > { %1549 = vmatmul.msk.f32.gmra.mxu2 %vm206_vm0, %v1670_v29  ;;  %1552 = vmatmul.msk.f32.gmra.mxu3 %vm206_vm0, %v1670_v29 }
  0xb5   : > { %v1966_v25 = vpop.f32.mrf.mxu2  ;;  %v1968_v26 = vpop.f32.mrf.mxu3 }
  0xb6   : > { %v1970_v27 = vpop.f32.mrf.mxu0  ;;  %v1972_v28 = vpop.f32.mrf.mxu1 }
  0xb7   : > { %2311 = vst [vmem:[#allocation2_spill] sm:$0xff] %v1972_v28 }
  0xb9   : > { %1544 = vmatmul.msk.f32.gmra.mxu0 %vm206_vm0, %v1695_v42  ;;  %1547 = vmatmul.msk.f32.gmra.mxu1 %vm206_vm0, %v1695_v42 }
  0xba   : > { %1550 = vmatmul.msk.f32.gmra.mxu2 %vm206_vm0, %v1695_v42  ;;  %1553 = vmatmul.msk.f32.gmra.mxu3 %vm206_vm0, %v1695_v42 }
  0xbd   : > { %v1982_v30 = vpop.f32.mrf.mxu2  ;;  %v1984_v31 = vpop.f32.mrf.mxu3 }
  0xbe   : > { %2312 = vst [vmem:[#allocation3_spill] sm:$0xff] %v1982_v30  ;;  %v1986_v32 = vpop.f32.mrf.mxu0  ;;  %v1988_v33 = vpop.f32.mrf.mxu1 }
  0xbf   : > { %2313 = vst [vmem:[#allocation4_spill] sm:$0xff] %v1984_v31 }
  0xc0   : > { %2314 = vst [vmem:[#allocation5_spill] sm:$0xff] %v1986_v32 }
  0xc1   : > { %2315 = vst [vmem:[#allocation6_spill] sm:$0xff] %v1988_v33  ;;  %1554 = vmatmul.msk.f32.vlgmr.msrb.gmra.mxu0 %vm206_vm0, %v1645_v16  ;;  %1557 = vmatmul.msk.f32.vlgmr.msrb.gmra.mxu1 %vm206_vm0, %v1645_v16 }
  0xc2   : > { %1560 = vmatmul.msk.f32.vlgmr.msrb.gmra.mxu2 %vm206_vm0, %v1645_v16  ;;  %1563 = vmatmul.msk.f32.vlgmr.msrb.gmra.mxu3 %vm206_vm0, %v1645_v16 }
  0xc5   : > { %v1998_v34 = vpop.f32.mrf.mxu2  ;;  %v2000_v35 = vpop.f32.mrf.mxu3 }
  0xc6   : > { %2316 = vst [vmem:[#allocation7_spill] sm:$0xff] %v1998_v34  ;;  %v2002_v36 = vpop.f32.mrf.mxu0  ;;  %v2004_v37 = vpop.f32.mrf.mxu1 }
  0xc7   : > { %2317 = vst [vmem:[#allocation8_spill] sm:$0xff] %v2000_v35  ;;  %v2330_v32 = vmax.f32 %v1890_v63, %v2002_v36  ;;  %v2331_v31 = vmax.f32 %v1892_v0, %v2004_v37 }
  0xc9   : > { %1555 = vmatmul.msk.f32.gmra.mxu0 %vm206_vm0, %v1670_v29  ;;  %1558 = vmatmul.msk.f32.gmra.mxu1 %vm206_vm0, %v1670_v29 }
  0xca   : > { %1561 = vmatmul.msk.f32.gmra.mxu2 %vm206_vm0, %v1670_v29  ;;  %1564 = vmatmul.msk.f32.gmra.mxu3 %vm206_vm0, %v1670_v29 }
  0xcd   : > { %v2018_v16 = vpop.f32.mrf.mxu2  ;;  %v2020_v40 = vpop.f32.mrf.mxu3 }
  0xce   : > { %v2026_v44 = vpop.f32.mrf.mxu0  ;;  %v2028_v45 = vpop.f32.mrf.mxu1 }
  0xd1   : > { %1556 = vmatmul.msk.f32.gmra.mxu0 %vm206_vm0, %v1695_v42  ;;  %1559 = vmatmul.msk.f32.gmra.mxu1 %vm206_vm0, %v1695_v42 }
  0xd2   : > { %1562 = vmatmul.msk.f32.gmra.mxu2 %vm206_vm0, %v1695_v42  ;;  %1565 = vmatmul.msk.f32.gmra.mxu3 %vm206_vm0, %v1695_v42 }
  0xd5   : > { %v2042_v47 = vpop.f32.mrf.mxu2  ;;  %v2044_v48 = vpop.f32.mrf.mxu3 }
  0xd6   : > { %v2050_v51 = vpop.f32.mrf.mxu0  ;;  %v2052_v52 = vpop.f32.mrf.mxu1 }
  0xdd   : > { %v2058_v54 = vpop.f32.mrf.mxu2  ;;  %v2060_v55 = vpop.f32.mrf.mxu3 }
  0xde   : > { %v2066_v58 = vpop.f32.mrf.mxu0  ;;  %v2068_v59 = vpop.f32.mrf.mxu1 }
  0xe5   : > { %v2074_v62 = vpop.f32.mrf.mxu2  ;;  %v2076_v1 = vpop.f32.mrf.mxu3 }
  0xe6   : > { %v2082_v4 = vpop.f32.mrf.mxu0  ;;  %v2084_v5 = vpop.f32.mrf.mxu1 }
  0xe7   : > { %2318 = vst [vmem:[#allocation9_spill] sm:$0xff] %v2084_v5 }
  0xed   : > { %v2090_v10 = vpop.f32.mrf.mxu2  ;;  %v2092_v13 = vpop.f32.mrf.mxu3 }
  0xee   : > { %2319 = vst [vmem:[#allocation10_spill] sm:$0xff] %v2090_v10  ;;  %v2098_v3 = vpop.f32.mrf.mxu0  ;;  %v2100_v2 = vpop.f32.mrf.mxu1 }
  0xef   : > { %2320 = vst [vmem:[#allocation11_spill] sm:$0xff] %v2092_v13 }
  0xf0   : > { %2321 = vst [vmem:[#allocation12_spill] sm:$0xff] %v2098_v3  ;;  %v2138_v3 = vpop.permute.xlu0 %1224 }
  0xf1   : > { %2322 = vst [vmem:[#allocation13_spill] sm:$0xff] %v2100_v2 }
  0xf5   : > { %v2106_v61 = vpop.f32.mrf.mxu2  ;;  %v2108_v60 = vpop.f32.mrf.mxu3 }
  0xf6   : > { %2323 = vst [vmem:[#allocation14_spill] sm:$0xff] %v2106_v61  ;;  %v739_v57 = vpop.f32.mrf.mxu0  ;;  %v765_v56 = vpop.f32.mrf.mxu1 }
  0xf7   : > { %2324 = vst [vmem:[#allocation15_spill] sm:$0xff] %v2108_v60  ;;  %v930_v13 = vmax.f32 %v2330_v32, %v739_v57  ;;  %v931_v10 = vmax.f32 %v2331_v31, %v765_v56  ;;  %v2332_v31 = vmax.f32 %v1910_v8, %v2018_v16  ;;  %v2335_v57 = vmax.f32 %v1919_v12, %v2028_v45 }
  0xf8   : > { %v2164_v37 = vpop.permute.xlu0 %1229 }
  0xfd   : > { %v791_v42 = vpop.f32.mrf.mxu2  ;;  %v817_v53 = vpop.f32.mrf.mxu3 }
  0xfe   : > { %v742_v50 = vpop.f32.mrf.mxu0  ;;  %v768_v49 = vpop.f32.mrf.mxu1  ;;  %v932_v32 = vmax.f32 %v2332_v31, %v791_v42 }
 0x105   : > { %v794_v6 = vpop.f32.mrf.mxu2  ;;  %v820_v29 = vpop.f32.mrf.mxu3 }
 0x106   : > { %v745_v46 = vpop.f32.mrf.mxu0  ;;  %v771_v7 = vpop.f32.mrf.mxu1 }
 0x10d   : > { %v2114_v43 = vpop.f32.mrf.mxu2  ;;  %v2116_v41 = vpop.f32.mrf.mxu3 }
 0x10e   : > { %v2118_v39 = vpop.f32.mrf.mxu0  ;;  %v2120_v14 = vpop.f32.mrf.mxu1 }
 0x115   : > { %v2122_v18 = vpop.f32.mrf.mxu2  ;;  %v2124_v38 = vpop.f32.mrf.mxu3 }
 0x116   : > { %v2126_v60 = vpop.f32.mrf.mxu0  ;;  %v2128_v35 = vpop.f32.mrf.mxu1 }
 0x117   : > { %2325 = vst [vmem:[#allocation16_spill] sm:$0xff] %v2128_v35 }
 0x11d   : > { %v2130_v61 = vpop.f32.mrf.mxu2  ;;  %v2132_v34 = vpop.f32.mrf.mxu3 }
 0x11e   : > { %2326 = vst [vmem:[#allocation17_spill] sm:$0xff] %v2130_v61  ;;  %v2134_v2 = vpop.f32.mrf.mxu0  ;;  %v2136_v33 = vpop.f32.mrf.mxu1 }
 0x11f   : > { %2327 = vst [vmem:[#allocation18_spill] sm:$0xff] %v2132_v34 }
 0x120   : > { %2328 = vst [vmem:[#allocation19_spill] sm:$0xff] %v2134_v2 }
 0x121   : > { %2329 = vst [vmem:[#allocation20_spill] sm:$0xff] %v2136_v33 }
 0x125   : > { %v2146_v30 = vpop.f32.mrf.mxu2  ;;  %v2148_v5 = vpop.f32.mrf.mxu3 }
 0x126   : > { %v1004_v61 = vpop.f32.mrf.mxu0  ;;  %v1030_v34 = vpop.f32.mrf.mxu1 }
 0x127   : > { %v1195_v2 = vmax.f32 %v930_v13, %v1004_v61  ;;  %v1196_v28 = vmax.f32 %v931_v10, %v1030_v34  ;;  %v2333_v34 = vmax.f32 %v1912_v9, %v2020_v40  ;;  %v939_v61 = vmax.f32 %v2335_v57, %v768_v49 }
 0x128   : > { %v2336_v13 = vmax.f32 %v1931_v15, %v2042_v47 }
 0x129   : > { %v1237_v33 = vadd.f32 %v2138_v3, %v1195_v2  ;;  %v1238_v35 = vadd.f32 %v2138_v3, %v1196_v28  ;;  %v933_v36 = vmax.f32 %v2333_v34, %v817_v53  ;;  %v2334_v28 = vmax.f32 %v1917_v11, %v2026_v44 }
 0x12a   : > { %v2338_v34 = vmax.f32 %v1938_v19, %v2050_v51 }
 0x12b   : > { %v1261_v63 = vmax.f32 %v1237_v33, 0.0  ;;  %v1262_v0 = vmax.f32 %v1238_v35, 0.0  ;;  %v938_v56 = vmax.f32 %v2334_v28, %v742_v50  ;;  %v2339_v28 = vmax.f32 %v1940_v20, %v2052_v52 }
 0x12d   : > { %1285 = vst [vmem:[%s2156_s6] sm:$0xff] %v1261_v63  ;;  %v1056_v33 = vpop.f32.mrf.mxu2  ;;  %v1082_v35 = vpop.f32.mrf.mxu3  ;;  %v940_v63 = vmax.f32 %v2336_v13, %v794_v6  ;;  %v2345_v13 = vmax.f32 %v1968_v26, %v2076_v1 }
 0x12e   : > { %1286 = vst [vmem:[%s2156_s6 + $0x8] sm:$0xff] %v1262_v0  ;;  %v1197_v8 = vmax.f32 %v932_v32, %v1056_v33  ;;  %v1198_v16 = vmax.f32 %v933_v36, %v1082_v35  ;;  %v1007_v42 = vpop.f32.mrf.mxu0  ;;  %v1033_v9 = vpop.f32.mrf.mxu1  ;;  %v2337_v0 = vmax.f32 %v1933_v17, %v2044_v48  ;;  %v946_v36 = vmax.f32 %v2338_v34, %v745_v46  ;;  %v2347_v34 = vld [vmem:[#allocation16_spill] sm:$0xff] }
 0x12f   : > { %v1203_v40 = vmax.f32 %v938_v56, %v1007_v42  ;;  %v1204_v53 = vmax.f32 %v939_v61, %v1033_v9  ;;  %v2185_v32 = vpop.permute.xlu1 %1234  ;;  %v947_v56 = vmax.f32 %v2339_v28, %v771_v7  ;;  %v2341_v42 = vmax.f32 %v1952_v22, %v2060_v55  ;;  %v2349_v28 = vld [vmem:[#allocation9_spill] sm:$0xff] }
 0x130   : > { %v1239_v2 = vadd.f32 %v2138_v3, %v1197_v8  ;;  %v1240_v11 = vadd.f32 %v2138_v3, %v1198_v16  ;;  %v941_v31 = vmax.f32 %v2337_v0, %v820_v29  ;;  %v2340_v8 = vmax.f32 %v1950_v21, %v2058_v54 }
 0x131   : > { %v1245_v12 = vadd.f32 %v2164_v37, %v1203_v40  ;;  %v1246_v44 = vadd.f32 %v2164_v37, %v1204_v53  ;;  %v949_v9 = vmax.f32 %v2341_v42, %v2116_v41  ;;  %v2342_v40 = vmax.f32 %v1954_v23, %v2066_v58  ;;  %v2360_v42 = vld [vmem:[#allocation5_spill] sm:$0xff] }
 0x132   : > { %v1263_v45 = vmax.f32 %v1239_v2, 0.0  ;;  %v1264_v49 = vmax.f32 %v1240_v11, 0.0  ;;  %v948_v16 = vmax.f32 %v2340_v8, %v2114_v43  ;;  %v2343_v2 = vmax.f32 %v1956_v24, %v2068_v59 }
 0x133   : > { %v1269_v50 = vmax.f32 %v1245_v12, 0.0  ;;  %v1270_v10 = vmax.f32 %v1246_v44, 0.0  ;;  %v934_v53 = vmax.f32 %v2342_v40, %v2118_v39  ;;  %v2346_v0 = vmax.f32 %v1970_v27, %v2082_v4 }
 0x134   : > { %1287 = vst [vmem:[%s2156_s6 + $0x10] sm:$0xff] %v1263_v45  ;;  %v935_v11 = vmax.f32 %v2343_v2, %v2120_v14  ;;  %v2363_v2 = vld [vmem:[#allocation20_spill] sm:$0xff] }
 0x135   : > { %1288 = vst [vmem:[%s2156_s6 + $0x18] sm:$0xff] %v1264_v49  ;;  %v1059_v57 = vpop.f32.mrf.mxu2  ;;  %v1085_v61 = vpop.f32.mrf.mxu3 }
 0x136   : > { %1294 = vst [vmem:[%s2156_s6 + $0x40] sm:$0xff] %v1269_v50  ;;  %v1205_v15 = vmax.f32 %v940_v63, %v1059_v57  ;;  %v1206_v47 = vmax.f32 %v941_v31, %v1085_v61  ;;  %v1010_v17 = vpop.f32.mrf.mxu0  ;;  %v1036_v29 = vpop.f32.mrf.mxu1  ;;  %v2344_v50 = vmax.f32 %v1966_v25, %v2074_v62  ;;  %v937_v63 = vmax.f32 %v2345_v13, %v2124_v38 }
 0x137   : > { %1295 = vst [vmem:[%s2156_s6 + $0x48] sm:$0xff] %v1270_v10  ;;  %v1211_v48 = vmax.f32 %v946_v36, %v1010_v17  ;;  %v1212_v6 = vmax.f32 %v947_v56, %v1036_v29  ;;  %v942_v31 = vmax.f32 %v2346_v0, %v2126_v60  ;;  %v2348_v36 = vld [vmem:[#allocation2_spill] sm:$0xff] }
 0x138   : > { %v1247_v19 = vadd.f32 %v2164_v37, %v1205_v15  ;;  %v1248_v46 = vadd.f32 %v2164_v37, %v1206_v47  ;;  %v936_v10 = vmax.f32 %v2344_v50, %v2122_v18  ;;  %v2350_v56 = vmax.f32 %v2348_v36, %v2349_v28  ;;  %v2368_v0 = vld [vmem:[#allocation14_spill] sm:$0xff]  ;;  %v2370_v36 = vld [vmem:[#allocation8_spill] sm:$0xff]  ;;  %v2371_v28 = vld [vmem:[#allocation15_spill] sm:$0xff] }
 0x139   : > { %v1253_v20 = vadd.f32 %v2185_v32, %v1211_v48  ;;  %v1254_v51 = vadd.f32 %v2185_v32, %v1212_v6 }
 0x13a   : > { %v1271_v52 = vmax.f32 %v1247_v19, 0.0  ;;  %v1272_v7 = vmax.f32 %v1248_v46, 0.0  ;;  %v943_v57 = vmax.f32 %v2350_v56, %v2347_v34  ;;  %v2351_v19 = vld [vmem:[#allocation17_spill] sm:$0xff]  ;;  %v2352_v46 = vld [vmem:[#allocation3_spill] sm:$0xff]  ;;  %v2372_v56 = vmax.f32 %v2370_v36, %v2371_v28 }
 0x13b   : > { %v1277_v33 = vmax.f32 %v1253_v20, 0.0  ;;  %v1278_v35 = vmax.f32 %v1254_v51, 0.0  ;;  %v2353_v20 = vld [vmem:[#allocation10_spill] sm:$0xff] }
 0x13c   : > { %1296 = vst [vmem:[%s2156_s6 + $0x50] sm:$0xff] %v1271_v52  ;;  %v2354_v51 = vmax.f32 %v2352_v46, %v2353_v20 }
 0x13d   : > { %1297 = vst [vmem:[%s2156_s6 + $0x58] sm:$0xff] %v1272_v7  ;;  %v1062_v12 = vpop.f32.mrf.mxu2  ;;  %v1088_v21 = vpop.f32.mrf.mxu3  ;;  %v2355_v7 = vld [vmem:[#allocation18_spill] sm:$0xff] }
 0x13e   : > { %1302 = vst [vmem:[%s2156_s6 + $0x80] sm:$0xf] %v1277_v33  ;;  %v1213_v43 = vmax.f32 %v948_v16, %v1062_v12  ;;  %v1214_v54 = vmax.f32 %v949_v9, %v1088_v21  ;;  %v1108_v22 = vpop.f32.mrf.mxu0  ;;  %v1134_v41 = vpop.f32.mrf.mxu1  ;;  %v944_v52 = vmax.f32 %v2354_v51, %v2351_v19  ;;  %v2356_v33 = vld [vmem:[#allocation4_spill] sm:$0xff]  ;;  %v2359_v16 = vld [vmem:[#allocation19_spill] sm:$0xff]  ;;  %v2365_v12 = vld [vmem:[#allocation13_spill] sm:$0xff] }
 0x13f   : > { %1303 = vst [vmem:[%s2156_s6 + $0x88] sm:$0xf] %v1278_v35  ;;  %v1199_v55 = vmax.f32 %v934_v53, %v1108_v22  ;;  %v1200_v44 = vmax.f32 %v935_v11, %v1134_v41  ;;  %v2357_v35 = vld [vmem:[#allocation11_spill] sm:$0xff]  ;;  %v2361_v9 = vld [vmem:[#allocation12_spill] sm:$0xff]  ;;  %v2364_v11 = vld [vmem:[#allocation6_spill] sm:$0xff] }
 0x140   : > { %v1255_v23 = vadd.f32 %v2185_v32, %v1213_v43  ;;  %v1256_v39 = vadd.f32 %v2185_v32, %v1214_v54  ;;  %v2362_v40 = vmax.f32 %v2360_v42, %v2361_v9  ;;  %v2366_v21 = vmax.f32 %v2364_v11, %v2365_v12 }
 0x141   : > { %v1241_v24 = vadd.f32 %v2138_v3, %v1199_v55  ;;  %v1242_v58 = vadd.f32 %v2138_v3, %v1200_v44 }
 0x142   : > { %v1279_v59 = vmax.f32 %v1255_v23, 0.0  ;;  %v1280_v14 = vmax.f32 %v1256_v39, 0.0  ;;  %v950_v53 = vmax.f32 %v2362_v40, %v2359_v16  ;;  %v951_v43 = vmax.f32 %v2366_v21, %v2363_v2 }
 0x143   : > { %v1265_v45 = vmax.f32 %v1241_v24, 0.0  ;;  %v1266_v49 = vmax.f32 %v1242_v58, 0.0 }
 0x144   : > { %1304 = vst [vmem:[%s2156_s6 + $0x90] sm:$0xf] %v1279_v59 }
 0x145   : > { %1305 = vst [vmem:[%s2156_s6 + $0x98] sm:$0xf] %v1280_v14  ;;  %v1160_v61 = vpop.f32.mrf.mxu2  ;;  %v1186_v25 = vpop.f32.mrf.mxu3 }
 0x146   : > { %1289 = vst [vmem:[%s2156_s6 + $0x20] sm:$0xff] %v1265_v45  ;;  %v1201_v62 = vmax.f32 %v936_v10, %v1160_v61  ;;  %v1202_v18 = vmax.f32 %v937_v63, %v1186_v25  ;;  %v1111_v15 = vpop.f32.mrf.mxu0  ;;  %v1137_v26 = vpop.f32.mrf.mxu1  ;;  %v2367_v63 = vld [vmem:[#allocation7_spill] sm:$0xff] }
 0x147   : > { %1290 = vst [vmem:[%s2156_s6 + $0x28] sm:$0xff] %v1266_v49  ;;  %v1207_v38 = vmax.f32 %v942_v31, %v1111_v15  ;;  %v1208_v1 = vmax.f32 %v943_v57, %v1137_v26  ;;  %v2369_v31 = vmax.f32 %v2367_v63, %v2368_v0 }
 0x148   : > { %v1243_v27 = vadd.f32 %v2138_v3, %v1201_v62  ;;  %v1244_v60 = vadd.f32 %v2138_v3, %v1202_v18  ;;  %v2358_v3 = vmax.f32 %v2356_v33, %v2357_v35 }
 0x149   : > { %v1249_v4 = vadd.f32 %v2164_v37, %v1207_v38  ;;  %v1250_v47 = vadd.f32 %v2164_v37, %v1208_v1  ;;  %v952_v34 = vmax.f32 %v2369_v31, %v2146_v30 }
 0x14a   : > { %v1267_v17 = vmax.f32 %v1243_v27, 0.0  ;;  %v1268_v29 = vmax.f32 %v1244_v60, 0.0  ;;  %v945_v8 = vmax.f32 %v2358_v3, %v2355_v7 }
 0x14b   : > { %v1273_v48 = vmax.f32 %v1249_v4, 0.0  ;;  %v1274_v6 = vmax.f32 %v1250_v47, 0.0 }
 0x14c   : > { %1291 = vst [vmem:[%s2156_s6 + $0x30] sm:$0xff] %v1267_v17 }
 0x14d   : > { %1293 = vst.msk [vmem:[%s2156_s6 + $0x38] sm:$0xff] %vm1292_vm1, %v1268_v29  ;;  %v1163_v54 = vpop.f32.mrf.mxu2  ;;  %v1189_v22 = vpop.f32.mrf.mxu3 }
 0x14e   : > { %1298 = vst [vmem:[%s2156_s6 + $0x60] sm:$0xff] %v1273_v48  ;;  %v1209_v41 = vmax.f32 %v944_v52, %v1163_v54  ;;  %v1210_v55 = vmax.f32 %v945_v8, %v1189_v22  ;;  %v1114_v44 = vpop.f32.mrf.mxu0  ;;  %v1140_v23 = vpop.f32.mrf.mxu1 }
 0x14f   : > { %1299 = vst [vmem:[%s2156_s6 + $0x68] sm:$0xff] %v1274_v6  ;;  %v1215_v39 = vmax.f32 %v950_v53, %v1114_v44  ;;  %v1216_v24 = vmax.f32 %v951_v43, %v1140_v23 }
 0x150   : > { %v1251_v58 = vadd.f32 %v2164_v37, %v1209_v41  ;;  %v1252_v59 = vadd.f32 %v2164_v37, %v1210_v55  ;;  %v953_v37 = vmax.f32 %v2372_v56, %v2148_v5 }
 0x151   : > { %v1257_v14 = vadd.f32 %v2185_v32, %v1215_v39  ;;  %v1258_v45 = vadd.f32 %v2185_v32, %v1216_v24 }
 0x152   : > { %v1275_v49 = vmax.f32 %v1251_v58, 0.0  ;;  %v1276_v50 = vmax.f32 %v1252_v59, 0.0 }
 0x153   : > { %v1281_v10 = vmax.f32 %v1257_v14, 0.0  ;;  %v1282_v13 = vmax.f32 %v1258_v45, 0.0 }
 0x154   : > { %1300 = vst [vmem:[%s2156_s6 + $0x70] sm:$0xff] %v1275_v49 }
 0x155   : > { %1301 = vst.msk [vmem:[%s2156_s6 + $0x78] sm:$0xff] %vm1292_vm1, %v1276_v50  ;;  %v1166_v57 = vpop.f32.mrf.mxu2  ;;  %v1192_v61 = vpop.f32.mrf.mxu3 }
 0x156   : > { %1306 = vst [vmem:[%s2156_s6 + $0xa0] sm:$0xf] %v1281_v10  ;;  %v1217_v25 = vmax.f32 %v952_v34, %v1166_v57  ;;  %v1218_v62 = vmax.f32 %v953_v37, %v1192_v61 }
 0x157   : > { %1307 = vst [vmem:[%s2156_s6 + $0xa8] sm:$0xf] %v1282_v13 }
 0x158   : > { %v1259_v18 = vadd.f32 %v2185_v32, %v1217_v25  ;;  %v1260_v15 = vadd.f32 %v2185_v32, %v1218_v62 }
 0x15a   : > { %v1283_v30 = vmax.f32 %v1259_v18, 0.0  ;;  %v1284_v26 = vmax.f32 %v1260_v15, 0.0 }
 0x15c   : > { %1308 = vst [vmem:[%s2156_s6 + $0xb0] sm:$0xf] %v1283_v30 }
 0x15d   : > { %1310 = vst.msk [vmem:[%s2156_s6 + $0xb8] sm:$0xf] %vm1309_vm2, %v1284_v26 }
 0x15e PF: > { %s13_s12 = sadd.s32 1, %s1587_s12  }
 0x15f   : > { %p10_p4 = scmp.ge.s32.totalorder %s13_s12, 4  }
 0x161   :  { %12 = sbr.rel (!%p10_p4) target bundleno = 1 (0x1), region = 65 }

// kernel: net_forward.4
= control target key start
LH: loop header
LB: loop body
LE: loop exit
PB: predicated region body
PF: predicated region fallthrough
CT: control target
= control target key end

     0   :  { %s2089_s12 = smov 0   ;;  %s2939_s0 = inlined_call_operand.vmem [shape: f32[2,4,512,169], index: 0, kind: input, shape index: {}]   ;;  %s2940_s1 = inlined_call_operand.vmem [shape: f32[20,512], index: 1, kind: input, shape index: {}]   ;;  %s2941_s2 = inlined_call_operand.vmem [shape: f32[20,1], index: 2, kind: input, shape index: {}]   ;;  %s2942_s3 = inlined_call_operand.vmem [shape: f32[2,20,169], index: 3, kind: output, shape index: {}]  }
   0x1 LB: > { %s1641_s13 = sadd.s32 4294967295, %s2066_s12   ;;  %p1645_p0 = scmp.ge.s32.totalorder %s2066_s12, 1  ;;  %s2066_s12 = sphi %s2089_s12, %s13_s12  }
   0x2   : > { %p137_p1 = scmp.lt.s32.totalorder %s2066_s12, 3 }
   0x4   : > { %p138_p2 = pnand %p1645_p0, %p137_p1 }
   0x5   : > { %p161_p3 = scmp.lt.s32.totalorder (!%p138_p2), %s1641_s13, 1 }
   0x6   : > { %141 = sbr.rel (%p138_p2) target bundleno = 472 (0x1d8), region = 32 }
   0xb   : > { %s2944_s13 = smov (!%p161_p3, %s1641_s13), 1  ;;  %vm1579_vm0 = vcmask 334848   ;;  %vm1584_vm1 = vcmask 330752  }
   0xc   : > { %s2035_s14 = sshll.u32 %s2944_s13, 12 }
   0xd   : > { %s2103_s17 = scalar_lea.vmem %s2939_s0, %s2035_s14 }
   0xe   : > { %v277_v0 = vld [vmem:[%s2103_s17 + $0x2f0] sm:$0xff]  ;;  %v275_v1 = vld [vmem:[%s2103_s17 + $0x2e0] sm:$0xff]  ;;  %v278_v62 = vld [vmem:[%s2103_s17 + $0x2f8] sm:$0xff] }
   0xf   : > { %v309_v2 = vld [vmem:[%s2103_s17 + $0x3f0] sm:$0xff]  ;;  %363 = vmatpush.msra.mxu2 %v277_v0  ;;  %v307_v6 = vld [vmem:[%s2103_s17 + $0x3e0] sm:$0xff]  ;;  %v310_v63 = vld [vmem:[%s2103_s17 + $0x3f8] sm:$0xff] }
  0x10   : > { %389 = vmatpush.msra.mxu3 %v309_v2  ;;  %v213_v3 = vld [vmem:[%s2103_s17 + $0xf0] sm:$0xff]  ;;  %v211_v7 = vld [vmem:[%s2103_s17 + $0xe0] sm:$0xff]  ;;  %v276_v2 = vld [vmem:[%s2103_s17 + $0x2e8] sm:$0xff] }
  0x11   : > { %v245_v4 = vld [vmem:[%s2103_s17 + $0x1f0] sm:$0xff]  ;;  %311 = vmatpush.msra.mxu0 %v213_v3  ;;  %v243_v8 = vld [vmem:[%s2103_s17 + $0x1e0] sm:$0xff]  ;;  %364 = vmatpush.msra.mxu2 %v275_v1  ;;  %v214_v3 = vld [vmem:[%s2103_s17 + $0xf8] sm:$0xff] }
  0x12   : > { %v273_v5 = vld [vmem:[%s2103_s17 + $0x2d0] sm:$0xff]  ;;  %337 = vmatpush.msra.mxu1 %v245_v4  ;;  %390 = vmatpush.msra.mxu3 %v307_v6  ;;  %v271_v11 = vld [vmem:[%s2103_s17 + $0x2c0] sm:$0xff]  ;;  %v246_v4 = vld [vmem:[%s2103_s17 + $0x1f8] sm:$0xff] }
  0x13   : > { %v305_v9 = vld [vmem:[%s2103_s17 + $0x3d0] sm:$0xff]  ;;  %312 = vmatpush.msra.mxu0 %v211_v7  ;;  %v303_v13 = vld [vmem:[%s2103_s17 + $0x3c0] sm:$0xff]  ;;  %365 = vmatpush.msra.mxu2 %v273_v5  ;;  %v308_v5 = vld [vmem:[%s2103_s17 + $0x3e8] sm:$0xff] }
  0x14   : > { %v209_v10 = vld [vmem:[%s2103_s17 + $0xd0] sm:$0xff]  ;;  %338 = vmatpush.msra.mxu1 %v243_v8  ;;  %391 = vmatpush.msra.mxu3 %v305_v9  ;;  %v207_v14 = vld [vmem:[%s2103_s17 + $0xc0] sm:$0xff]  ;;  %v274_v6 = vld [vmem:[%s2103_s17 + $0x2d8] sm:$0xff] }
  0x15   : > { %v241_v12 = vld [vmem:[%s2103_s17 + $0x1d0] sm:$0xff]  ;;  %v239_v15 = vld [vmem:[%s2103_s17 + $0x1c0] sm:$0xff]  ;;  %313 = vmatpush.msra.mxu0 %v209_v10  ;;  %366 = vmatpush.msra.mxu2 %v271_v11  ;;  %v212_v7 = vld [vmem:[%s2103_s17 + $0xe8] sm:$0xff] }
  0x16   : > { %339 = vmatpush.msra.mxu1 %v241_v12  ;;  %v269_v16 = vld [vmem:[%s2103_s17 + $0x2b0] sm:$0xff]  ;;  %392 = vmatpush.msra.mxu3 %v303_v13  ;;  %v267_v20 = vld [vmem:[%s2103_s17 + $0x2a0] sm:$0xff]  ;;  %v244_v8 = vld [vmem:[%s2103_s17 + $0x1e8] sm:$0xff] }
  0x17   : > { %v301_v17 = vld [vmem:[%s2103_s17 + $0x3b0] sm:$0xff]  ;;  %314 = vmatpush.msra.mxu0 %v207_v14  ;;  %v299_v21 = vld [vmem:[%s2103_s17 + $0x3a0] sm:$0xff]  ;;  %367 = vmatpush.msra.mxu2 %v269_v16  ;;  %v306_v9 = vld [vmem:[%s2103_s17 + $0x3d8] sm:$0xff] }
  0x18   : > { %v205_v18 = vld [vmem:[%s2103_s17 + $0xb0] sm:$0xff]  ;;  %340 = vmatpush.msra.mxu1 %v239_v15  ;;  %393 = vmatpush.msra.mxu3 %v301_v17  ;;  %v203_v22 = vld [vmem:[%s2103_s17 + $0xa0] sm:$0xff]  ;;  %v272_v10 = vld [vmem:[%s2103_s17 + $0x2c8] sm:$0xff] }
  0x19   : > { %v237_v19 = vld [vmem:[%s2103_s17 + $0x1b0] sm:$0xff]  ;;  %v235_v23 = vld [vmem:[%s2103_s17 + $0x1a0] sm:$0xff]  ;;  %315 = vmatpush.msra.mxu0 %v205_v18  ;;  %368 = vmatpush.msra.mxu2 %v267_v20  ;;  %v210_v11 = vld [vmem:[%s2103_s17 + $0xd8] sm:$0xff] }
  0x1a   : > { %341 = vmatpush.msra.mxu1 %v237_v19  ;;  %v265_v24 = vld [vmem:[%s2103_s17 + $0x290] sm:$0xff]  ;;  %394 = vmatpush.msra.mxu3 %v299_v21  ;;  %v263_v28 = vld [vmem:[%s2103_s17 + $0x280] sm:$0xff]  ;;  %v242_v12 = vld [vmem:[%s2103_s17 + $0x1d8] sm:$0xff] }
  0x1b   : > { %v297_v25 = vld [vmem:[%s2103_s17 + $0x390] sm:$0xff]  ;;  %316 = vmatpush.msra.mxu0 %v203_v22  ;;  %v295_v29 = vld [vmem:[%s2103_s17 + $0x380] sm:$0xff]  ;;  %369 = vmatpush.msra.mxu2 %v265_v24  ;;  %v304_v13 = vld [vmem:[%s2103_s17 + $0x3c8] sm:$0xff] }
  0x1c   : > { %v201_v26 = vld [vmem:[%s2103_s17 + $0x90] sm:$0xff]  ;;  %342 = vmatpush.msra.mxu1 %v235_v23  ;;  %395 = vmatpush.msra.mxu3 %v297_v25  ;;  %v199_v30 = vld [vmem:[%s2103_s17 + $0x80] sm:$0xff]  ;;  %v270_v14 = vld [vmem:[%s2103_s17 + $0x2b8] sm:$0xff] }
  0x1d   : > { %v233_v27 = vld [vmem:[%s2103_s17 + $0x190] sm:$0xff]  ;;  %v231_v31 = vld [vmem:[%s2103_s17 + $0x180] sm:$0xff]  ;;  %317 = vmatpush.msra.mxu0 %v201_v26  ;;  %370 = vmatpush.msra.mxu2 %v263_v28  ;;  %v208_v15 = vld [vmem:[%s2103_s17 + $0xc8] sm:$0xff] }
  0x1e   : > { %343 = vmatpush.msra.mxu1 %v233_v27  ;;  %v261_v32 = vld [vmem:[%s2103_s17 + $0x270] sm:$0xff]  ;;  %396 = vmatpush.msra.mxu3 %v295_v29  ;;  %v259_v36 = vld [vmem:[%s2103_s17 + $0x260] sm:$0xff]  ;;  %v240_v16 = vld [vmem:[%s2103_s17 + $0x1c8] sm:$0xff] }
  0x1f   : > { %v293_v33 = vld [vmem:[%s2103_s17 + $0x370] sm:$0xff]  ;;  %318 = vmatpush.msra.mxu0 %v199_v30  ;;  %v291_v37 = vld [vmem:[%s2103_s17 + $0x360] sm:$0xff]  ;;  %371 = vmatpush.msra.mxu2 %v261_v32  ;;  %v302_v17 = vld [vmem:[%s2103_s17 + $0x3b8] sm:$0xff] }
  0x20   : > { %v197_v34 = vld [vmem:[%s2103_s17 + $0x70] sm:$0xff]  ;;  %344 = vmatpush.msra.mxu1 %v231_v31  ;;  %397 = vmatpush.msra.mxu3 %v293_v33  ;;  %v195_v38 = vld [vmem:[%s2103_s17 + $0x60] sm:$0xff]  ;;  %v268_v18 = vld [vmem:[%s2103_s17 + $0x2a8] sm:$0xff] }
  0x21   : > { %v229_v35 = vld [vmem:[%s2103_s17 + $0x170] sm:$0xff]  ;;  %v227_v39 = vld [vmem:[%s2103_s17 + $0x160] sm:$0xff]  ;;  %319 = vmatpush.msra.mxu0 %v197_v34  ;;  %372 = vmatpush.msra.mxu2 %v259_v36  ;;  %v206_v19 = vld [vmem:[%s2103_s17 + $0xb8] sm:$0xff] }
  0x22   : > { %345 = vmatpush.msra.mxu1 %v229_v35  ;;  %v257_v40 = vld [vmem:[%s2103_s17 + $0x250] sm:$0xff]  ;;  %398 = vmatpush.msra.mxu3 %v291_v37  ;;  %v255_v44 = vld [vmem:[%s2103_s17 + $0x240] sm:$0xff]  ;;  %v238_v20 = vld [vmem:[%s2103_s17 + $0x1b8] sm:$0xff] }
  0x23   : > { %v289_v41 = vld [vmem:[%s2103_s17 + $0x350] sm:$0xff]  ;;  %320 = vmatpush.msra.mxu0 %v195_v38  ;;  %v287_v45 = vld [vmem:[%s2103_s17 + $0x340] sm:$0xff]  ;;  %373 = vmatpush.msra.mxu2 %v257_v40  ;;  %v300_v21 = vld [vmem:[%s2103_s17 + $0x3a8] sm:$0xff] }
  0x24   : > { %v193_v42 = vld [vmem:[%s2103_s17 + $0x50] sm:$0xff]  ;;  %346 = vmatpush.msra.mxu1 %v227_v39  ;;  %399 = vmatpush.msra.mxu3 %v289_v41  ;;  %v191_v46 = vld [vmem:[%s2103_s17 + $0x40] sm:$0xff]  ;;  %v266_v22 = vld [vmem:[%s2103_s17 + $0x298] sm:$0xff] }
  0x25   : > { %v225_v43 = vld [vmem:[%s2103_s17 + $0x150] sm:$0xff]  ;;  %v223_v47 = vld [vmem:[%s2103_s17 + $0x140] sm:$0xff]  ;;  %321 = vmatpush.msra.mxu0 %v193_v42  ;;  %374 = vmatpush.msra.mxu2 %v255_v44  ;;  %v204_v23 = vld [vmem:[%s2103_s17 + $0xa8] sm:$0xff] }
  0x26   : > { %347 = vmatpush.msra.mxu1 %v225_v43  ;;  %v253_v48 = vld [vmem:[%s2103_s17 + $0x230] sm:$0xff]  ;;  %400 = vmatpush.msra.mxu3 %v287_v45  ;;  %v251_v52 = vld [vmem:[%s2103_s17 + $0x220] sm:$0xff]  ;;  %v236_v25 = vld [vmem:[%s2103_s17 + $0x1a8] sm:$0xff] }
  0x27   : > { %v285_v49 = vld [vmem:[%s2103_s17 + $0x330] sm:$0xff]  ;;  %322 = vmatpush.msra.mxu0 %v191_v46  ;;  %v283_v53 = vld [vmem:[%s2103_s17 + $0x320] sm:$0xff]  ;;  %375 = vmatpush.msra.mxu2 %v253_v48  ;;  %v264_v26 = vld [vmem:[%s2103_s17 + $0x288] sm:$0xff] }
  0x28   : > { %v189_v50 = vld [vmem:[%s2103_s17 + $0x30] sm:$0xff]  ;;  %348 = vmatpush.msra.mxu1 %v223_v47  ;;  %401 = vmatpush.msra.mxu3 %v285_v49  ;;  %v187_v54 = vld [vmem:[%s2103_s17 + $0x20] sm:$0xff]  ;;  %v298_v27 = vld [vmem:[%s2103_s17 + $0x398] sm:$0xff] }
  0x29   : > { %v221_v51 = vld [vmem:[%s2103_s17 + $0x130] sm:$0xff]  ;;  %v219_v55 = vld [vmem:[%s2103_s17 + $0x120] sm:$0xff]  ;;  %323 = vmatpush.msra.mxu0 %v189_v50  ;;  %376 = vmatpush.msra.mxu2 %v251_v52  ;;  %v2204_v28 = vld [vmem:[%s2940_s1 + $0x18] sm:$0xff] }
  0x2a   : > { %349 = vmatpush.msra.mxu1 %v221_v51  ;;  %v249_v56 = vld [vmem:[%s2103_s17 + $0x210] sm:$0xff]  ;;  %402 = vmatpush.msra.mxu3 %v283_v53  ;;  %v247_v60 = vld [vmem:[%s2103_s17 + $0x200] sm:$0xff]  ;;  %v202_v29 = vld [vmem:[%s2103_s17 + $0x98] sm:$0xff] }
  0x2b   : > { %v281_v57 = vld [vmem:[%s2103_s17 + $0x310] sm:$0xff]  ;;  %324 = vmatpush.msra.mxu0 %v187_v54  ;;  %v279_v61 = vld [vmem:[%s2103_s17 + $0x300] sm:$0xff]  ;;  %377 = vmatpush.msra.mxu2 %v249_v56  ;;  %v234_v30 = vld [vmem:[%s2103_s17 + $0x198] sm:$0xff] }
  0x2c   : > { %v185_v58 = vld [vmem:[%s2103_s17 + $0x10] sm:$0xff]  ;;  %350 = vmatpush.msra.mxu1 %v219_v55  ;;  %403 = vmatpush.msra.mxu3 %v281_v57  ;;  %v183_v0 = vld [vmem:[%s2103_s17] sm:$0xff]  ;;  %v262_v31 = vld [vmem:[%s2103_s17 + $0x278] sm:$0xff] }
  0x2d   : > { %v217_v59 = vld [vmem:[%s2103_s17 + $0x110] sm:$0xff]  ;;  %325 = vmatpush.msra.mxu0 %v185_v58  ;;  %v215_v1 = vld [vmem:[%s2103_s17 + $0x100] sm:$0xff]  ;;  %378 = vmatpush.msra.mxu2 %v247_v60  ;;  %v296_v32 = vld [vmem:[%s2103_s17 + $0x388] sm:$0xff] }
  0x2e   : > { %351 = vmatpush.msra.mxu1 %v217_v59  ;;  %404 = vmatpush.msra.mxu3 %v279_v61  ;;  %v2196_v24 = vld [vmem:[%s2940_s1 + $0x10] sm:$0xff]  ;;  %v2214_v33 = vld [vmem:[%s2940_s1] sm:$0xff]  ;;  %v2220_v34 = vld [vmem:[%s2940_s1 + $0x8] sm:$0xff] }
  0x2f   : > { %467 = vmatpush.msrb.mxu2 %v278_v62  ;;  %326 = vmatpush.msra.mxu0 %v183_v0  ;;  %v200_v35 = vld [vmem:[%s2103_s17 + $0x88] sm:$0xff]  ;;  %v294_v38 = vld [vmem:[%s2103_s17 + $0x378] sm:$0xff]  ;;  %v2235_v43 = vld [vmem:[%s2940_s1 + $0x30] sm:$0xff] }
  0x30   : > { %493 = vmatpush.msrb.mxu3 %v310_v63  ;;  %352 = vmatpush.msra.mxu1 %v215_v1  ;;  %v232_v36 = vld [vmem:[%s2103_s17 + $0x188] sm:$0xff]  ;;  %v198_v39 = vld [vmem:[%s2103_s17 + $0x78] sm:$0xff]  ;;  %v2254_v53 = vld [vmem:[%s2940_s1 + $0x20] sm:$0xff] }
  0x31   : > { %468 = vmatpush.msrb.mxu2 %v276_v2  ;;  %415 = vmatpush.msrb.mxu0 %v214_v3  ;;  %v260_v37 = vld [vmem:[%s2103_s17 + $0x268] sm:$0xff]  ;;  %v230_v40 = vld [vmem:[%s2103_s17 + $0x178] sm:$0xff]  ;;  %v2275_v63 = vld [vmem:[%s2940_s1 + $0x50] sm:$0xf] }
  0x32   : > { %441 = vmatpush.msrb.mxu1 %v246_v4  ;;  %494 = vmatpush.msrb.mxu3 %v308_v5  ;;  %v258_v41 = vld [vmem:[%s2103_s17 + $0x258] sm:$0xff]  ;;  %v292_v42 = vld [vmem:[%s2103_s17 + $0x368] sm:$0xff]  ;;  %v1743_v4 = vld [vmem:[%s2103_s17 + $0x6f0] sm:$0xff] }
  0x33   : > { %469 = vmatpush.msrb.mxu2 %v274_v6  ;;  %416 = vmatpush.msrb.mxu0 %v212_v7  ;;  %v196_v44 = vld [vmem:[%s2103_s17 + $0x68] sm:$0xff]  ;;  %v290_v47 = vld [vmem:[%s2103_s17 + $0x358] sm:$0xff] }
  0x34   : > { %442 = vmatpush.msrb.mxu1 %v244_v8  ;;  %495 = vmatpush.msrb.mxu3 %v306_v9  ;;  %v228_v45 = vld [vmem:[%s2103_s17 + $0x168] sm:$0xff]  ;;  %v2245_v48 = vld [vmem:[%s2940_s1 + $0x38] sm:$0xff]  ;;  %v1741_v9 = vld [vmem:[%s2103_s17 + $0x6e0] sm:$0xff] }
  0x35   : > { %470 = vmatpush.msrb.mxu2 %v272_v10  ;;  %417 = vmatpush.msrb.mxu0 %v210_v11  ;;  %v256_v46 = vld [vmem:[%s2103_s17 + $0x248] sm:$0xff]  ;;  %v194_v49 = vld [vmem:[%s2103_s17 + $0x58] sm:$0xff]  ;;  %v1775_v10 = vld [vmem:[%s2103_s17 + $0x7f0] sm:$0xff] }
  0x36   : > { %443 = vmatpush.msrb.mxu1 %v242_v12  ;;  %496 = vmatpush.msrb.mxu3 %v304_v13  ;;  %v226_v50 = vld [vmem:[%s2103_s17 + $0x158] sm:$0xff]  ;;  %v288_v52 = vld [vmem:[%s2103_s17 + $0x348] sm:$0xff]  ;;  %v2297_v11 = vld [vmem:[%s2940_s1 + $0x40] sm:$0xf] }
  0x37   : > { %471 = vmatpush.msrb.mxu2 %v270_v14  ;;  %418 = vmatpush.msrb.mxu0 %v208_v15  ;;  %v254_v51 = vld [vmem:[%s2103_s17 + $0x238] sm:$0xff]  ;;  %v2260_v54 = vld [vmem:[%s2940_s1 + $0x28] sm:$0xff]  ;;  %v1679_v15 = vld [vmem:[%s2103_s17 + $0x4f0] sm:$0xff] }
  0x38   : > { %444 = vmatpush.msrb.mxu1 %v240_v16  ;;  %497 = vmatpush.msrb.mxu3 %v302_v17  ;;  %v192_v55 = vld [vmem:[%s2103_s17 + $0x48] sm:$0xff]  ;;  %v286_v58 = vld [vmem:[%s2103_s17 + $0x338] sm:$0xff]  ;;  %v1711_v16 = vld [vmem:[%s2103_s17 + $0x5f0] sm:$0xff] }
  0x39   : > { %472 = vmatpush.msrb.mxu2 %v268_v18  ;;  %419 = vmatpush.msrb.mxu0 %v206_v19  ;;  %v224_v56 = vld [vmem:[%s2103_s17 + $0x148] sm:$0xff]  ;;  %v190_v59 = vld [vmem:[%s2103_s17 + $0x38] sm:$0xff]  ;;  %v1739_v17 = vld [vmem:[%s2103_s17 + $0x6d0] sm:$0xff] }
  0x3a   : > { %445 = vmatpush.msrb.mxu1 %v238_v20  ;;  %498 = vmatpush.msrb.mxu3 %v300_v21  ;;  %v252_v57 = vld [vmem:[%s2103_s17 + $0x228] sm:$0xff]  ;;  %v222_v60 = vld [vmem:[%s2103_s17 + $0x138] sm:$0xff]  ;;  %v1773_v18 = vld [vmem:[%s2103_s17 + $0x7e0] sm:$0xff] }
  0x3b   : > { %473 = vmatpush.msrb.mxu2 %v266_v22  ;;  %420 = vmatpush.msrb.mxu0 %v204_v23  ;;  %v250_v61 = vld [vmem:[%s2103_s17 + $0x218] sm:$0xff]  ;;  %v284_v62 = vld [vmem:[%s2103_s17 + $0x328] sm:$0xff]  ;;  %v1677_v19 = vld [vmem:[%s2103_s17 + $0x4e0] sm:$0xff] }
  0x3c   : > { %379 = vmatmul.f32.vlgmr.msra.gmra.mxu2 %v2196_v24  ;;  %446 = vmatpush.msrb.mxu1 %v236_v25  ;;  %v188_v0 = vld [vmem:[%s2103_s17 + $0x28] sm:$0xff]  ;;  %v282_v3 = vld [vmem:[%s2103_s17 + $0x318] sm:$0xff]  ;;  %v1709_v20 = vld [vmem:[%s2103_s17 + $0x5e0] sm:$0xff] }
  0x3d   : > { %474 = vmatpush.msrb.mxu2 %v264_v26  ;;  %499 = vmatpush.msrb.mxu3 %v298_v27  ;;  %v220_v1 = vld [vmem:[%s2103_s17 + $0x128] sm:$0xff]  ;;  %v2286_v5 = vld [vmem:[%s2940_s1 + $0x58] sm:$0xf]  ;;  %v1737_v21 = vld [vmem:[%s2103_s17 + $0x6c0] sm:$0xff] }
  0x3e   : > { %405 = vmatmul.f32.vlgmr.msra.gmra.mxu3 %v2204_v28  ;;  %421 = vmatpush.msrb.mxu0 %v202_v29  ;;  %v248_v2 = vld [vmem:[%s2103_s17 + $0x208] sm:$0xff]  ;;  %v186_v6 = vld [vmem:[%s2103_s17 + $0x18] sm:$0xff]  ;;  %v1771_v22 = vld [vmem:[%s2103_s17 + $0x7d0] sm:$0xff] }
  0x3f   : > { %447 = vmatpush.msrb.mxu1 %v234_v30  ;;  %475 = vmatpush.msrb.mxu2 %v262_v31  ;;  %v218_v7 = vld [vmem:[%s2103_s17 + $0x118] sm:$0xff]  ;;  %v280_v8 = vld [vmem:[%s2103_s17 + $0x308] sm:$0xff]  ;;  %v1675_v23 = vld [vmem:[%s2103_s17 + $0x4d0] sm:$0xff] }
  0x40   : > { %500 = vmatpush.msrb.mxu3 %v296_v32  ;;  %327 = vmatmul.f32.vlgmr.msra.gmra.mxu0 %v2214_v33  ;;  %v2302_v12 = vld [vmem:[%s2940_s1 + $0x48] sm:$0xf]  ;;  %v1707_v25 = vld [vmem:[%s2103_s17 + $0x5d0] sm:$0xff]  ;;  %v1769_v27 = vld [vmem:[%s2103_s17 + $0x7c0] sm:$0xff] }
  0x41   : > { %353 = vmatmul.f32.vlgmr.msra.gmra.mxu1 %v2220_v34  ;;  %422 = vmatpush.msrb.mxu0 %v200_v35  ;;  %v184_v13 = vld [vmem:[%s2103_s17 + $0x8] sm:$0xff]  ;;  %v1735_v26 = vld [vmem:[%s2103_s17 + $0x6b0] sm:$0xff]  ;;  %v1673_v29 = vld [vmem:[%s2103_s17 + $0x4c0] sm:$0xff] }
  0x42   : > { %448 = vmatpush.msrb.mxu1 %v232_v36  ;;  %476 = vmatpush.msrb.mxu2 %v260_v37  ;;  %v216_v14 = vld [vmem:[%s2103_s17 + $0x108] sm:$0xff]  ;;  %v1705_v30 = vld [vmem:[%s2103_s17 + $0x5c0] sm:$0xff]  ;;  %v1767_v32 = vld [vmem:[%s2103_s17 + $0x7b0] sm:$0xff] }
  0x43   : > { %501 = vmatpush.msrb.mxu3 %v294_v38  ;;  %423 = vmatpush.msrb.mxu0 %v198_v39  ;;  %v1733_v31 = vld [vmem:[%s2103_s17 + $0x6a0] sm:$0xff]  ;;  %v1671_v35 = vld [vmem:[%s2103_s17 + $0x4b0] sm:$0xff] }
  0x44   : > { %449 = vmatpush.msrb.mxu1 %v230_v40  ;;  %477 = vmatpush.msrb.mxu2 %v258_v41  ;;  %v1703_v36 = vld [vmem:[%s2103_s17 + $0x5b0] sm:$0xff]  ;;  %v1765_v38 = vld [vmem:[%s2103_s17 + $0x7a0] sm:$0xff] }
  0x45   : > { %502 = vmatpush.msrb.mxu3 %v292_v42  ;;  %382 = vmatmul.f32.gmra.mxu2 %v2235_v43  ;;  %v1731_v37 = vld [vmem:[%s2103_s17 + $0x690] sm:$0xff]  ;;  %v1669_v39 = vld [vmem:[%s2103_s17 + $0x4a0] sm:$0xff] }
  0x46   : > { %424 = vmatpush.msrb.mxu0 %v196_v44  ;;  %450 = vmatpush.msrb.mxu1 %v228_v45  ;;  %v1701_v40 = vld [vmem:[%s2103_s17 + $0x5a0] sm:$0xff]  ;;  %v1763_v42 = vld [vmem:[%s2103_s17 + $0x790] sm:$0xff] }
  0x47   : > { %478 = vmatpush.msrb.mxu2 %v256_v46  ;;  %503 = vmatpush.msrb.mxu3 %v290_v47  ;;  %v1729_v41 = vld [vmem:[%s2103_s17 + $0x680] sm:$0xff]  ;;  %v1667_v44 = vld [vmem:[%s2103_s17 + $0x490] sm:$0xff] }
  0x48   : > { %408 = vmatmul.f32.gmra.mxu3 %v2245_v48  ;;  %425 = vmatpush.msrb.mxu0 %v194_v49  ;;  %v1699_v45 = vld [vmem:[%s2103_s17 + $0x590] sm:$0xff]  ;;  %v1761_v47 = vld [vmem:[%s2103_s17 + $0x780] sm:$0xff] }
  0x49   : > { %451 = vmatpush.msrb.mxu1 %v226_v50  ;;  %479 = vmatpush.msrb.mxu2 %v254_v51  ;;  %v1727_v46 = vld [vmem:[%s2103_s17 + $0x670] sm:$0xff]  ;;  %v1665_v49 = vld [vmem:[%s2103_s17 + $0x480] sm:$0xff] }
  0x4a   : > { %504 = vmatpush.msrb.mxu3 %v288_v52  ;;  %330 = vmatmul.f32.gmra.mxu0 %v2254_v53  ;;  %v1697_v50 = vld [vmem:[%s2103_s17 + $0x580] sm:$0xff]  ;;  %v1759_v52 = vld [vmem:[%s2103_s17 + $0x770] sm:$0xff] }
  0x4b   : > { %356 = vmatmul.f32.gmra.mxu1 %v2260_v54  ;;  %426 = vmatpush.msrb.mxu0 %v192_v55  ;;  %v1725_v51 = vld [vmem:[%s2103_s17 + $0x660] sm:$0xff]  ;;  %v1663_v55 = vld [vmem:[%s2103_s17 + $0x470] sm:$0xff] }
  0x4c   : > { %452 = vmatpush.msrb.mxu1 %v224_v56  ;;  %480 = vmatpush.msrb.mxu2 %v252_v57  ;;  %v1695_v56 = vld [vmem:[%s2103_s17 + $0x570] sm:$0xff] }
  0x4d   : > { %505 = vmatpush.msrb.mxu3 %v286_v58  ;;  %427 = vmatpush.msrb.mxu0 %v190_v59  ;;  %v1723_v57 = vld [vmem:[%s2103_s17 + $0x650] sm:$0xff]  ;;  %v1757_v58 = vld [vmem:[%s2103_s17 + $0x760] sm:$0xff] }
  0x4e   : > { %453 = vmatpush.msrb.mxu1 %v222_v60  ;;  %481 = vmatpush.msrb.mxu2 %v250_v61  ;;  %v1661_v59 = vld [vmem:[%s2103_s17 + $0x460] sm:$0xff] }
  0x4f   : > { %506 = vmatpush.msrb.mxu3 %v284_v62  ;;  %385 = vmatmul.f32.gmra.mxu2 %v2275_v63  ;;  %v1693_v60 = vld [vmem:[%s2103_s17 + $0x560] sm:$0xff]  ;;  %v1755_v62 = vld [vmem:[%s2103_s17 + $0x750] sm:$0xff] }
  0x50   : > { %428 = vmatpush.msrb.mxu0 %v188_v0  ;;  %454 = vmatpush.msrb.mxu1 %v220_v1  ;;  %v1721_v61 = vld [vmem:[%s2103_s17 + $0x640] sm:$0xff]  ;;  %v1659_v0 = vld [vmem:[%s2103_s17 + $0x450] sm:$0xff] }
  0x51   : > { %482 = vmatpush.msrb.mxu2 %v248_v2  ;;  %507 = vmatpush.msrb.mxu3 %v282_v3  ;;  %v1691_v1 = vld [vmem:[%s2103_s17 + $0x550] sm:$0xff]  ;;  %v1753_v3 = vld [vmem:[%s2103_s17 + $0x740] sm:$0xff] }
  0x52   : > { %411 = vmatmul.f32.gmra.mxu3 %v2286_v5  ;;  %429 = vmatpush.msrb.mxu0 %v186_v6  ;;  %v1719_v2 = vld [vmem:[%s2103_s17 + $0x630] sm:$0xff]  ;;  %v1689_v6 = vld [vmem:[%s2103_s17 + $0x540] sm:$0xff] }
  0x53   : > { %700 = vmatpush.msra.mxu2 %v1743_v4  ;;  %455 = vmatpush.msrb.mxu1 %v218_v7  ;;  %v1657_v4 = vld [vmem:[%s2103_s17 + $0x440] sm:$0xff] }
  0x54   : > { %508 = vmatpush.msrb.mxu3 %v280_v8  ;;  %333 = vmatmul.f32.gmra.mxu0 %v2297_v11  ;;  %v1717_v7 = vld [vmem:[%s2103_s17 + $0x620] sm:$0xff]  ;;  %v1751_v8 = vld [vmem:[%s2103_s17 + $0x730] sm:$0xff] }
  0x55   : > { %701 = vmatpush.msra.mxu2 %v1741_v9  ;;  %359 = vmatmul.f32.gmra.mxu1 %v2302_v12  ;;  %v1655_v9 = vld [vmem:[%s2103_s17 + $0x430] sm:$0xff] }
  0x56   : > { %726 = vmatpush.msra.mxu3 %v1775_v10  ;;  %430 = vmatpush.msrb.mxu0 %v184_v13  ;;  %v1687_v10 = vld [vmem:[%s2103_s17 + $0x530] sm:$0xff] }
  0x57   : > { %456 = vmatpush.msrb.mxu1 %v216_v14  ;;  %702 = vmatpush.msra.mxu2 %v1739_v17  ;;  %v1715_v13 = vld [vmem:[%s2103_s17 + $0x610] sm:$0xff]  ;;  %v1749_v14 = vld [vmem:[%s2103_s17 + $0x720] sm:$0xff] }
  0x58   : > { %648 = vmatpush.msra.mxu0 %v1679_v15  ;;  %727 = vmatpush.msra.mxu3 %v1773_v18  ;;  %v1653_v15 = vld [vmem:[%s2103_s17 + $0x420] sm:$0xff]  ;;  %v1747_v18 = vld [vmem:[%s2103_s17 + $0x710] sm:$0xff] }
  0x59   : > { %674 = vmatpush.msra.mxu1 %v1711_v16  ;;  %703 = vmatpush.msra.mxu2 %v1737_v21  ;;  %v1685_v16 = vld [vmem:[%s2103_s17 + $0x520] sm:$0xff]  ;;  %v1683_v21 = vld [vmem:[%s2103_s17 + $0x510] sm:$0xff] }
  0x5a   : > { %649 = vmatpush.msra.mxu0 %v1677_v19  ;;  %728 = vmatpush.msra.mxu3 %v1771_v22  ;;  %v1713_v17 = vld [vmem:[%s2103_s17 + $0x600] sm:$0xff]  ;;  %v1744_v19 = vld [vmem:[%s2103_s17 + $0x6f8] sm:$0xff] }
  0x5b   : > { %675 = vmatpush.msra.mxu1 %v1709_v20  ;;  %483 = vmatmul.f32.vlgmr.msrb.gmra.mxu2 %v2196_v24  ;;  %v1651_v20 = vld [vmem:[%s2103_s17 + $0x410] sm:$0xff]  ;;  %v1745_v22 = vld [vmem:[%s2103_s17 + $0x700] sm:$0xff] }
  0x5c   : > { %650 = vmatpush.msra.mxu0 %v1675_v23  ;;  %704 = vmatpush.msra.mxu2 %v1735_v26  ;;  %v1742_v23 = vld [vmem:[%s2103_s17 + $0x6e8] sm:$0xff]  ;;  %v1649_v26 = vld [vmem:[%s2103_s17 + $0x400] sm:$0xff] }
  0x5d   : > { %676 = vmatpush.msra.mxu1 %v1707_v25  ;;  %729 = vmatpush.msra.mxu3 %v1769_v27  ;;  %v1776_v25 = vld [vmem:[%s2103_s17 + $0x7f8] sm:$0xff]  ;;  %v1681_v27 = vld [vmem:[%s2103_s17 + $0x500] sm:$0xff] }
  0x5e   : > { %509 = vmatmul.f32.vlgmr.msrb.gmra.mxu3 %v2204_v28  ;;  %651 = vmatpush.msra.mxu0 %v1673_v29  ;;  %v1680_v29 = vld [vmem:[%s2103_s17 + $0x4f8] sm:$0xff] }
  0x5f   : > { %677 = vmatpush.msra.mxu1 %v1705_v30  ;;  %705 = vmatpush.msra.mxu2 %v1733_v31  ;;  %v1712_v30 = vld [vmem:[%s2103_s17 + $0x5f8] sm:$0xff] }
  0x60   : > { %730 = vmatpush.msra.mxu3 %v1767_v32  ;;  %431 = vmatmul.f32.vlgmr.msrb.gmra.mxu0 %v2214_v33  ;;  %v1740_v31 = vld [vmem:[%s2103_s17 + $0x6d8] sm:$0xff]  ;;  %v1774_v32 = vld [vmem:[%s2103_s17 + $0x7e8] sm:$0xff] }
  0x61   : > { %457 = vmatmul.f32.vlgmr.msrb.gmra.mxu1 %v2220_v34  ;;  %652 = vmatpush.msra.mxu0 %v1671_v35  ;;  %v1678_v35 = vld [vmem:[%s2103_s17 + $0x4e8] sm:$0xff] }
  0x62   : > { %678 = vmatpush.msra.mxu1 %v1703_v36  ;;  %706 = vmatpush.msra.mxu2 %v1731_v37  ;;  %v1710_v36 = vld [vmem:[%s2103_s17 + $0x5e8] sm:$0xff] }
  0x63   : > { %731 = vmatpush.msra.mxu3 %v1765_v38  ;;  %653 = vmatpush.msra.mxu0 %v1669_v39  ;;  %v1738_v37 = vld [vmem:[%s2103_s17 + $0x6c8] sm:$0xff]  ;;  %v1772_v38 = vld [vmem:[%s2103_s17 + $0x7d8] sm:$0xff] }
  0x64   : > { %679 = vmatpush.msra.mxu1 %v1701_v40  ;;  %707 = vmatpush.msra.mxu2 %v1729_v41  ;;  %v1676_v39 = vld [vmem:[%s2103_s17 + $0x4d8] sm:$0xff] }
  0x65   : > { %732 = vmatpush.msra.mxu3 %v1763_v42  ;;  %486 = vmatmul.f32.gmra.mxu2 %v2235_v43  ;;  %v1708_v40 = vld [vmem:[%s2103_s17 + $0x5d8] sm:$0xff]  ;;  %v1770_v42 = vld [vmem:[%s2103_s17 + $0x7c8] sm:$0xff] }
  0x66   : > { %654 = vmatpush.msra.mxu0 %v1667_v44  ;;  %680 = vmatpush.msra.mxu1 %v1699_v45  ;;  %v1736_v41 = vld [vmem:[%s2103_s17 + $0x6b8] sm:$0xff]  ;;  %v1674_v44 = vld [vmem:[%s2103_s17 + $0x4c8] sm:$0xff] }
  0x67   : > { %708 = vmatpush.msra.mxu2 %v1727_v46  ;;  %733 = vmatpush.msra.mxu3 %v1761_v47  ;;  %v1706_v45 = vld [vmem:[%s2103_s17 + $0x5c8] sm:$0xff]  ;;  %v1768_v47 = vld [vmem:[%s2103_s17 + $0x7b8] sm:$0xff] }
  0x68   : > { %512 = vmatmul.f32.gmra.mxu3 %v2245_v48  ;;  %655 = vmatpush.msra.mxu0 %v1665_v49  ;;  %v1734_v46 = vld [vmem:[%s2103_s17 + $0x6a8] sm:$0xff]  ;;  %v1672_v49 = vld [vmem:[%s2103_s17 + $0x4b8] sm:$0xff] }
  0x69   : > { %681 = vmatpush.msra.mxu1 %v1697_v50  ;;  %709 = vmatpush.msra.mxu2 %v1725_v51  ;;  %v1704_v50 = vld [vmem:[%s2103_s17 + $0x5b8] sm:$0xff] }
  0x6a   : > { %734 = vmatpush.msra.mxu3 %v1759_v52  ;;  %434 = vmatmul.f32.gmra.mxu0 %v2254_v53  ;;  %v1732_v51 = vld [vmem:[%s2103_s17 + $0x698] sm:$0xff]  ;;  %v1766_v52 = vld [vmem:[%s2103_s17 + $0x7a8] sm:$0xff] }
  0x6b   : > { %460 = vmatmul.f32.gmra.mxu1 %v2260_v54  ;;  %656 = vmatpush.msra.mxu0 %v1663_v55  ;;  %v1670_v55 = vld [vmem:[%s2103_s17 + $0x4a8] sm:$0xff] }
  0x6c   : > { %682 = vmatpush.msra.mxu1 %v1695_v56  ;;  %710 = vmatpush.msra.mxu2 %v1723_v57  ;;  %v1702_v56 = vld [vmem:[%s2103_s17 + $0x5a8] sm:$0xff] }
  0x6d   : > { %735 = vmatpush.msra.mxu3 %v1757_v58  ;;  %657 = vmatpush.msra.mxu0 %v1661_v59  ;;  %v1730_v57 = vld [vmem:[%s2103_s17 + $0x688] sm:$0xff]  ;;  %v1764_v58 = vld [vmem:[%s2103_s17 + $0x798] sm:$0xff] }
  0x6e   : > { %683 = vmatpush.msra.mxu1 %v1693_v60  ;;  %711 = vmatpush.msra.mxu2 %v1721_v61  ;;  %v1668_v59 = vld [vmem:[%s2103_s17 + $0x498] sm:$0xff] }
  0x6f   : > { %736 = vmatpush.msra.mxu3 %v1755_v62  ;;  %489 = vmatmul.f32.gmra.mxu2 %v2275_v63  ;;  %v1700_v60 = vld [vmem:[%s2103_s17 + $0x598] sm:$0xff]  ;;  %v1762_v62 = vld [vmem:[%s2103_s17 + $0x788] sm:$0xff] }
  0x70   : > { %658 = vmatpush.msra.mxu0 %v1659_v0  ;;  %684 = vmatpush.msra.mxu1 %v1691_v1  ;;  %v1728_v61 = vld [vmem:[%s2103_s17 + $0x678] sm:$0xff]  ;;  %v1666_v0 = vld [vmem:[%s2103_s17 + $0x488] sm:$0xff] }
  0x71   : > { %712 = vmatpush.msra.mxu2 %v1719_v2  ;;  %737 = vmatpush.msra.mxu3 %v1753_v3  ;;  %v1698_v1 = vld [vmem:[%s2103_s17 + $0x588] sm:$0xff]  ;;  %v1760_v3 = vld [vmem:[%s2103_s17 + $0x778] sm:$0xff] }
  0x72   : > { %515 = vmatmul.f32.gmra.mxu3 %v2286_v5  ;;  %659 = vmatpush.msra.mxu0 %v1657_v4  ;;  %v1726_v2 = vld [vmem:[%s2103_s17 + $0x668] sm:$0xff]  ;;  %v1664_v4 = vld [vmem:[%s2103_s17 + $0x478] sm:$0xff] }
  0x73   : > { %685 = vmatpush.msra.mxu1 %v1689_v6  ;;  %713 = vmatpush.msra.mxu2 %v1717_v7  ;;  %v1696_v6 = vld [vmem:[%s2103_s17 + $0x578] sm:$0xff] }
  0x74   : > { %738 = vmatpush.msra.mxu3 %v1751_v8  ;;  %437 = vmatmul.f32.gmra.mxu0 %v2297_v11  ;;  %v1724_v7 = vld [vmem:[%s2103_s17 + $0x658] sm:$0xff]  ;;  %v1758_v8 = vld [vmem:[%s2103_s17 + $0x768] sm:$0xff] }
  0x75   : > { %463 = vmatmul.f32.gmra.mxu1 %v2302_v12  ;;  %660 = vmatpush.msra.mxu0 %v1655_v9  ;;  %v1662_v9 = vld [vmem:[%s2103_s17 + $0x468] sm:$0xff] }
  0x76   : > { %686 = vmatpush.msra.mxu1 %v1687_v10  ;;  %714 = vmatpush.msra.mxu2 %v1715_v13  ;;  %v1694_v10 = vld [vmem:[%s2103_s17 + $0x568] sm:$0xff] }
  0x77   : > { %739 = vmatpush.msra.mxu3 %v1749_v14  ;;  %661 = vmatpush.msra.mxu0 %v1653_v15  ;;  %v1722_v13 = vld [vmem:[%s2103_s17 + $0x648] sm:$0xff]  ;;  %v1756_v14 = vld [vmem:[%s2103_s17 + $0x758] sm:$0xff] }
  0x78   : > { %687 = vmatpush.msra.mxu1 %v1685_v16  ;;  %715 = vmatpush.msra.mxu2 %v1713_v17  ;;  %v1660_v15 = vld [vmem:[%s2103_s17 + $0x458] sm:$0xff] }
  0x79   : > { %740 = vmatpush.msra.mxu3 %v1747_v18  ;;  %716 = vmatmul.f32.vlgmr.msra.gmra.mxu2 %v2196_v24  ;;  %v1692_v16 = vld [vmem:[%s2103_s17 + $0x558] sm:$0xff]  ;;  %v1754_v18 = vld [vmem:[%s2103_s17 + $0x748] sm:$0xff] }
  0x7a   : > { %804 = vmatpush.msrb.mxu2 %v1744_v19  ;;  %662 = vmatpush.msra.mxu0 %v1651_v20  ;;  %v1720_v17 = vld [vmem:[%s2103_s17 + $0x638] sm:$0xff]  ;;  %v1658_v19 = vld [vmem:[%s2103_s17 + $0x448] sm:$0xff] }
  0x7b   : > { %688 = vmatpush.msra.mxu1 %v1683_v21  ;;  %741 = vmatpush.msra.mxu3 %v1745_v22  ;;  %v1690_v20 = vld [vmem:[%s2103_s17 + $0x548] sm:$0xff]  ;;  %v1752_v22 = vld [vmem:[%s2103_s17 + $0x738] sm:$0xff] }
  0x7c   : > { %742 = vmatmul.f32.vlgmr.msra.gmra.mxu3 %v2204_v28  ;;  %805 = vmatpush.msrb.mxu2 %v1742_v23  ;;  %v1718_v21 = vld [vmem:[%s2103_s17 + $0x628] sm:$0xff]  ;;  %v1656_v23 = vld [vmem:[%s2103_s17 + $0x438] sm:$0xff] }
  0x7d   : > { %830 = vmatpush.msrb.mxu3 %v1776_v25  ;;  %663 = vmatpush.msra.mxu0 %v1649_v26  ;;  %v1688_v25 = vld [vmem:[%s2103_s17 + $0x538] sm:$0xff] }
  0x7e   : > { %689 = vmatpush.msra.mxu1 %v1681_v27  ;;  %664 = vmatmul.f32.vlgmr.msra.gmra.mxu0 %v2214_v33  ;;  %v1716_v26 = vld [vmem:[%s2103_s17 + $0x618] sm:$0xff]  ;;  %v1750_v27 = vld [vmem:[%s2103_s17 + $0x728] sm:$0xff] }
  0x7f   : > { %690 = vmatmul.f32.vlgmr.msra.gmra.mxu1 %v2220_v34  ;;  %752 = vmatpush.msrb.mxu0 %v1680_v29  ;;  %v1654_v29 = vld [vmem:[%s2103_s17 + $0x428] sm:$0xff] }
  0x80   : > { %778 = vmatpush.msrb.mxu1 %v1712_v30  ;;  %806 = vmatpush.msrb.mxu2 %v1740_v31  ;;  %v1686_v30 = vld [vmem:[%s2103_s17 + $0x528] sm:$0xff] }
  0x81   : > { %831 = vmatpush.msrb.mxu3 %v1774_v32  ;;  %753 = vmatpush.msrb.mxu0 %v1678_v35  ;;  %v1714_v31 = vld [vmem:[%s2103_s17 + $0x608] sm:$0xff]  ;;  %v1748_v32 = vld [vmem:[%s2103_s17 + $0x718] sm:$0xff]  ;;  %v1871_v35 = vld [vmem:[%s2103_s17 + $0xaf0] sm:$0xff] }
  0x82   : > { %779 = vmatpush.msrb.mxu1 %v1710_v36  ;;  %807 = vmatpush.msrb.mxu2 %v1738_v37  ;;  %v1652_v36 = vld [vmem:[%s2103_s17 + $0x418] sm:$0xff] }
  0x83   : > { %832 = vmatpush.msrb.mxu3 %v1772_v38  ;;  %719 = vmatmul.f32.gmra.mxu2 %v2235_v43  ;;  %v1684_v37 = vld [vmem:[%s2103_s17 + $0x518] sm:$0xff]  ;;  %v1746_v38 = vld [vmem:[%s2103_s17 + $0x708] sm:$0xff] }
  0x84   : > { %754 = vmatpush.msrb.mxu0 %v1676_v39  ;;  %780 = vmatpush.msrb.mxu1 %v1708_v40  ;;  %v1869_v39 = vld [vmem:[%s2103_s17 + $0xae0] sm:$0xff]  ;;  %v1903_v40 = vld [vmem:[%s2103_s17 + $0xbf0] sm:$0xff] }
  0x85   : > { %808 = vmatpush.msrb.mxu2 %v1736_v41  ;;  %833 = vmatpush.msrb.mxu3 %v1770_v42  ;;  %v1650_v41 = vld [vmem:[%s2103_s17 + $0x408] sm:$0xff] }
  0x86   : > { %745 = vmatmul.f32.gmra.mxu3 %v2245_v48  ;;  %755 = vmatpush.msrb.mxu0 %v1674_v44  ;;  %v1682_v42 = vld [vmem:[%s2103_s17 + $0x508] sm:$0xff]  ;;  %v1807_v44 = vld [vmem:[%s2103_s17 + $0x8f0] sm:$0xff] }
  0x87   : > { %781 = vmatpush.msrb.mxu1 %v1706_v45  ;;  %809 = vmatpush.msrb.mxu2 %v1734_v46  ;;  %v1867_v45 = vld [vmem:[%s2103_s17 + $0xad0] sm:$0xff]  ;;  %v1901_v46 = vld [vmem:[%s2103_s17 + $0xbe0] sm:$0xff] }
  0x88   : > { %834 = vmatpush.msrb.mxu3 %v1768_v47  ;;  %667 = vmatmul.f32.gmra.mxu0 %v2254_v53  ;;  %v1805_v47 = vld [vmem:[%s2103_s17 + $0x8e0] sm:$0xff] }
  0x89   : > { %693 = vmatmul.f32.gmra.mxu1 %v2260_v54  ;;  %756 = vmatpush.msrb.mxu0 %v1672_v49  ;;  %v1865_v49 = vld [vmem:[%s2103_s17 + $0xac0] sm:$0xff] }
  0x8a   : > { %782 = vmatpush.msrb.mxu1 %v1704_v50  ;;  %810 = vmatpush.msrb.mxu2 %v1732_v51  ;;  %v1899_v50 = vld [vmem:[%s2103_s17 + $0xbd0] sm:$0xff] }
  0x8b   : > { %835 = vmatpush.msrb.mxu3 %v1766_v52  ;;  %757 = vmatpush.msrb.mxu0 %v1670_v55  ;;  %v1803_v51 = vld [vmem:[%s2103_s17 + $0x8d0] sm:$0xff]  ;;  %v1897_v55 = vld [vmem:[%s2103_s17 + $0xbc0] sm:$0xff] }
  0x8c   : > { %783 = vmatpush.msrb.mxu1 %v1702_v56  ;;  %811 = vmatpush.msrb.mxu2 %v1730_v57  ;;  %v1863_v52 = vld [vmem:[%s2103_s17 + $0xab0] sm:$0xff]  ;;  %v1833_v56 = vld [vmem:[%s2103_s17 + $0x9c0] sm:$0xff] }
  0x8d   : > { %836 = vmatpush.msrb.mxu3 %v1764_v58  ;;  %722 = vmatmul.f32.gmra.mxu2 %v2275_v63  ;;  %v1861_v57 = vld [vmem:[%s2103_s17 + $0xaa0] sm:$0xff]  ;;  %v1895_v58 = vld [vmem:[%s2103_s17 + $0xbb0] sm:$0xff] }
  0x8e   : > { %758 = vmatpush.msrb.mxu0 %v1668_v59  ;;  %784 = vmatpush.msrb.mxu1 %v1700_v60  ;;  %v1799_v59 = vld [vmem:[%s2103_s17 + $0x8b0] sm:$0xff] }
  0x8f   : > { %812 = vmatpush.msrb.mxu2 %v1728_v61  ;;  %837 = vmatpush.msrb.mxu3 %v1762_v62  ;;  %v1859_v60 = vld [vmem:[%s2103_s17 + $0xa90] sm:$0xff]  ;;  %v1893_v61 = vld [vmem:[%s2103_s17 + $0xba0] sm:$0xff] }
  0x90   : > { %748 = vmatmul.f32.gmra.mxu3 %v2286_v5  ;;  %759 = vmatpush.msrb.mxu0 %v1666_v0  ;;  %v1797_v62 = vld [vmem:[%s2103_s17 + $0x8a0] sm:$0xff] }
  0x91   : > { %785 = vmatpush.msrb.mxu1 %v1698_v1  ;;  %813 = vmatpush.msrb.mxu2 %v1726_v2  ;;  %v1857_v0 = vld [vmem:[%s2103_s17 + $0xa80] sm:$0xff]  ;;  %v1891_v1 = vld [vmem:[%s2103_s17 + $0xb90] sm:$0xff] }
  0x92   : > { %838 = vmatpush.msrb.mxu3 %v1760_v3  ;;  %670 = vmatmul.f32.gmra.mxu0 %v2297_v11  ;;  %v1795_v2 = vld [vmem:[%s2103_s17 + $0x890] sm:$0xff] }
  0x93   : > { %696 = vmatmul.f32.gmra.mxu1 %v2302_v12  ;;  %760 = vmatpush.msrb.mxu0 %v1664_v4  ;;  %v1855_v3 = vld [vmem:[%s2103_s17 + $0xa70] sm:$0xff]  ;;  %v1889_v4 = vld [vmem:[%s2103_s17 + $0xb80] sm:$0xff] }
  0x94   : > { %786 = vmatpush.msrb.mxu1 %v1696_v6  ;;  %814 = vmatpush.msrb.mxu2 %v1724_v7  ;;  %v1825_v6 = vld [vmem:[%s2103_s17 + $0x980] sm:$0xff] }
  0x95   : > { %839 = vmatpush.msrb.mxu3 %v1758_v8  ;;  %761 = vmatpush.msrb.mxu0 %v1662_v9  ;;  %v1853_v7 = vld [vmem:[%s2103_s17 + $0xa60] sm:$0xff]  ;;  %v1887_v8 = vld [vmem:[%s2103_s17 + $0xb70] sm:$0xff] }
  0x96   : > { %787 = vmatpush.msrb.mxu1 %v1694_v10  ;;  %815 = vmatpush.msrb.mxu2 %v1722_v13  ;;  %v1791_v9 = vld [vmem:[%s2103_s17 + $0x870] sm:$0xff]  ;;  %v1885_v13 = vld [vmem:[%s2103_s17 + $0xb60] sm:$0xff] }
  0x97   : > { %840 = vmatpush.msrb.mxu3 %v1756_v14  ;;  %762 = vmatpush.msrb.mxu0 %v1660_v15  ;;  %v1851_v10 = vld [vmem:[%s2103_s17 + $0xa50] sm:$0xff]  ;;  %v1789_v14 = vld [vmem:[%s2103_s17 + $0x860] sm:$0xff] }
  0x98   : > { %788 = vmatpush.msrb.mxu1 %v1692_v16  ;;  %816 = vmatpush.msrb.mxu2 %v1720_v17  ;;  %v1849_v15 = vld [vmem:[%s2103_s17 + $0xa40] sm:$0xff]  ;;  %v1883_v16 = vld [vmem:[%s2103_s17 + $0xb50] sm:$0xff] }
  0x99   : > { %841 = vmatpush.msrb.mxu3 %v1754_v18  ;;  %763 = vmatpush.msrb.mxu0 %v1658_v19  ;;  %v1787_v17 = vld [vmem:[%s2103_s17 + $0x850] sm:$0xff]  ;;  %v1785_v19 = vld [vmem:[%s2103_s17 + $0x840] sm:$0xff] }
  0x9a   : > { %789 = vmatpush.msrb.mxu1 %v1690_v20  ;;  %817 = vmatpush.msrb.mxu2 %v1718_v21  ;;  %v1847_v18 = vld [vmem:[%s2103_s17 + $0xa30] sm:$0xff]  ;;  %v1817_v20 = vld [vmem:[%s2103_s17 + $0x940] sm:$0xff] }
  0x9b   : > { %842 = vmatpush.msrb.mxu3 %v1752_v22  ;;  %764 = vmatpush.msrb.mxu0 %v1656_v23  ;;  %v1845_v21 = vld [vmem:[%s2103_s17 + $0xa20] sm:$0xff]  ;;  %v1879_v22 = vld [vmem:[%s2103_s17 + $0xb30] sm:$0xff] }
  0x9c   : > { %790 = vmatpush.msrb.mxu1 %v1688_v25  ;;  %818 = vmatpush.msrb.mxu2 %v1716_v26  ;;  %v1783_v23 = vld [vmem:[%s2103_s17 + $0x830] sm:$0xff] }
  0x9d   : > { %843 = vmatpush.msrb.mxu3 %v1750_v27  ;;  %765 = vmatpush.msrb.mxu0 %v1654_v29  ;;  %v1815_v27 = vld [vmem:[%s2103_s17 + $0x930] sm:$0xff] }
  0x9e   : > { %791 = vmatpush.msrb.mxu1 %v1686_v30  ;;  %819 = vmatpush.msrb.mxu2 %v1714_v31  ;;  %v1843_v29 = vld [vmem:[%s2103_s17 + $0xa10] sm:$0xff]  ;;  %v1877_v31 = vld [vmem:[%s2103_s17 + $0xb20] sm:$0xff] }
  0x9f   : > { %844 = vmatpush.msrb.mxu3 %v1748_v32  ;;  %820 = vmatmul.f32.vlgmr.msrb.gmra.mxu2 %v2196_v24  ;;  %v1839_v24 = vld [vmem:[%s2103_s17 + $0x9f0] sm:$0xff]  ;;  %v1781_v32 = vld [vmem:[%s2103_s17 + $0x820] sm:$0xff] }
  0xa0   : > { %1043 = vmatpush.msra.mxu2 %v1871_v35  ;;  %766 = vmatpush.msrb.mxu0 %v1652_v36  ;;  %v1813_v35 = vld [vmem:[%s2103_s17 + $0x920] sm:$0xff] }
  0xa1   : > { %792 = vmatpush.msrb.mxu1 %v1684_v37  ;;  %845 = vmatpush.msrb.mxu3 %v1746_v38  ;;  %v1841_v36 = vld [vmem:[%s2103_s17 + $0xa00] sm:$0xff]  ;;  %v1875_v38 = vld [vmem:[%s2103_s17 + $0xb10] sm:$0xff] }
  0xa2   : > { %846 = vmatmul.f32.vlgmr.msrb.gmra.mxu3 %v2204_v28  ;;  %1044 = vmatpush.msra.mxu2 %v1869_v39  ;;  %v1837_v28 = vld [vmem:[%s2103_s17 + $0x9e0] sm:$0xff] }
  0xa3   : > { %1069 = vmatpush.msra.mxu3 %v1903_v40  ;;  %767 = vmatpush.msrb.mxu0 %v1650_v41  ;;  %v1872_v40 = vld [vmem:[%s2103_s17 + $0xaf8] sm:$0xff]  ;;  %v1779_v41 = vld [vmem:[%s2103_s17 + $0x810] sm:$0xff] }
  0xa4   : > { %793 = vmatpush.msrb.mxu1 %v1682_v42  ;;  %768 = vmatmul.f32.vlgmr.msrb.gmra.mxu0 %v2214_v33  ;;  %v1835_v33 = vld [vmem:[%s2103_s17 + $0x9d0] sm:$0xff] }
  0xa5   : > { %794 = vmatmul.f32.vlgmr.msrb.gmra.mxu1 %v2220_v34  ;;  %991 = vmatpush.msra.mxu0 %v1807_v44  ;;  %v1801_v34 = vld [vmem:[%s2103_s17 + $0x8c0] sm:$0xff]  ;;  %v1811_v44 = vld [vmem:[%s2103_s17 + $0x910] sm:$0xff] }
  0xa6   : > { %1017 = vmatpush.msra.mxu1 %v1839_v24  ;;  %1045 = vmatpush.msra.mxu2 %v1867_v45  ;;  %v1873_v24 = vld [vmem:[%s2103_s17 + $0xb00] sm:$0xff] }
  0xa7   : > { %1070 = vmatpush.msra.mxu3 %v1901_v46  ;;  %992 = vmatpush.msra.mxu0 %v1805_v47  ;;  %v2537_v46 = vld [vmem:[%s2940_s1 + $0x10] sm:$0xff]  ;;  %v1870_v47 = vld [vmem:[%s2103_s17 + $0xae8] sm:$0xff] }
  0xa8   : > { %1018 = vmatpush.msra.mxu1 %v1837_v28  ;;  %1046 = vmatpush.msra.mxu2 %v1865_v49  ;;  %v1904_v28 = vld [vmem:[%s2103_s17 + $0xbf8] sm:$0xff]  ;;  %v1777_v49 = vld [vmem:[%s2103_s17 + $0x800] sm:$0xff] }
  0xa9   : > { %1071 = vmatpush.msra.mxu3 %v1899_v50  ;;  %823 = vmatmul.f32.gmra.mxu2 %v2235_v43  ;;  %v1831_v43 = vld [vmem:[%s2103_s17 + $0x9b0] sm:$0xff]  ;;  %v1809_v50 = vld [vmem:[%s2103_s17 + $0x900] sm:$0xff] }
  0xaa   : > { %993 = vmatpush.msra.mxu0 %v1803_v51  ;;  %1019 = vmatpush.msra.mxu1 %v1835_v33  ;;  %v2547_v51 = vld [vmem:[%s2940_s1 + $0x18] sm:$0xff] }
  0xab   : > { %1047 = vmatpush.msra.mxu2 %v1863_v52  ;;  %1072 = vmatpush.msra.mxu3 %v1897_v55  ;;  %v1808_v33 = vld [vmem:[%s2103_s17 + $0x8f8] sm:$0xff] }
  0xac   : > { %849 = vmatmul.f32.gmra.mxu3 %v2245_v48  ;;  %994 = vmatpush.msra.mxu0 %v1801_v34  ;;  %v1829_v48 = vld [vmem:[%s2103_s17 + $0x9a0] sm:$0xff]  ;;  %v1840_v34 = vld [vmem:[%s2103_s17 + $0x9f8] sm:$0xff] }
  0xad   : > { %1020 = vmatpush.msra.mxu1 %v1833_v56  ;;  %1048 = vmatpush.msra.mxu2 %v1861_v57  ;;  %v1868_v56 = vld [vmem:[%s2103_s17 + $0xad8] sm:$0xff] }
  0xae   : > { %1073 = vmatpush.msra.mxu3 %v1895_v58  ;;  %771 = vmatmul.f32.gmra.mxu0 %v2254_v53  ;;  %v1827_v53 = vld [vmem:[%s2103_s17 + $0x990] sm:$0xff]  ;;  %v2556_v58 = vld [vmem:[%s2940_s1] sm:$0xff] }
  0xaf   : > { %797 = vmatmul.f32.gmra.mxu1 %v2260_v54  ;;  %995 = vmatpush.msra.mxu0 %v1799_v59  ;;  %v1793_v54 = vld [vmem:[%s2103_s17 + $0x880] sm:$0xff]  ;;  %v1902_v59 = vld [vmem:[%s2103_s17 + $0xbe8] sm:$0xff] }
  0xb0   : > { %1021 = vmatpush.msra.mxu1 %v1831_v43  ;;  %1049 = vmatpush.msra.mxu2 %v1859_v60  ;;  %v1806_v43 = vld [vmem:[%s2103_s17 + $0x8e8] sm:$0xff] }
  0xb1   : > { %1074 = vmatpush.msra.mxu3 %v1893_v61  ;;  %996 = vmatpush.msra.mxu0 %v1797_v62  ;;  %v2564_v61 = vld [vmem:[%s2940_s1 + $0x8] sm:$0xff] }
  0xb2   : > { %1022 = vmatpush.msra.mxu1 %v1829_v48  ;;  %1050 = vmatpush.msra.mxu2 %v1857_v0  ;;  %v1838_v62 = vld [vmem:[%s2103_s17 + $0x9e8] sm:$0xff] }
  0xb3   : > { %1075 = vmatpush.msra.mxu3 %v1891_v1  ;;  %826 = vmatmul.f32.gmra.mxu2 %v2275_v63  ;;  %v1823_v63 = vld [vmem:[%s2103_s17 + $0x970] sm:$0xff]  ;;  %v1866_v48 = vld [vmem:[%s2103_s17 + $0xac8] sm:$0xff]  ;;  %v1900_v1 = vld [vmem:[%s2103_s17 + $0xbd8] sm:$0xff] }
  0xb4   : > { %997 = vmatpush.msra.mxu0 %v1795_v2  ;;  %1023 = vmatpush.msra.mxu1 %v1827_v53  ;;  %v1804_v53 = vld [vmem:[%s2103_s17 + $0x8d8] sm:$0xff] }
  0xb5   : > { %1051 = vmatpush.msra.mxu2 %v1855_v3  ;;  %1076 = vmatpush.msra.mxu3 %v1889_v4  ;;  %v1836_v3 = vld [vmem:[%s2103_s17 + $0x9d8] sm:$0xff] }
  0xb6   : > { %852 = vmatmul.f32.gmra.mxu3 %v2286_v5  ;;  %998 = vmatpush.msra.mxu0 %v1793_v54  ;;  %v1821_v5 = vld [vmem:[%s2103_s17 + $0x960] sm:$0xff]  ;;  %v1864_v54 = vld [vmem:[%s2103_s17 + $0xab8] sm:$0xff] }
  0xb7   : > { %1024 = vmatpush.msra.mxu1 %v1825_v6  ;;  %1052 = vmatpush.msra.mxu2 %v1853_v7  ;;  %v1898_v6 = vld [vmem:[%s2103_s17 + $0xbc8] sm:$0xff]  ;;  %v2579_v7 = vld [vmem:[%s2940_s1 + $0x30] sm:$0xff] }
  0xb8   : > { %1077 = vmatpush.msra.mxu3 %v1887_v8  ;;  %774 = vmatmul.f32.gmra.mxu0 %v2297_v11  ;;  %v1819_v11 = vld [vmem:[%s2103_s17 + $0x950] sm:$0xff]  ;;  %v1802_v8 = vld [vmem:[%s2103_s17 + $0x8c8] sm:$0xff] }
  0xb9   : > { %800 = vmatmul.f32.gmra.mxu1 %v2302_v12  ;;  %999 = vmatpush.msra.mxu0 %v1791_v9  ;;  %v1881_v12 = vld [vmem:[%s2103_s17 + $0xb40] sm:$0xff]  ;;  %v1834_v9 = vld [vmem:[%s2103_s17 + $0x9c8] sm:$0xff] }
  0xba   : > { %1025 = vmatpush.msra.mxu1 %v1823_v63  ;;  %1053 = vmatpush.msra.mxu2 %v1851_v10  ;;  %v1862_v63 = vld [vmem:[%s2103_s17 + $0xaa8] sm:$0xff]  ;;  %v1896_v10 = vld [vmem:[%s2103_s17 + $0xbb8] sm:$0xff] }
  0xbb   : > { %1078 = vmatpush.msra.mxu3 %v1885_v13  ;;  %1000 = vmatpush.msra.mxu0 %v1789_v14  ;;  %v2589_v13 = vld [vmem:[%s2940_s1 + $0x38] sm:$0xff] }
  0xbc   : > { %1026 = vmatpush.msra.mxu1 %v1821_v5  ;;  %1054 = vmatpush.msra.mxu2 %v1849_v15  ;;  %v1800_v14 = vld [vmem:[%s2103_s17 + $0x8b8] sm:$0xff] }
  0xbd   : > { %1079 = vmatpush.msra.mxu3 %v1883_v16  ;;  %1001 = vmatpush.msra.mxu0 %v1787_v17  ;;  %v328_v25 = vpop.f32.mrf.mxu0  ;;  %v1832_v5 = vld [vmem:[%s2103_s17 + $0x9b8] sm:$0xff] }
  0xbe   : > { %1027 = vmatpush.msra.mxu1 %v1819_v11  ;;  %1055 = vmatpush.msra.mxu2 %v1847_v18  ;;  %v354_v26 = vpop.f32.mrf.mxu1  ;;  %v1860_v15 = vld [vmem:[%s2103_s17 + $0xa98] sm:$0xff]  ;;  %v2598_v11 = vld [vmem:[%s2940_s1 + $0x20] sm:$0xff]  ;;  %v1894_v18 = vld [vmem:[%s2103_s17 + $0xba8] sm:$0xff] }
  0xbf   : > { %1080 = vmatpush.msra.mxu3 %v1881_v12  ;;  %1002 = vmatpush.msra.mxu0 %v1785_v19  ;;  %v355_v30 = vadd.f32 %v354_v26, %v328_v25  ;;  %v380_v37 = vpop.f32.mrf.mxu2  ;;  %v1798_v12 = vld [vmem:[%s2103_s17 + $0x8a8] sm:$0xff]  ;;  %v1892_v25 = vld [vmem:[%s2103_s17 + $0xb98] sm:$0xff] }
  0xc0   : > { %1028 = vmatpush.msra.mxu1 %v1817_v20  ;;  %1056 = vmatpush.msra.mxu2 %v1845_v21  ;;  %v2606_v21 = vld [vmem:[%s2940_s1 + $0x28] sm:$0xff] }
  0xc1   : > { %1081 = vmatpush.msra.mxu3 %v1879_v22  ;;  %1003 = vmatpush.msra.mxu0 %v1783_v23  ;;  %v381_v39 = vadd.f32 %v380_v37, %v355_v30  ;;  %v406_v42 = vpop.f32.mrf.mxu3  ;;  %v1830_v22 = vld [vmem:[%s2103_s17 + $0x9a8] sm:$0xff] }
  0xc2   : > { %1029 = vmatpush.msra.mxu1 %v1815_v27  ;;  %1057 = vmatpush.msra.mxu2 %v1843_v29  ;;  %v1858_v23 = vld [vmem:[%s2103_s17 + $0xa88] sm:$0xff]  ;;  %v1796_v27 = vld [vmem:[%s2103_s17 + $0x898] sm:$0xff] }
  0xc3   : > { %1082 = vmatpush.msra.mxu3 %v1877_v31  ;;  %1004 = vmatpush.msra.mxu0 %v1781_v32  ;;  %v2532_v45 = vadd.f32 %v406_v42, %v381_v39  ;;  %v1828_v29 = vld [vmem:[%s2103_s17 + $0x998] sm:$0xff]  ;;  %v1890_v32 = vld [vmem:[%s2103_s17 + $0xb88] sm:$0xff] }
  0xc4   : > { %1030 = vmatpush.msra.mxu1 %v1813_v35  ;;  %1058 = vmatpush.msra.mxu2 %v1841_v36  ;;  %v1856_v31 = vld [vmem:[%s2103_s17 + $0xa78] sm:$0xff]  ;;  %v2621_v36 = vld [vmem:[%s2940_s1 + $0x50] sm:$0xf]  ;;  %v1794_v37 = vld [vmem:[%s2103_s17 + $0x888] sm:$0xff] }
  0xc5   : > { %1083 = vmatpush.msra.mxu3 %v1875_v38  ;;  %1059 = vmatmul.f32.vlgmr.msra.gmra.mxu2 %v2537_v46  ;;  %v1826_v38 = vld [vmem:[%s2103_s17 + $0x988] sm:$0xff]  ;;  %v1792_v42 = vld [vmem:[%s2103_s17 + $0x878] sm:$0xff] }
  0xc6   : > { %1147 = vmatpush.msrb.mxu2 %v1872_v40  ;;  %1005 = vmatpush.msra.mxu0 %v1779_v41  ;;  %v1854_v39 = vld [vmem:[%s2103_s17 + $0xa68] sm:$0xff]  ;;  %v1888_v40 = vld [vmem:[%s2103_s17 + $0xb78] sm:$0xff] }
  0xc7   : > { %1031 = vmatpush.msra.mxu1 %v1811_v44  ;;  %1084 = vmatpush.msra.mxu3 %v1873_v24  ;;  %v331_v52 = vpop.f32.mrf.mxu0  ;;  %v2631_v41 = vld [vmem:[%s2940_s1 + $0x58] sm:$0xf] }
  0xc8   : > { %1085 = vmatmul.f32.vlgmr.msra.gmra.mxu3 %v2547_v51  ;;  %1148 = vmatpush.msrb.mxu2 %v1870_v47  ;;  %v357_v55 = vpop.f32.mrf.mxu1  ;;  %v383_v60 = vpop.f32.mrf.mxu2  ;;  %v1824_v44 = vld [vmem:[%s2103_s17 + $0x978] sm:$0xff] }
  0xc9   : > { %1173 = vmatpush.msrb.mxu3 %v1904_v28  ;;  %1006 = vmatpush.msra.mxu0 %v1777_v49  ;;  %v358_v57 = vadd.f32 %v357_v55, %v331_v52  ;;  %v1852_v24 = vld [vmem:[%s2103_s17 + $0xa58] sm:$0xff]  ;;  %v2640_v28 = vld [vmem:[%s2940_s1 + $0x40] sm:$0xf]  ;;  %v1886_v49 = vld [vmem:[%s2103_s17 + $0xb68] sm:$0xff] }
  0xca   : > { %1032 = vmatpush.msra.mxu1 %v1809_v50  ;;  %1007 = vmatmul.f32.vlgmr.msra.gmra.mxu0 %v2556_v58  ;;  %v1790_v50 = vld [vmem:[%s2103_s17 + $0x868] sm:$0xff] }
  0xcb   : > { %1033 = vmatmul.f32.vlgmr.msra.gmra.mxu1 %v2564_v61  ;;  %1095 = vmatpush.msrb.mxu0 %v1808_v33  ;;  %v384_v0 = vadd.f32 %v383_v60, %v358_v57  ;;  %v409_v2 = vpop.f32.mrf.mxu3  ;;  %v2648_v55 = vld [vmem:[%s2940_s1 + $0x48] sm:$0xf]  ;;  %v1820_v60 = vld [vmem:[%s2103_s17 + $0x958] sm:$0xff] }
  0xcc   : > { %1121 = vmatpush.msrb.mxu1 %v1840_v34  ;;  %1149 = vmatpush.msrb.mxu2 %v1868_v56  ;;  %v1822_v34 = vld [vmem:[%s2103_s17 + $0x968] sm:$0xff] }
  0xcd   : > { %1174 = vmatpush.msrb.mxu3 %v1902_v59  ;;  %1096 = vmatpush.msrb.mxu0 %v1806_v43  ;;  %v2572_v4 = vadd.f32 %v409_v2, %v384_v0  ;;  %v1850_v56 = vld [vmem:[%s2103_s17 + $0xa48] sm:$0xff]  ;;  %v1884_v59 = vld [vmem:[%s2103_s17 + $0xb58] sm:$0xff] }
  0xce   : > { %1122 = vmatpush.msrb.mxu1 %v1838_v62  ;;  %1150 = vmatpush.msrb.mxu2 %v1866_v48  ;;  %v1788_v43 = vld [vmem:[%s2103_s17 + $0x858] sm:$0xff]  ;;  %v1786_v2 = vld [vmem:[%s2103_s17 + $0x848] sm:$0xff] }
  0xcf   : > { %1175 = vmatpush.msrb.mxu3 %v1900_v1  ;;  %1062 = vmatmul.f32.gmra.mxu2 %v2579_v7  ;;  %v1848_v62 = vld [vmem:[%s2103_s17 + $0xa38] sm:$0xff]  ;;  %v1882_v1 = vld [vmem:[%s2103_s17 + $0xb48] sm:$0xff] }
  0xd0   : > { %1097 = vmatpush.msrb.mxu0 %v1804_v53  ;;  %1123 = vmatpush.msrb.mxu1 %v1836_v3  ;;  %v1818_v53 = vld [vmem:[%s2103_s17 + $0x948] sm:$0xff] }
  0xd1   : > { %1151 = vmatpush.msrb.mxu2 %v1864_v54  ;;  %1176 = vmatpush.msrb.mxu3 %v1898_v6  ;;  %v334_v16 = vpop.f32.mrf.mxu0  ;;  %v1846_v3 = vld [vmem:[%s2103_s17 + $0xa28] sm:$0xff]  ;;  %v1880_v6 = vld [vmem:[%s2103_s17 + $0xb38] sm:$0xff] }
  0xd2   : > { %1088 = vmatmul.f32.gmra.mxu3 %v2589_v13  ;;  %1098 = vmatpush.msrb.mxu0 %v1802_v8  ;;  %v360_v17 = vpop.f32.mrf.mxu1  ;;  %v386_v20 = vpop.f32.mrf.mxu2  ;;  %v1784_v8 = vld [vmem:[%s2103_s17 + $0x838] sm:$0xff] }
  0xd3   : > { %1124 = vmatpush.msrb.mxu1 %v1834_v9  ;;  %1152 = vmatpush.msrb.mxu2 %v1862_v63  ;;  %v361_v19 = vadd.f32 %v360_v17, %v334_v16  ;;  %v1816_v9 = vld [vmem:[%s2103_s17 + $0x938] sm:$0xff] }
  0xd4   : > { %1177 = vmatpush.msrb.mxu3 %v1896_v10  ;;  %1010 = vmatmul.f32.gmra.mxu0 %v2598_v11  ;;  %v1844_v63 = vld [vmem:[%s2103_s17 + $0xa18] sm:$0xff]  ;;  %v1878_v10 = vld [vmem:[%s2103_s17 + $0xb28] sm:$0xff] }
  0xd5   : > { %1036 = vmatmul.f32.gmra.mxu1 %v2606_v21  ;;  %1099 = vmatpush.msrb.mxu0 %v1800_v14  ;;  %v387_v26 = vadd.f32 %v386_v20, %v361_v19  ;;  %v412_v30 = vpop.f32.mrf.mxu3  ;;  %v1782_v14 = vld [vmem:[%s2103_s17 + $0x828] sm:$0xff]  ;;  %v1876_v17 = vld [vmem:[%s2103_s17 + $0xb18] sm:$0xff]  ;;  %v1999_v19 = vld [vmem:[%s2103_s17 + $0xef0] sm:$0xff] }
  0xd6   : > { %1125 = vmatpush.msrb.mxu1 %v1832_v5  ;;  %1153 = vmatpush.msrb.mxu2 %v1860_v15  ;;  %v1814_v5 = vld [vmem:[%s2103_s17 + $0x928] sm:$0xff]  ;;  %v1780_v20 = vld [vmem:[%s2103_s17 + $0x818] sm:$0xff] }
  0xd7   : > { %1178 = vmatpush.msrb.mxu3 %v1894_v18  ;;  %1100 = vmatpush.msrb.mxu0 %v1798_v12  ;;  %v2616_v35 = vadd.f32 %v412_v30, %v387_v26  ;;  %v1842_v15 = vld [vmem:[%s2103_s17 + $0xa08] sm:$0xff]  ;;  %v1997_v26 = vld [vmem:[%s2103_s17 + $0xee0] sm:$0xff]  ;;  %v2031_v30 = vld [vmem:[%s2103_s17 + $0xff0] sm:$0xff] }
  0xd8   : > { %1126 = vmatpush.msrb.mxu1 %v1830_v22  ;;  %1154 = vmatpush.msrb.mxu2 %v1858_v23  ;;  %v1812_v23 = vld [vmem:[%s2103_s17 + $0x918] sm:$0xff] }
  0xd9   : > { %1179 = vmatpush.msrb.mxu3 %v1892_v25  ;;  %1065 = vmatmul.f32.gmra.mxu2 %v2621_v36  ;;  %v1874_v25 = vld [vmem:[%s2103_s17 + $0xb08] sm:$0xff] }
  0xda   : > { %1101 = vmatpush.msrb.mxu0 %v1796_v27  ;;  %1127 = vmatpush.msrb.mxu1 %v1828_v29 }
  0xdb   : > { %1155 = vmatpush.msrb.mxu2 %v1856_v31  ;;  %1180 = vmatpush.msrb.mxu3 %v1890_v32  ;;  %v1778_v31 = vld [vmem:[%s2103_s17 + $0x808] sm:$0xff] }
  0xdc   : > { %1091 = vmatmul.f32.gmra.mxu3 %v2631_v41  ;;  %1102 = vmatpush.msrb.mxu0 %v1794_v37  ;;  %v1810_v32 = vld [vmem:[%s2103_s17 + $0x908] sm:$0xff] }
  0xdd   : > { %1128 = vmatpush.msrb.mxu1 %v1826_v38  ;;  %1156 = vmatpush.msrb.mxu2 %v1854_v39  ;;  %v432_v47 = vpop.f32.mrf.mxu0  ;;  %v1935_v38 = vld [vmem:[%s2103_s17 + $0xcf0] sm:$0xff] }
  0xde   : > { %1181 = vmatpush.msrb.mxu3 %v1888_v40  ;;  %1013 = vmatmul.f32.gmra.mxu0 %v2640_v28  ;;  %v458_v33 = vpop.f32.mrf.mxu1  ;;  %v484_v52 = vpop.f32.mrf.mxu2  ;;  %v1967_v39 = vld [vmem:[%s2103_s17 + $0xdf0] sm:$0xff] }
  0xdf   : > { %1039 = vmatmul.f32.gmra.mxu1 %v2648_v55  ;;  %1103 = vmatpush.msrb.mxu0 %v1792_v42  ;;  %v459_v57 = vadd.f32 %v458_v33, %v432_v47  ;;  %v1995_v40 = vld [vmem:[%s2103_s17 + $0xed0] sm:$0xff]  ;;  %v2029_v42 = vld [vmem:[%s2103_s17 + $0xfe0] sm:$0xff] }
  0xe0   : > { %1129 = vmatpush.msrb.mxu1 %v1824_v44  ;;  %1157 = vmatpush.msrb.mxu2 %v1852_v24  ;;  %v1933_v44 = vld [vmem:[%s2103_s17 + $0xce0] sm:$0xff] }
  0xe1   : > { %1182 = vmatpush.msrb.mxu3 %v1886_v49  ;;  %1104 = vmatpush.msrb.mxu0 %v1790_v50  ;;  %v485_v48 = vadd.f32 %v484_v52, %v459_v57  ;;  %v510_v0 = vpop.f32.mrf.mxu3  ;;  %v1965_v24 = vld [vmem:[%s2103_s17 + $0xde0] sm:$0xff]  ;;  %v2027_v50 = vld [vmem:[%s2103_s17 + $0xfd0] sm:$0xff] }
  0xe2   : > { %1130 = vmatpush.msrb.mxu1 %v1822_v34  ;;  %1158 = vmatpush.msrb.mxu2 %v1850_v56  ;;  %v1993_v47 = vld [vmem:[%s2103_s17 + $0xec0] sm:$0xff]  ;;  %v1931_v34 = vld [vmem:[%s2103_s17 + $0xcd0] sm:$0xff] }
  0xe3   : > { %1183 = vmatpush.msrb.mxu3 %v1884_v59  ;;  %1105 = vmatpush.msrb.mxu0 %v1788_v43  ;;  %v2661_v54 = vadd.f32 %v510_v0, %v485_v48  ;;  %v1963_v56 = vld [vmem:[%s2103_s17 + $0xdd0] sm:$0xff]  ;;  %v2025_v43 = vld [vmem:[%s2103_s17 + $0xfc0] sm:$0xff] }
  0xe4   : > { %1131 = vmatpush.msrb.mxu1 %v1820_v60  ;;  %1159 = vmatpush.msrb.mxu2 %v1848_v62  ;;  %v1991_v59 = vld [vmem:[%s2103_s17 + $0xeb0] sm:$0xff]  ;;  %v1929_v60 = vld [vmem:[%s2103_s17 + $0xcc0] sm:$0xff] }
  0xe5   : > { %1184 = vmatpush.msrb.mxu3 %v1882_v1  ;;  %1106 = vmatpush.msrb.mxu0 %v1786_v2  ;;  %v1961_v0 = vld [vmem:[%s2103_s17 + $0xdc0] sm:$0xff]  ;;  %v2023_v2 = vld [vmem:[%s2103_s17 + $0xfb0] sm:$0xff] }
  0xe6   : > { %1132 = vmatpush.msrb.mxu1 %v1818_v53  ;;  %1160 = vmatpush.msrb.mxu2 %v1846_v3  ;;  %v1989_v1 = vld [vmem:[%s2103_s17 + $0xea0] sm:$0xff]  ;;  %v1927_v3 = vld [vmem:[%s2103_s17 + $0xcb0] sm:$0xff] }
  0xe7   : > { %1185 = vmatpush.msrb.mxu3 %v1880_v6  ;;  %1107 = vmatpush.msrb.mxu0 %v1784_v8  ;;  %v435_v16 = vpop.f32.mrf.mxu0  ;;  %v1959_v6 = vld [vmem:[%s2103_s17 + $0xdb0] sm:$0xff] }
  0xe8   : > { %1133 = vmatpush.msrb.mxu1 %v1816_v9  ;;  %1161 = vmatpush.msrb.mxu2 %v1844_v63  ;;  %v461_v18 = vpop.f32.mrf.mxu1  ;;  %v487_v12 = vpop.f32.mrf.mxu2  ;;  %v1987_v8 = vld [vmem:[%s2103_s17 + $0xe90] sm:$0xff]  ;;  %v2021_v9 = vld [vmem:[%s2103_s17 + $0xfa0] sm:$0xff] }
  0xe9   : > { %1186 = vmatpush.msrb.mxu3 %v1878_v10  ;;  %1108 = vmatpush.msrb.mxu0 %v1782_v14  ;;  %v462_v22 = vadd.f32 %v461_v18, %v435_v16  ;;  %v1925_v63 = vld [vmem:[%s2103_s17 + $0xca0] sm:$0xff]  ;;  %v1923_v18 = vld [vmem:[%s2103_s17 + $0xc90] sm:$0xff] }
  0xea   : > { %1134 = vmatpush.msrb.mxu1 %v1814_v5  ;;  %1162 = vmatpush.msrb.mxu2 %v1842_v15  ;;  %v1957_v10 = vld [vmem:[%s2103_s17 + $0xda0] sm:$0xff]  ;;  %v2019_v15 = vld [vmem:[%s2103_s17 + $0xf90] sm:$0xff] }
  0xeb   : > { %1187 = vmatpush.msrb.mxu3 %v1876_v17  ;;  %1163 = vmatmul.f32.vlgmr.msrb.gmra.mxu2 %v2537_v46  ;;  %v488_v27 = vadd.f32 %v487_v12, %v462_v22  ;;  %v513_v29 = vpop.f32.mrf.mxu3  ;;  %v1985_v14 = vld [vmem:[%s2103_s17 + $0xe80] sm:$0xff]  ;;  %v1955_v12 = vld [vmem:[%s2103_s17 + $0xd90] sm:$0xff] }
  0xec   : > { %1386 = vmatpush.msra.mxu2 %v1999_v19  ;;  %1109 = vmatpush.msrb.mxu0 %v1780_v20  ;;  %v1983_v20 = vld [vmem:[%s2103_s17 + $0xe70] sm:$0xff]  ;;  %v2017_v22 = vld [vmem:[%s2103_s17 + $0xf80] sm:$0xff] }
  0xed   : > { %1135 = vmatpush.msrb.mxu1 %v1812_v23  ;;  %1188 = vmatpush.msrb.mxu3 %v1874_v25  ;;  %v2681_v37 = vadd.f32 %v513_v29, %v488_v27  ;;  %v1921_v23 = vld [vmem:[%s2103_s17 + $0xc80] sm:$0xff] }
  0xee   : > { %1189 = vmatmul.f32.vlgmr.msrb.gmra.mxu3 %v2547_v51  ;;  %1387 = vmatpush.msra.mxu2 %v1997_v26  ;;  %v1953_v27 = vld [vmem:[%s2103_s17 + $0xd80] sm:$0xff] }
  0xef   : > { %1412 = vmatpush.msra.mxu3 %v2031_v30  ;;  %1110 = vmatpush.msrb.mxu0 %v1778_v31  ;;  %v1981_v29 = vld [vmem:[%s2103_s17 + $0xe60] sm:$0xff]  ;;  %v2015_v30 = vld [vmem:[%s2103_s17 + $0xf70] sm:$0xff] }
  0xf0   : > { %1136 = vmatpush.msrb.mxu1 %v1810_v32  ;;  %1111 = vmatmul.f32.vlgmr.msrb.gmra.mxu0 %v2556_v58  ;;  %v1919_v32 = vld [vmem:[%s2103_s17 + $0xc70] sm:$0xff] }
  0xf1   : > { %1137 = vmatmul.f32.vlgmr.msrb.gmra.mxu1 %v2564_v61  ;;  %1334 = vmatpush.msra.mxu0 %v1935_v38  ;;  %v438_v49 = vpop.f32.mrf.mxu0  ;;  %v1951_v38 = vld [vmem:[%s2103_s17 + $0xd70] sm:$0xff] }
  0xf2   : > { %1360 = vmatpush.msra.mxu1 %v1967_v39  ;;  %1388 = vmatpush.msra.mxu2 %v1995_v40  ;;  %v464_v33 = vpop.f32.mrf.mxu1  ;;  %v490_v52 = vpop.f32.mrf.mxu2  ;;  %v1979_v39 = vld [vmem:[%s2103_s17 + $0xe50] sm:$0xff] }
  0xf3   : > { %1413 = vmatpush.msra.mxu3 %v2029_v42  ;;  %1335 = vmatpush.msra.mxu0 %v1933_v44  ;;  %v465_v57 = vadd.f32 %v464_v33, %v438_v49  ;;  %v2013_v42 = vld [vmem:[%s2103_s17 + $0xf60] sm:$0xff]  ;;  %v1915_v33 = vld [vmem:[%s2103_s17 + $0xc50] sm:$0xff] }
  0xf4   : > { %1361 = vmatpush.msra.mxu1 %v1965_v24  ;;  %1389 = vmatpush.msra.mxu2 %v1993_v47  ;;  %v1917_v44 = vld [vmem:[%s2103_s17 + $0xc60] sm:$0xff] }
  0xf5   : > { %1414 = vmatpush.msra.mxu3 %v2027_v50  ;;  %1166 = vmatmul.f32.gmra.mxu2 %v2579_v7  ;;  %v491_v62 = vadd.f32 %v490_v52, %v465_v57  ;;  %v516_v48 = vpop.f32.mrf.mxu3  ;;  %v1949_v24 = vld [vmem:[%s2103_s17 + $0xd60] sm:$0xff]  ;;  %v2011_v50 = vld [vmem:[%s2103_s17 + $0xf50] sm:$0xff] }
  0xf6   : > { %1336 = vmatpush.msra.mxu0 %v1931_v34  ;;  %1362 = vmatpush.msra.mxu1 %v1963_v56  ;;  %v1977_v47 = vld [vmem:[%s2103_s17 + $0xe40] sm:$0xff]  ;;  %v1947_v56 = vld [vmem:[%s2103_s17 + $0xd50] sm:$0xff] }
  0xf7   : > { %1390 = vmatpush.msra.mxu2 %v1991_v59  ;;  %1415 = vmatpush.msra.mxu3 %v2025_v43  ;;  %v2703_v53 = vadd.f32 %v516_v48, %v491_v62  ;;  %v1975_v57 = vld [vmem:[%s2103_s17 + $0xe30] sm:$0xff]  ;;  %v2009_v43 = vld [vmem:[%s2103_s17 + $0xf40] sm:$0xff] }
  0xf8   : > { %1192 = vmatmul.f32.gmra.mxu3 %v2589_v13  ;;  %1337 = vmatpush.msra.mxu0 %v1929_v60  ;;  %v1913_v60 = vld [vmem:[%s2103_s17 + $0xc40] sm:$0xff] }
  0xf9   : > { %1363 = vmatpush.msra.mxu1 %v1961_v0  ;;  %1391 = vmatpush.msra.mxu2 %v1989_v1  ;;  %v1945_v62 = vld [vmem:[%s2103_s17 + $0xd40] sm:$0xff] }
  0xfa   : > { %1416 = vmatpush.msra.mxu3 %v2023_v2  ;;  %1114 = vmatmul.f32.gmra.mxu0 %v2598_v11  ;;  %v1973_v48 = vld [vmem:[%s2103_s17 + $0xe20] sm:$0xff]  ;;  %v2007_v2 = vld [vmem:[%s2103_s17 + $0xf30] sm:$0xff] }
  0xfb   : > { %1140 = vmatmul.f32.gmra.mxu1 %v2606_v21  ;;  %1338 = vmatpush.msra.mxu0 %v1927_v3  ;;  %v665_v5 = vpop.f32.mrf.mxu0  ;;  %v1911_v3 = vld [vmem:[%s2103_s17 + $0xc30] sm:$0xff] }
  0xfc   : > { %1364 = vmatpush.msra.mxu1 %v1959_v6  ;;  %1392 = vmatpush.msra.mxu2 %v1987_v8  ;;  %v691_v16 = vpop.f32.mrf.mxu1  ;;  %v717_v17 = vpop.f32.mrf.mxu2  ;;  %v1943_v6 = vld [vmem:[%s2103_s17 + $0xd30] sm:$0xff] }
  0xfd   : > { %1417 = vmatpush.msra.mxu3 %v2021_v9  ;;  %1339 = vmatpush.msra.mxu0 %v1925_v63  ;;  %v692_v19 = vadd.f32 %v691_v16, %v665_v5  ;;  %v1971_v8 = vld [vmem:[%s2103_s17 + $0xe10] sm:$0xff]  ;;  %v2005_v63 = vld [vmem:[%s2103_s17 + $0xf20] sm:$0xff] }
  0xfe   : > { %1365 = vmatpush.msra.mxu1 %v1957_v10  ;;  %1393 = vmatpush.msra.mxu2 %v1985_v14  ;;  %v1909_v10 = vld [vmem:[%s2103_s17 + $0xc20] sm:$0xff]  ;;  %v2003_v16 = vld [vmem:[%s2103_s17 + $0xf10] sm:$0xff] }
  0xff   : > { %1418 = vmatpush.msra.mxu3 %v2019_v15  ;;  %1169 = vmatmul.f32.gmra.mxu2 %v2621_v36  ;;  %v718_v25 = vadd.f32 %v717_v17, %v692_v19  ;;  %v743_v26 = vpop.f32.mrf.mxu3  ;;  %v1941_v14 = vld [vmem:[%s2103_s17 + $0xd20] sm:$0xff]  ;;  %v2000_v17 = vld [vmem:[%s2103_s17 + $0xef8] sm:$0xff]  ;;  %v1939_v19 = vld [vmem:[%s2103_s17 + $0xd10] sm:$0xff] }
 0x100   : > { %1340 = vmatpush.msra.mxu0 %v1923_v18  ;;  %1366 = vmatpush.msra.mxu1 %v1955_v12  ;;  %v1969_v5 = vld [vmem:[%s2103_s17 + $0xe00] sm:$0xff]  ;;  %v1907_v18 = vld [vmem:[%s2103_s17 + $0xc10] sm:$0xff] }
 0x101   : > { %1394 = vmatpush.msra.mxu2 %v1983_v20  ;;  %1419 = vmatpush.msra.mxu3 %v2017_v22  ;;  %v2725_v31 = vadd.f32 %v743_v26, %v718_v25  ;;  %v2001_v20 = vld [vmem:[%s2103_s17 + $0xf00] sm:$0xff]  ;;  %v1998_v25 = vld [vmem:[%s2103_s17 + $0xee8] sm:$0xff] }
 0x102   : > { %1195 = vmatmul.f32.gmra.mxu3 %v2631_v41  ;;  %1341 = vmatpush.msra.mxu0 %v1921_v23 }
 0x103   : > { %1367 = vmatpush.msra.mxu1 %v1953_v27  ;;  %1395 = vmatpush.msra.mxu2 %v1981_v29  ;;  %v856_v40 = vmax.f32 %v2532_v45, %v2725_v31  ;;  %v2032_v27 = vld [vmem:[%s2103_s17 + $0xff8] sm:$0xff]  ;;  %v1905_v29 = vld [vmem:[%s2103_s17 + $0xc00] sm:$0xff] }
 0x104   : > { %1420 = vmatpush.msra.mxu3 %v2015_v30  ;;  %1117 = vmatmul.f32.gmra.mxu0 %v2640_v28  ;;  %v1937_v30 = vld [vmem:[%s2103_s17 + $0xd00] sm:$0xff] }
 0x105   : > { %1143 = vmatmul.f32.gmra.mxu1 %v2648_v55  ;;  %1342 = vmatpush.msra.mxu0 %v1919_v32  ;;  %v668_v49 = vpop.f32.mrf.mxu0 }
 0x106   : > { %1368 = vmatpush.msra.mxu1 %v1951_v38  ;;  %1396 = vmatpush.msra.mxu2 %v1979_v39  ;;  %v694_v52 = vpop.f32.mrf.mxu1  ;;  %v720_v34 = vpop.f32.mrf.mxu2  ;;  %v1936_v39 = vld [vmem:[%s2103_s17 + $0xcf8] sm:$0xff] }
 0x107   : > { %1421 = vmatpush.msra.mxu3 %v2013_v42  ;;  %1343 = vmatpush.msra.mxu0 %v1917_v44  ;;  %v695_v59 = vadd.f32 %v694_v52, %v668_v49  ;;  %v1968_v42 = vld [vmem:[%s2103_s17 + $0xdf8] sm:$0xff]  ;;  %v1934_v49 = vld [vmem:[%s2103_s17 + $0xce8] sm:$0xff] }
 0x108   : > { %1369 = vmatpush.msra.mxu1 %v1949_v24  ;;  %1397 = vmatpush.msra.mxu2 %v1977_v47  ;;  %v1996_v44 = vld [vmem:[%s2103_s17 + $0xed8] sm:$0xff]  ;;  %v2030_v47 = vld [vmem:[%s2103_s17 + $0xfe8] sm:$0xff] }
 0x109   : > { %1422 = vmatpush.msra.mxu3 %v2011_v50  ;;  %1344 = vmatpush.msra.mxu0 %v1915_v33  ;;  %v721_v0 = vadd.f32 %v720_v34, %v695_v59  ;;  %v746_v1 = vpop.f32.mrf.mxu3  ;;  %v1966_v50 = vld [vmem:[%s2103_s17 + $0xde8] sm:$0xff]  ;;  %v2028_v34 = vld [vmem:[%s2103_s17 + $0xfd8] sm:$0xff] }
 0x10a   : > { %1370 = vmatpush.msra.mxu1 %v1947_v56  ;;  %1398 = vmatpush.msra.mxu2 %v1975_v57  ;;  %v1994_v33 = vld [vmem:[%s2103_s17 + $0xec8] sm:$0xff]  ;;  %v1932_v56 = vld [vmem:[%s2103_s17 + $0xcd8] sm:$0xff] }
 0x10b   : > { %1423 = vmatpush.msra.mxu3 %v2009_v43  ;;  %1345 = vmatpush.msra.mxu0 %v1913_v60  ;;  %v2751_v9 = vadd.f32 %v746_v1, %v721_v0  ;;  %v1964_v57 = vld [vmem:[%s2103_s17 + $0xdd8] sm:$0xff]  ;;  %v2026_v43 = vld [vmem:[%s2103_s17 + $0xfc8] sm:$0xff] }
 0x10c   : > { %1371 = vmatpush.msra.mxu1 %v1945_v62  ;;  %1399 = vmatpush.msra.mxu2 %v1973_v48  ;;  %v1992_v59 = vld [vmem:[%s2103_s17 + $0xeb8] sm:$0xff]  ;;  %v1930_v60 = vld [vmem:[%s2103_s17 + $0xcc8] sm:$0xff] }
 0x10d   : > { %1424 = vmatpush.msra.mxu3 %v2007_v2  ;;  %1346 = vmatpush.msra.mxu0 %v1911_v3  ;;  %v858_v15 = vmax.f32 %v2572_v4, %v2751_v9  ;;  %v1962_v62 = vld [vmem:[%s2103_s17 + $0xdc8] sm:$0xff]  ;;  %v2024_v0 = vld [vmem:[%s2103_s17 + $0xfb8] sm:$0xff] }
 0x10e   : > { %1372 = vmatpush.msra.mxu1 %v1943_v6  ;;  %1400 = vmatpush.msra.mxu2 %v1971_v8  ;;  %v1990_v48 = vld [vmem:[%s2103_s17 + $0xea8] sm:$0xff]  ;;  %v1928_v1 = vld [vmem:[%s2103_s17 + $0xcb8] sm:$0xff] }
 0x10f   : > { %1425 = vmatpush.msra.mxu3 %v2005_v63  ;;  %1347 = vmatpush.msra.mxu0 %v1909_v10  ;;  %v671_v12 = vpop.f32.mrf.mxu0  ;;  %v1960_v2 = vld [vmem:[%s2103_s17 + $0xdb8] sm:$0xff]  ;;  %v2022_v6 = vld [vmem:[%s2103_s17 + $0xfa8] sm:$0xff] }
 0x110   : > { %1373 = vmatpush.msra.mxu1 %v1941_v14  ;;  %1401 = vmatpush.msra.mxu2 %v1969_v5  ;;  %v697_v22 = vpop.f32.mrf.mxu1  ;;  %v723_v23 = vpop.f32.mrf.mxu2  ;;  %v1988_v3 = vld [vmem:[%s2103_s17 + $0xe98] sm:$0xff]  ;;  %v1926_v8 = vld [vmem:[%s2103_s17 + $0xca8] sm:$0xff] }
 0x111   : > { %1426 = vmatpush.msra.mxu3 %v2003_v16  ;;  %1402 = vmatmul.f32.vlgmr.msra.gmra.mxu2 %v2537_v46  ;;  %v698_v26 = vadd.f32 %v697_v22, %v671_v12  ;;  %v1958_v63 = vld [vmem:[%s2103_s17 + $0xda8] sm:$0xff]  ;;  %v2020_v5 = vld [vmem:[%s2103_s17 + $0xf98] sm:$0xff] }
 0x112   : > { %1490 = vmatpush.msrb.mxu2 %v2000_v17  ;;  %1348 = vmatpush.msra.mxu0 %v1907_v18  ;;  %v1986_v10 = vld [vmem:[%s2103_s17 + $0xe88] sm:$0xff]  ;;  %v1924_v18 = vld [vmem:[%s2103_s17 + $0xc98] sm:$0xff] }
 0x113   : > { %1374 = vmatpush.msra.mxu1 %v1939_v19  ;;  %1427 = vmatpush.msra.mxu3 %v2001_v20  ;;  %v724_v32 = vadd.f32 %v723_v23, %v698_v26  ;;  %v749_v38 = vpop.f32.mrf.mxu3  ;;  %v1956_v12 = vld [vmem:[%s2103_s17 + $0xd98] sm:$0xff]  ;;  %v2018_v22 = vld [vmem:[%s2103_s17 + $0xf88] sm:$0xff] }
 0x114   : > { %1428 = vmatmul.f32.vlgmr.msra.gmra.mxu3 %v2547_v51  ;;  %1491 = vmatpush.msrb.mxu2 %v1998_v25  ;;  %v1984_v20 = vld [vmem:[%s2103_s17 + $0xe78] sm:$0xff]  ;;  %v1922_v23 = vld [vmem:[%s2103_s17 + $0xc88] sm:$0xff] }
 0x115   : > { %1516 = vmatpush.msrb.mxu3 %v2032_v27  ;;  %1349 = vmatpush.msra.mxu0 %v1905_v29  ;;  %v2773_v24 = vadd.f32 %v749_v38, %v724_v32  ;;  %v1954_v27 = vld [vmem:[%s2103_s17 + $0xd88] sm:$0xff]  ;;  %v1920_v38 = vld [vmem:[%s2103_s17 + $0xc78] sm:$0xff] }
 0x116   : > { %1375 = vmatpush.msra.mxu1 %v1937_v30  ;;  %1350 = vmatmul.f32.vlgmr.msra.gmra.mxu0 %v2556_v58  ;;  %v1982_v29 = vld [vmem:[%s2103_s17 + $0xe68] sm:$0xff]  ;;  %v2016_v30 = vld [vmem:[%s2103_s17 + $0xf78] sm:$0xff] }
 0x117   : > { %1376 = vmatmul.f32.vlgmr.msra.gmra.mxu1 %v2564_v61  ;;  %1438 = vmatpush.msrb.mxu0 %v1936_v39  ;;  %v860_v52 = vmax.f32 %v2616_v35, %v2773_v24  ;;  %v1952_v39 = vld [vmem:[%s2103_s17 + $0xd78] sm:$0xff] }
 0x118   : > { %1464 = vmatpush.msrb.mxu1 %v1968_v42  ;;  %1492 = vmatpush.msrb.mxu2 %v1996_v44  ;;  %v1980_v42 = vld [vmem:[%s2103_s17 + $0xe58] sm:$0xff] }
 0x119   : > { %1517 = vmatpush.msrb.mxu3 %v2030_v47  ;;  %1439 = vmatpush.msrb.mxu0 %v1934_v49  ;;  %v2014_v47 = vld [vmem:[%s2103_s17 + $0xf68] sm:$0xff] }
 0x11a   : > { %1465 = vmatpush.msrb.mxu1 %v1966_v50  ;;  %1493 = vmatpush.msrb.mxu2 %v1994_v33  ;;  %v1918_v49 = vld [vmem:[%s2103_s17 + $0xc68] sm:$0xff] }
 0x11b   : > { %1518 = vmatpush.msrb.mxu3 %v2028_v34  ;;  %1405 = vmatmul.f32.gmra.mxu2 %v2579_v7  ;;  %v1950_v50 = vld [vmem:[%s2103_s17 + $0xd68] sm:$0xff] }
 0x11c   : > { %1440 = vmatpush.msrb.mxu0 %v1932_v56  ;;  %1466 = vmatpush.msrb.mxu1 %v1964_v57  ;;  %v1978_v34 = vld [vmem:[%s2103_s17 + $0xe48] sm:$0xff]  ;;  %v2012_v56 = vld [vmem:[%s2103_s17 + $0xf58] sm:$0xff] }
 0x11d   : > { %1494 = vmatpush.msrb.mxu2 %v1992_v59  ;;  %1519 = vmatpush.msrb.mxu3 %v2026_v43  ;;  %v2068_v43 = vmov 0  }
 0x11e   : > { %1431 = vmatmul.f32.gmra.mxu3 %v2589_v13  ;;  %1441 = vmatpush.msrb.mxu0 %v1930_v60  ;;  %v1548_v60 = vld [vmem:[%s2941_s2] sm:$0xff] }
 0x11f   : > { %1467 = vmatpush.msrb.mxu1 %v1962_v62  ;;  %1495 = vmatpush.msrb.mxu2 %v1990_v48  ;;  %v1916_v62 = vld [vmem:[%s2103_s17 + $0xc58] sm:$0xff] }
 0x120   : > { %1520 = vmatpush.msrb.mxu3 %v2024_v0  ;;  %1353 = vmatmul.f32.gmra.mxu0 %v2598_v11  ;;  %v1948_v0 = vld [vmem:[%s2103_s17 + $0xd58] sm:$0xff] }
 0x121   : > { %1379 = vmatmul.f32.gmra.mxu1 %v2606_v21  ;;  %1442 = vmatpush.msrb.mxu0 %v1928_v1  ;;  %v769_v14 = vpop.f32.mrf.mxu0  ;;  %v1976_v1 = vld [vmem:[%s2103_s17 + $0xe38] sm:$0xff] }
 0x122   : > { %1468 = vmatpush.msrb.mxu1 %v1960_v2  ;;  %1496 = vmatpush.msrb.mxu2 %v1988_v3  ;;  %v795_v16 = vpop.f32.mrf.mxu1  ;;  %v821_v17 = vpop.f32.mrf.mxu2  ;;  %v2010_v2 = vld [vmem:[%s2103_s17 + $0xf48] sm:$0xff] }
 0x123   : > { %1521 = vmatpush.msrb.mxu3 %v2022_v6  ;;  %1443 = vmatpush.msrb.mxu0 %v1926_v8  ;;  %v796_v19 = vadd.f32 %v795_v16, %v769_v14  ;;  %v1914_v3 = vld [vmem:[%s2103_s17 + $0xc48] sm:$0xff]  ;;  %v2008_v14 = vld [vmem:[%s2103_s17 + $0xf38] sm:$0xff] }
 0x124   : > { %1469 = vmatpush.msrb.mxu1 %v1958_v63  ;;  %1497 = vmatpush.msrb.mxu2 %v1986_v10  ;;  %v1946_v63 = vld [vmem:[%s2103_s17 + $0xd48] sm:$0xff] }
 0x125   : > { %1522 = vmatpush.msrb.mxu3 %v2020_v5  ;;  %1408 = vmatmul.f32.gmra.mxu2 %v2621_v36  ;;  %v822_v25 = vadd.f32 %v821_v17, %v796_v19  ;;  %v847_v26 = vpop.f32.mrf.mxu3  ;;  %v1974_v10 = vld [vmem:[%s2103_s17 + $0xe28] sm:$0xff]  ;;  %v1912_v5 = vld [vmem:[%s2103_s17 + $0xc38] sm:$0xff] }
 0x126   : > { %1444 = vmatpush.msrb.mxu0 %v1924_v18  ;;  %1470 = vmatpush.msrb.mxu1 %v1956_v12  ;;  %v1944_v17 = vld [vmem:[%s2103_s17 + $0xd38] sm:$0xff]  ;;  %v2006_v12 = vld [vmem:[%s2103_s17 + $0xf28] sm:$0xff] }
 0x127   : > { %1498 = vmatpush.msrb.mxu2 %v1984_v20  ;;  %1523 = vmatpush.msrb.mxu3 %v2018_v22  ;;  %v2813_v32 = vadd.f32 %v847_v26, %v822_v25  ;;  %v1972_v18 = vld [vmem:[%s2103_s17 + $0xe18] sm:$0xff]  ;;  %v1910_v19 = vld [vmem:[%s2103_s17 + $0xc28] sm:$0xff] }
 0x128   : > { %1434 = vmatmul.f32.gmra.mxu3 %v2631_v41  ;;  %1445 = vmatpush.msrb.mxu0 %v1922_v23  ;;  %v1942_v22 = vld [vmem:[%s2103_s17 + $0xd28] sm:$0xff]  ;;  %v2004_v25 = vld [vmem:[%s2103_s17 + $0xf18] sm:$0xff] }
 0x129   : > { %1471 = vmatpush.msrb.mxu1 %v1954_v27  ;;  %1499 = vmatpush.msrb.mxu2 %v1982_v29  ;;  %v857_v44 = vmax.f32 %v2661_v54, %v2813_v32  ;;  %v1970_v23 = vld [vmem:[%s2103_s17 + $0xe08] sm:$0xff]  ;;  %v1908_v29 = vld [vmem:[%s2103_s17 + $0xc18] sm:$0xff] }
 0x12a   : > { %1524 = vmatpush.msrb.mxu3 %v2016_v30  ;;  %1356 = vmatmul.f32.gmra.mxu0 %v2640_v28  ;;  %v1549_v26 = vld [vmem:[%s2941_s2 + $0x8] sm:$0xff] }
 0x12b   : > { %1382 = vmatmul.f32.gmra.mxu1 %v2648_v55  ;;  %1446 = vmatpush.msrb.mxu0 %v1920_v38  ;;  %v772_v33 = vpop.f32.mrf.mxu0 }
 0x12c   : > { %1472 = vmatpush.msrb.mxu1 %v1952_v39  ;;  %1500 = vmatpush.msrb.mxu2 %v1980_v42  ;;  %v798_v57 = vpop.f32.mrf.mxu1  ;;  %v824_v59 = vpop.f32.mrf.mxu2  ;;  %v1940_v39 = vld [vmem:[%s2103_s17 + $0xd18] sm:$0xff]  ;;  %v2002_v42 = vld [vmem:[%s2103_s17 + $0xf08] sm:$0xff] }
 0x12d   : > { %1525 = vmatpush.msrb.mxu3 %v2014_v47  ;;  %2046 = vset.pattern.permute.xlu0 %v2068_v43  ;;  %v799_v48 = vadd.f32 %v798_v57, %v772_v33 }
 0x12e   : > { %1447 = vmatpush.msrb.mxu0 %v1918_v49  ;;  %1473 = vmatpush.msrb.mxu1 %v1950_v50  ;;  %v1906_v49 = vld [vmem:[%s2103_s17 + $0xc08] sm:$0xff] }
 0x12f   : > { %1501 = vmatpush.msrb.mxu2 %v1978_v34  ;;  %1526 = vmatpush.msrb.mxu3 %v2012_v56  ;;  %v825_v6 = vadd.f32 %v824_v59, %v799_v48  ;;  %v850_v8 = vpop.f32.mrf.mxu3  ;;  %v1938_v50 = vld [vmem:[%s2103_s17 + $0xd08] sm:$0xff]  ;;  %v1550_v56 = vld [vmem:[%s2941_s2 + $0x10] sm:$0xf]  ;;  %s2036_s17 = smul.u32 48, %s2944_s13 }
 0x130   : > { %1553 = vperm.xlu0 %2046, %v1548_v60   ;;  %1448 = vmatpush.msrb.mxu0 %v1916_v62 }
 0x131   : > { %1474 = vmatpush.msrb.mxu1 %v1948_v0  ;;  %1502 = vmatpush.msrb.mxu2 %v1976_v1  ;;  %v2841_v16 = vadd.f32 %v850_v8, %v825_v6  ;;  %s2903_s26 = scalar_lea.vmem %s2942_s3, %s2036_s17 }
 0x132   : > { %1527 = vmatpush.msrb.mxu3 %v2010_v2  ;;  %1449 = vmatpush.msrb.mxu0 %v1914_v3 }
 0x133   : > { %1475 = vmatpush.msrb.mxu1 %v1946_v63  ;;  %1503 = vmatpush.msrb.mxu2 %v1974_v10  ;;  %v859_v20 = vmax.f32 %v2681_v37, %v2841_v16 }
 0x134   : > { %1528 = vmatpush.msrb.mxu3 %v2008_v14  ;;  %1450 = vmatpush.msrb.mxu0 %v1912_v5 }
 0x135   : > { %1476 = vmatpush.msrb.mxu1 %v1944_v17  ;;  %1504 = vmatpush.msrb.mxu2 %v1972_v18  ;;  %v775_v27 = vpop.f32.mrf.mxu0 }
 0x136   : > { %1529 = vmatpush.msrb.mxu3 %v2006_v12  ;;  %1451 = vmatpush.msrb.mxu0 %v1910_v19  ;;  %v801_v30 = vpop.f32.mrf.mxu1  ;;  %v827_v38 = vpop.f32.mrf.mxu2 }
 0x137   : > { %1477 = vmatpush.msrb.mxu1 %v1942_v22  ;;  %1505 = vmatpush.msrb.mxu2 %v1970_v23  ;;  %v802_v47 = vadd.f32 %v801_v30, %v775_v27 }
 0x138   : > { %1530 = vmatpush.msrb.mxu3 %v2004_v25  ;;  %1558 = vperm.xlu0 %2046, %v1549_v26  }
 0x139   : > { %1506 = vmatmul.f32.vlgmr.msrb.gmra.mxu2 %v2537_v46  ;;  %1452 = vmatpush.msrb.mxu0 %v1908_v29  ;;  %v828_v33 = vadd.f32 %v827_v38, %v802_v47  ;;  %v853_v34 = vpop.f32.mrf.mxu3 }
 0x13a   : > { %1478 = vmatpush.msrb.mxu1 %v1940_v39  ;;  %1531 = vmatpush.msrb.mxu3 %v2002_v42 }
 0x13b   : > { %1532 = vmatmul.f32.vlgmr.msrb.gmra.mxu3 %v2547_v51  ;;  %1453 = vmatpush.msrb.mxu0 %v1906_v49  ;;  %v2865_v57 = vadd.f32 %v853_v34, %v828_v33 }
 0x13c   : > { %1479 = vmatpush.msrb.mxu1 %v1938_v50  ;;  %1454 = vmatmul.f32.vlgmr.msrb.gmra.mxu0 %v2556_v58 }
 0x13d   : > { %1480 = vmatmul.f32.vlgmr.msrb.gmra.mxu1 %v2564_v61  ;;  %2047 = vset.pattern.permute.xlu1 %v2068_v43  ;;  %v861_v46 = vmax.f32 %v2703_v53, %v2865_v57 }
 0x13e   : > { %1563 = vperm.xlu1 %2047, %v1550_v56  }
 0x141   : > { %1509 = vmatmul.f32.gmra.mxu2 %v2579_v7 }
 0x143   : > { %1535 = vmatmul.f32.gmra.mxu3 %v2589_v13 }
 0x144   : > { %1457 = vmatmul.f32.gmra.mxu0 %v2598_v11 }
 0x145   : > { %1483 = vmatmul.f32.gmra.mxu1 %v2606_v21 }
 0x147   : > { %v1008_v51 = vpop.f32.mrf.mxu0 }
 0x148   : > { %v1034_v58 = vpop.f32.mrf.mxu1  ;;  %v1060_v61 = vpop.f32.mrf.mxu2 }
 0x149   : > { %1512 = vmatmul.f32.gmra.mxu2 %v2621_v36  ;;  %v1035_v14 = vadd.f32 %v1034_v58, %v1008_v51 }
 0x14b   : > { %1538 = vmatmul.f32.gmra.mxu3 %v2631_v41  ;;  %v1086_v59 = vpop.f32.mrf.mxu3  ;;  %v1061_v12 = vadd.f32 %v1060_v61, %v1035_v14 }
 0x14c   : > { %1460 = vmatmul.f32.gmra.mxu0 %v2640_v28 }
 0x14d   : > { %1486 = vmatmul.f32.gmra.mxu1 %v2648_v55  ;;  %v1087_v25 = vadd.f32 %v1086_v59, %v1061_v12 }
 0x14f   : > { %v1199_v29 = vmax.f32 %v856_v40, %v1087_v25 }
 0x151   : > { %v1011_v43 = vpop.f32.mrf.mxu0 }
 0x152   : > { %v1037_v7 = vpop.f32.mrf.mxu1  ;;  %v1063_v60 = vpop.f32.mrf.mxu2 }
 0x153   : > { %v1038_v26 = vadd.f32 %v1037_v7, %v1011_v43 }
 0x155   : > { %v1089_v13 = vpop.f32.mrf.mxu3  ;;  %v1064_v30 = vadd.f32 %v1063_v60, %v1038_v26 }
 0x157   : > { %v1090_v50 = vadd.f32 %v1089_v13, %v1064_v30 }
 0x159   : > { %v1201_v45 = vmax.f32 %v858_v15, %v1090_v50 }
 0x15b   : > { %v1014_v62 = vpop.f32.mrf.mxu0 }
 0x15c   : > { %v1040_v11 = vpop.f32.mrf.mxu1  ;;  %v1066_v48 = vpop.f32.mrf.mxu2 }
 0x15d   : > { %v1041_v33 = vadd.f32 %v1040_v11, %v1014_v62 }
 0x15f   : > { %v1092_v21 = vpop.f32.mrf.mxu3  ;;  %v1067_v31 = vadd.f32 %v1066_v48, %v1041_v33 }
 0x161   : > { %v1093_v13 = vadd.f32 %v1092_v21, %v1067_v31 }
 0x163   : > { %v1203_v4 = vmax.f32 %v860_v52, %v1093_v13 }
 0x16d   : > { %v1112_v0 = vpop.f32.mrf.mxu0 }
 0x16e   : > { %v1138_v36 = vpop.f32.mrf.mxu1  ;;  %v1164_v1 = vpop.f32.mrf.mxu2 }
 0x171   : > { %v2880_v41 = vpop.f32.mrf.mxu3 }
 0x177   : > { %v2882_v28 = vpop.f32.mrf.mxu0 }
 0x178   : > { %v1141_v55 = vpop.f32.mrf.mxu1  ;;  %v2884_v2 = vpop.f32.mrf.mxu2 }
 0x17b   : > { %v2886_v3 = vpop.f32.mrf.mxu3 }
 0x181   : > { %v2888_v6 = vpop.f32.mrf.mxu0 }
 0x182   : > { %v2890_v8 = vpop.f32.mrf.mxu1  ;;  %v2892_v63 = vpop.f32.mrf.mxu2 }
 0x185   : > { %v2894_v10 = vpop.f32.mrf.mxu3 }
 0x193   : > { %v1351_v5 = vpop.f32.mrf.mxu0 }
 0x194   : > { %v1377_v17 = vpop.f32.mrf.mxu1  ;;  %v1403_v18 = vpop.f32.mrf.mxu2 }
 0x195   : > { %v1378_v19 = vadd.f32 %v1377_v17, %v1351_v5 }
 0x197   : > { %v1404_v22 = vadd.f32 %v1403_v18, %v1378_v19  ;;  %v1429_v23 = vpop.f32.mrf.mxu3  ;;  %v1139_v19 = vadd.f32 %v1138_v36, %v1112_v0 }
 0x199   : > { %v1430_v27 = vadd.f32 %v1429_v23, %v1404_v22  ;;  %v1165_v23 = vadd.f32 %v1164_v1, %v1139_v19 }
 0x19b   : > { %v1542_v47 = vmax.f32 %v1199_v29, %v1430_v27  ;;  %v1191_v26 = vadd.f32 %v2880_v41, %v1165_v23  ;;  %v1142_v27 = vadd.f32 %v1141_v55, %v2882_v28  ;;  %v1145_v41 = vadd.f32 %v2890_v8, %v2888_v6 }
 0x19d   : > { %v1354_v38 = vpop.f32.mrf.mxu0  ;;  %v1200_v52 = vmax.f32 %v857_v44, %v1191_v26  ;;  %v1171_v44 = vadd.f32 %v2892_v63, %v1145_v41 }
 0x19e   : > { %v1380_v39 = vpop.f32.mrf.mxu1  ;;  %v1406_v42 = vpop.f32.mrf.mxu2 }
 0x19f   : > { %v1381_v49 = vadd.f32 %v1380_v39, %v1354_v38  ;;  %v1168_v38 = vadd.f32 %v2884_v2, %v1142_v27  ;;  %v1197_v8 = vadd.f32 %v2894_v10, %v1171_v44 }
 0x1a1   : > { %v1407_v34 = vadd.f32 %v1406_v42, %v1381_v49  ;;  %v1432_v56 = vpop.f32.mrf.mxu3  ;;  %v1194_v42 = vadd.f32 %v2886_v3, %v1168_v38  ;;  %v1204_v37 = vmax.f32 %v861_v46, %v1197_v8 }
 0x1a2   : > { %v1554_v51 = vpop.permute.xlu0 %1553 }
 0x1a3   : > { %v1566_v58 = vadd.f32 %v1554_v51, %v1542_v47  ;;  %v1433_v61 = vadd.f32 %v1432_v56, %v1407_v34  ;;  %v1202_v32 = vmax.f32 %v859_v20, %v1194_v42 }
 0x1a5   : > { %v1572_v40 = vmax.f32 %v1566_v58, 0.0  ;;  %v1544_v59 = vmax.f32 %v1201_v45, %v1433_v61 }
 0x1a7   : > { %1578 = vst [vmem:[%s2903_s26] sm:$0xff] %v1572_v40  ;;  %v1357_v43 = vpop.f32.mrf.mxu0 }
 0x1a8   : > { %v1383_v7 = vpop.f32.mrf.mxu1  ;;  %v1409_v60 = vpop.f32.mrf.mxu2 }
 0x1a9   : > { %v1384_v62 = vadd.f32 %v1383_v7, %v1357_v43 }
 0x1aa   : > { %v1559_v11 = vpop.permute.xlu0 %1558 }
 0x1ab   : > { %v1568_v14 = vadd.f32 %v1559_v11, %v1544_v59  ;;  %v1410_v5 = vadd.f32 %v1409_v60, %v1384_v62  ;;  %v1435_v17 = vpop.f32.mrf.mxu3 }
 0x1ad   : > { %v1574_v9 = vmax.f32 %v1568_v14, 0.0  ;;  %v1436_v15 = vadd.f32 %v1435_v17, %v1410_v5 }
 0x1af   : > { %1581 = vst [vmem:[%s2903_s26 + $0x10] sm:$0xff] %v1574_v9  ;;  %v1546_v48 = vmax.f32 %v1203_v4, %v1436_v15 }
 0x1b0   : > { %v1564_v18 = vpop.permute.xlu1 %1563 }
 0x1b1   : > { %v1570_v12 = vadd.f32 %v1564_v18, %v1546_v48 }
 0x1b3   : > { %v1576_v22 = vmax.f32 %v1570_v12, 0.0 }
 0x1b5   : > { %1583 = vst [vmem:[%s2903_s26 + $0x20] sm:$0xf] %v1576_v22 }
 0x1b9   : > { %v1455_v21 = vpop.f32.mrf.mxu0 }
 0x1ba   : > { %v1481_v25 = vpop.f32.mrf.mxu1 }
 0x1bb   : > { %v1482_v29 = vadd.f32 %v1481_v25, %v1455_v21 }
 0x1bc   : > { %v1507_v30 = vpop.f32.mrf.mxu2 }
 0x1bd   : > { %v1508_v35 = vadd.f32 %v1507_v30, %v1482_v29 }
 0x1be   : > { %v1533_v24 = vpop.f32.mrf.mxu3 }
 0x1bf   : > { %v1534_v0 = vadd.f32 %v1533_v24, %v1508_v35 }
 0x1c1   : > { %v1543_v36 = vmax.f32 %v1200_v52, %v1534_v0  ;;  %v1458_v1 = vpop.f32.mrf.mxu0 }
 0x1c2   : > { %v1484_v39 = vpop.f32.mrf.mxu1 }
 0x1c3   : > { %v1567_v28 = vadd.f32 %v1554_v51, %v1543_v36  ;;  %v1485_v55 = vadd.f32 %v1484_v39, %v1458_v1 }
 0x1c4   : > { %v1510_v47 = vpop.f32.mrf.mxu2 }
 0x1c5   : > { %v1573_v49 = vmax.f32 %v1567_v28, 0.0  ;;  %v1511_v50 = vadd.f32 %v1510_v47, %v1485_v55 }
 0x1c6   : > { %v1536_v54 = vpop.f32.mrf.mxu3 }
 0x1c7   : > { %1580 = vst.msk [vmem:[%s2903_s26 + $0x8] sm:$0xff] %vm1579_vm0, %v1573_v49  ;;  %v1537_v2 = vadd.f32 %v1536_v54, %v1511_v50 }
 0x1c9   : > { %v1545_v3 = vmax.f32 %v1202_v32, %v1537_v2  ;;  %v1461_v33 = vpop.f32.mrf.mxu0 }
 0x1ca   : > { %v1487_v6 = vpop.f32.mrf.mxu1 }
 0x1cb   : > { %v1569_v34 = vadd.f32 %v1559_v11, %v1545_v3  ;;  %v1488_v56 = vadd.f32 %v1487_v6, %v1461_v33 }
 0x1cc   : > { %v1513_v51 = vpop.f32.mrf.mxu2 }
 0x1cd   : > { %v1575_v58 = vmax.f32 %v1569_v34, 0.0  ;;  %v1514_v61 = vadd.f32 %v1513_v51, %v1488_v56 }
 0x1ce   : > { %v1539_v45 = vpop.f32.mrf.mxu3 }
 0x1cf   : > { %1582 = vst.msk [vmem:[%s2903_s26 + $0x18] sm:$0xff] %vm1579_vm0, %v1575_v58  ;;  %v1540_v16 = vadd.f32 %v1539_v45, %v1514_v61 }
 0x1d1   : > { %v1547_v20 = vmax.f32 %v1204_v37, %v1540_v16 }
 0x1d3   : > { %v1571_v63 = vadd.f32 %v1564_v18, %v1547_v20 }
 0x1d5   : > { %v1577_v31 = vmax.f32 %v1571_v63, 0.0 }
 0x1d7   : > { %1585 = vst.msk [vmem:[%s2903_s26 + $0x28] sm:$0xf] %vm1584_vm1, %v1577_v31 }
 0x1d8 PF: > { %s13_s12 = sadd.s32 1, %s2066_s12  }
 0x1d9   : > { %p10_p4 = scmp.ge.s32.totalorder %s13_s12, 4  }
 0x1db   :  { %12 = sbr.rel (!%p10_p4) target bundleno = 1 (0x1), region = 65 }

// kernel: net_forward.5
= control target key start
LH: loop header
LB: loop body
LE: loop exit
PB: predicated region body
PF: predicated region fallthrough
CT: control target
= control target key end

     0   :  { %s5122_s15 = smov 0   ;;  %s5124_s16 = smov 0   ;;  %s7052_s0 = inlined_call_operand.vmem [shape: f32[2,3380], index: 0, kind: input, shape index: {}]   ;;  %s7053_s1 = inlined_call_operand.vmem [shape: f32[3380,512], index: 1, kind: input, shape index: {}]   ;;  %s7054_s2 = inlined_call_operand.vmem [shape: f32[1,512], index: 2, kind: input, shape index: {}]   ;;  %s7055_s3 = inlined_call_operand.vmem [shape: f32[1,512], index: 3, kind: input, shape index: {}]   ;;  %s7056_s4 = inlined_call_operand.vmem [shape: f32[2,2,1], index: 4, kind: output, shape index: {}]  }
   0x1   :  { %s5126_s17 = smov 0  }
   0x2 LB: > { %s5138_s18 = sadd.s32 4294967295, %s5079_s17   ;;  %s5141_s19 = sadd.s32 1, %s5079_s17   ;;  %s5079_s17 = sphi %s5126_s17, %s7064_s17   ;;  %s5075_s16 = sphi %s5124_s16, %s7063_s16   ;;  %s5071_s15 = sphi %s5122_s15, %s7062_s15  }
   0x3   : > { %s39_s20 = ssub.s32 %s5079_s17, %s5141_s19  ;;  %s42_s21 = sadd.s32 1, %s5075_s16 }
   0x4   : > { %p40_p0 = scmp.eq.s32.totalorder %s39_s20, 0  ;;  %p49_p1 = scmp.ne.s32.totalorder %s5075_s16, %s5071_s15 }
   0x5   : > { %p50_p2 = scmp.eq.s32.totalorder %s5079_s17, 0  ;;  %p4960_p4 = scmp.ge.s32.totalorder %s5079_s17, 2 }
   0x6   : > { %s5150_s22 = scalar_select %p40_p0, %s5075_s16, %s42_s21  }
   0x7   : > { %p51_p3 = por %p50_p2, %p49_p1  ;;  %156 = sbr.rel (%p4960_p4) target bundleno = 441 (0x1b9), region = 20 }
   0xc   : > { %159 = sbr.rel (!%p51_p3) target bundleno = 441 (0x1b9), region = 24  ;;  %s161_s23 = sand.u32 (%p51_p3), 1, %s5075_s16  }
   0xd   : > { %s4975_s24 = sshll.u32 (%p51_p3), %s5079_s17, 4  ;;  %s5155_s25 = smul.u32 (%p51_p3), 6768, %s161_s23 }
   0xe   : > { %s5160_s28 = scalar_lea.vmem (%p51_p3), %s7053_s1, %s4975_s24   ;;  %s5170_s6 = smov (%p51_p3), 0  }
   0xf   : > { %s163_s29 = scalar_lea.vmem (%p51_p3), [#allocation2], %s5155_s25   ;;  %s7058_s5 = smov (%p51_p3), %s5160_s28 }
  0x10   : > { %s7057_s30 = smov (%p51_p3), %s163_s29  ;;  %s5172_s7 = smov (%p51_p3), 0  }
  0x11 LB: >> { %v180_v0 = vld [vmem:[%s5087_s5] sm:$0xff]  ;;  %s1026_s8 = sadd.s32 1, %s5091_s6  ;;  %s176_s7 = sadd.s32 1, %s5095_s7   ;;  %s5095_s7 = sphi %s5172_s7, %s176_s7   ;;  %s5091_s6 = sphi %s5170_s6, %s7061_s6   ;;  %s5087_s5 = sphi %s7058_s5, %s7060_s5   ;;  %s5083_s30 = sphi %s7057_s30, %s7059_s30  }
  0x12   : >> { %v182_v1 = vld [vmem:[%s5087_s5 + $0x20] sm:$0xff]  ;;  %181 = vst [vmem:[%s5083_s30] sm:$0xff] %v180_v0  ;;  %p1027_p5 = scmp.ge.s32.totalorder %s1026_s8, 2  ;;  %p173_p6 = scmp.ge.s32.totalorder %s176_s7, 2  }
  0x13   : >> { %v184_v2 = vld [vmem:[%s5087_s5 + $0x40] sm:$0xff]  ;;  %183 = vst [vmem:[%s5083_s30 + $0x10] sm:$0xff] %v182_v1 }
  0x14   : >> { %v186_v3 = vld [vmem:[%s5087_s5 + $0x60] sm:$0xff]  ;;  %185 = vst [vmem:[%s5083_s30 + $0x20] sm:$0xff] %v184_v2  ;;  %s7066_s8 = smov (%p1027_p5, %s1026_s8), 0 }
  0x15   : >> { %v188_v4 = vld [vmem:[%s5087_s5 + $0x80] sm:$0xff]  ;;  %187 = vst [vmem:[%s5083_s30 + $0x30] sm:$0xff] %v186_v3  ;;  %s4963_s9 = sshll.u32 %s7066_s8, 3  ;;  %s7061_s6 = smov %s7066_s8 }
  0x16   : >> { %v190_v5 = vld [vmem:[%s5087_s5 + $0xa0] sm:$0xff]  ;;  %189 = vst [vmem:[%s5083_s30 + $0x40] sm:$0xff] %v188_v4  ;;  %s5784_s10 = scalar_lea.vmem %s5160_s28, %s4963_s9   ;;  %s5788_s11 = scalar_lea.vmem %s163_s29, %s4963_s9 [#allocation2]  }
  0x17   : >> { %v192_v6 = vld [vmem:[%s5087_s5 + $0xc0] sm:$0xff]  ;;  %191 = vst [vmem:[%s5083_s30 + $0x50] sm:$0xff] %v190_v5 }
  0x18   : >> { %v194_v7 = vld [vmem:[%s5087_s5 + $0xe0] sm:$0xff]  ;;  %193 = vst [vmem:[%s5083_s30 + $0x60] sm:$0xff] %v192_v6 }
  0x19   : >> { %v196_v8 = vld [vmem:[%s5087_s5 + $0x100] sm:$0xff]  ;;  %195 = vst [vmem:[%s5083_s30 + $0x70] sm:$0xff] %v194_v7 }
  0x1a   : >> { %v198_v9 = vld [vmem:[%s5087_s5 + $0x120] sm:$0xff]  ;;  %197 = vst [vmem:[%s5083_s30 + $0x80] sm:$0xff] %v196_v8 }
  0x1b   : >> { %v200_v10 = vld [vmem:[%s5087_s5 + $0x140] sm:$0xff]  ;;  %199 = vst [vmem:[%s5083_s30 + $0x90] sm:$0xff] %v198_v9 }
  0x1c   : >> { %v202_v11 = vld [vmem:[%s5087_s5 + $0x160] sm:$0xff]  ;;  %201 = vst [vmem:[%s5083_s30 + $0xa0] sm:$0xff] %v200_v10 }
  0x1d   : >> { %v204_v12 = vld [vmem:[%s5087_s5 + $0x180] sm:$0xff]  ;;  %203 = vst [vmem:[%s5083_s30 + $0xb0] sm:$0xff] %v202_v11 }
  0x1e   : >> { %v206_v13 = vld [vmem:[%s5087_s5 + $0x1a0] sm:$0xff]  ;;  %205 = vst [vmem:[%s5083_s30 + $0xc0] sm:$0xff] %v204_v12 }
  0x1f   : >> { %v208_v14 = vld [vmem:[%s5087_s5 + $0x1c0] sm:$0xff]  ;;  %207 = vst [vmem:[%s5083_s30 + $0xd0] sm:$0xff] %v206_v13 }
  0x20   : >> { %v210_v15 = vld [vmem:[%s5087_s5 + $0x1e0] sm:$0xff]  ;;  %209 = vst [vmem:[%s5083_s30 + $0xe0] sm:$0xff] %v208_v14 }
  0x21   : >> { %v212_v16 = vld [vmem:[%s5087_s5 + $0x200] sm:$0xff]  ;;  %211 = vst [vmem:[%s5083_s30 + $0xf0] sm:$0xff] %v210_v15 }
  0x22   : >> { %v214_v17 = vld [vmem:[%s5087_s5 + $0x220] sm:$0xff]  ;;  %213 = vst [vmem:[%s5083_s30 + $0x100] sm:$0xff] %v212_v16 }
  0x23   : >> { %v216_v18 = vld [vmem:[%s5087_s5 + $0x240] sm:$0xff]  ;;  %215 = vst [vmem:[%s5083_s30 + $0x110] sm:$0xff] %v214_v17 }
  0x24   : >> { %v218_v19 = vld [vmem:[%s5087_s5 + $0x260] sm:$0xff]  ;;  %217 = vst [vmem:[%s5083_s30 + $0x120] sm:$0xff] %v216_v18 }
  0x25   : >> { %v220_v20 = vld [vmem:[%s5087_s5 + $0x280] sm:$0xff]  ;;  %219 = vst [vmem:[%s5083_s30 + $0x130] sm:$0xff] %v218_v19 }
  0x26   : >> { %v222_v21 = vld [vmem:[%s5087_s5 + $0x2a0] sm:$0xff]  ;;  %221 = vst [vmem:[%s5083_s30 + $0x140] sm:$0xff] %v220_v20 }
  0x27   : >> { %v224_v22 = vld [vmem:[%s5087_s5 + $0x2c0] sm:$0xff]  ;;  %223 = vst [vmem:[%s5083_s30 + $0x150] sm:$0xff] %v222_v21 }
  0x28   : >> { %v226_v23 = vld [vmem:[%s5087_s5 + $0x2e0] sm:$0xff]  ;;  %225 = vst [vmem:[%s5083_s30 + $0x160] sm:$0xff] %v224_v22 }
  0x29   : >> { %v228_v24 = vld [vmem:[%s5087_s5 + $0x300] sm:$0xff]  ;;  %227 = vst [vmem:[%s5083_s30 + $0x170] sm:$0xff] %v226_v23 }
  0x2a   : >> { %v230_v25 = vld [vmem:[%s5087_s5 + $0x320] sm:$0xff]  ;;  %229 = vst [vmem:[%s5083_s30 + $0x180] sm:$0xff] %v228_v24 }
  0x2b   : >> { %v232_v26 = vld [vmem:[%s5087_s5 + $0x340] sm:$0xff]  ;;  %231 = vst [vmem:[%s5083_s30 + $0x190] sm:$0xff] %v230_v25 }
  0x2c   : >> { %v234_v27 = vld [vmem:[%s5087_s5 + $0x360] sm:$0xff]  ;;  %233 = vst [vmem:[%s5083_s30 + $0x1a0] sm:$0xff] %v232_v26 }
  0x2d   : >> { %v236_v28 = vld [vmem:[%s5087_s5 + $0x380] sm:$0xff]  ;;  %235 = vst [vmem:[%s5083_s30 + $0x1b0] sm:$0xff] %v234_v27 }
  0x2e   : >> { %v238_v29 = vld [vmem:[%s5087_s5 + $0x3a0] sm:$0xff]  ;;  %237 = vst [vmem:[%s5083_s30 + $0x1c0] sm:$0xff] %v236_v28 }
  0x2f   : >> { %v240_v30 = vld [vmem:[%s5087_s5 + $0x3c0] sm:$0xff]  ;;  %239 = vst [vmem:[%s5083_s30 + $0x1d0] sm:$0xff] %v238_v29 }
  0x30   : >> { %v242_v31 = vld [vmem:[%s5087_s5 + $0x3e0] sm:$0xff]  ;;  %241 = vst [vmem:[%s5083_s30 + $0x1e0] sm:$0xff] %v240_v30 }
  0x31   : >> { %v244_v32 = vld [vmem:[%s5087_s5 + $0x400] sm:$0xff]  ;;  %243 = vst [vmem:[%s5083_s30 + $0x1f0] sm:$0xff] %v242_v31 }
  0x32   : >> { %v246_v33 = vld [vmem:[%s5087_s5 + $0x420] sm:$0xff]  ;;  %245 = vst [vmem:[%s5083_s30 + $0x200] sm:$0xff] %v244_v32 }
  0x33   : >> { %v248_v34 = vld [vmem:[%s5087_s5 + $0x440] sm:$0xff]  ;;  %247 = vst [vmem:[%s5083_s30 + $0x210] sm:$0xff] %v246_v33 }
  0x34   : >> { %v250_v35 = vld [vmem:[%s5087_s5 + $0x460] sm:$0xff]  ;;  %249 = vst [vmem:[%s5083_s30 + $0x220] sm:$0xff] %v248_v34 }
  0x35   : >> { %v252_v36 = vld [vmem:[%s5087_s5 + $0x480] sm:$0xff]  ;;  %251 = vst [vmem:[%s5083_s30 + $0x230] sm:$0xff] %v250_v35 }
  0x36   : >> { %v254_v37 = vld [vmem:[%s5087_s5 + $0x4a0] sm:$0xff]  ;;  %253 = vst [vmem:[%s5083_s30 + $0x240] sm:$0xff] %v252_v36 }
  0x37   : >> { %v256_v38 = vld [vmem:[%s5087_s5 + $0x4c0] sm:$0xff]  ;;  %255 = vst [vmem:[%s5083_s30 + $0x250] sm:$0xff] %v254_v37 }
  0x38   : >> { %v258_v39 = vld [vmem:[%s5087_s5 + $0x4e0] sm:$0xff]  ;;  %257 = vst [vmem:[%s5083_s30 + $0x260] sm:$0xff] %v256_v38 }
  0x39   : >> { %v260_v40 = vld [vmem:[%s5087_s5 + $0x500] sm:$0xff]  ;;  %259 = vst [vmem:[%s5083_s30 + $0x270] sm:$0xff] %v258_v39 }
  0x3a   : >> { %v262_v41 = vld [vmem:[%s5087_s5 + $0x520] sm:$0xff]  ;;  %261 = vst [vmem:[%s5083_s30 + $0x280] sm:$0xff] %v260_v40 }
  0x3b   : >> { %v264_v42 = vld [vmem:[%s5087_s5 + $0x540] sm:$0xff]  ;;  %263 = vst [vmem:[%s5083_s30 + $0x290] sm:$0xff] %v262_v41 }
  0x3c   : >> { %v266_v43 = vld [vmem:[%s5087_s5 + $0x560] sm:$0xff]  ;;  %265 = vst [vmem:[%s5083_s30 + $0x2a0] sm:$0xff] %v264_v42 }
  0x3d   : >> { %v268_v44 = vld [vmem:[%s5087_s5 + $0x580] sm:$0xff]  ;;  %267 = vst [vmem:[%s5083_s30 + $0x2b0] sm:$0xff] %v266_v43 }
  0x3e   : >> { %v270_v45 = vld [vmem:[%s5087_s5 + $0x5a0] sm:$0xff]  ;;  %269 = vst [vmem:[%s5083_s30 + $0x2c0] sm:$0xff] %v268_v44 }
  0x3f   : >> { %v272_v46 = vld [vmem:[%s5087_s5 + $0x5c0] sm:$0xff]  ;;  %271 = vst [vmem:[%s5083_s30 + $0x2d0] sm:$0xff] %v270_v45 }
  0x40   : >> { %v274_v47 = vld [vmem:[%s5087_s5 + $0x5e0] sm:$0xff]  ;;  %273 = vst [vmem:[%s5083_s30 + $0x2e0] sm:$0xff] %v272_v46 }
  0x41   : >> { %v276_v48 = vld [vmem:[%s5087_s5 + $0x600] sm:$0xff]  ;;  %275 = vst [vmem:[%s5083_s30 + $0x2f0] sm:$0xff] %v274_v47 }
  0x42   : >> { %v278_v49 = vld [vmem:[%s5087_s5 + $0x620] sm:$0xff]  ;;  %277 = vst [vmem:[%s5083_s30 + $0x300] sm:$0xff] %v276_v48 }
  0x43   : >> { %v280_v50 = vld [vmem:[%s5087_s5 + $0x640] sm:$0xff]  ;;  %279 = vst [vmem:[%s5083_s30 + $0x310] sm:$0xff] %v278_v49 }
  0x44   : >> { %v282_v51 = vld [vmem:[%s5087_s5 + $0x660] sm:$0xff]  ;;  %281 = vst [vmem:[%s5083_s30 + $0x320] sm:$0xff] %v280_v50 }
  0x45   : >> { %v284_v52 = vld [vmem:[%s5087_s5 + $0x680] sm:$0xff]  ;;  %283 = vst [vmem:[%s5083_s30 + $0x330] sm:$0xff] %v282_v51 }
  0x46   : >> { %v286_v53 = vld [vmem:[%s5087_s5 + $0x6a0] sm:$0xff]  ;;  %285 = vst [vmem:[%s5083_s30 + $0x340] sm:$0xff] %v284_v52 }
  0x47   : >> { %v288_v54 = vld [vmem:[%s5087_s5 + $0x6c0] sm:$0xff]  ;;  %287 = vst [vmem:[%s5083_s30 + $0x350] sm:$0xff] %v286_v53 }
  0x48   : >> { %v290_v55 = vld [vmem:[%s5087_s5 + $0x6e0] sm:$0xff]  ;;  %289 = vst [vmem:[%s5083_s30 + $0x360] sm:$0xff] %v288_v54 }
  0x49   : >> { %v292_v56 = vld [vmem:[%s5087_s5 + $0x700] sm:$0xff]  ;;  %291 = vst [vmem:[%s5083_s30 + $0x370] sm:$0xff] %v290_v55 }
  0x4a   : >> { %v294_v57 = vld [vmem:[%s5087_s5 + $0x720] sm:$0xff]  ;;  %293 = vst [vmem:[%s5083_s30 + $0x380] sm:$0xff] %v292_v56 }
  0x4b   : >> { %v296_v58 = vld [vmem:[%s5087_s5 + $0x740] sm:$0xff]  ;;  %295 = vst [vmem:[%s5083_s30 + $0x390] sm:$0xff] %v294_v57 }
  0x4c   : >> { %v298_v59 = vld [vmem:[%s5087_s5 + $0x760] sm:$0xff]  ;;  %297 = vst [vmem:[%s5083_s30 + $0x3a0] sm:$0xff] %v296_v58 }
  0x4d   : >> { %v300_v60 = vld [vmem:[%s5087_s5 + $0x780] sm:$0xff]  ;;  %299 = vst [vmem:[%s5083_s30 + $0x3b0] sm:$0xff] %v298_v59 }
  0x4e   : >> { %v302_v61 = vld [vmem:[%s5087_s5 + $0x7a0] sm:$0xff]  ;;  %301 = vst [vmem:[%s5083_s30 + $0x3c0] sm:$0xff] %v300_v60 }
  0x4f   : >> { %v304_v62 = vld [vmem:[%s5087_s5 + $0x7c0] sm:$0xff]  ;;  %303 = vst [vmem:[%s5083_s30 + $0x3d0] sm:$0xff] %v302_v61 }
  0x50   : >> { %v306_v63 = vld [vmem:[%s5087_s5 + $0x7e0] sm:$0xff]  ;;  %305 = vst [vmem:[%s5083_s30 + $0x3e0] sm:$0xff] %v304_v62 }
  0x51   : >> { %v308_v0 = vld [vmem:[%s5087_s5 + $0x800] sm:$0xff]  ;;  %307 = vst [vmem:[%s5083_s30 + $0x3f0] sm:$0xff] %v306_v63 }
  0x52   : >> { %v310_v1 = vld [vmem:[%s5087_s5 + $0x820] sm:$0xff]  ;;  %309 = vst [vmem:[%s5083_s30 + $0x400] sm:$0xff] %v308_v0 }
  0x53   : >> { %v312_v2 = vld [vmem:[%s5087_s5 + $0x840] sm:$0xff]  ;;  %311 = vst [vmem:[%s5083_s30 + $0x410] sm:$0xff] %v310_v1 }
  0x54   : >> { %v314_v3 = vld [vmem:[%s5087_s5 + $0x860] sm:$0xff]  ;;  %313 = vst [vmem:[%s5083_s30 + $0x420] sm:$0xff] %v312_v2 }
  0x55   : >> { %v316_v4 = vld [vmem:[%s5087_s5 + $0x880] sm:$0xff]  ;;  %315 = vst [vmem:[%s5083_s30 + $0x430] sm:$0xff] %v314_v3 }
  0x56   : >> { %v318_v5 = vld [vmem:[%s5087_s5 + $0x8a0] sm:$0xff]  ;;  %317 = vst [vmem:[%s5083_s30 + $0x440] sm:$0xff] %v316_v4 }
  0x57   : >> { %v320_v6 = vld [vmem:[%s5087_s5 + $0x8c0] sm:$0xff]  ;;  %319 = vst [vmem:[%s5083_s30 + $0x450] sm:$0xff] %v318_v5 }
  0x58   : >> { %v322_v7 = vld [vmem:[%s5087_s5 + $0x8e0] sm:$0xff]  ;;  %321 = vst [vmem:[%s5083_s30 + $0x460] sm:$0xff] %v320_v6 }
  0x59   : >> { %v324_v8 = vld [vmem:[%s5087_s5 + $0x900] sm:$0xff]  ;;  %323 = vst [vmem:[%s5083_s30 + $0x470] sm:$0xff] %v322_v7 }
  0x5a   : >> { %v326_v9 = vld [vmem:[%s5087_s5 + $0x920] sm:$0xff]  ;;  %325 = vst [vmem:[%s5083_s30 + $0x480] sm:$0xff] %v324_v8 }
  0x5b   : >> { %v328_v10 = vld [vmem:[%s5087_s5 + $0x940] sm:$0xff]  ;;  %327 = vst [vmem:[%s5083_s30 + $0x490] sm:$0xff] %v326_v9 }
  0x5c   : >> { %v330_v11 = vld [vmem:[%s5087_s5 + $0x960] sm:$0xff]  ;;  %329 = vst [vmem:[%s5083_s30 + $0x4a0] sm:$0xff] %v328_v10 }
  0x5d   : >> { %v332_v12 = vld [vmem:[%s5087_s5 + $0x980] sm:$0xff]  ;;  %331 = vst [vmem:[%s5083_s30 + $0x4b0] sm:$0xff] %v330_v11 }
  0x5e   : >> { %v334_v13 = vld [vmem:[%s5087_s5 + $0x9a0] sm:$0xff]  ;;  %333 = vst [vmem:[%s5083_s30 + $0x4c0] sm:$0xff] %v332_v12 }
  0x5f   : >> { %v336_v14 = vld [vmem:[%s5087_s5 + $0x9c0] sm:$0xff]  ;;  %335 = vst [vmem:[%s5083_s30 + $0x4d0] sm:$0xff] %v334_v13 }
  0x60   : >> { %v338_v15 = vld [vmem:[%s5087_s5 + $0x9e0] sm:$0xff]  ;;  %337 = vst [vmem:[%s5083_s30 + $0x4e0] sm:$0xff] %v336_v14 }
  0x61   : >> { %v340_v16 = vld [vmem:[%s5087_s5 + $0xa00] sm:$0xff]  ;;  %339 = vst [vmem:[%s5083_s30 + $0x4f0] sm:$0xff] %v338_v15 }
  0x62   : >> { %v342_v17 = vld [vmem:[%s5087_s5 + $0xa20] sm:$0xff]  ;;  %341 = vst [vmem:[%s5083_s30 + $0x500] sm:$0xff] %v340_v16 }
  0x63   : >> { %v344_v18 = vld [vmem:[%s5087_s5 + $0xa40] sm:$0xff]  ;;  %343 = vst [vmem:[%s5083_s30 + $0x510] sm:$0xff] %v342_v17 }
  0x64   : >> { %v346_v19 = vld [vmem:[%s5087_s5 + $0xa60] sm:$0xff]  ;;  %345 = vst [vmem:[%s5083_s30 + $0x520] sm:$0xff] %v344_v18 }
  0x65   : >> { %v348_v20 = vld [vmem:[%s5087_s5 + $0xa80] sm:$0xff]  ;;  %347 = vst [vmem:[%s5083_s30 + $0x530] sm:$0xff] %v346_v19 }
  0x66   : >> { %v350_v21 = vld [vmem:[%s5087_s5 + $0xaa0] sm:$0xff]  ;;  %349 = vst [vmem:[%s5083_s30 + $0x540] sm:$0xff] %v348_v20 }
  0x67   : >> { %v352_v22 = vld [vmem:[%s5087_s5 + $0xac0] sm:$0xff]  ;;  %351 = vst [vmem:[%s5083_s30 + $0x550] sm:$0xff] %v350_v21 }
  0x68   : >> { %v354_v23 = vld [vmem:[%s5087_s5 + $0xae0] sm:$0xff]  ;;  %353 = vst [vmem:[%s5083_s30 + $0x560] sm:$0xff] %v352_v22 }
  0x69   : >> { %v356_v24 = vld [vmem:[%s5087_s5 + $0xb00] sm:$0xff]  ;;  %355 = vst [vmem:[%s5083_s30 + $0x570] sm:$0xff] %v354_v23 }
  0x6a   : >> { %v358_v25 = vld [vmem:[%s5087_s5 + $0xb20] sm:$0xff]  ;;  %357 = vst [vmem:[%s5083_s30 + $0x580] sm:$0xff] %v356_v24 }
  0x6b   : >> { %v360_v26 = vld [vmem:[%s5087_s5 + $0xb40] sm:$0xff]  ;;  %359 = vst [vmem:[%s5083_s30 + $0x590] sm:$0xff] %v358_v25 }
  0x6c   : >> { %v362_v27 = vld [vmem:[%s5087_s5 + $0xb60] sm:$0xff]  ;;  %361 = vst [vmem:[%s5083_s30 + $0x5a0] sm:$0xff] %v360_v26 }
  0x6d   : >> { %v364_v28 = vld [vmem:[%s5087_s5 + $0xb80] sm:$0xff]  ;;  %363 = vst [vmem:[%s5083_s30 + $0x5b0] sm:$0xff] %v362_v27 }
  0x6e   : >> { %v366_v29 = vld [vmem:[%s5087_s5 + $0xba0] sm:$0xff]  ;;  %365 = vst [vmem:[%s5083_s30 + $0x5c0] sm:$0xff] %v364_v28 }
  0x6f   : >> { %v368_v30 = vld [vmem:[%s5087_s5 + $0xbc0] sm:$0xff]  ;;  %367 = vst [vmem:[%s5083_s30 + $0x5d0] sm:$0xff] %v366_v29 }
  0x70   : >> { %v370_v31 = vld [vmem:[%s5087_s5 + $0xbe0] sm:$0xff]  ;;  %369 = vst [vmem:[%s5083_s30 + $0x5e0] sm:$0xff] %v368_v30 }
  0x71   : >> { %v372_v32 = vld [vmem:[%s5087_s5 + $0xc00] sm:$0xff]  ;;  %371 = vst [vmem:[%s5083_s30 + $0x5f0] sm:$0xff] %v370_v31 }
  0x72   : >> { %v374_v33 = vld [vmem:[%s5087_s5 + $0xc20] sm:$0xff]  ;;  %373 = vst [vmem:[%s5083_s30 + $0x600] sm:$0xff] %v372_v32 }
  0x73   : >> { %v376_v34 = vld [vmem:[%s5087_s5 + $0xc40] sm:$0xff]  ;;  %375 = vst [vmem:[%s5083_s30 + $0x610] sm:$0xff] %v374_v33 }
  0x74   : >> { %v378_v35 = vld [vmem:[%s5087_s5 + $0xc60] sm:$0xff]  ;;  %377 = vst [vmem:[%s5083_s30 + $0x620] sm:$0xff] %v376_v34 }
  0x75   : >> { %v380_v36 = vld [vmem:[%s5087_s5 + $0xc80] sm:$0xff]  ;;  %379 = vst [vmem:[%s5083_s30 + $0x630] sm:$0xff] %v378_v35 }
  0x76   : >> { %v382_v37 = vld [vmem:[%s5087_s5 + $0xca0] sm:$0xff]  ;;  %381 = vst [vmem:[%s5083_s30 + $0x640] sm:$0xff] %v380_v36 }
  0x77   : >> { %v384_v38 = vld [vmem:[%s5087_s5 + $0xcc0] sm:$0xff]  ;;  %383 = vst [vmem:[%s5083_s30 + $0x650] sm:$0xff] %v382_v37 }
  0x78   : >> { %v386_v39 = vld [vmem:[%s5087_s5 + $0xce0] sm:$0xff]  ;;  %385 = vst [vmem:[%s5083_s30 + $0x660] sm:$0xff] %v384_v38 }
  0x79   : >> { %v388_v40 = vld [vmem:[%s5087_s5 + $0xd00] sm:$0xff]  ;;  %387 = vst [vmem:[%s5083_s30 + $0x670] sm:$0xff] %v386_v39 }
  0x7a   : >> { %v390_v41 = vld [vmem:[%s5087_s5 + $0xd20] sm:$0xff]  ;;  %389 = vst [vmem:[%s5083_s30 + $0x680] sm:$0xff] %v388_v40 }
  0x7b   : >> { %v392_v42 = vld [vmem:[%s5087_s5 + $0xd40] sm:$0xff]  ;;  %391 = vst [vmem:[%s5083_s30 + $0x690] sm:$0xff] %v390_v41 }
  0x7c   : >> { %v394_v43 = vld [vmem:[%s5087_s5 + $0xd60] sm:$0xff]  ;;  %393 = vst [vmem:[%s5083_s30 + $0x6a0] sm:$0xff] %v392_v42 }
  0x7d   : >> { %v396_v44 = vld [vmem:[%s5087_s5 + $0xd80] sm:$0xff]  ;;  %395 = vst [vmem:[%s5083_s30 + $0x6b0] sm:$0xff] %v394_v43 }
  0x7e   : >> { %v398_v45 = vld [vmem:[%s5087_s5 + $0xda0] sm:$0xff]  ;;  %397 = vst [vmem:[%s5083_s30 + $0x6c0] sm:$0xff] %v396_v44 }
  0x7f   : >> { %v400_v46 = vld [vmem:[%s5087_s5 + $0xdc0] sm:$0xff]  ;;  %399 = vst [vmem:[%s5083_s30 + $0x6d0] sm:$0xff] %v398_v45 }
  0x80   : >> { %v402_v47 = vld [vmem:[%s5087_s5 + $0xde0] sm:$0xff]  ;;  %401 = vst [vmem:[%s5083_s30 + $0x6e0] sm:$0xff] %v400_v46 }
  0x81   : >> { %v404_v48 = vld [vmem:[%s5087_s5 + $0xe00] sm:$0xff]  ;;  %403 = vst [vmem:[%s5083_s30 + $0x6f0] sm:$0xff] %v402_v47 }
  0x82   : >> { %v406_v49 = vld [vmem:[%s5087_s5 + $0xe20] sm:$0xff]  ;;  %405 = vst [vmem:[%s5083_s30 + $0x700] sm:$0xff] %v404_v48 }
  0x83   : >> { %v408_v50 = vld [vmem:[%s5087_s5 + $0xe40] sm:$0xff]  ;;  %407 = vst [vmem:[%s5083_s30 + $0x710] sm:$0xff] %v406_v49 }
  0x84   : >> { %v410_v51 = vld [vmem:[%s5087_s5 + $0xe60] sm:$0xff]  ;;  %409 = vst [vmem:[%s5083_s30 + $0x720] sm:$0xff] %v408_v50 }
  0x85   : >> { %v412_v52 = vld [vmem:[%s5087_s5 + $0xe80] sm:$0xff]  ;;  %411 = vst [vmem:[%s5083_s30 + $0x730] sm:$0xff] %v410_v51 }
  0x86   : >> { %v414_v53 = vld [vmem:[%s5087_s5 + $0xea0] sm:$0xff]  ;;  %413 = vst [vmem:[%s5083_s30 + $0x740] sm:$0xff] %v412_v52 }
  0x87   : >> { %v416_v54 = vld [vmem:[%s5087_s5 + $0xec0] sm:$0xff]  ;;  %415 = vst [vmem:[%s5083_s30 + $0x750] sm:$0xff] %v414_v53 }
  0x88   : >> { %v418_v55 = vld [vmem:[%s5087_s5 + $0xee0] sm:$0xff]  ;;  %417 = vst [vmem:[%s5083_s30 + $0x760] sm:$0xff] %v416_v54 }
  0x89   : >> { %v420_v56 = vld [vmem:[%s5087_s5 + $0xf00] sm:$0xff]  ;;  %419 = vst [vmem:[%s5083_s30 + $0x770] sm:$0xff] %v418_v55 }
  0x8a   : >> { %v422_v57 = vld [vmem:[%s5087_s5 + $0xf20] sm:$0xff]  ;;  %421 = vst [vmem:[%s5083_s30 + $0x780] sm:$0xff] %v420_v56 }
  0x8b   : >> { %v424_v58 = vld [vmem:[%s5087_s5 + $0xf40] sm:$0xff]  ;;  %423 = vst [vmem:[%s5083_s30 + $0x790] sm:$0xff] %v422_v57 }
  0x8c   : >> { %v426_v59 = vld [vmem:[%s5087_s5 + $0xf60] sm:$0xff]  ;;  %425 = vst [vmem:[%s5083_s30 + $0x7a0] sm:$0xff] %v424_v58 }
  0x8d   : >> { %v428_v60 = vld [vmem:[%s5087_s5 + $0xf80] sm:$0xff]  ;;  %427 = vst [vmem:[%s5083_s30 + $0x7b0] sm:$0xff] %v426_v59 }
  0x8e   : >> { %v430_v61 = vld [vmem:[%s5087_s5 + $0xfa0] sm:$0xff]  ;;  %429 = vst [vmem:[%s5083_s30 + $0x7c0] sm:$0xff] %v428_v60 }
  0x8f   : >> { %v432_v62 = vld [vmem:[%s5087_s5 + $0xfc0] sm:$0xff]  ;;  %431 = vst [vmem:[%s5083_s30 + $0x7d0] sm:$0xff] %v430_v61 }
  0x90   : >> { %v434_v63 = vld [vmem:[%s5087_s5 + $0xfe0] sm:$0xff]  ;;  %433 = vst [vmem:[%s5083_s30 + $0x7e0] sm:$0xff] %v432_v62 }
  0x91   : >> { %v436_v0 = vld [vmem:[%s5087_s5 + $0x1000] sm:$0xff]  ;;  %435 = vst [vmem:[%s5083_s30 + $0x7f0] sm:$0xff] %v434_v63 }
  0x92   : >> { %v438_v1 = vld [vmem:[%s5087_s5 + $0x1020] sm:$0xff]  ;;  %437 = vst [vmem:[%s5083_s30 + $0x800] sm:$0xff] %v436_v0 }
  0x93   : >> { %v440_v2 = vld [vmem:[%s5087_s5 + $0x1040] sm:$0xff]  ;;  %439 = vst [vmem:[%s5083_s30 + $0x810] sm:$0xff] %v438_v1 }
  0x94   : >> { %v442_v3 = vld [vmem:[%s5087_s5 + $0x1060] sm:$0xff]  ;;  %441 = vst [vmem:[%s5083_s30 + $0x820] sm:$0xff] %v440_v2 }
  0x95   : >> { %v444_v4 = vld [vmem:[%s5087_s5 + $0x1080] sm:$0xff]  ;;  %443 = vst [vmem:[%s5083_s30 + $0x830] sm:$0xff] %v442_v3 }
  0x96   : >> { %v446_v5 = vld [vmem:[%s5087_s5 + $0x10a0] sm:$0xff]  ;;  %445 = vst [vmem:[%s5083_s30 + $0x840] sm:$0xff] %v444_v4 }
  0x97   : >> { %v448_v6 = vld [vmem:[%s5087_s5 + $0x10c0] sm:$0xff]  ;;  %447 = vst [vmem:[%s5083_s30 + $0x850] sm:$0xff] %v446_v5 }
  0x98   : >> { %v450_v7 = vld [vmem:[%s5087_s5 + $0x10e0] sm:$0xff]  ;;  %449 = vst [vmem:[%s5083_s30 + $0x860] sm:$0xff] %v448_v6 }
  0x99   : >> { %v452_v8 = vld [vmem:[%s5087_s5 + $0x1100] sm:$0xff]  ;;  %451 = vst [vmem:[%s5083_s30 + $0x870] sm:$0xff] %v450_v7 }
  0x9a   : >> { %v454_v9 = vld [vmem:[%s5087_s5 + $0x1120] sm:$0xff]  ;;  %453 = vst [vmem:[%s5083_s30 + $0x880] sm:$0xff] %v452_v8 }
  0x9b   : >> { %v456_v10 = vld [vmem:[%s5087_s5 + $0x1140] sm:$0xff]  ;;  %455 = vst [vmem:[%s5083_s30 + $0x890] sm:$0xff] %v454_v9 }
  0x9c   : >> { %v458_v11 = vld [vmem:[%s5087_s5 + $0x1160] sm:$0xff]  ;;  %457 = vst [vmem:[%s5083_s30 + $0x8a0] sm:$0xff] %v456_v10 }
  0x9d   : >> { %v460_v12 = vld [vmem:[%s5087_s5 + $0x1180] sm:$0xff]  ;;  %459 = vst [vmem:[%s5083_s30 + $0x8b0] sm:$0xff] %v458_v11 }
  0x9e   : >> { %v462_v13 = vld [vmem:[%s5087_s5 + $0x11a0] sm:$0xff]  ;;  %461 = vst [vmem:[%s5083_s30 + $0x8c0] sm:$0xff] %v460_v12 }
  0x9f   : >> { %v464_v14 = vld [vmem:[%s5087_s5 + $0x11c0] sm:$0xff]  ;;  %463 = vst [vmem:[%s5083_s30 + $0x8d0] sm:$0xff] %v462_v13 }
  0xa0   : >> { %v466_v15 = vld [vmem:[%s5087_s5 + $0x11e0] sm:$0xff]  ;;  %465 = vst [vmem:[%s5083_s30 + $0x8e0] sm:$0xff] %v464_v14 }
  0xa1   : >> { %v468_v16 = vld [vmem:[%s5087_s5 + $0x1200] sm:$0xff]  ;;  %467 = vst [vmem:[%s5083_s30 + $0x8f0] sm:$0xff] %v466_v15 }
  0xa2   : >> { %v470_v17 = vld [vmem:[%s5087_s5 + $0x1220] sm:$0xff]  ;;  %469 = vst [vmem:[%s5083_s30 + $0x900] sm:$0xff] %v468_v16 }
  0xa3   : >> { %v472_v18 = vld [vmem:[%s5087_s5 + $0x1240] sm:$0xff]  ;;  %471 = vst [vmem:[%s5083_s30 + $0x910] sm:$0xff] %v470_v17 }
  0xa4   : >> { %v474_v19 = vld [vmem:[%s5087_s5 + $0x1260] sm:$0xff]  ;;  %473 = vst [vmem:[%s5083_s30 + $0x920] sm:$0xff] %v472_v18 }
  0xa5   : >> { %v476_v20 = vld [vmem:[%s5087_s5 + $0x1280] sm:$0xff]  ;;  %475 = vst [vmem:[%s5083_s30 + $0x930] sm:$0xff] %v474_v19 }
  0xa6   : >> { %v478_v21 = vld [vmem:[%s5087_s5 + $0x12a0] sm:$0xff]  ;;  %477 = vst [vmem:[%s5083_s30 + $0x940] sm:$0xff] %v476_v20 }
  0xa7   : >> { %v480_v22 = vld [vmem:[%s5087_s5 + $0x12c0] sm:$0xff]  ;;  %479 = vst [vmem:[%s5083_s30 + $0x950] sm:$0xff] %v478_v21 }
  0xa8   : >> { %v482_v23 = vld [vmem:[%s5087_s5 + $0x12e0] sm:$0xff]  ;;  %481 = vst [vmem:[%s5083_s30 + $0x960] sm:$0xff] %v480_v22 }
  0xa9   : >> { %v484_v24 = vld [vmem:[%s5087_s5 + $0x1300] sm:$0xff]  ;;  %483 = vst [vmem:[%s5083_s30 + $0x970] sm:$0xff] %v482_v23 }
  0xaa   : >> { %v486_v25 = vld [vmem:[%s5087_s5 + $0x1320] sm:$0xff]  ;;  %485 = vst [vmem:[%s5083_s30 + $0x980] sm:$0xff] %v484_v24 }
  0xab   : >> { %v488_v26 = vld [vmem:[%s5087_s5 + $0x1340] sm:$0xff]  ;;  %487 = vst [vmem:[%s5083_s30 + $0x990] sm:$0xff] %v486_v25 }
  0xac   : >> { %v490_v27 = vld [vmem:[%s5087_s5 + $0x1360] sm:$0xff]  ;;  %489 = vst [vmem:[%s5083_s30 + $0x9a0] sm:$0xff] %v488_v26 }
  0xad   : >> { %v492_v28 = vld [vmem:[%s5087_s5 + $0x1380] sm:$0xff]  ;;  %491 = vst [vmem:[%s5083_s30 + $0x9b0] sm:$0xff] %v490_v27 }
  0xae   : >> { %v494_v29 = vld [vmem:[%s5087_s5 + $0x13a0] sm:$0xff]  ;;  %493 = vst [vmem:[%s5083_s30 + $0x9c0] sm:$0xff] %v492_v28 }
  0xaf   : >> { %v496_v30 = vld [vmem:[%s5087_s5 + $0x13c0] sm:$0xff]  ;;  %495 = vst [vmem:[%s5083_s30 + $0x9d0] sm:$0xff] %v494_v29 }
  0xb0   : >> { %v498_v31 = vld [vmem:[%s5087_s5 + $0x13e0] sm:$0xff]  ;;  %497 = vst [vmem:[%s5083_s30 + $0x9e0] sm:$0xff] %v496_v30 }
  0xb1   : >> { %v500_v32 = vld [vmem:[%s5087_s5 + $0x1400] sm:$0xff]  ;;  %499 = vst [vmem:[%s5083_s30 + $0x9f0] sm:$0xff] %v498_v31 }
  0xb2   : >> { %v502_v33 = vld [vmem:[%s5087_s5 + $0x1420] sm:$0xff]  ;;  %501 = vst [vmem:[%s5083_s30 + $0xa00] sm:$0xff] %v500_v32 }
  0xb3   : >> { %v504_v34 = vld [vmem:[%s5087_s5 + $0x1440] sm:$0xff]  ;;  %503 = vst [vmem:[%s5083_s30 + $0xa10] sm:$0xff] %v502_v33 }
  0xb4   : >> { %v506_v35 = vld [vmem:[%s5087_s5 + $0x1460] sm:$0xff]  ;;  %505 = vst [vmem:[%s5083_s30 + $0xa20] sm:$0xff] %v504_v34 }
  0xb5   : >> { %v508_v36 = vld [vmem:[%s5087_s5 + $0x1480] sm:$0xff]  ;;  %507 = vst [vmem:[%s5083_s30 + $0xa30] sm:$0xff] %v506_v35 }
  0xb6   : >> { %v510_v37 = vld [vmem:[%s5087_s5 + $0x14a0] sm:$0xff]  ;;  %509 = vst [vmem:[%s5083_s30 + $0xa40] sm:$0xff] %v508_v36 }
  0xb7   : >> { %v512_v38 = vld [vmem:[%s5087_s5 + $0x14c0] sm:$0xff]  ;;  %511 = vst [vmem:[%s5083_s30 + $0xa50] sm:$0xff] %v510_v37 }
  0xb8   : >> { %v514_v39 = vld [vmem:[%s5087_s5 + $0x14e0] sm:$0xff]  ;;  %513 = vst [vmem:[%s5083_s30 + $0xa60] sm:$0xff] %v512_v38 }
  0xb9   : >> { %v516_v40 = vld [vmem:[%s5087_s5 + $0x1500] sm:$0xff]  ;;  %515 = vst [vmem:[%s5083_s30 + $0xa70] sm:$0xff] %v514_v39 }
  0xba   : >> { %v518_v41 = vld [vmem:[%s5087_s5 + $0x1520] sm:$0xff]  ;;  %517 = vst [vmem:[%s5083_s30 + $0xa80] sm:$0xff] %v516_v40 }
  0xbb   : >> { %v520_v42 = vld [vmem:[%s5087_s5 + $0x1540] sm:$0xff]  ;;  %519 = vst [vmem:[%s5083_s30 + $0xa90] sm:$0xff] %v518_v41 }
  0xbc   : >> { %v522_v43 = vld [vmem:[%s5087_s5 + $0x1560] sm:$0xff]  ;;  %521 = vst [vmem:[%s5083_s30 + $0xaa0] sm:$0xff] %v520_v42 }
  0xbd   : >> { %v524_v44 = vld [vmem:[%s5087_s5 + $0x1580] sm:$0xff]  ;;  %523 = vst [vmem:[%s5083_s30 + $0xab0] sm:$0xff] %v522_v43 }
  0xbe   : >> { %v526_v45 = vld [vmem:[%s5087_s5 + $0x15a0] sm:$0xff]  ;;  %525 = vst [vmem:[%s5083_s30 + $0xac0] sm:$0xff] %v524_v44 }
  0xbf   : >> { %v528_v46 = vld [vmem:[%s5087_s5 + $0x15c0] sm:$0xff]  ;;  %527 = vst [vmem:[%s5083_s30 + $0xad0] sm:$0xff] %v526_v45 }
  0xc0   : >> { %v530_v47 = vld [vmem:[%s5087_s5 + $0x15e0] sm:$0xff]  ;;  %529 = vst [vmem:[%s5083_s30 + $0xae0] sm:$0xff] %v528_v46 }
  0xc1   : >> { %v532_v48 = vld [vmem:[%s5087_s5 + $0x1600] sm:$0xff]  ;;  %531 = vst [vmem:[%s5083_s30 + $0xaf0] sm:$0xff] %v530_v47 }
  0xc2   : >> { %v534_v49 = vld [vmem:[%s5087_s5 + $0x1620] sm:$0xff]  ;;  %533 = vst [vmem:[%s5083_s30 + $0xb00] sm:$0xff] %v532_v48 }
  0xc3   : >> { %v536_v50 = vld [vmem:[%s5087_s5 + $0x1640] sm:$0xff]  ;;  %535 = vst [vmem:[%s5083_s30 + $0xb10] sm:$0xff] %v534_v49 }
  0xc4   : >> { %v538_v51 = vld [vmem:[%s5087_s5 + $0x1660] sm:$0xff]  ;;  %537 = vst [vmem:[%s5083_s30 + $0xb20] sm:$0xff] %v536_v50 }
  0xc5   : >> { %v540_v52 = vld [vmem:[%s5087_s5 + $0x1680] sm:$0xff]  ;;  %539 = vst [vmem:[%s5083_s30 + $0xb30] sm:$0xff] %v538_v51 }
  0xc6   : >> { %v542_v53 = vld [vmem:[%s5087_s5 + $0x16a0] sm:$0xff]  ;;  %541 = vst [vmem:[%s5083_s30 + $0xb40] sm:$0xff] %v540_v52 }
  0xc7   : >> { %v544_v54 = vld [vmem:[%s5087_s5 + $0x16c0] sm:$0xff]  ;;  %543 = vst [vmem:[%s5083_s30 + $0xb50] sm:$0xff] %v542_v53 }
  0xc8   : >> { %v546_v55 = vld [vmem:[%s5087_s5 + $0x16e0] sm:$0xff]  ;;  %545 = vst [vmem:[%s5083_s30 + $0xb60] sm:$0xff] %v544_v54 }
  0xc9   : >> { %v548_v56 = vld [vmem:[%s5087_s5 + $0x1700] sm:$0xff]  ;;  %547 = vst [vmem:[%s5083_s30 + $0xb70] sm:$0xff] %v546_v55 }
  0xca   : >> { %v550_v57 = vld [vmem:[%s5087_s5 + $0x1720] sm:$0xff]  ;;  %549 = vst [vmem:[%s5083_s30 + $0xb80] sm:$0xff] %v548_v56 }
  0xcb   : >> { %v552_v58 = vld [vmem:[%s5087_s5 + $0x1740] sm:$0xff]  ;;  %551 = vst [vmem:[%s5083_s30 + $0xb90] sm:$0xff] %v550_v57 }
  0xcc   : >> { %v554_v59 = vld [vmem:[%s5087_s5 + $0x1760] sm:$0xff]  ;;  %553 = vst [vmem:[%s5083_s30 + $0xba0] sm:$0xff] %v552_v58 }
  0xcd   : >> { %v556_v60 = vld [vmem:[%s5087_s5 + $0x1780] sm:$0xff]  ;;  %555 = vst [vmem:[%s5083_s30 + $0xbb0] sm:$0xff] %v554_v59 }
  0xce   : >> { %v558_v61 = vld [vmem:[%s5087_s5 + $0x17a0] sm:$0xff]  ;;  %557 = vst [vmem:[%s5083_s30 + $0xbc0] sm:$0xff] %v556_v60 }
  0xcf   : >> { %v560_v62 = vld [vmem:[%s5087_s5 + $0x17c0] sm:$0xff]  ;;  %559 = vst [vmem:[%s5083_s30 + $0xbd0] sm:$0xff] %v558_v61 }
  0xd0   : >> { %v562_v63 = vld [vmem:[%s5087_s5 + $0x17e0] sm:$0xff]  ;;  %561 = vst [vmem:[%s5083_s30 + $0xbe0] sm:$0xff] %v560_v62 }
  0xd1   : >> { %v564_v0 = vld [vmem:[%s5087_s5 + $0x1800] sm:$0xff]  ;;  %563 = vst [vmem:[%s5083_s30 + $0xbf0] sm:$0xff] %v562_v63 }
  0xd2   : >> { %v566_v1 = vld [vmem:[%s5087_s5 + $0x1820] sm:$0xff]  ;;  %565 = vst [vmem:[%s5083_s30 + $0xc00] sm:$0xff] %v564_v0 }
  0xd3   : >> { %v568_v2 = vld [vmem:[%s5087_s5 + $0x1840] sm:$0xff]  ;;  %567 = vst [vmem:[%s5083_s30 + $0xc10] sm:$0xff] %v566_v1 }
  0xd4   : >> { %v570_v3 = vld [vmem:[%s5087_s5 + $0x1860] sm:$0xff]  ;;  %569 = vst [vmem:[%s5083_s30 + $0xc20] sm:$0xff] %v568_v2 }
  0xd5   : >> { %v572_v4 = vld [vmem:[%s5087_s5 + $0x1880] sm:$0xff]  ;;  %571 = vst [vmem:[%s5083_s30 + $0xc30] sm:$0xff] %v570_v3 }
  0xd6   : >> { %v574_v5 = vld [vmem:[%s5087_s5 + $0x18a0] sm:$0xff]  ;;  %573 = vst [vmem:[%s5083_s30 + $0xc40] sm:$0xff] %v572_v4 }
  0xd7   : >> { %v576_v6 = vld [vmem:[%s5087_s5 + $0x18c0] sm:$0xff]  ;;  %575 = vst [vmem:[%s5083_s30 + $0xc50] sm:$0xff] %v574_v5 }
  0xd8   : >> { %v578_v7 = vld [vmem:[%s5087_s5 + $0x18e0] sm:$0xff]  ;;  %577 = vst [vmem:[%s5083_s30 + $0xc60] sm:$0xff] %v576_v6 }
  0xd9   : >> { %v580_v8 = vld [vmem:[%s5087_s5 + $0x1900] sm:$0xff]  ;;  %579 = vst [vmem:[%s5083_s30 + $0xc70] sm:$0xff] %v578_v7 }
  0xda   : >> { %v582_v9 = vld [vmem:[%s5087_s5 + $0x1920] sm:$0xff]  ;;  %581 = vst [vmem:[%s5083_s30 + $0xc80] sm:$0xff] %v580_v8 }
  0xdb   : >> { %v584_v10 = vld [vmem:[%s5087_s5 + $0x1940] sm:$0xff]  ;;  %583 = vst [vmem:[%s5083_s30 + $0xc90] sm:$0xff] %v582_v9 }
  0xdc   : >> { %v586_v11 = vld [vmem:[%s5087_s5 + $0x1960] sm:$0xff]  ;;  %585 = vst [vmem:[%s5083_s30 + $0xca0] sm:$0xff] %v584_v10 }
  0xdd   : >> { %v588_v12 = vld [vmem:[%s5087_s5 + $0x1980] sm:$0xff]  ;;  %587 = vst [vmem:[%s5083_s30 + $0xcb0] sm:$0xff] %v586_v11 }
  0xde   : >> { %v590_v13 = vld [vmem:[%s5087_s5 + $0x19a0] sm:$0xff]  ;;  %589 = vst [vmem:[%s5083_s30 + $0xcc0] sm:$0xff] %v588_v12 }
  0xdf   : >> { %v592_v14 = vld [vmem:[%s5087_s5 + $0x19c0] sm:$0xff]  ;;  %591 = vst [vmem:[%s5083_s30 + $0xcd0] sm:$0xff] %v590_v13 }
  0xe0   : >> { %v594_v15 = vld [vmem:[%s5087_s5 + $0x19e0] sm:$0xff]  ;;  %593 = vst [vmem:[%s5083_s30 + $0xce0] sm:$0xff] %v592_v14 }
  0xe1   : >> { %v596_v16 = vld [vmem:[%s5087_s5 + $0x1a00] sm:$0xff]  ;;  %595 = vst [vmem:[%s5083_s30 + $0xcf0] sm:$0xff] %v594_v15 }
  0xe2   : >> { %v598_v17 = vld [vmem:[%s5087_s5 + $0x1a20] sm:$0xff]  ;;  %597 = vst [vmem:[%s5083_s30 + $0xd00] sm:$0xff] %v596_v16 }
  0xe3   : >> { %v600_v18 = vld [vmem:[%s5087_s5 + $0x1a40] sm:$0xff]  ;;  %599 = vst [vmem:[%s5083_s30 + $0xd10] sm:$0xff] %v598_v17 }
  0xe4   : >> { %v602_v19 = vld [vmem:[%s5087_s5 + $0x1a60] sm:$0xff]  ;;  %601 = vst [vmem:[%s5083_s30 + $0xd20] sm:$0xff] %v600_v18 }
  0xe5   : >> { %v604_v20 = vld [vmem:[%s5087_s5 + $0x1a80] sm:$0xff]  ;;  %603 = vst [vmem:[%s5083_s30 + $0xd30] sm:$0xff] %v602_v19 }
  0xe6   : >> { %v606_v21 = vld [vmem:[%s5087_s5 + $0x1aa0] sm:$0xff]  ;;  %605 = vst [vmem:[%s5083_s30 + $0xd40] sm:$0xff] %v604_v20 }
  0xe7   : >> { %v608_v22 = vld [vmem:[%s5087_s5 + $0x1ac0] sm:$0xff]  ;;  %607 = vst [vmem:[%s5083_s30 + $0xd50] sm:$0xff] %v606_v21 }
  0xe8   : >> { %v610_v23 = vld [vmem:[%s5087_s5 + $0x1ae0] sm:$0xff]  ;;  %609 = vst [vmem:[%s5083_s30 + $0xd60] sm:$0xff] %v608_v22 }
  0xe9   : >> { %v612_v24 = vld [vmem:[%s5087_s5 + $0x1b00] sm:$0xff]  ;;  %611 = vst [vmem:[%s5083_s30 + $0xd70] sm:$0xff] %v610_v23 }
  0xea   : >> { %v614_v25 = vld [vmem:[%s5087_s5 + $0x1b20] sm:$0xff]  ;;  %613 = vst [vmem:[%s5083_s30 + $0xd80] sm:$0xff] %v612_v24 }
  0xeb   : >> { %v616_v26 = vld [vmem:[%s5087_s5 + $0x1b40] sm:$0xff]  ;;  %615 = vst [vmem:[%s5083_s30 + $0xd90] sm:$0xff] %v614_v25 }
  0xec   : >> { %v618_v27 = vld [vmem:[%s5087_s5 + $0x1b60] sm:$0xff]  ;;  %617 = vst [vmem:[%s5083_s30 + $0xda0] sm:$0xff] %v616_v26 }
  0xed   : >> { %v620_v28 = vld [vmem:[%s5087_s5 + $0x1b80] sm:$0xff]  ;;  %619 = vst [vmem:[%s5083_s30 + $0xdb0] sm:$0xff] %v618_v27 }
  0xee   : >> { %v622_v29 = vld [vmem:[%s5087_s5 + $0x1ba0] sm:$0xff]  ;;  %621 = vst [vmem:[%s5083_s30 + $0xdc0] sm:$0xff] %v620_v28 }
  0xef   : >> { %v624_v30 = vld [vmem:[%s5087_s5 + $0x1bc0] sm:$0xff]  ;;  %623 = vst [vmem:[%s5083_s30 + $0xdd0] sm:$0xff] %v622_v29 }
  0xf0   : >> { %v626_v31 = vld [vmem:[%s5087_s5 + $0x1be0] sm:$0xff]  ;;  %625 = vst [vmem:[%s5083_s30 + $0xde0] sm:$0xff] %v624_v30 }
  0xf1   : >> { %v628_v32 = vld [vmem:[%s5087_s5 + $0x1c00] sm:$0xff]  ;;  %627 = vst [vmem:[%s5083_s30 + $0xdf0] sm:$0xff] %v626_v31 }
  0xf2   : >> { %v630_v33 = vld [vmem:[%s5087_s5 + $0x1c20] sm:$0xff]  ;;  %629 = vst [vmem:[%s5083_s30 + $0xe00] sm:$0xff] %v628_v32 }
  0xf3   : >> { %v632_v34 = vld [vmem:[%s5087_s5 + $0x1c40] sm:$0xff]  ;;  %631 = vst [vmem:[%s5083_s30 + $0xe10] sm:$0xff] %v630_v33 }
  0xf4   : >> { %v634_v35 = vld [vmem:[%s5087_s5 + $0x1c60] sm:$0xff]  ;;  %633 = vst [vmem:[%s5083_s30 + $0xe20] sm:$0xff] %v632_v34 }
  0xf5   : >> { %v636_v36 = vld [vmem:[%s5087_s5 + $0x1c80] sm:$0xff]  ;;  %635 = vst [vmem:[%s5083_s30 + $0xe30] sm:$0xff] %v634_v35 }
  0xf6   : >> { %v638_v37 = vld [vmem:[%s5087_s5 + $0x1ca0] sm:$0xff]  ;;  %637 = vst [vmem:[%s5083_s30 + $0xe40] sm:$0xff] %v636_v36 }
  0xf7   : >> { %v640_v38 = vld [vmem:[%s5087_s5 + $0x1cc0] sm:$0xff]  ;;  %639 = vst [vmem:[%s5083_s30 + $0xe50] sm:$0xff] %v638_v37 }
  0xf8   : >> { %v642_v39 = vld [vmem:[%s5087_s5 + $0x1ce0] sm:$0xff]  ;;  %641 = vst [vmem:[%s5083_s30 + $0xe60] sm:$0xff] %v640_v38 }
  0xf9   : >> { %v644_v40 = vld [vmem:[%s5087_s5 + $0x1d00] sm:$0xff]  ;;  %643 = vst [vmem:[%s5083_s30 + $0xe70] sm:$0xff] %v642_v39 }
  0xfa   : >> { %v646_v41 = vld [vmem:[%s5087_s5 + $0x1d20] sm:$0xff]  ;;  %645 = vst [vmem:[%s5083_s30 + $0xe80] sm:$0xff] %v644_v40 }
  0xfb   : >> { %v648_v42 = vld [vmem:[%s5087_s5 + $0x1d40] sm:$0xff]  ;;  %647 = vst [vmem:[%s5083_s30 + $0xe90] sm:$0xff] %v646_v41 }
  0xfc   : >> { %v650_v43 = vld [vmem:[%s5087_s5 + $0x1d60] sm:$0xff]  ;;  %649 = vst [vmem:[%s5083_s30 + $0xea0] sm:$0xff] %v648_v42 }
  0xfd   : >> { %v652_v44 = vld [vmem:[%s5087_s5 + $0x1d80] sm:$0xff]  ;;  %651 = vst [vmem:[%s5083_s30 + $0xeb0] sm:$0xff] %v650_v43 }
  0xfe   : >> { %v654_v45 = vld [vmem:[%s5087_s5 + $0x1da0] sm:$0xff]  ;;  %653 = vst [vmem:[%s5083_s30 + $0xec0] sm:$0xff] %v652_v44 }
  0xff   : >> { %v656_v46 = vld [vmem:[%s5087_s5 + $0x1dc0] sm:$0xff]  ;;  %655 = vst [vmem:[%s5083_s30 + $0xed0] sm:$0xff] %v654_v45 }
 0x100   : >> { %v658_v47 = vld [vmem:[%s5087_s5 + $0x1de0] sm:$0xff]  ;;  %657 = vst [vmem:[%s5083_s30 + $0xee0] sm:$0xff] %v656_v46 }
 0x101   : >> { %v660_v48 = vld [vmem:[%s5087_s5 + $0x1e00] sm:$0xff]  ;;  %659 = vst [vmem:[%s5083_s30 + $0xef0] sm:$0xff] %v658_v47 }
 0x102   : >> { %v662_v49 = vld [vmem:[%s5087_s5 + $0x1e20] sm:$0xff]  ;;  %661 = vst [vmem:[%s5083_s30 + $0xf00] sm:$0xff] %v660_v48 }
 0x103   : >> { %v664_v50 = vld [vmem:[%s5087_s5 + $0x1e40] sm:$0xff]  ;;  %663 = vst [vmem:[%s5083_s30 + $0xf10] sm:$0xff] %v662_v49 }
 0x104   : >> { %v666_v51 = vld [vmem:[%s5087_s5 + $0x1e60] sm:$0xff]  ;;  %665 = vst [vmem:[%s5083_s30 + $0xf20] sm:$0xff] %v664_v50 }
 0x105   : >> { %v668_v52 = vld [vmem:[%s5087_s5 + $0x1e80] sm:$0xff]  ;;  %667 = vst [vmem:[%s5083_s30 + $0xf30] sm:$0xff] %v666_v51 }
 0x106   : >> { %v670_v53 = vld [vmem:[%s5087_s5 + $0x1ea0] sm:$0xff]  ;;  %669 = vst [vmem:[%s5083_s30 + $0xf40] sm:$0xff] %v668_v52 }
 0x107   : >> { %v672_v54 = vld [vmem:[%s5087_s5 + $0x1ec0] sm:$0xff]  ;;  %671 = vst [vmem:[%s5083_s30 + $0xf50] sm:$0xff] %v670_v53 }
 0x108   : >> { %v674_v55 = vld [vmem:[%s5087_s5 + $0x1ee0] sm:$0xff]  ;;  %673 = vst [vmem:[%s5083_s30 + $0xf60] sm:$0xff] %v672_v54 }
 0x109   : >> { %v676_v56 = vld [vmem:[%s5087_s5 + $0x1f00] sm:$0xff]  ;;  %675 = vst [vmem:[%s5083_s30 + $0xf70] sm:$0xff] %v674_v55 }
 0x10a   : >> { %v678_v57 = vld [vmem:[%s5087_s5 + $0x1f20] sm:$0xff]  ;;  %677 = vst [vmem:[%s5083_s30 + $0xf80] sm:$0xff] %v676_v56 }
 0x10b   : >> { %v680_v58 = vld [vmem:[%s5087_s5 + $0x1f40] sm:$0xff]  ;;  %679 = vst [vmem:[%s5083_s30 + $0xf90] sm:$0xff] %v678_v57 }
 0x10c   : >> { %v682_v59 = vld [vmem:[%s5087_s5 + $0x1f60] sm:$0xff]  ;;  %681 = vst [vmem:[%s5083_s30 + $0xfa0] sm:$0xff] %v680_v58 }
 0x10d   : >> { %v684_v60 = vld [vmem:[%s5087_s5 + $0x1f80] sm:$0xff]  ;;  %683 = vst [vmem:[%s5083_s30 + $0xfb0] sm:$0xff] %v682_v59 }
 0x10e   : >> { %v686_v61 = vld [vmem:[%s5087_s5 + $0x1fa0] sm:$0xff]  ;;  %685 = vst [vmem:[%s5083_s30 + $0xfc0] sm:$0xff] %v684_v60 }
 0x10f   : >> { %v688_v62 = vld [vmem:[%s5087_s5 + $0x1fc0] sm:$0xff]  ;;  %687 = vst [vmem:[%s5083_s30 + $0xfd0] sm:$0xff] %v686_v61 }
 0x110   : >> { %v690_v63 = vld [vmem:[%s5087_s5 + $0x1fe0] sm:$0xff]  ;;  %689 = vst [vmem:[%s5083_s30 + $0xfe0] sm:$0xff] %v688_v62 }
 0x111   : >> { %v692_v0 = vld [vmem:[%s5087_s5 + $0x2000] sm:$0xff]  ;;  %691 = vst [vmem:[%s5083_s30 + $0xff0] sm:$0xff] %v690_v63 }
 0x112   : >> { %v694_v1 = vld [vmem:[%s5087_s5 + $0x2020] sm:$0xff]  ;;  %693 = vst [vmem:[%s5083_s30 + $0x1000] sm:$0xff] %v692_v0 }
 0x113   : >> { %v696_v2 = vld [vmem:[%s5087_s5 + $0x2040] sm:$0xff]  ;;  %695 = vst [vmem:[%s5083_s30 + $0x1010] sm:$0xff] %v694_v1 }
 0x114   : >> { %v698_v3 = vld [vmem:[%s5087_s5 + $0x2060] sm:$0xff]  ;;  %697 = vst [vmem:[%s5083_s30 + $0x1020] sm:$0xff] %v696_v2 }
 0x115   : >> { %v700_v4 = vld [vmem:[%s5087_s5 + $0x2080] sm:$0xff]  ;;  %699 = vst [vmem:[%s5083_s30 + $0x1030] sm:$0xff] %v698_v3 }
 0x116   : >> { %v702_v5 = vld [vmem:[%s5087_s5 + $0x20a0] sm:$0xff]  ;;  %701 = vst [vmem:[%s5083_s30 + $0x1040] sm:$0xff] %v700_v4 }
 0x117   : >> { %v704_v6 = vld [vmem:[%s5087_s5 + $0x20c0] sm:$0xff]  ;;  %703 = vst [vmem:[%s5083_s30 + $0x1050] sm:$0xff] %v702_v5 }
 0x118   : >> { %v706_v7 = vld [vmem:[%s5087_s5 + $0x20e0] sm:$0xff]  ;;  %705 = vst [vmem:[%s5083_s30 + $0x1060] sm:$0xff] %v704_v6 }
 0x119   : >> { %v708_v8 = vld [vmem:[%s5087_s5 + $0x2100] sm:$0xff]  ;;  %707 = vst [vmem:[%s5083_s30 + $0x1070] sm:$0xff] %v706_v7 }
 0x11a   : >> { %v710_v9 = vld [vmem:[%s5087_s5 + $0x2120] sm:$0xff]  ;;  %709 = vst [vmem:[%s5083_s30 + $0x1080] sm:$0xff] %v708_v8 }
 0x11b   : >> { %v712_v10 = vld [vmem:[%s5087_s5 + $0x2140] sm:$0xff]  ;;  %711 = vst [vmem:[%s5083_s30 + $0x1090] sm:$0xff] %v710_v9 }
 0x11c   : >> { %v714_v11 = vld [vmem:[%s5087_s5 + $0x2160] sm:$0xff]  ;;  %713 = vst [vmem:[%s5083_s30 + $0x10a0] sm:$0xff] %v712_v10 }
 0x11d   : >> { %v716_v12 = vld [vmem:[%s5087_s5 + $0x2180] sm:$0xff]  ;;  %715 = vst [vmem:[%s5083_s30 + $0x10b0] sm:$0xff] %v714_v11 }
 0x11e   : >> { %v718_v13 = vld [vmem:[%s5087_s5 + $0x21a0] sm:$0xff]  ;;  %717 = vst [vmem:[%s5083_s30 + $0x10c0] sm:$0xff] %v716_v12 }
 0x11f   : >> { %v720_v14 = vld [vmem:[%s5087_s5 + $0x21c0] sm:$0xff]  ;;  %719 = vst [vmem:[%s5083_s30 + $0x10d0] sm:$0xff] %v718_v13 }
 0x120   : >> { %v722_v15 = vld [vmem:[%s5087_s5 + $0x21e0] sm:$0xff]  ;;  %721 = vst [vmem:[%s5083_s30 + $0x10e0] sm:$0xff] %v720_v14 }
 0x121   : >> { %v724_v16 = vld [vmem:[%s5087_s5 + $0x2200] sm:$0xff]  ;;  %723 = vst [vmem:[%s5083_s30 + $0x10f0] sm:$0xff] %v722_v15 }
 0x122   : >> { %v726_v17 = vld [vmem:[%s5087_s5 + $0x2220] sm:$0xff]  ;;  %725 = vst [vmem:[%s5083_s30 + $0x1100] sm:$0xff] %v724_v16 }
 0x123   : >> { %v728_v18 = vld [vmem:[%s5087_s5 + $0x2240] sm:$0xff]  ;;  %727 = vst [vmem:[%s5083_s30 + $0x1110] sm:$0xff] %v726_v17 }
 0x124   : >> { %v730_v19 = vld [vmem:[%s5087_s5 + $0x2260] sm:$0xff]  ;;  %729 = vst [vmem:[%s5083_s30 + $0x1120] sm:$0xff] %v728_v18 }
 0x125   : >> { %v732_v20 = vld [vmem:[%s5087_s5 + $0x2280] sm:$0xff]  ;;  %731 = vst [vmem:[%s5083_s30 + $0x1130] sm:$0xff] %v730_v19 }
 0x126   : >> { %v734_v21 = vld [vmem:[%s5087_s5 + $0x22a0] sm:$0xff]  ;;  %733 = vst [vmem:[%s5083_s30 + $0x1140] sm:$0xff] %v732_v20 }
 0x127   : >> { %v736_v22 = vld [vmem:[%s5087_s5 + $0x22c0] sm:$0xff]  ;;  %735 = vst [vmem:[%s5083_s30 + $0x1150] sm:$0xff] %v734_v21 }
 0x128   : >> { %v738_v23 = vld [vmem:[%s5087_s5 + $0x22e0] sm:$0xff]  ;;  %737 = vst [vmem:[%s5083_s30 + $0x1160] sm:$0xff] %v736_v22 }
 0x129   : >> { %v740_v24 = vld [vmem:[%s5087_s5 + $0x2300] sm:$0xff]  ;;  %739 = vst [vmem:[%s5083_s30 + $0x1170] sm:$0xff] %v738_v23 }
 0x12a   : >> { %v742_v25 = vld [vmem:[%s5087_s5 + $0x2320] sm:$0xff]  ;;  %741 = vst [vmem:[%s5083_s30 + $0x1180] sm:$0xff] %v740_v24 }
 0x12b   : >> { %v744_v26 = vld [vmem:[%s5087_s5 + $0x2340] sm:$0xff]  ;;  %743 = vst [vmem:[%s5083_s30 + $0x1190] sm:$0xff] %v742_v25 }
 0x12c   : >> { %v746_v27 = vld [vmem:[%s5087_s5 + $0x2360] sm:$0xff]  ;;  %745 = vst [vmem:[%s5083_s30 + $0x11a0] sm:$0xff] %v744_v26 }
 0x12d   : >> { %v748_v28 = vld [vmem:[%s5087_s5 + $0x2380] sm:$0xff]  ;;  %747 = vst [vmem:[%s5083_s30 + $0x11b0] sm:$0xff] %v746_v27 }
 0x12e   : >> { %v750_v29 = vld [vmem:[%s5087_s5 + $0x23a0] sm:$0xff]  ;;  %749 = vst [vmem:[%s5083_s30 + $0x11c0] sm:$0xff] %v748_v28 }
 0x12f   : >> { %v752_v30 = vld [vmem:[%s5087_s5 + $0x23c0] sm:$0xff]  ;;  %751 = vst [vmem:[%s5083_s30 + $0x11d0] sm:$0xff] %v750_v29 }
 0x130   : >> { %v754_v31 = vld [vmem:[%s5087_s5 + $0x23e0] sm:$0xff]  ;;  %753 = vst [vmem:[%s5083_s30 + $0x11e0] sm:$0xff] %v752_v30 }
 0x131   : >> { %v756_v32 = vld [vmem:[%s5087_s5 + $0x2400] sm:$0xff]  ;;  %755 = vst [vmem:[%s5083_s30 + $0x11f0] sm:$0xff] %v754_v31 }
 0x132   : >> { %v758_v33 = vld [vmem:[%s5087_s5 + $0x2420] sm:$0xff]  ;;  %757 = vst [vmem:[%s5083_s30 + $0x1200] sm:$0xff] %v756_v32 }
 0x133   : >> { %v760_v34 = vld [vmem:[%s5087_s5 + $0x2440] sm:$0xff]  ;;  %759 = vst [vmem:[%s5083_s30 + $0x1210] sm:$0xff] %v758_v33 }
 0x134   : >> { %v762_v35 = vld [vmem:[%s5087_s5 + $0x2460] sm:$0xff]  ;;  %761 = vst [vmem:[%s5083_s30 + $0x1220] sm:$0xff] %v760_v34 }
 0x135   : >> { %v764_v36 = vld [vmem:[%s5087_s5 + $0x2480] sm:$0xff]  ;;  %763 = vst [vmem:[%s5083_s30 + $0x1230] sm:$0xff] %v762_v35 }
 0x136   : >> { %v766_v37 = vld [vmem:[%s5087_s5 + $0x24a0] sm:$0xff]  ;;  %765 = vst [vmem:[%s5083_s30 + $0x1240] sm:$0xff] %v764_v36 }
 0x137   : >> { %v768_v38 = vld [vmem:[%s5087_s5 + $0x24c0] sm:$0xff]  ;;  %767 = vst [vmem:[%s5083_s30 + $0x1250] sm:$0xff] %v766_v37 }
 0x138   : >> { %v770_v39 = vld [vmem:[%s5087_s5 + $0x24e0] sm:$0xff]  ;;  %769 = vst [vmem:[%s5083_s30 + $0x1260] sm:$0xff] %v768_v38 }
 0x139   : >> { %v772_v40 = vld [vmem:[%s5087_s5 + $0x2500] sm:$0xff]  ;;  %771 = vst [vmem:[%s5083_s30 + $0x1270] sm:$0xff] %v770_v39 }
 0x13a   : >> { %v774_v41 = vld [vmem:[%s5087_s5 + $0x2520] sm:$0xff]  ;;  %773 = vst [vmem:[%s5083_s30 + $0x1280] sm:$0xff] %v772_v40 }
 0x13b   : >> { %v776_v42 = vld [vmem:[%s5087_s5 + $0x2540] sm:$0xff]  ;;  %775 = vst [vmem:[%s5083_s30 + $0x1290] sm:$0xff] %v774_v41 }
 0x13c   : >> { %v778_v43 = vld [vmem:[%s5087_s5 + $0x2560] sm:$0xff]  ;;  %777 = vst [vmem:[%s5083_s30 + $0x12a0] sm:$0xff] %v776_v42 }
 0x13d   : >> { %v780_v44 = vld [vmem:[%s5087_s5 + $0x2580] sm:$0xff]  ;;  %779 = vst [vmem:[%s5083_s30 + $0x12b0] sm:$0xff] %v778_v43 }
 0x13e   : >> { %v782_v45 = vld [vmem:[%s5087_s5 + $0x25a0] sm:$0xff]  ;;  %781 = vst [vmem:[%s5083_s30 + $0x12c0] sm:$0xff] %v780_v44 }
 0x13f   : >> { %v784_v46 = vld [vmem:[%s5087_s5 + $0x25c0] sm:$0xff]  ;;  %783 = vst [vmem:[%s5083_s30 + $0x12d0] sm:$0xff] %v782_v45 }
 0x140   : >> { %v786_v47 = vld [vmem:[%s5087_s5 + $0x25e0] sm:$0xff]  ;;  %785 = vst [vmem:[%s5083_s30 + $0x12e0] sm:$0xff] %v784_v46 }
 0x141   : >> { %v788_v48 = vld [vmem:[%s5087_s5 + $0x2600] sm:$0xff]  ;;  %787 = vst [vmem:[%s5083_s30 + $0x12f0] sm:$0xff] %v786_v47 }
 0x142   : >> { %v790_v49 = vld [vmem:[%s5087_s5 + $0x2620] sm:$0xff]  ;;  %789 = vst [vmem:[%s5083_s30 + $0x1300] sm:$0xff] %v788_v48 }
 0x143   : >> { %v792_v50 = vld [vmem:[%s5087_s5 + $0x2640] sm:$0xff]  ;;  %791 = vst [vmem:[%s5083_s30 + $0x1310] sm:$0xff] %v790_v49 }
 0x144   : >> { %v794_v51 = vld [vmem:[%s5087_s5 + $0x2660] sm:$0xff]  ;;  %793 = vst [vmem:[%s5083_s30 + $0x1320] sm:$0xff] %v792_v50 }
 0x145   : >> { %v796_v52 = vld [vmem:[%s5087_s5 + $0x2680] sm:$0xff]  ;;  %795 = vst [vmem:[%s5083_s30 + $0x1330] sm:$0xff] %v794_v51 }
 0x146   : >> { %v798_v53 = vld [vmem:[%s5087_s5 + $0x26a0] sm:$0xff]  ;;  %797 = vst [vmem:[%s5083_s30 + $0x1340] sm:$0xff] %v796_v52 }
 0x147   : >> { %v800_v54 = vld [vmem:[%s5087_s5 + $0x26c0] sm:$0xff]  ;;  %799 = vst [vmem:[%s5083_s30 + $0x1350] sm:$0xff] %v798_v53 }
 0x148   : >> { %v802_v55 = vld [vmem:[%s5087_s5 + $0x26e0] sm:$0xff]  ;;  %801 = vst [vmem:[%s5083_s30 + $0x1360] sm:$0xff] %v800_v54 }
 0x149   : >> { %v804_v56 = vld [vmem:[%s5087_s5 + $0x2700] sm:$0xff]  ;;  %803 = vst [vmem:[%s5083_s30 + $0x1370] sm:$0xff] %v802_v55 }
 0x14a   : >> { %v806_v57 = vld [vmem:[%s5087_s5 + $0x2720] sm:$0xff]  ;;  %805 = vst [vmem:[%s5083_s30 + $0x1380] sm:$0xff] %v804_v56 }
 0x14b   : >> { %v808_v58 = vld [vmem:[%s5087_s5 + $0x2740] sm:$0xff]  ;;  %807 = vst [vmem:[%s5083_s30 + $0x1390] sm:$0xff] %v806_v57 }
 0x14c   : >> { %v810_v59 = vld [vmem:[%s5087_s5 + $0x2760] sm:$0xff]  ;;  %809 = vst [vmem:[%s5083_s30 + $0x13a0] sm:$0xff] %v808_v58 }
 0x14d   : >> { %v812_v60 = vld [vmem:[%s5087_s5 + $0x2780] sm:$0xff]  ;;  %811 = vst [vmem:[%s5083_s30 + $0x13b0] sm:$0xff] %v810_v59 }
 0x14e   : >> { %v814_v61 = vld [vmem:[%s5087_s5 + $0x27a0] sm:$0xff]  ;;  %813 = vst [vmem:[%s5083_s30 + $0x13c0] sm:$0xff] %v812_v60 }
 0x14f   : >> { %v816_v62 = vld [vmem:[%s5087_s5 + $0x27c0] sm:$0xff]  ;;  %815 = vst [vmem:[%s5083_s30 + $0x13d0] sm:$0xff] %v814_v61 }
 0x150   : >> { %v818_v63 = vld [vmem:[%s5087_s5 + $0x27e0] sm:$0xff]  ;;  %817 = vst [vmem:[%s5083_s30 + $0x13e0] sm:$0xff] %v816_v62 }
 0x151   : >> { %v820_v0 = vld [vmem:[%s5087_s5 + $0x2800] sm:$0xff]  ;;  %819 = vst [vmem:[%s5083_s30 + $0x13f0] sm:$0xff] %v818_v63 }
 0x152   : >> { %v822_v1 = vld [vmem:[%s5087_s5 + $0x2820] sm:$0xff]  ;;  %821 = vst [vmem:[%s5083_s30 + $0x1400] sm:$0xff] %v820_v0 }
 0x153   : >> { %v824_v2 = vld [vmem:[%s5087_s5 + $0x2840] sm:$0xff]  ;;  %823 = vst [vmem:[%s5083_s30 + $0x1410] sm:$0xff] %v822_v1 }
 0x154   : >> { %v826_v3 = vld [vmem:[%s5087_s5 + $0x2860] sm:$0xff]  ;;  %825 = vst [vmem:[%s5083_s30 + $0x1420] sm:$0xff] %v824_v2 }
 0x155   : >> { %v828_v4 = vld [vmem:[%s5087_s5 + $0x2880] sm:$0xff]  ;;  %827 = vst [vmem:[%s5083_s30 + $0x1430] sm:$0xff] %v826_v3 }
 0x156   : >> { %v830_v5 = vld [vmem:[%s5087_s5 + $0x28a0] sm:$0xff]  ;;  %829 = vst [vmem:[%s5083_s30 + $0x1440] sm:$0xff] %v828_v4 }
 0x157   : >> { %v832_v6 = vld [vmem:[%s5087_s5 + $0x28c0] sm:$0xff]  ;;  %831 = vst [vmem:[%s5083_s30 + $0x1450] sm:$0xff] %v830_v5 }
 0x158   : >> { %v834_v7 = vld [vmem:[%s5087_s5 + $0x28e0] sm:$0xff]  ;;  %833 = vst [vmem:[%s5083_s30 + $0x1460] sm:$0xff] %v832_v6 }
 0x159   : >> { %v836_v8 = vld [vmem:[%s5087_s5 + $0x2900] sm:$0xff]  ;;  %835 = vst [vmem:[%s5083_s30 + $0x1470] sm:$0xff] %v834_v7 }
 0x15a   : >> { %v838_v9 = vld [vmem:[%s5087_s5 + $0x2920] sm:$0xff]  ;;  %837 = vst [vmem:[%s5083_s30 + $0x1480] sm:$0xff] %v836_v8 }
 0x15b   : >> { %v840_v10 = vld [vmem:[%s5087_s5 + $0x2940] sm:$0xff]  ;;  %839 = vst [vmem:[%s5083_s30 + $0x1490] sm:$0xff] %v838_v9 }
 0x15c   : >> { %v842_v11 = vld [vmem:[%s5087_s5 + $0x2960] sm:$0xff]  ;;  %841 = vst [vmem:[%s5083_s30 + $0x14a0] sm:$0xff] %v840_v10 }
 0x15d   : >> { %v844_v12 = vld [vmem:[%s5087_s5 + $0x2980] sm:$0xff]  ;;  %843 = vst [vmem:[%s5083_s30 + $0x14b0] sm:$0xff] %v842_v11 }
 0x15e   : >> { %v846_v13 = vld [vmem:[%s5087_s5 + $0x29a0] sm:$0xff]  ;;  %845 = vst [vmem:[%s5083_s30 + $0x14c0] sm:$0xff] %v844_v12 }
 0x15f   : >> { %v848_v14 = vld [vmem:[%s5087_s5 + $0x29c0] sm:$0xff]  ;;  %847 = vst [vmem:[%s5083_s30 + $0x14d0] sm:$0xff] %v846_v13 }
 0x160   : >> { %v850_v15 = vld [vmem:[%s5087_s5 + $0x29e0] sm:$0xff]  ;;  %849 = vst [vmem:[%s5083_s30 + $0x14e0] sm:$0xff] %v848_v14 }
 0x161   : >> { %v852_v16 = vld [vmem:[%s5087_s5 + $0x2a00] sm:$0xff]  ;;  %851 = vst [vmem:[%s5083_s30 + $0x14f0] sm:$0xff] %v850_v15 }
 0x162   : >> { %v854_v17 = vld [vmem:[%s5087_s5 + $0x2a20] sm:$0xff]  ;;  %853 = vst [vmem:[%s5083_s30 + $0x1500] sm:$0xff] %v852_v16 }
 0x163   : >> { %v856_v18 = vld [vmem:[%s5087_s5 + $0x2a40] sm:$0xff]  ;;  %855 = vst [vmem:[%s5083_s30 + $0x1510] sm:$0xff] %v854_v17 }
 0x164   : >> { %v858_v19 = vld [vmem:[%s5087_s5 + $0x2a60] sm:$0xff]  ;;  %857 = vst [vmem:[%s5083_s30 + $0x1520] sm:$0xff] %v856_v18 }
 0x165   : >> { %v860_v20 = vld [vmem:[%s5087_s5 + $0x2a80] sm:$0xff]  ;;  %859 = vst [vmem:[%s5083_s30 + $0x1530] sm:$0xff] %v858_v19 }
 0x166   : >> { %v862_v21 = vld [vmem:[%s5087_s5 + $0x2aa0] sm:$0xff]  ;;  %861 = vst [vmem:[%s5083_s30 + $0x1540] sm:$0xff] %v860_v20 }
 0x167   : >> { %v864_v22 = vld [vmem:[%s5087_s5 + $0x2ac0] sm:$0xff]  ;;  %863 = vst [vmem:[%s5083_s30 + $0x1550] sm:$0xff] %v862_v21 }
 0x168   : >> { %v866_v23 = vld [vmem:[%s5087_s5 + $0x2ae0] sm:$0xff]  ;;  %865 = vst [vmem:[%s5083_s30 + $0x1560] sm:$0xff] %v864_v22 }
 0x169   : >> { %v868_v24 = vld [vmem:[%s5087_s5 + $0x2b00] sm:$0xff]  ;;  %867 = vst [vmem:[%s5083_s30 + $0x1570] sm:$0xff] %v866_v23 }
 0x16a   : >> { %v870_v25 = vld [vmem:[%s5087_s5 + $0x2b20] sm:$0xff]  ;;  %869 = vst [vmem:[%s5083_s30 + $0x1580] sm:$0xff] %v868_v24 }
 0x16b   : >> { %v872_v26 = vld [vmem:[%s5087_s5 + $0x2b40] sm:$0xff]  ;;  %871 = vst [vmem:[%s5083_s30 + $0x1590] sm:$0xff] %v870_v25 }
 0x16c   : >> { %v874_v27 = vld [vmem:[%s5087_s5 + $0x2b60] sm:$0xff]  ;;  %873 = vst [vmem:[%s5083_s30 + $0x15a0] sm:$0xff] %v872_v26 }
 0x16d   : >> { %v876_v28 = vld [vmem:[%s5087_s5 + $0x2b80] sm:$0xff]  ;;  %875 = vst [vmem:[%s5083_s30 + $0x15b0] sm:$0xff] %v874_v27 }
 0x16e   : >> { %v878_v29 = vld [vmem:[%s5087_s5 + $0x2ba0] sm:$0xff]  ;;  %877 = vst [vmem:[%s5083_s30 + $0x15c0] sm:$0xff] %v876_v28 }
 0x16f   : >> { %v880_v30 = vld [vmem:[%s5087_s5 + $0x2bc0] sm:$0xff]  ;;  %879 = vst [vmem:[%s5083_s30 + $0x15d0] sm:$0xff] %v878_v29 }
 0x170   : >> { %v882_v31 = vld [vmem:[%s5087_s5 + $0x2be0] sm:$0xff]  ;;  %881 = vst [vmem:[%s5083_s30 + $0x15e0] sm:$0xff] %v880_v30 }
 0x171   : >> { %v884_v32 = vld [vmem:[%s5087_s5 + $0x2c00] sm:$0xff]  ;;  %883 = vst [vmem:[%s5083_s30 + $0x15f0] sm:$0xff] %v882_v31 }
 0x172   : >> { %v886_v33 = vld [vmem:[%s5087_s5 + $0x2c20] sm:$0xff]  ;;  %885 = vst [vmem:[%s5083_s30 + $0x1600] sm:$0xff] %v884_v32 }
 0x173   : >> { %v888_v34 = vld [vmem:[%s5087_s5 + $0x2c40] sm:$0xff]  ;;  %887 = vst [vmem:[%s5083_s30 + $0x1610] sm:$0xff] %v886_v33 }
 0x174   : >> { %v890_v35 = vld [vmem:[%s5087_s5 + $0x2c60] sm:$0xff]  ;;  %889 = vst [vmem:[%s5083_s30 + $0x1620] sm:$0xff] %v888_v34 }
 0x175   : >> { %v892_v36 = vld [vmem:[%s5087_s5 + $0x2c80] sm:$0xff]  ;;  %891 = vst [vmem:[%s5083_s30 + $0x1630] sm:$0xff] %v890_v35 }
 0x176   : >> { %v894_v37 = vld [vmem:[%s5087_s5 + $0x2ca0] sm:$0xff]  ;;  %893 = vst [vmem:[%s5083_s30 + $0x1640] sm:$0xff] %v892_v36 }
 0x177   : >> { %v896_v38 = vld [vmem:[%s5087_s5 + $0x2cc0] sm:$0xff]  ;;  %895 = vst [vmem:[%s5083_s30 + $0x1650] sm:$0xff] %v894_v37 }
 0x178   : >> { %v898_v39 = vld [vmem:[%s5087_s5 + $0x2ce0] sm:$0xff]  ;;  %897 = vst [vmem:[%s5083_s30 + $0x1660] sm:$0xff] %v896_v38 }
 0x179   : >> { %v900_v40 = vld [vmem:[%s5087_s5 + $0x2d00] sm:$0xff]  ;;  %899 = vst [vmem:[%s5083_s30 + $0x1670] sm:$0xff] %v898_v39 }
 0x17a   : >> { %v902_v41 = vld [vmem:[%s5087_s5 + $0x2d20] sm:$0xff]  ;;  %901 = vst [vmem:[%s5083_s30 + $0x1680] sm:$0xff] %v900_v40 }
 0x17b   : >> { %v904_v42 = vld [vmem:[%s5087_s5 + $0x2d40] sm:$0xff]  ;;  %903 = vst [vmem:[%s5083_s30 + $0x1690] sm:$0xff] %v902_v41 }
 0x17c   : >> { %v906_v43 = vld [vmem:[%s5087_s5 + $0x2d60] sm:$0xff]  ;;  %905 = vst [vmem:[%s5083_s30 + $0x16a0] sm:$0xff] %v904_v42 }
 0x17d   : >> { %v908_v44 = vld [vmem:[%s5087_s5 + $0x2d80] sm:$0xff]  ;;  %907 = vst [vmem:[%s5083_s30 + $0x16b0] sm:$0xff] %v906_v43 }
 0x17e   : >> { %v910_v45 = vld [vmem:[%s5087_s5 + $0x2da0] sm:$0xff]  ;;  %909 = vst [vmem:[%s5083_s30 + $0x16c0] sm:$0xff] %v908_v44 }
 0x17f   : >> { %v912_v46 = vld [vmem:[%s5087_s5 + $0x2dc0] sm:$0xff]  ;;  %911 = vst [vmem:[%s5083_s30 + $0x16d0] sm:$0xff] %v910_v45 }
 0x180   : >> { %v914_v47 = vld [vmem:[%s5087_s5 + $0x2de0] sm:$0xff]  ;;  %913 = vst [vmem:[%s5083_s30 + $0x16e0] sm:$0xff] %v912_v46 }
 0x181   : >> { %v916_v48 = vld [vmem:[%s5087_s5 + $0x2e00] sm:$0xff]  ;;  %915 = vst [vmem:[%s5083_s30 + $0x16f0] sm:$0xff] %v914_v47 }
 0x182   : >> { %v918_v49 = vld [vmem:[%s5087_s5 + $0x2e20] sm:$0xff]  ;;  %917 = vst [vmem:[%s5083_s30 + $0x1700] sm:$0xff] %v916_v48 }
 0x183   : >> { %v920_v50 = vld [vmem:[%s5087_s5 + $0x2e40] sm:$0xff]  ;;  %919 = vst [vmem:[%s5083_s30 + $0x1710] sm:$0xff] %v918_v49 }
 0x184   : >> { %v922_v51 = vld [vmem:[%s5087_s5 + $0x2e60] sm:$0xff]  ;;  %921 = vst [vmem:[%s5083_s30 + $0x1720] sm:$0xff] %v920_v50 }
 0x185   : >> { %v924_v52 = vld [vmem:[%s5087_s5 + $0x2e80] sm:$0xff]  ;;  %923 = vst [vmem:[%s5083_s30 + $0x1730] sm:$0xff] %v922_v51 }
 0x186   : >> { %v926_v53 = vld [vmem:[%s5087_s5 + $0x2ea0] sm:$0xff]  ;;  %925 = vst [vmem:[%s5083_s30 + $0x1740] sm:$0xff] %v924_v52 }
 0x187   : >> { %v928_v54 = vld [vmem:[%s5087_s5 + $0x2ec0] sm:$0xff]  ;;  %927 = vst [vmem:[%s5083_s30 + $0x1750] sm:$0xff] %v926_v53 }
 0x188   : >> { %v930_v55 = vld [vmem:[%s5087_s5 + $0x2ee0] sm:$0xff]  ;;  %929 = vst [vmem:[%s5083_s30 + $0x1760] sm:$0xff] %v928_v54 }
 0x189   : >> { %v932_v56 = vld [vmem:[%s5087_s5 + $0x2f00] sm:$0xff]  ;;  %931 = vst [vmem:[%s5083_s30 + $0x1770] sm:$0xff] %v930_v55 }
 0x18a   : >> { %v934_v57 = vld [vmem:[%s5087_s5 + $0x2f20] sm:$0xff]  ;;  %933 = vst [vmem:[%s5083_s30 + $0x1780] sm:$0xff] %v932_v56 }
 0x18b   : >> { %v936_v58 = vld [vmem:[%s5087_s5 + $0x2f40] sm:$0xff]  ;;  %935 = vst [vmem:[%s5083_s30 + $0x1790] sm:$0xff] %v934_v57 }
 0x18c   : >> { %v938_v59 = vld [vmem:[%s5087_s5 + $0x2f60] sm:$0xff]  ;;  %937 = vst [vmem:[%s5083_s30 + $0x17a0] sm:$0xff] %v936_v58 }
 0x18d   : >> { %v940_v60 = vld [vmem:[%s5087_s5 + $0x2f80] sm:$0xff]  ;;  %939 = vst [vmem:[%s5083_s30 + $0x17b0] sm:$0xff] %v938_v59 }
 0x18e   : >> { %v942_v61 = vld [vmem:[%s5087_s5 + $0x2fa0] sm:$0xff]  ;;  %941 = vst [vmem:[%s5083_s30 + $0x17c0] sm:$0xff] %v940_v60 }
 0x18f   : >> { %v944_v62 = vld [vmem:[%s5087_s5 + $0x2fc0] sm:$0xff]  ;;  %943 = vst [vmem:[%s5083_s30 + $0x17d0] sm:$0xff] %v942_v61 }
 0x190   : >> { %v946_v63 = vld [vmem:[%s5087_s5 + $0x2fe0] sm:$0xff]  ;;  %945 = vst [vmem:[%s5083_s30 + $0x17e0] sm:$0xff] %v944_v62 }
 0x191   : >> { %v948_v0 = vld [vmem:[%s5087_s5 + $0x3000] sm:$0xff]  ;;  %947 = vst [vmem:[%s5083_s30 + $0x17f0] sm:$0xff] %v946_v63 }
 0x192   : >> { %v950_v1 = vld [vmem:[%s5087_s5 + $0x3020] sm:$0xff]  ;;  %949 = vst [vmem:[%s5083_s30 + $0x1800] sm:$0xff] %v948_v0 }
 0x193   : >> { %v952_v2 = vld [vmem:[%s5087_s5 + $0x3040] sm:$0xff]  ;;  %951 = vst [vmem:[%s5083_s30 + $0x1810] sm:$0xff] %v950_v1 }
 0x194   : >> { %v954_v3 = vld [vmem:[%s5087_s5 + $0x3060] sm:$0xff]  ;;  %953 = vst [vmem:[%s5083_s30 + $0x1820] sm:$0xff] %v952_v2 }
 0x195   : >> { %v956_v4 = vld [vmem:[%s5087_s5 + $0x3080] sm:$0xff]  ;;  %955 = vst [vmem:[%s5083_s30 + $0x1830] sm:$0xff] %v954_v3 }
 0x196   : >> { %v958_v5 = vld [vmem:[%s5087_s5 + $0x30a0] sm:$0xff]  ;;  %957 = vst [vmem:[%s5083_s30 + $0x1840] sm:$0xff] %v956_v4 }
 0x197   : >> { %v960_v6 = vld [vmem:[%s5087_s5 + $0x30c0] sm:$0xff]  ;;  %959 = vst [vmem:[%s5083_s30 + $0x1850] sm:$0xff] %v958_v5 }
 0x198   : >> { %v962_v7 = vld [vmem:[%s5087_s5 + $0x30e0] sm:$0xff]  ;;  %961 = vst [vmem:[%s5083_s30 + $0x1860] sm:$0xff] %v960_v6 }
 0x199   : >> { %v964_v8 = vld [vmem:[%s5087_s5 + $0x3100] sm:$0xff]  ;;  %963 = vst [vmem:[%s5083_s30 + $0x1870] sm:$0xff] %v962_v7 }
 0x19a   : >> { %v966_v9 = vld [vmem:[%s5087_s5 + $0x3120] sm:$0xff]  ;;  %965 = vst [vmem:[%s5083_s30 + $0x1880] sm:$0xff] %v964_v8 }
 0x19b   : >> { %v968_v10 = vld [vmem:[%s5087_s5 + $0x3140] sm:$0xff]  ;;  %967 = vst [vmem:[%s5083_s30 + $0x1890] sm:$0xff] %v966_v9 }
 0x19c   : >> { %v970_v11 = vld [vmem:[%s5087_s5 + $0x3160] sm:$0xff]  ;;  %969 = vst [vmem:[%s5083_s30 + $0x18a0] sm:$0xff] %v968_v10 }
 0x19d   : >> { %v972_v12 = vld [vmem:[%s5087_s5 + $0x3180] sm:$0xff]  ;;  %971 = vst [vmem:[%s5083_s30 + $0x18b0] sm:$0xff] %v970_v11 }
 0x19e   : >> { %v974_v13 = vld [vmem:[%s5087_s5 + $0x31a0] sm:$0xff]  ;;  %973 = vst [vmem:[%s5083_s30 + $0x18c0] sm:$0xff] %v972_v12 }
 0x19f   : >> { %v976_v14 = vld [vmem:[%s5087_s5 + $0x31c0] sm:$0xff]  ;;  %975 = vst [vmem:[%s5083_s30 + $0x18d0] sm:$0xff] %v974_v13 }
 0x1a0   : >> { %v978_v15 = vld [vmem:[%s5087_s5 + $0x31e0] sm:$0xff]  ;;  %977 = vst [vmem:[%s5083_s30 + $0x18e0] sm:$0xff] %v976_v14 }
 0x1a1   : >> { %v980_v16 = vld [vmem:[%s5087_s5 + $0x3200] sm:$0xff]  ;;  %979 = vst [vmem:[%s5083_s30 + $0x18f0] sm:$0xff] %v978_v15 }
 0x1a2   : >> { %v982_v17 = vld [vmem:[%s5087_s5 + $0x3220] sm:$0xff]  ;;  %981 = vst [vmem:[%s5083_s30 + $0x1900] sm:$0xff] %v980_v16 }
 0x1a3   : >> { %v984_v18 = vld [vmem:[%s5087_s5 + $0x3240] sm:$0xff]  ;;  %983 = vst [vmem:[%s5083_s30 + $0x1910] sm:$0xff] %v982_v17 }
 0x1a4   : >> { %v986_v19 = vld [vmem:[%s5087_s5 + $0x3260] sm:$0xff]  ;;  %985 = vst [vmem:[%s5083_s30 + $0x1920] sm:$0xff] %v984_v18 }
 0x1a5   : >> { %v988_v20 = vld [vmem:[%s5087_s5 + $0x3280] sm:$0xff]  ;;  %987 = vst [vmem:[%s5083_s30 + $0x1930] sm:$0xff] %v986_v19 }
 0x1a6   : >> { %v990_v21 = vld [vmem:[%s5087_s5 + $0x32a0] sm:$0xff]  ;;  %989 = vst [vmem:[%s5083_s30 + $0x1940] sm:$0xff] %v988_v20 }
 0x1a7   : >> { %v992_v22 = vld [vmem:[%s5087_s5 + $0x32c0] sm:$0xff]  ;;  %991 = vst [vmem:[%s5083_s30 + $0x1950] sm:$0xff] %v990_v21 }
 0x1a8   : >> { %v994_v23 = vld [vmem:[%s5087_s5 + $0x32e0] sm:$0xff]  ;;  %993 = vst [vmem:[%s5083_s30 + $0x1960] sm:$0xff] %v992_v22 }
 0x1a9   : >> { %v996_v24 = vld [vmem:[%s5087_s5 + $0x3300] sm:$0xff]  ;;  %995 = vst [vmem:[%s5083_s30 + $0x1970] sm:$0xff] %v994_v23 }
 0x1aa   : >> { %v998_v25 = vld [vmem:[%s5087_s5 + $0x3320] sm:$0xff]  ;;  %997 = vst [vmem:[%s5083_s30 + $0x1980] sm:$0xff] %v996_v24 }
 0x1ab   : >> { %v1000_v26 = vld [vmem:[%s5087_s5 + $0x3340] sm:$0xff]  ;;  %999 = vst [vmem:[%s5083_s30 + $0x1990] sm:$0xff] %v998_v25 }
 0x1ac   : >> { %v1002_v27 = vld [vmem:[%s5087_s5 + $0x3360] sm:$0xff]  ;;  %1001 = vst [vmem:[%s5083_s30 + $0x19a0] sm:$0xff] %v1000_v26 }
 0x1ad   : >> { %v1004_v28 = vld [vmem:[%s5087_s5 + $0x3380] sm:$0xff]  ;;  %1003 = vst [vmem:[%s5083_s30 + $0x19b0] sm:$0xff] %v1002_v27 }
 0x1ae   : >> { %v1006_v29 = vld [vmem:[%s5087_s5 + $0x33a0] sm:$0xff]  ;;  %1005 = vst [vmem:[%s5083_s30 + $0x19c0] sm:$0xff] %v1004_v28 }
 0x1af   : >> { %v1008_v30 = vld [vmem:[%s5087_s5 + $0x33c0] sm:$0xff]  ;;  %1007 = vst [vmem:[%s5083_s30 + $0x19d0] sm:$0xff] %v1006_v29 }
 0x1b0   : >> { %v1010_v31 = vld [vmem:[%s5087_s5 + $0x33e0] sm:$0xff]  ;;  %1009 = vst [vmem:[%s5083_s30 + $0x19e0] sm:$0xff] %v1008_v30 }
 0x1b1   : >> { %v1012_v32 = vld [vmem:[%s5087_s5 + $0x3400] sm:$0xff]  ;;  %1011 = vst [vmem:[%s5083_s30 + $0x19f0] sm:$0xff] %v1010_v31 }
 0x1b2   : >> { %v1014_v33 = vld [vmem:[%s5087_s5 + $0x3420] sm:$0xff]  ;;  %1013 = vst [vmem:[%s5083_s30 + $0x1a00] sm:$0xff] %v1012_v32 }
 0x1b3   : >> { %v1016_v34 = vld [vmem:[%s5087_s5 + $0x3440] sm:$0xff]  ;;  %1015 = vst [vmem:[%s5083_s30 + $0x1a10] sm:$0xff] %v1014_v33 }
 0x1b4   : >> { %v1018_v35 = vld [vmem:[%s5087_s5 + $0x3460] sm:$0xff]  ;;  %1017 = vst [vmem:[%s5083_s30 + $0x1a20] sm:$0xff] %v1016_v34  ;;  %175 = sbr.rel (!%p173_p6) target bundleno = 17 (0x11), region = 117 }
 0x1b5   : >> { %v1020_v36 = vld [vmem:[%s5087_s5 + $0x3480] sm:$0xff]  ;;  %1019 = vst [vmem:[%s5083_s30 + $0x1a30] sm:$0xff] %v1018_v35 }
 0x1b6   : >> { %v1022_v37 = vld [vmem:[%s5087_s5 + $0x34a0] sm:$0xff]  ;;  %1021 = vst [vmem:[%s5083_s30 + $0x1a40] sm:$0xff] %v1020_v36 }
 0x1b7   : >> { %v1024_v38 = vld [vmem:[%s5087_s5 + $0x34c0] sm:$0xff]  ;;  %1023 = vst [vmem:[%s5083_s30 + $0x1a50] sm:$0xff] %v1022_v37  ;;  %s7060_s5 = smov %s5784_s10 }
 0x1b8   : >> { %1025 = vst [vmem:[%s5083_s30 + $0x1a60] sm:$0xff] %v1024_v38  ;;  %s7059_s30 = smov %s5788_s11 }
 0x1b9 PF: > { %p4965_p7 = scmp.ge.s32.totalorder %s5079_s17, 1  ;;  %p2773_p8 = scmp.lt.s32.totalorder %s5079_s17, 3 }
 0x1bb   : > { %p2774_p9 = pnand %p4965_p7, %p2773_p8 }
 0x1bc   : > { %s2780_s12 = sand.u32 (!%p2774_p9), 1, %s5071_s15   ;;  %s4966_s7 = sshll.u32 (!%p2774_p9), %s5138_s18, 1 }
 0x1bd   : > { %2777 = sbr.rel (%p2774_p9) target bundleno = 1167 (0x48f), region = 69  ;;  %p2814_p10 = scmp.lt.s32.totalorder (!%p2774_p9), %s4966_s7, 3 }
 0x1be   : > { %s4977_s13 = smul.u32 (!%p2774_p9), 6768, %s2780_s12  ;;  %p2823_p11 = scmp.lt.s32.totalorder (!%p2774_p9), %s5138_s18, 1 }
 0x1c0   : > { %s6058_s14 = scalar_lea.vmem (!%p2774_p9), [#allocation2], %s4977_s13 }
 0x1c2   : > { %v2864_v39 = vld [vmem:[%s6058_s14 + $0xf0] sm:$0xff]  ;;  %v2862_v42 = vld [vmem:[%s6058_s14 + $0xe0] sm:$0xff]  ;;  %vm3757_vm0 = vcmask 1043456   ;;  %vm3754_vm1 = vcmask 424960   ;;  %s7068_s7 = smov (!%p2814_p10, %s4966_s7), 3  ;;  %vm4854_vm2 = vcmask 1041408  }
 0x1c3   : > { %v2928_v40 = vld [vmem:[%s6058_s14 + $0x2f0] sm:$0xff]  ;;  %3764 = vmatpush.msra.mxu0 %v2864_v39  ;;  %v2926_v44 = vld [vmem:[%s6058_s14 + $0x2e0] sm:$0xff]  ;;  %s2816_s10 = scalar_lea.vmem %s7054_s2, %s7068_s7  ;;  %s2821_s13 = scalar_lea.vmem %s7055_s3, %s7068_s7  ;;  %vm4860_vm3 = vcmask 1024  }
 0x1c4   : > { %v2960_v41 = vld [vmem:[%s6058_s14 + $0x3f0] sm:$0xff]  ;;  %3804 = vmatpush.msra.mxu2 %v2928_v40  ;;  %v2958_v45 = vld [vmem:[%s6058_s14 + $0x3e0] sm:$0xff]  ;;  %s7070_s18 = smov (!%p2823_p11, %s5138_s18), 1 }
 0x1c5   : > { %v2896_v43 = vld [vmem:[%s6058_s14 + $0x1f0] sm:$0xff]  ;;  %3824 = vmatpush.msra.mxu3 %v2960_v41  ;;  %v2894_v47 = vld [vmem:[%s6058_s14 + $0x1e0] sm:$0xff]  ;;  %3765 = vmatpush.msra.mxu0 %v2862_v42 }
 0x1c6   : > { %3784 = vmatpush.msra.mxu1 %v2896_v43  ;;  %v2860_v46 = vld [vmem:[%s6058_s14 + $0xd0] sm:$0xff]  ;;  %3805 = vmatpush.msra.mxu2 %v2926_v44  ;;  %v2858_v50 = vld [vmem:[%s6058_s14 + $0xc0] sm:$0xff] }
 0x1c7   : > { %v2924_v48 = vld [vmem:[%s6058_s14 + $0x2d0] sm:$0xff]  ;;  %3825 = vmatpush.msra.mxu3 %v2958_v45  ;;  %v2922_v52 = vld [vmem:[%s6058_s14 + $0x2c0] sm:$0xff]  ;;  %3766 = vmatpush.msra.mxu0 %v2860_v46 }
 0x1c8   : > { %v2956_v49 = vld [vmem:[%s6058_s14 + $0x3d0] sm:$0xff]  ;;  %3785 = vmatpush.msra.mxu1 %v2894_v47  ;;  %3806 = vmatpush.msra.mxu2 %v2924_v48  ;;  %v2954_v53 = vld [vmem:[%s6058_s14 + $0x3c0] sm:$0xff] }
 0x1c9   : > { %v2892_v51 = vld [vmem:[%s6058_s14 + $0x1d0] sm:$0xff]  ;;  %v2890_v54 = vld [vmem:[%s6058_s14 + $0x1c0] sm:$0xff]  ;;  %3826 = vmatpush.msra.mxu3 %v2956_v49  ;;  %3767 = vmatpush.msra.mxu0 %v2858_v50 }
 0x1ca   : > { %3786 = vmatpush.msra.mxu1 %v2892_v51  ;;  %v2856_v55 = vld [vmem:[%s6058_s14 + $0xb0] sm:$0xff]  ;;  %3807 = vmatpush.msra.mxu2 %v2922_v52  ;;  %v2854_v59 = vld [vmem:[%s6058_s14 + $0xa0] sm:$0xff] }
 0x1cb   : > { %v2920_v56 = vld [vmem:[%s6058_s14 + $0x2b0] sm:$0xff]  ;;  %3827 = vmatpush.msra.mxu3 %v2954_v53  ;;  %v2918_v60 = vld [vmem:[%s6058_s14 + $0x2a0] sm:$0xff]  ;;  %3768 = vmatpush.msra.mxu0 %v2856_v55 }
 0x1cc   : > { %v2952_v57 = vld [vmem:[%s6058_s14 + $0x3b0] sm:$0xff]  ;;  %3787 = vmatpush.msra.mxu1 %v2890_v54  ;;  %3808 = vmatpush.msra.mxu2 %v2920_v56  ;;  %v2950_v61 = vld [vmem:[%s6058_s14 + $0x3a0] sm:$0xff] }
 0x1cd   : > { %v2888_v58 = vld [vmem:[%s6058_s14 + $0x1b0] sm:$0xff]  ;;  %v2886_v62 = vld [vmem:[%s6058_s14 + $0x1a0] sm:$0xff]  ;;  %3828 = vmatpush.msra.mxu3 %v2952_v57  ;;  %3769 = vmatpush.msra.mxu0 %v2854_v59 }
 0x1ce   : > { %3788 = vmatpush.msra.mxu1 %v2888_v58  ;;  %v2852_v63 = vld [vmem:[%s6058_s14 + $0x90] sm:$0xff]  ;;  %3809 = vmatpush.msra.mxu2 %v2918_v60  ;;  %v2850_v3 = vld [vmem:[%s6058_s14 + $0x80] sm:$0xff] }
 0x1cf   : > { %v2916_v0 = vld [vmem:[%s6058_s14 + $0x290] sm:$0xff]  ;;  %3829 = vmatpush.msra.mxu3 %v2950_v61  ;;  %v2914_v4 = vld [vmem:[%s6058_s14 + $0x280] sm:$0xff]  ;;  %3770 = vmatpush.msra.mxu0 %v2852_v63 }
 0x1d0   : > { %v2948_v1 = vld [vmem:[%s6058_s14 + $0x390] sm:$0xff]  ;;  %3789 = vmatpush.msra.mxu1 %v2886_v62  ;;  %3810 = vmatpush.msra.mxu2 %v2916_v0  ;;  %v2946_v5 = vld [vmem:[%s6058_s14 + $0x380] sm:$0xff] }
 0x1d1   : > { %v2884_v2 = vld [vmem:[%s6058_s14 + $0x190] sm:$0xff]  ;;  %v2882_v6 = vld [vmem:[%s6058_s14 + $0x180] sm:$0xff]  ;;  %3830 = vmatpush.msra.mxu3 %v2948_v1  ;;  %3771 = vmatpush.msra.mxu0 %v2850_v3  ;;  %v2827_v1 = vld [vmem:[%s7052_s0] sm:$0xff] }
 0x1d2   : > { %3790 = vmatpush.msra.mxu1 %v2884_v2  ;;  %v2848_v7 = vld [vmem:[%s6058_s14 + $0x70] sm:$0xff]  ;;  %3811 = vmatpush.msra.mxu2 %v2914_v4  ;;  %v2846_v11 = vld [vmem:[%s6058_s14 + $0x60] sm:$0xff]  ;;  %3693 = vst [vmem:[#allocation1] ss:$4 sm:$0xff] %v2827_v1 }
 0x1d3   : > { %v2912_v8 = vld [vmem:[%s6058_s14 + $0x270] sm:$0xff]  ;;  %3831 = vmatpush.msra.mxu3 %v2946_v5  ;;  %v2910_v12 = vld [vmem:[%s6058_s14 + $0x260] sm:$0xff]  ;;  %3772 = vmatpush.msra.mxu0 %v2848_v7 }
 0x1d4   : > { %v2944_v9 = vld [vmem:[%s6058_s14 + $0x370] sm:$0xff]  ;;  %3791 = vmatpush.msra.mxu1 %v2882_v6  ;;  %3812 = vmatpush.msra.mxu2 %v2912_v8  ;;  %v2942_v13 = vld [vmem:[%s6058_s14 + $0x360] sm:$0xff] }
 0x1d5   : > { %v2880_v10 = vld [vmem:[%s6058_s14 + $0x170] sm:$0xff]  ;;  %v2878_v14 = vld [vmem:[%s6058_s14 + $0x160] sm:$0xff]  ;;  %3832 = vmatpush.msra.mxu3 %v2944_v9  ;;  %3773 = vmatpush.msra.mxu0 %v2846_v11 }
 0x1d6   : > { %3792 = vmatpush.msra.mxu1 %v2880_v10  ;;  %v2844_v15 = vld [vmem:[%s6058_s14 + $0x50] sm:$0xff]  ;;  %3813 = vmatpush.msra.mxu2 %v2910_v12  ;;  %v2842_v19 = vld [vmem:[%s6058_s14 + $0x40] sm:$0xff] }
 0x1d7   : > { %v2908_v16 = vld [vmem:[%s6058_s14 + $0x250] sm:$0xff]  ;;  %3833 = vmatpush.msra.mxu3 %v2942_v13  ;;  %v2906_v20 = vld [vmem:[%s6058_s14 + $0x240] sm:$0xff]  ;;  %3774 = vmatpush.msra.mxu0 %v2844_v15 }
 0x1d8   : > { %v2940_v17 = vld [vmem:[%s6058_s14 + $0x350] sm:$0xff]  ;;  %3793 = vmatpush.msra.mxu1 %v2878_v14  ;;  %3814 = vmatpush.msra.mxu2 %v2908_v16  ;;  %v2938_v21 = vld [vmem:[%s6058_s14 + $0x340] sm:$0xff] }
 0x1d9   : > { %v2876_v18 = vld [vmem:[%s6058_s14 + $0x150] sm:$0xff]  ;;  %v2874_v22 = vld [vmem:[%s6058_s14 + $0x140] sm:$0xff]  ;;  %3834 = vmatpush.msra.mxu3 %v2940_v17  ;;  %3775 = vmatpush.msra.mxu0 %v2842_v19 }
 0x1da   : > { %3794 = vmatpush.msra.mxu1 %v2876_v18  ;;  %v2840_v23 = vld [vmem:[%s6058_s14 + $0x30] sm:$0xff]  ;;  %3815 = vmatpush.msra.mxu2 %v2906_v20  ;;  %v2838_v27 = vld [vmem:[%s6058_s14 + $0x20] sm:$0xff] }
 0x1db   : > { %v2904_v24 = vld [vmem:[%s6058_s14 + $0x230] sm:$0xff]  ;;  %3835 = vmatpush.msra.mxu3 %v2938_v21  ;;  %v2902_v28 = vld [vmem:[%s6058_s14 + $0x220] sm:$0xff]  ;;  %3776 = vmatpush.msra.mxu0 %v2840_v23  ;;  %v2829_v21 = vld [vmem:[%s7052_s0 + $0x10] sm:$0xff] }
 0x1dc   : > { %v2936_v25 = vld [vmem:[%s6058_s14 + $0x330] sm:$0xff]  ;;  %3795 = vmatpush.msra.mxu1 %v2874_v22  ;;  %3816 = vmatpush.msra.mxu2 %v2904_v24  ;;  %v2934_v29 = vld [vmem:[%s6058_s14 + $0x320] sm:$0xff]  ;;  %v6178_v23 = vld.sshfl [vmem:[#allocation1] sm:$0xff pattern:$0x73625140] }
 0x1dd   : > { %v2872_v26 = vld [vmem:[%s6058_s14 + $0x130] sm:$0xff]  ;;  %v2870_v30 = vld [vmem:[%s6058_s14 + $0x120] sm:$0xff]  ;;  %3836 = vmatpush.msra.mxu3 %v2936_v25  ;;  %3777 = vmatpush.msra.mxu0 %v2838_v27  ;;  %v6180_v24 = vld.sshfl [vmem:[#allocation1 + $0x10] sm:$0xff pattern:$0x73625140] }
 0x1de   : > { %3796 = vmatpush.msra.mxu1 %v2872_v26  ;;  %v2836_v31 = vld [vmem:[%s6058_s14 + $0x10] sm:$0xff]  ;;  %3817 = vmatpush.msra.mxu2 %v2902_v28  ;;  %v2834_v35 = vld [vmem:[%s6058_s14] sm:$0xff] }
 0x1df   : > { %v2900_v32 = vld [vmem:[%s6058_s14 + $0x210] sm:$0xff]  ;;  %3837 = vmatpush.msra.mxu3 %v2934_v29  ;;  %v2898_v36 = vld [vmem:[%s6058_s14 + $0x200] sm:$0xff]  ;;  %3778 = vmatpush.msra.mxu0 %v2836_v31 }
 0x1e0   : > { %v2932_v33 = vld [vmem:[%s6058_s14 + $0x310] sm:$0xff]  ;;  %3797 = vmatpush.msra.mxu1 %v2870_v30  ;;  %3818 = vmatpush.msra.mxu2 %v2900_v32  ;;  %v2930_v37 = vld [vmem:[%s6058_s14 + $0x300] sm:$0xff] }
 0x1e1   : > { %v2868_v34 = vld [vmem:[%s6058_s14 + $0x110] sm:$0xff]  ;;  %3838 = vmatpush.msra.mxu3 %v2932_v33  ;;  %3779 = vmatpush.msra.mxu0 %v2834_v35  ;;  %v2866_v41 = vld [vmem:[%s6058_s14 + $0x100] sm:$0xff] }
 0x1e2   : > { %v2992_v38 = vld [vmem:[%s6058_s14 + $0x4f0] sm:$0xff]  ;;  %3798 = vmatpush.msra.mxu1 %v2868_v34  ;;  %3819 = vmatpush.msra.mxu2 %v2898_v36  ;;  %v2990_v42 = vld [vmem:[%s6058_s14 + $0x4e0] sm:$0xff] }
 0x1e3   : > { %v3056_v39 = vld [vmem:[%s6058_s14 + $0x6f0] sm:$0xff]  ;;  %3839 = vmatpush.msra.mxu3 %v2930_v37  ;;  %3844 = vmatpush.msrb.mxu0 %v2992_v38  ;;  %v3054_v44 = vld [vmem:[%s6058_s14 + $0x6e0] sm:$0xff] }
 0x1e4   : > { %v3088_v40 = vld [vmem:[%s6058_s14 + $0x7f0] sm:$0xff]  ;;  %3884 = vmatpush.msrb.mxu2 %v3056_v39  ;;  %v3086_v45 = vld [vmem:[%s6058_s14 + $0x7e0] sm:$0xff]  ;;  %3799 = vmatpush.msra.mxu1 %v2866_v41 }
 0x1e5   : > { %v3024_v43 = vld [vmem:[%s6058_s14 + $0x5f0] sm:$0xff]  ;;  %3904 = vmatpush.msrb.mxu3 %v3088_v40  ;;  %3845 = vmatpush.msrb.mxu0 %v2990_v42  ;;  %v3022_v47 = vld [vmem:[%s6058_s14 + $0x5e0] sm:$0xff] }
 0x1e6   : > { %v2988_v46 = vld [vmem:[%s6058_s14 + $0x4d0] sm:$0xff]  ;;  %3864 = vmatpush.msrb.mxu1 %v3024_v43  ;;  %3885 = vmatpush.msrb.mxu2 %v3054_v44  ;;  %v2986_v50 = vld [vmem:[%s6058_s14 + $0x4c0] sm:$0xff] }
 0x1e7   : > { %v3052_v48 = vld [vmem:[%s6058_s14 + $0x6d0] sm:$0xff]  ;;  %3905 = vmatpush.msrb.mxu3 %v3086_v45  ;;  %3846 = vmatpush.msrb.mxu0 %v2988_v46  ;;  %v3050_v52 = vld [vmem:[%s6058_s14 + $0x6c0] sm:$0xff] }
 0x1e8   : > { %v3084_v49 = vld [vmem:[%s6058_s14 + $0x7d0] sm:$0xff]  ;;  %3865 = vmatpush.msrb.mxu1 %v3022_v47  ;;  %3886 = vmatpush.msrb.mxu2 %v3052_v48  ;;  %v3082_v53 = vld [vmem:[%s6058_s14 + $0x7c0] sm:$0xff] }
 0x1e9   : > { %v3020_v51 = vld [vmem:[%s6058_s14 + $0x5d0] sm:$0xff]  ;;  %3906 = vmatpush.msrb.mxu3 %v3084_v49  ;;  %3847 = vmatpush.msrb.mxu0 %v2986_v50  ;;  %v3018_v55 = vld [vmem:[%s6058_s14 + $0x5c0] sm:$0xff] }
 0x1ea   : > { %v2984_v54 = vld [vmem:[%s6058_s14 + $0x4b0] sm:$0xff]  ;;  %3866 = vmatpush.msrb.mxu1 %v3020_v51  ;;  %3887 = vmatpush.msrb.mxu2 %v3050_v52  ;;  %v2982_v58 = vld [vmem:[%s6058_s14 + $0x4a0] sm:$0xff] }
 0x1eb   : > { %v3048_v56 = vld [vmem:[%s6058_s14 + $0x6b0] sm:$0xff]  ;;  %3907 = vmatpush.msrb.mxu3 %v3082_v53  ;;  %3848 = vmatpush.msrb.mxu0 %v2984_v54  ;;  %v3046_v60 = vld [vmem:[%s6058_s14 + $0x6a0] sm:$0xff] }
 0x1ec   : > { %v3080_v57 = vld [vmem:[%s6058_s14 + $0x7b0] sm:$0xff]  ;;  %3867 = vmatpush.msrb.mxu1 %v3018_v55  ;;  %3888 = vmatpush.msrb.mxu2 %v3048_v56  ;;  %v3078_v61 = vld [vmem:[%s6058_s14 + $0x7a0] sm:$0xff] }
 0x1ed   : > { %v3016_v59 = vld [vmem:[%s6058_s14 + $0x5b0] sm:$0xff]  ;;  %3908 = vmatpush.msrb.mxu3 %v3080_v57  ;;  %3849 = vmatpush.msrb.mxu0 %v2982_v58  ;;  %v3014_v63 = vld [vmem:[%s6058_s14 + $0x5a0] sm:$0xff] }
 0x1ee   : > { %v2980_v62 = vld [vmem:[%s6058_s14 + $0x490] sm:$0xff]  ;;  %3868 = vmatpush.msrb.mxu1 %v3016_v59  ;;  %3889 = vmatpush.msrb.mxu2 %v3046_v60  ;;  %v2978_v3 = vld [vmem:[%s6058_s14 + $0x480] sm:$0xff] }
 0x1ef   : > { %v3044_v0 = vld [vmem:[%s6058_s14 + $0x690] sm:$0xff]  ;;  %3909 = vmatpush.msrb.mxu3 %v3078_v61  ;;  %3850 = vmatpush.msrb.mxu0 %v2980_v62  ;;  %v3042_v5 = vld [vmem:[%s6058_s14 + $0x680] sm:$0xff] }
 0x1f0   : > { %v3076_v2 = vld [vmem:[%s6058_s14 + $0x790] sm:$0xff]  ;;  %v3074_v6 = vld [vmem:[%s6058_s14 + $0x780] sm:$0xff]  ;;  %3869 = vmatpush.msrb.mxu1 %v3014_v63  ;;  %3890 = vmatpush.msrb.mxu2 %v3044_v0 }
 0x1f1   : > { %v3012_v4 = vld [vmem:[%s6058_s14 + $0x590] sm:$0xff]  ;;  %v3010_v8 = vld [vmem:[%s6058_s14 + $0x580] sm:$0xff]  ;;  %3910 = vmatpush.msrb.mxu3 %v3076_v2  ;;  %3851 = vmatpush.msrb.mxu0 %v2978_v3 }
 0x1f2   : > { %v2976_v7 = vld [vmem:[%s6058_s14 + $0x470] sm:$0xff]  ;;  %v2974_v11 = vld [vmem:[%s6058_s14 + $0x460] sm:$0xff]  ;;  %3870 = vmatpush.msrb.mxu1 %v3012_v4  ;;  %3891 = vmatpush.msrb.mxu2 %v3042_v5 }
 0x1f3   : > { %v3040_v9 = vld [vmem:[%s6058_s14 + $0x670] sm:$0xff]  ;;  %v3038_v13 = vld [vmem:[%s6058_s14 + $0x660] sm:$0xff]  ;;  %3911 = vmatpush.msrb.mxu3 %v3074_v6  ;;  %3852 = vmatpush.msrb.mxu0 %v2976_v7  ;;  %v2831_v7 = vld [vmem:[%s7052_s0 + $0x20] sm:$0xff] }
 0x1f4   : > { %v3072_v10 = vld [vmem:[%s6058_s14 + $0x770] sm:$0xff]  ;;  %v3070_v14 = vld [vmem:[%s6058_s14 + $0x760] sm:$0xff]  ;;  %3871 = vmatpush.msrb.mxu1 %v3010_v8  ;;  %3892 = vmatpush.msrb.mxu2 %v3040_v9 }
 0x1f5   : > { %v3008_v12 = vld [vmem:[%s6058_s14 + $0x570] sm:$0xff]  ;;  %v3006_v16 = vld [vmem:[%s6058_s14 + $0x560] sm:$0xff]  ;;  %3912 = vmatpush.msrb.mxu3 %v3072_v10  ;;  %3853 = vmatpush.msrb.mxu0 %v2974_v11 }
 0x1f6   : > { %v2972_v15 = vld [vmem:[%s6058_s14 + $0x450] sm:$0xff]  ;;  %v2970_v20 = vld [vmem:[%s6058_s14 + $0x440] sm:$0xff]  ;;  %3872 = vmatpush.msrb.mxu1 %v3008_v12  ;;  %3893 = vmatpush.msrb.mxu2 %v3038_v13 }
 0x1f7   : > { %v3036_v17 = vld [vmem:[%s6058_s14 + $0x650] sm:$0xff]  ;;  %3913 = vmatpush.msrb.mxu3 %v3070_v14  ;;  %3854 = vmatpush.msrb.mxu0 %v2972_v15  ;;  %v3034_v27 = vld [vmem:[%s6058_s14 + $0x640] sm:$0xff] }
 0x1f8   : > { %v2828_v18 = vld [vmem:[%s7052_s0 + $0x8] sm:$0xff]  ;;  %v6182_v25 = vld.sshfl [vmem:[#allocation1 + $0x18] sm:$0xff pattern:$0x73625140]  ;;  %3873 = vmatpush.msrb.mxu1 %v3006_v16  ;;  %3894 = vmatpush.msrb.mxu2 %v3036_v17 }
 0x1f9   : > { %v3068_v19 = vld [vmem:[%s6058_s14 + $0x750] sm:$0xff]  ;;  %3695 = vst [vmem:[#allocation1 + $0x20] ss:$4 sm:$0xff] %v2828_v18  ;;  %v3066_v28 = vld [vmem:[%s6058_s14 + $0x740] sm:$0xff]  ;;  %3855 = vmatpush.msrb.mxu0 %v2970_v20  ;;  %3820 = vmatmul.f32.vlgmr.msra.gmra.mxu2 %v6180_v24 }
 0x1fa   : > { %v3004_v22 = vld [vmem:[%s6058_s14 + $0x550] sm:$0xff]  ;;  %v3002_v30 = vld [vmem:[%s6058_s14 + $0x540] sm:$0xff]  ;;  %3914 = vmatpush.msrb.mxu3 %v3068_v19  ;;  %3895 = vmatpush.msrb.mxu2 %v3034_v27 }
 0x1fb   : > { %v6184_v26 = vld.sshfl [vmem:[#allocation1 + $0x8] sm:$0xff pattern:$0x73625140]  ;;  %3874 = vmatpush.msrb.mxu1 %v3004_v22  ;;  %v2830_v38 = vld [vmem:[%s7052_s0 + $0x18] sm:$0xff]  ;;  %3780 = vmatmul.f32.vlgmr.msra.gmra.mxu0 %v6178_v23 }
 0x1fc   : > { %v2968_v29 = vld [vmem:[%s6058_s14 + $0x430] sm:$0xff]  ;;  %3704 = vst [vmem:[#allocation1] ss:$4 sm:$0xff] %v2829_v21  ;;  %v2966_v33 = vld [vmem:[%s6058_s14 + $0x420] sm:$0xff]  ;;  %3915 = vmatpush.msrb.mxu3 %v3066_v28  ;;  %3800 = vmatmul.f32.vlgmr.msra.gmra.mxu1 %v6184_v26 }
 0x1fd   : > { %v3032_v31 = vld [vmem:[%s6058_s14 + $0x630] sm:$0xff]  ;;  %v3030_v35 = vld [vmem:[%s6058_s14 + $0x620] sm:$0xff]  ;;  %3856 = vmatpush.msrb.mxu0 %v2968_v29  ;;  %3875 = vmatpush.msrb.mxu1 %v3002_v30 }
 0x1fe   : > { %v3064_v32 = vld [vmem:[%s6058_s14 + $0x730] sm:$0xff]  ;;  %v3062_v36 = vld [vmem:[%s6058_s14 + $0x720] sm:$0xff]  ;;  %3896 = vmatpush.msrb.mxu2 %v3032_v31  ;;  %3840 = vmatmul.f32.vlgmr.msra.gmra.mxu3 %v6182_v25 }
 0x1ff   : > { %v3000_v34 = vld [vmem:[%s6058_s14 + $0x530] sm:$0xff]  ;;  %3916 = vmatpush.msrb.mxu3 %v3064_v32  ;;  %3857 = vmatpush.msrb.mxu0 %v2966_v33  ;;  %v2998_v43 = vld [vmem:[%s6058_s14 + $0x520] sm:$0xff] }
 0x200   : > { %v2964_v37 = vld [vmem:[%s6058_s14 + $0x410] sm:$0xff]  ;;  %v6200_v39 = vld.sshfl [vmem:[#allocation1 + $0x30] sm:$0xff pattern:$0x73625140]  ;;  %3876 = vmatpush.msrb.mxu1 %v3000_v34  ;;  %3897 = vmatpush.msrb.mxu2 %v3030_v35  ;;  %v2962_v46 = vld [vmem:[%s6058_s14 + $0x400] sm:$0xff] }
 0x201   : > { %v6202_v40 = vld.sshfl [vmem:[#allocation1 + $0x20] sm:$0xff pattern:$0x73625140]  ;;  %v6204_v41 = vld.sshfl [vmem:[#allocation1 + $0x38] sm:$0xff pattern:$0x73625140]  ;;  %3917 = vmatpush.msrb.mxu3 %v3062_v36  ;;  %3858 = vmatpush.msrb.mxu0 %v2964_v37 }
 0x202   : > { %v6206_v42 = vld.sshfl [vmem:[#allocation1 + $0x28] sm:$0xff pattern:$0x73625140]  ;;  %3877 = vmatpush.msrb.mxu1 %v2998_v43 }
 0x203   : > { %v3028_v44 = vld [vmem:[%s6058_s14 + $0x610] sm:$0xff]  ;;  %3705 = vst [vmem:[#allocation1 + $0x20] ss:$4 sm:$0xff] %v2830_v38  ;;  %v3026_v48 = vld [vmem:[%s6058_s14 + $0x600] sm:$0xff]  ;;  %3859 = vmatpush.msrb.mxu0 %v2962_v46 }
 0x204   : > { %v3060_v45 = vld [vmem:[%s6058_s14 + $0x710] sm:$0xff]  ;;  %3898 = vmatpush.msrb.mxu2 %v3028_v44  ;;  %v3058_v49 = vld [vmem:[%s6058_s14 + $0x700] sm:$0xff]  ;;  %v6236_v3 = vld.sshfl [vmem:[#allocation1] sm:$0xff pattern:$0x73625140]  ;;  %3860 = vmatmul.f32.vlgmr.msrb.gmra.mxu0 %v6202_v40 }
 0x205   : > { %v2996_v47 = vld [vmem:[%s6058_s14 + $0x510] sm:$0xff]  ;;  %3918 = vmatpush.msrb.mxu3 %v3060_v45  ;;  %v2994_v53 = vld [vmem:[%s6058_s14 + $0x500] sm:$0xff]  ;;  %v6238_v4 = vld.sshfl [vmem:[#allocation1 + $0x10] sm:$0xff pattern:$0x73625140] }
 0x206   : > { %3878 = vmatpush.msrb.mxu1 %v2996_v47  ;;  %3899 = vmatpush.msrb.mxu2 %v3026_v48  ;;  %v3120_v50 = vld [vmem:[%s6058_s14 + $0x8f0] sm:$0xff]  ;;  %v3118_v54 = vld [vmem:[%s6058_s14 + $0x8e0] sm:$0xff] }
 0x207   : > { %v3184_v51 = vld [vmem:[%s6058_s14 + $0xaf0] sm:$0xff]  ;;  %3919 = vmatpush.msrb.mxu3 %v3058_v49  ;;  %3924 = vmatpush.msra.mxu0 %v3120_v50  ;;  %v3182_v56 = vld [vmem:[%s6058_s14 + $0xae0] sm:$0xff] }
 0x208   : > { %v3216_v52 = vld [vmem:[%s6058_s14 + $0xbf0] sm:$0xff]  ;;  %3964 = vmatpush.msra.mxu2 %v3184_v51  ;;  %3879 = vmatpush.msrb.mxu1 %v2994_v53  ;;  %v3214_v57 = vld [vmem:[%s6058_s14 + $0xbe0] sm:$0xff] }
 0x209   : > { %v3152_v55 = vld [vmem:[%s6058_s14 + $0x9f0] sm:$0xff]  ;;  %3984 = vmatpush.msra.mxu3 %v3216_v52  ;;  %3925 = vmatpush.msra.mxu0 %v3118_v54  ;;  %v3150_v59 = vld [vmem:[%s6058_s14 + $0x9e0] sm:$0xff] }
 0x20a   : > { %v3116_v58 = vld [vmem:[%s6058_s14 + $0x8d0] sm:$0xff]  ;;  %3944 = vmatpush.msra.mxu1 %v3152_v55  ;;  %3965 = vmatpush.msra.mxu2 %v3182_v56  ;;  %v3114_v62 = vld [vmem:[%s6058_s14 + $0x8c0] sm:$0xff] }
 0x20b   : > { %v3180_v60 = vld [vmem:[%s6058_s14 + $0xad0] sm:$0xff]  ;;  %v3178_v0 = vld [vmem:[%s6058_s14 + $0xac0] sm:$0xff]  ;;  %3985 = vmatpush.msra.mxu3 %v3214_v57  ;;  %3926 = vmatpush.msra.mxu0 %v3116_v58 }
 0x20c   : > { %v3212_v61 = vld [vmem:[%s6058_s14 + $0xbd0] sm:$0xff]  ;;  %v3210_v1 = vld [vmem:[%s6058_s14 + $0xbc0] sm:$0xff]  ;;  %3945 = vmatpush.msra.mxu1 %v3150_v59  ;;  %3966 = vmatpush.msra.mxu2 %v3180_v60 }
 0x20d   : > { %v3148_v63 = vld [vmem:[%s6058_s14 + $0x9d0] sm:$0xff]  ;;  %3986 = vmatpush.msra.mxu3 %v3212_v61  ;;  %3927 = vmatpush.msra.mxu0 %v3114_v62  ;;  %v3146_v6 = vld [vmem:[%s6058_s14 + $0x9c0] sm:$0xff] }
 0x20e   : > { %v3112_v2 = vld [vmem:[%s6058_s14 + $0x8b0] sm:$0xff]  ;;  %3946 = vmatpush.msra.mxu1 %v3148_v63  ;;  %3967 = vmatpush.msra.mxu2 %v3178_v0  ;;  %v3110_v11 = vld [vmem:[%s6058_s14 + $0x8a0] sm:$0xff] }
 0x20f   : > { %v6240_v5 = vld.sshfl [vmem:[#allocation1 + $0x8] sm:$0xff pattern:$0x73625140]  ;;  %v6246_v8 = vld.sshfl [vmem:[#allocation1 + $0x18] sm:$0xff pattern:$0x73625140]  ;;  %3987 = vmatpush.msra.mxu3 %v3210_v1  ;;  %3900 = vmatmul.f32.vlgmr.msrb.gmra.mxu2 %v6200_v39 }
 0x210   : > { %v3176_v9 = vld [vmem:[%s6058_s14 + $0xab0] sm:$0xff]  ;;  %3714 = vst [vmem:[#allocation1] ss:$4 sm:$0xff] %v2831_v7  ;;  %3928 = vmatpush.msra.mxu0 %v3112_v2  ;;  %3947 = vmatpush.msra.mxu1 %v3146_v6  ;;  %v3174_v13 = vld [vmem:[%s6058_s14 + $0xaa0] sm:$0xff] }
 0x211   : > { %v3208_v10 = vld [vmem:[%s6058_s14 + $0xbb0] sm:$0xff]  ;;  %3968 = vmatpush.msra.mxu2 %v3176_v9  ;;  %v3206_v14 = vld [vmem:[%s6058_s14 + $0xba0] sm:$0xff]  ;;  %3920 = vmatmul.f32.vlgmr.msrb.gmra.mxu3 %v6204_v41 }
 0x212   : > { %v3144_v12 = vld [vmem:[%s6058_s14 + $0x9b0] sm:$0xff]  ;;  %3988 = vmatpush.msra.mxu3 %v3208_v10  ;;  %3929 = vmatpush.msra.mxu0 %v3110_v11  ;;  %v3142_v16 = vld [vmem:[%s6058_s14 + $0x9a0] sm:$0xff] }
 0x213   : > { %v3108_v15 = vld [vmem:[%s6058_s14 + $0x890] sm:$0xff]  ;;  %3948 = vmatpush.msra.mxu1 %v3144_v12  ;;  %3969 = vmatpush.msra.mxu2 %v3174_v13  ;;  %v3106_v19 = vld [vmem:[%s6058_s14 + $0x880] sm:$0xff] }
 0x214   : > { %v3172_v17 = vld [vmem:[%s6058_s14 + $0xa90] sm:$0xff]  ;;  %3989 = vmatpush.msra.mxu3 %v3206_v14  ;;  %3880 = vmatmul.f32.vlgmr.msrb.gmra.mxu1 %v6206_v42  ;;  %v3170_v21 = vld [vmem:[%s6058_s14 + $0xa80] sm:$0xff] }
 0x215   : > { %v3204_v18 = vld [vmem:[%s6058_s14 + $0xb90] sm:$0xff]  ;;  %3930 = vmatpush.msra.mxu0 %v3108_v15  ;;  %3949 = vmatpush.msra.mxu1 %v3142_v16  ;;  %v3202_v22 = vld [vmem:[%s6058_s14 + $0xb80] sm:$0xff] }
 0x216   : > { %v3140_v20 = vld [vmem:[%s6058_s14 + $0x990] sm:$0xff]  ;;  %3970 = vmatpush.msra.mxu2 %v3172_v17  ;;  %3990 = vmatpush.msra.mxu3 %v3204_v18  ;;  %v3138_v28 = vld [vmem:[%s6058_s14 + $0x980] sm:$0xff]  ;;  %v6316_v17 = vld.sshfl [vmem:[#allocation1 + $0x20] sm:$0xff pattern:$0x73625140] }
 0x217   : > { %v3104_v27 = vld [vmem:[%s6058_s14 + $0x870] sm:$0xff]  ;;  %3931 = vmatpush.msra.mxu0 %v3106_v19  ;;  %3950 = vmatpush.msra.mxu1 %v3140_v20  ;;  %v3102_v31 = vld [vmem:[%s6058_s14 + $0x860] sm:$0xff]  ;;  %v6318_v18 = vld.sshfl [vmem:[#allocation1 + $0x30] sm:$0xff pattern:$0x73625140] }
 0x218   : > { %v3168_v29 = vld [vmem:[%s6058_s14 + $0xa70] sm:$0xff]  ;;  %3971 = vmatpush.msra.mxu2 %v3170_v21  ;;  %3991 = vmatpush.msra.mxu3 %v3202_v22  ;;  %v3166_v33 = vld [vmem:[%s6058_s14 + $0xa60] sm:$0xff] }
 0x219   : > { %v3200_v30 = vld [vmem:[%s6058_s14 + $0xb70] sm:$0xff]  ;;  %3932 = vmatpush.msra.mxu0 %v3104_v27  ;;  %3951 = vmatpush.msra.mxu1 %v3138_v28  ;;  %v3198_v34 = vld [vmem:[%s6058_s14 + $0xb60] sm:$0xff] }
 0x21a   : > { %v3136_v32 = vld [vmem:[%s6058_s14 + $0x970] sm:$0xff]  ;;  %3972 = vmatpush.msra.mxu2 %v3168_v29  ;;  %3992 = vmatpush.msra.mxu3 %v3200_v30  ;;  %v3134_v36 = vld [vmem:[%s6058_s14 + $0x960] sm:$0xff] }
 0x21b   : > { %v3100_v35 = vld [vmem:[%s6058_s14 + $0x850] sm:$0xff]  ;;  %3933 = vmatpush.msra.mxu0 %v3102_v31  ;;  %3952 = vmatpush.msra.mxu1 %v3136_v32  ;;  %v3098_v43 = vld [vmem:[%s6058_s14 + $0x840] sm:$0xff] }
 0x21c   : > { %v3164_v37 = vld [vmem:[%s6058_s14 + $0xa50] sm:$0xff]  ;;  %3973 = vmatpush.msra.mxu2 %v3166_v33  ;;  %3993 = vmatpush.msra.mxu3 %v3198_v34  ;;  %v3162_v45 = vld [vmem:[%s6058_s14 + $0xa40] sm:$0xff] }
 0x21d   : > { %v3196_v38 = vld [vmem:[%s6058_s14 + $0xb50] sm:$0xff]  ;;  %3934 = vmatpush.msra.mxu0 %v3100_v35  ;;  %3953 = vmatpush.msra.mxu1 %v3134_v36  ;;  %v3194_v46 = vld [vmem:[%s6058_s14 + $0xb40] sm:$0xff] }
 0x21e   : > { %v3132_v44 = vld [vmem:[%s6058_s14 + $0x950] sm:$0xff]  ;;  %3974 = vmatpush.msra.mxu2 %v3164_v37  ;;  %3994 = vmatpush.msra.mxu3 %v3196_v38  ;;  %v3130_v48 = vld [vmem:[%s6058_s14 + $0x940] sm:$0xff] }
 0x21f   : > { %v3096_v47 = vld [vmem:[%s6058_s14 + $0x830] sm:$0xff]  ;;  %3935 = vmatpush.msra.mxu0 %v3098_v43  ;;  %3954 = vmatpush.msra.mxu1 %v3132_v44  ;;  %v3094_v51 = vld [vmem:[%s6058_s14 + $0x820] sm:$0xff] }
 0x220   : > { %v3160_v49 = vld [vmem:[%s6058_s14 + $0xa30] sm:$0xff]  ;;  %3975 = vmatpush.msra.mxu2 %v3162_v45  ;;  %3995 = vmatpush.msra.mxu3 %v3194_v46  ;;  %v3158_v53 = vld [vmem:[%s6058_s14 + $0xa20] sm:$0xff] }
 0x221   : > { %v3192_v50 = vld [vmem:[%s6058_s14 + $0xb30] sm:$0xff]  ;;  %3936 = vmatpush.msra.mxu0 %v3096_v47  ;;  %3955 = vmatpush.msra.mxu1 %v3130_v48  ;;  %v3190_v54 = vld [vmem:[%s6058_s14 + $0xb20] sm:$0xff] }
 0x222   : > { %v3128_v52 = vld [vmem:[%s6058_s14 + $0x930] sm:$0xff]  ;;  %3976 = vmatpush.msra.mxu2 %v3160_v49  ;;  %3996 = vmatpush.msra.mxu3 %v3192_v50  ;;  %v3126_v56 = vld [vmem:[%s6058_s14 + $0x920] sm:$0xff] }
 0x223   : > { %v3092_v55 = vld [vmem:[%s6058_s14 + $0x810] sm:$0xff]  ;;  %3937 = vmatpush.msra.mxu0 %v3094_v51  ;;  %3956 = vmatpush.msra.mxu1 %v3128_v52  ;;  %v3090_v59 = vld [vmem:[%s6058_s14 + $0x800] sm:$0xff] }
 0x224   : > { %v3156_v57 = vld [vmem:[%s6058_s14 + $0xa10] sm:$0xff]  ;;  %3977 = vmatpush.msra.mxu2 %v3158_v53  ;;  %3997 = vmatpush.msra.mxu3 %v3190_v54  ;;  %v3154_v61 = vld [vmem:[%s6058_s14 + $0xa00] sm:$0xff] }
 0x225   : > { %v3188_v58 = vld [vmem:[%s6058_s14 + $0xb10] sm:$0xff]  ;;  %3938 = vmatpush.msra.mxu0 %v3092_v55  ;;  %3957 = vmatpush.msra.mxu1 %v3126_v56  ;;  %v3186_v62 = vld [vmem:[%s6058_s14 + $0xb00] sm:$0xff] }
 0x226   : > { %v3124_v60 = vld [vmem:[%s6058_s14 + $0x910] sm:$0xff]  ;;  %3978 = vmatpush.msra.mxu2 %v3156_v57  ;;  %3998 = vmatpush.msra.mxu3 %v3188_v58  ;;  %v3122_v2 = vld [vmem:[%s6058_s14 + $0x900] sm:$0xff] }
 0x227   : > { %3939 = vmatpush.msra.mxu0 %v3090_v59  ;;  %v3248_v63 = vld [vmem:[%s6058_s14 + $0xcf0] sm:$0xff]  ;;  %3958 = vmatpush.msra.mxu1 %v3124_v60  ;;  %v3246_v6 = vld [vmem:[%s6058_s14 + $0xce0] sm:$0xff] }
 0x228   : > { %3979 = vmatpush.msra.mxu2 %v3154_v61  ;;  %v3312_v0 = vld [vmem:[%s6058_s14 + $0xef0] sm:$0xff]  ;;  %3999 = vmatpush.msra.mxu3 %v3186_v62  ;;  %v3310_v9 = vld [vmem:[%s6058_s14 + $0xee0] sm:$0xff] }
 0x229   : > { %v3344_v1 = vld [vmem:[%s6058_s14 + $0xff0] sm:$0xff]  ;;  %3940 = vmatmul.f32.vlgmr.msra.gmra.mxu0 %v6236_v3  ;;  %3980 = vmatmul.f32.vlgmr.msra.gmra.mxu2 %v6238_v4  ;;  %v3342_v10 = vld [vmem:[%s6058_s14 + $0xfe0] sm:$0xff] }
 0x22a   : > { %4004 = vmatpush.msrb.mxu0 %v3248_v63  ;;  %v3280_v7 = vld [vmem:[%s6058_s14 + $0xdf0] sm:$0xff]  ;;  %4044 = vmatpush.msrb.mxu2 %v3312_v0  ;;  %v3278_v12 = vld [vmem:[%s6058_s14 + $0xde0] sm:$0xff] }
 0x22b   : > { %4064 = vmatpush.msrb.mxu3 %v3344_v1  ;;  %v3244_v11 = vld [vmem:[%s6058_s14 + $0xcd0] sm:$0xff]  ;;  %3959 = vmatpush.msra.mxu1 %v3122_v2  ;;  %v3242_v15 = vld [vmem:[%s6058_s14 + $0xcc0] sm:$0xff] }
 0x22c   : > { %4000 = vmatmul.f32.vlgmr.msra.gmra.mxu3 %v6246_v8  ;;  %v3308_v13 = vld [vmem:[%s6058_s14 + $0xed0] sm:$0xff]  ;;  %3960 = vmatmul.f32.vlgmr.msra.gmra.mxu1 %v6240_v5  ;;  %v3306_v20 = vld [vmem:[%s6058_s14 + $0xec0] sm:$0xff] }
 0x22d   : > { %v3340_v14 = vld [vmem:[%s6058_s14 + $0xfd0] sm:$0xff]  ;;  %4005 = vmatpush.msrb.mxu0 %v3246_v6  ;;  %4024 = vmatpush.msrb.mxu1 %v3280_v7  ;;  %v3338_v27 = vld [vmem:[%s6058_s14 + $0xfc0] sm:$0xff] }
 0x22e   : > { %v3276_v16 = vld [vmem:[%s6058_s14 + $0xdd0] sm:$0xff]  ;;  %4045 = vmatpush.msrb.mxu2 %v3310_v9  ;;  %4065 = vmatpush.msrb.mxu3 %v3342_v10  ;;  %v3274_v29 = vld [vmem:[%s6058_s14 + $0xdc0] sm:$0xff] }
 0x22f   : > { %v6320_v19 = vld.sshfl [vmem:[#allocation1 + $0x28] sm:$0xff pattern:$0x73625140]  ;;  %4006 = vmatpush.msrb.mxu0 %v3244_v11  ;;  %v6326_v22 = vld.sshfl [vmem:[#allocation1 + $0x38] sm:$0xff pattern:$0x73625140]  ;;  %4025 = vmatpush.msrb.mxu1 %v3278_v12 }
 0x230   : > { %v2832_v21 = vld [vmem:[%s7052_s0 + $0x28] sm:$0xff]  ;;  %4046 = vmatpush.msrb.mxu2 %v3308_v13  ;;  %4066 = vmatpush.msrb.mxu3 %v3340_v14 }
 0x231   : > { %v3240_v28 = vld [vmem:[%s6058_s14 + $0xcb0] sm:$0xff]  ;;  %3715 = vst [vmem:[#allocation1 + $0x20] ss:$4 sm:$0xff] %v2832_v21  ;;  %4007 = vmatpush.msrb.mxu0 %v3242_v15  ;;  %4026 = vmatpush.msrb.mxu1 %v3276_v16  ;;  %v3238_v32 = vld [vmem:[%s6058_s14 + $0xca0] sm:$0xff] }
 0x232   : > { %v3304_v30 = vld [vmem:[%s6058_s14 + $0xeb0] sm:$0xff]  ;;  %4047 = vmatpush.msrb.mxu2 %v3306_v20  ;;  %4067 = vmatpush.msrb.mxu3 %v3338_v27  ;;  %v3302_v34 = vld [vmem:[%s6058_s14 + $0xea0] sm:$0xff] }
 0x233   : > { %v3336_v31 = vld [vmem:[%s6058_s14 + $0xfb0] sm:$0xff]  ;;  %4008 = vmatpush.msrb.mxu0 %v3240_v28  ;;  %4027 = vmatpush.msrb.mxu1 %v3274_v29  ;;  %v3334_v35 = vld [vmem:[%s6058_s14 + $0xfa0] sm:$0xff] }
 0x234   : > { %v3272_v33 = vld [vmem:[%s6058_s14 + $0xdb0] sm:$0xff]  ;;  %4048 = vmatpush.msrb.mxu2 %v3304_v30  ;;  %4068 = vmatpush.msrb.mxu3 %v3336_v31  ;;  %v3270_v37 = vld [vmem:[%s6058_s14 + $0xda0] sm:$0xff] }
 0x235   : > { %v3236_v36 = vld [vmem:[%s6058_s14 + $0xc90] sm:$0xff]  ;;  %4009 = vmatpush.msrb.mxu0 %v3238_v32  ;;  %4028 = vmatpush.msrb.mxu1 %v3272_v33  ;;  %v3234_v44 = vld [vmem:[%s6058_s14 + $0xc80] sm:$0xff] }
 0x236   : > { %v3300_v38 = vld [vmem:[%s6058_s14 + $0xe90] sm:$0xff]  ;;  %4049 = vmatpush.msrb.mxu2 %v3302_v34  ;;  %4069 = vmatpush.msrb.mxu3 %v3334_v35  ;;  %v3298_v46 = vld [vmem:[%s6058_s14 + $0xe80] sm:$0xff] }
 0x237   : > { %v3332_v43 = vld [vmem:[%s6058_s14 + $0xf90] sm:$0xff]  ;;  %4010 = vmatpush.msrb.mxu0 %v3236_v36  ;;  %4029 = vmatpush.msrb.mxu1 %v3270_v37  ;;  %v3330_v47 = vld [vmem:[%s6058_s14 + $0xf80] sm:$0xff] }
 0x238   : > { %v3268_v45 = vld [vmem:[%s6058_s14 + $0xd90] sm:$0xff]  ;;  %4050 = vmatpush.msrb.mxu2 %v3300_v38  ;;  %4070 = vmatpush.msrb.mxu3 %v3332_v43  ;;  %v3266_v49 = vld [vmem:[%s6058_s14 + $0xd80] sm:$0xff] }
 0x239   : > { %v3232_v48 = vld [vmem:[%s6058_s14 + $0xc70] sm:$0xff]  ;;  %4011 = vmatpush.msrb.mxu0 %v3234_v44  ;;  %4030 = vmatpush.msrb.mxu1 %v3268_v45  ;;  %v3230_v52 = vld [vmem:[%s6058_s14 + $0xc60] sm:$0xff] }
 0x23a   : > { %v3296_v50 = vld [vmem:[%s6058_s14 + $0xe70] sm:$0xff]  ;;  %4051 = vmatpush.msrb.mxu2 %v3298_v46  ;;  %4071 = vmatpush.msrb.mxu3 %v3330_v47  ;;  %v3294_v54 = vld [vmem:[%s6058_s14 + $0xe60] sm:$0xff] }
 0x23b   : > { %v3328_v51 = vld [vmem:[%s6058_s14 + $0xf70] sm:$0xff]  ;;  %4012 = vmatpush.msrb.mxu0 %v3232_v48  ;;  %4031 = vmatpush.msrb.mxu1 %v3266_v49  ;;  %v3326_v55 = vld [vmem:[%s6058_s14 + $0xf60] sm:$0xff] }
 0x23c   : > { %v3264_v53 = vld [vmem:[%s6058_s14 + $0xd70] sm:$0xff]  ;;  %4052 = vmatpush.msrb.mxu2 %v3296_v50  ;;  %4072 = vmatpush.msrb.mxu3 %v3328_v51  ;;  %v3262_v57 = vld [vmem:[%s6058_s14 + $0xd60] sm:$0xff] }
 0x23d   : > { %v3228_v56 = vld [vmem:[%s6058_s14 + $0xc50] sm:$0xff]  ;;  %4013 = vmatpush.msrb.mxu0 %v3230_v52  ;;  %4032 = vmatpush.msrb.mxu1 %v3264_v53  ;;  %v3226_v60 = vld [vmem:[%s6058_s14 + $0xc40] sm:$0xff] }
 0x23e   : > { %v3292_v58 = vld [vmem:[%s6058_s14 + $0xe50] sm:$0xff]  ;;  %4053 = vmatpush.msrb.mxu2 %v3294_v54  ;;  %4073 = vmatpush.msrb.mxu3 %v3326_v55  ;;  %v3290_v62 = vld [vmem:[%s6058_s14 + $0xe40] sm:$0xff] }
 0x23f   : > { %v3324_v59 = vld [vmem:[%s6058_s14 + $0xf50] sm:$0xff]  ;;  %4014 = vmatpush.msrb.mxu0 %v3228_v56  ;;  %4033 = vmatpush.msrb.mxu1 %v3262_v57  ;;  %v3322_v63 = vld [vmem:[%s6058_s14 + $0xf40] sm:$0xff] }
 0x240   : > { %v3260_v61 = vld [vmem:[%s6058_s14 + $0xd50] sm:$0xff]  ;;  %4054 = vmatpush.msrb.mxu2 %v3292_v58  ;;  %4074 = vmatpush.msrb.mxu3 %v3324_v59  ;;  %v3258_v1 = vld [vmem:[%s6058_s14 + $0xd40] sm:$0xff] }
 0x241   : > { %v3224_v0 = vld [vmem:[%s6058_s14 + $0xc30] sm:$0xff]  ;;  %4015 = vmatpush.msrb.mxu0 %v3226_v60  ;;  %4034 = vmatpush.msrb.mxu1 %v3260_v61  ;;  %v3222_v7 = vld [vmem:[%s6058_s14 + $0xc20] sm:$0xff] }
 0x242   : > { %v3288_v2 = vld [vmem:[%s6058_s14 + $0xe30] sm:$0xff]  ;;  %4055 = vmatpush.msrb.mxu2 %v3290_v62  ;;  %4075 = vmatpush.msrb.mxu3 %v3322_v63  ;;  %v3286_v10 = vld [vmem:[%s6058_s14 + $0xe20] sm:$0xff] }
 0x243   : > { %v3320_v6 = vld [vmem:[%s6058_s14 + $0xf30] sm:$0xff]  ;;  %4016 = vmatpush.msrb.mxu0 %v3224_v0  ;;  %4035 = vmatpush.msrb.mxu1 %v3258_v1  ;;  %v3318_v11 = vld [vmem:[%s6058_s14 + $0xf20] sm:$0xff] }
 0x244   : > { %v3256_v9 = vld [vmem:[%s6058_s14 + $0xd30] sm:$0xff]  ;;  %4056 = vmatpush.msrb.mxu2 %v3288_v2  ;;  %4076 = vmatpush.msrb.mxu3 %v3320_v6  ;;  %v3254_v13 = vld [vmem:[%s6058_s14 + $0xd20] sm:$0xff] }
 0x245   : > { %v3220_v12 = vld [vmem:[%s6058_s14 + $0xc10] sm:$0xff]  ;;  %4017 = vmatpush.msrb.mxu0 %v3222_v7  ;;  %4036 = vmatpush.msrb.mxu1 %v3256_v9  ;;  %v3218_v16 = vld [vmem:[%s6058_s14 + $0xc00] sm:$0xff] }
 0x246   : > { %v3284_v14 = vld [vmem:[%s6058_s14 + $0xe10] sm:$0xff]  ;;  %4057 = vmatpush.msrb.mxu2 %v3286_v10  ;;  %4077 = vmatpush.msrb.mxu3 %v3318_v11  ;;  %v3282_v21 = vld [vmem:[%s6058_s14 + $0xe00] sm:$0xff] }
 0x247   : > { %v3316_v15 = vld [vmem:[%s6058_s14 + $0xf10] sm:$0xff]  ;;  %4018 = vmatpush.msrb.mxu0 %v3220_v12  ;;  %4037 = vmatpush.msrb.mxu1 %v3254_v13  ;;  %v3314_v27 = vld [vmem:[%s6058_s14 + $0xf00] sm:$0xff] }
 0x248   : > { %v3252_v20 = vld [vmem:[%s6058_s14 + $0xd10] sm:$0xff]  ;;  %4058 = vmatpush.msrb.mxu2 %v3284_v14  ;;  %4078 = vmatpush.msrb.mxu3 %v3316_v15  ;;  %v3250_v31 = vld [vmem:[%s6058_s14 + $0xd00] sm:$0xff] }
 0x249   : > { %4019 = vmatpush.msrb.mxu0 %v3218_v16  ;;  %v3376_v28 = vld [vmem:[%s6058_s14 + $0x10f0] sm:$0xff]  ;;  %4038 = vmatpush.msrb.mxu1 %v3252_v20  ;;  %v3374_v32 = vld [vmem:[%s6058_s14 + $0x10e0] sm:$0xff] }
 0x24a   : > { %4059 = vmatpush.msrb.mxu2 %v3282_v21  ;;  %v3440_v29 = vld [vmem:[%s6058_s14 + $0x12f0] sm:$0xff]  ;;  %4079 = vmatpush.msrb.mxu3 %v3314_v27  ;;  %v3438_v34 = vld [vmem:[%s6058_s14 + $0x12e0] sm:$0xff] }
 0x24b   : > { %v3472_v30 = vld [vmem:[%s6058_s14 + $0x13f0] sm:$0xff]  ;;  %4020 = vmatmul.f32.vlgmr.msrb.gmra.mxu0 %v6316_v17  ;;  %4060 = vmatmul.f32.vlgmr.msrb.gmra.mxu2 %v6318_v18  ;;  %v3470_v35 = vld [vmem:[%s6058_s14 + $0x13e0] sm:$0xff] }
 0x24c   : > { %4084 = vmatpush.msra.mxu0 %v3376_v28  ;;  %4124 = vmatpush.msra.mxu2 %v3440_v29  ;;  %v3408_v33 = vld [vmem:[%s6058_s14 + $0x11f0] sm:$0xff]  ;;  %v3406_v37 = vld [vmem:[%s6058_s14 + $0x11e0] sm:$0xff] }
 0x24d   : > { %4144 = vmatpush.msra.mxu3 %v3472_v30  ;;  %4039 = vmatpush.msrb.mxu1 %v3250_v31  ;;  %v3372_v36 = vld [vmem:[%s6058_s14 + $0x10d0] sm:$0xff]  ;;  %v3370_v44 = vld [vmem:[%s6058_s14 + $0x10c0] sm:$0xff] }
 0x24e   : > { %4080 = vmatmul.f32.vlgmr.msrb.gmra.mxu3 %v6326_v22  ;;  %4040 = vmatmul.f32.vlgmr.msrb.gmra.mxu1 %v6320_v19  ;;  %v3436_v38 = vld [vmem:[%s6058_s14 + $0x12d0] sm:$0xff]  ;;  %v3434_v46 = vld [vmem:[%s6058_s14 + $0x12c0] sm:$0xff] }
 0x24f   : > { %4085 = vmatpush.msra.mxu0 %v3374_v32  ;;  %4104 = vmatpush.msra.mxu1 %v3408_v33  ;;  %v3468_v43 = vld [vmem:[%s6058_s14 + $0x13d0] sm:$0xff]  ;;  %v3466_v47 = vld [vmem:[%s6058_s14 + $0x13c0] sm:$0xff] }
 0x250   : > { %4125 = vmatpush.msra.mxu2 %v3438_v34  ;;  %4145 = vmatpush.msra.mxu3 %v3470_v35  ;;  %v3404_v45 = vld [vmem:[%s6058_s14 + $0x11d0] sm:$0xff]  ;;  %v3402_v49 = vld [vmem:[%s6058_s14 + $0x11c0] sm:$0xff] }
 0x251   : > { %4086 = vmatpush.msra.mxu0 %v3372_v36  ;;  %4105 = vmatpush.msra.mxu1 %v3406_v37  ;;  %v3368_v48 = vld [vmem:[%s6058_s14 + $0x10b0] sm:$0xff]  ;;  %v3366_v52 = vld [vmem:[%s6058_s14 + $0x10a0] sm:$0xff] }
 0x252   : > { %4126 = vmatpush.msra.mxu2 %v3436_v38  ;;  %4146 = vmatpush.msra.mxu3 %v3468_v43  ;;  %v3432_v50 = vld [vmem:[%s6058_s14 + $0x12b0] sm:$0xff]  ;;  %v3430_v54 = vld [vmem:[%s6058_s14 + $0x12a0] sm:$0xff] }
 0x253   : > { %4087 = vmatpush.msra.mxu0 %v3370_v44  ;;  %4106 = vmatpush.msra.mxu1 %v3404_v45  ;;  %v3464_v51 = vld [vmem:[%s6058_s14 + $0x13b0] sm:$0xff]  ;;  %v3462_v55 = vld [vmem:[%s6058_s14 + $0x13a0] sm:$0xff] }
 0x254   : > { %4127 = vmatpush.msra.mxu2 %v3434_v46  ;;  %4147 = vmatpush.msra.mxu3 %v3466_v47  ;;  %v3400_v53 = vld [vmem:[%s6058_s14 + $0x11b0] sm:$0xff]  ;;  %v3398_v57 = vld [vmem:[%s6058_s14 + $0x11a0] sm:$0xff] }
 0x255   : > { %4088 = vmatpush.msra.mxu0 %v3368_v48  ;;  %4107 = vmatpush.msra.mxu1 %v3402_v49  ;;  %v3364_v56 = vld [vmem:[%s6058_s14 + $0x1090] sm:$0xff]  ;;  %v3362_v60 = vld [vmem:[%s6058_s14 + $0x1080] sm:$0xff]  ;;  %v6445_v48 = vld.sshfl [vmem:[#allocation1] sm:$0xff pattern:$0x73625140] }
 0x256   : > { %4128 = vmatpush.msra.mxu2 %v3432_v50  ;;  %4148 = vmatpush.msra.mxu3 %v3464_v51  ;;  %v3428_v58 = vld [vmem:[%s6058_s14 + $0x1290] sm:$0xff]  ;;  %v3426_v62 = vld [vmem:[%s6058_s14 + $0x1280] sm:$0xff]  ;;  %v6447_v49 = vld.sshfl [vmem:[#allocation1 + $0x10] sm:$0xff pattern:$0x73625140] }
 0x257   : > { %4089 = vmatpush.msra.mxu0 %v3366_v52  ;;  %4108 = vmatpush.msra.mxu1 %v3400_v53  ;;  %v3460_v59 = vld [vmem:[%s6058_s14 + $0x1390] sm:$0xff]  ;;  %v3458_v63 = vld [vmem:[%s6058_s14 + $0x1380] sm:$0xff] }
 0x258   : > { %4129 = vmatpush.msra.mxu2 %v3430_v54  ;;  %4149 = vmatpush.msra.mxu3 %v3462_v55  ;;  %v3396_v61 = vld [vmem:[%s6058_s14 + $0x1190] sm:$0xff]  ;;  %v3394_v1 = vld [vmem:[%s6058_s14 + $0x1180] sm:$0xff] }
 0x259   : > { %4090 = vmatpush.msra.mxu0 %v3364_v56  ;;  %4109 = vmatpush.msra.mxu1 %v3398_v57  ;;  %v3360_v0 = vld [vmem:[%s6058_s14 + $0x1070] sm:$0xff]  ;;  %v3358_v7 = vld [vmem:[%s6058_s14 + $0x1060] sm:$0xff] }
 0x25a   : > { %4130 = vmatpush.msra.mxu2 %v3428_v58  ;;  %4150 = vmatpush.msra.mxu3 %v3460_v59  ;;  %v3424_v2 = vld [vmem:[%s6058_s14 + $0x1270] sm:$0xff]  ;;  %v3422_v10 = vld [vmem:[%s6058_s14 + $0x1260] sm:$0xff] }
 0x25b   : > { %4091 = vmatpush.msra.mxu0 %v3362_v60  ;;  %4110 = vmatpush.msra.mxu1 %v3396_v61  ;;  %v3456_v6 = vld [vmem:[%s6058_s14 + $0x1370] sm:$0xff]  ;;  %v3454_v11 = vld [vmem:[%s6058_s14 + $0x1360] sm:$0xff] }
 0x25c   : > { %4131 = vmatpush.msra.mxu2 %v3426_v62  ;;  %4151 = vmatpush.msra.mxu3 %v3458_v63  ;;  %v3392_v9 = vld [vmem:[%s6058_s14 + $0x1170] sm:$0xff]  ;;  %v3390_v13 = vld [vmem:[%s6058_s14 + $0x1160] sm:$0xff] }
 0x25d   : > { %4092 = vmatpush.msra.mxu0 %v3360_v0  ;;  %4111 = vmatpush.msra.mxu1 %v3394_v1  ;;  %v3356_v12 = vld [vmem:[%s6058_s14 + $0x1050] sm:$0xff]  ;;  %v3354_v16 = vld [vmem:[%s6058_s14 + $0x1040] sm:$0xff] }
 0x25e   : > { %4132 = vmatpush.msra.mxu2 %v3424_v2  ;;  %4152 = vmatpush.msra.mxu3 %v3456_v6  ;;  %v3420_v14 = vld [vmem:[%s6058_s14 + $0x1250] sm:$0xff]  ;;  %v3418_v21 = vld [vmem:[%s6058_s14 + $0x1240] sm:$0xff] }
 0x25f   : > { %4093 = vmatpush.msra.mxu0 %v3358_v7  ;;  %4112 = vmatpush.msra.mxu1 %v3392_v9  ;;  %v3452_v15 = vld [vmem:[%s6058_s14 + $0x1350] sm:$0xff]  ;;  %v3450_v27 = vld [vmem:[%s6058_s14 + $0x1340] sm:$0xff] }
 0x260   : > { %4133 = vmatpush.msra.mxu2 %v3422_v10  ;;  %4153 = vmatpush.msra.mxu3 %v3454_v11  ;;  %v3388_v20 = vld [vmem:[%s6058_s14 + $0x1150] sm:$0xff]  ;;  %v3386_v29 = vld [vmem:[%s6058_s14 + $0x1140] sm:$0xff] }
 0x261   : > { %4094 = vmatpush.msra.mxu0 %v3356_v12  ;;  %4113 = vmatpush.msra.mxu1 %v3390_v13  ;;  %v3352_v28 = vld [vmem:[%s6058_s14 + $0x1030] sm:$0xff]  ;;  %v3350_v32 = vld [vmem:[%s6058_s14 + $0x1020] sm:$0xff] }
 0x262   : > { %4134 = vmatpush.msra.mxu2 %v3420_v14  ;;  %4154 = vmatpush.msra.mxu3 %v3452_v15  ;;  %v3416_v30 = vld [vmem:[%s6058_s14 + $0x1230] sm:$0xff]  ;;  %v3414_v34 = vld [vmem:[%s6058_s14 + $0x1220] sm:$0xff] }
 0x263   : > { %4095 = vmatpush.msra.mxu0 %v3354_v16  ;;  %4114 = vmatpush.msra.mxu1 %v3388_v20  ;;  %v3448_v31 = vld [vmem:[%s6058_s14 + $0x1330] sm:$0xff]  ;;  %v3446_v35 = vld [vmem:[%s6058_s14 + $0x1320] sm:$0xff] }
 0x264   : > { %4135 = vmatpush.msra.mxu2 %v3418_v21  ;;  %4155 = vmatpush.msra.mxu3 %v3450_v27  ;;  %v3384_v33 = vld [vmem:[%s6058_s14 + $0x1130] sm:$0xff]  ;;  %v3382_v37 = vld [vmem:[%s6058_s14 + $0x1120] sm:$0xff] }
 0x265   : > { %4096 = vmatpush.msra.mxu0 %v3352_v28  ;;  %4115 = vmatpush.msra.mxu1 %v3386_v29  ;;  %v3348_v36 = vld [vmem:[%s6058_s14 + $0x1010] sm:$0xff]  ;;  %v3346_v44 = vld [vmem:[%s6058_s14 + $0x1000] sm:$0xff] }
 0x266   : > { %4136 = vmatpush.msra.mxu2 %v3416_v30  ;;  %4156 = vmatpush.msra.mxu3 %v3448_v31  ;;  %v3412_v38 = vld [vmem:[%s6058_s14 + $0x1210] sm:$0xff]  ;;  %v3410_v46 = vld [vmem:[%s6058_s14 + $0x1200] sm:$0xff] }
 0x267   : > { %4097 = vmatpush.msra.mxu0 %v3350_v32  ;;  %4116 = vmatpush.msra.mxu1 %v3384_v33  ;;  %v3444_v43 = vld [vmem:[%s6058_s14 + $0x1310] sm:$0xff]  ;;  %v3442_v47 = vld [vmem:[%s6058_s14 + $0x1300] sm:$0xff] }
 0x268   : > { %4137 = vmatpush.msra.mxu2 %v3414_v34  ;;  %4157 = vmatpush.msra.mxu3 %v3446_v35  ;;  %v3380_v45 = vld [vmem:[%s6058_s14 + $0x1110] sm:$0xff]  ;;  %v3378_v53 = vld [vmem:[%s6058_s14 + $0x1100] sm:$0xff] }
 0x269   : > { %4098 = vmatpush.msra.mxu0 %v3348_v36  ;;  %4117 = vmatpush.msra.mxu1 %v3382_v37  ;;  %v3504_v50 = vld [vmem:[%s6058_s14 + $0x14f0] sm:$0xff]  ;;  %v3502_v56 = vld [vmem:[%s6058_s14 + $0x14e0] sm:$0xff] }
 0x26a   : > { %4138 = vmatpush.msra.mxu2 %v3412_v38  ;;  %4158 = vmatpush.msra.mxu3 %v3444_v43  ;;  %v3568_v51 = vld [vmem:[%s6058_s14 + $0x16f0] sm:$0xff]  ;;  %v3566_v58 = vld [vmem:[%s6058_s14 + $0x16e0] sm:$0xff] }
 0x26b   : > { %4099 = vmatpush.msra.mxu0 %v3346_v44  ;;  %4118 = vmatpush.msra.mxu1 %v3380_v45  ;;  %v3600_v52 = vld [vmem:[%s6058_s14 + $0x17f0] sm:$0xff]  ;;  %v3598_v59 = vld [vmem:[%s6058_s14 + $0x17e0] sm:$0xff] }
 0x26c   : > { %4139 = vmatpush.msra.mxu2 %v3410_v46  ;;  %4159 = vmatpush.msra.mxu3 %v3442_v47  ;;  %v6454_v54 = vld.sshfl [vmem:[#allocation1 + $0x18] sm:$0xff pattern:$0x73625140]  ;;  %v6457_v55 = vld.sshfl [vmem:[#allocation1 + $0x8] sm:$0xff pattern:$0x73625140] }
 0x26d   : > { %4100 = vmatmul.f32.vlgmr.msra.gmra.mxu0 %v6445_v48  ;;  %4140 = vmatmul.f32.vlgmr.msra.gmra.mxu2 %v6447_v49  ;;  %v3536_v57 = vld [vmem:[%s6058_s14 + $0x15f0] sm:$0xff]  ;;  %v3534_v61 = vld [vmem:[%s6058_s14 + $0x15e0] sm:$0xff] }
 0x26e   : > { %4164 = vmatpush.msrb.mxu0 %v3504_v50  ;;  %4204 = vmatpush.msrb.mxu2 %v3568_v51  ;;  %v3500_v60 = vld [vmem:[%s6058_s14 + $0x14d0] sm:$0xff]  ;;  %v3498_v0 = vld [vmem:[%s6058_s14 + $0x14c0] sm:$0xff] }
 0x26f   : > { %4224 = vmatpush.msrb.mxu3 %v3600_v52  ;;  %4119 = vmatpush.msra.mxu1 %v3378_v53  ;;  %v3564_v62 = vld [vmem:[%s6058_s14 + $0x16d0] sm:$0xff]  ;;  %v3562_v2 = vld [vmem:[%s6058_s14 + $0x16c0] sm:$0xff] }
 0x270   : > { %4160 = vmatmul.f32.vlgmr.msra.gmra.mxu3 %v6454_v54  ;;  %4120 = vmatmul.f32.vlgmr.msra.gmra.mxu1 %v6457_v55  ;;  %v3596_v63 = vld [vmem:[%s6058_s14 + $0x17d0] sm:$0xff]  ;;  %v3594_v6 = vld [vmem:[%s6058_s14 + $0x17c0] sm:$0xff] }
 0x271   : > { %4165 = vmatpush.msrb.mxu0 %v3502_v56  ;;  %4184 = vmatpush.msrb.mxu1 %v3536_v57  ;;  %v3532_v1 = vld [vmem:[%s6058_s14 + $0x15d0] sm:$0xff]  ;;  %v3530_v9 = vld [vmem:[%s6058_s14 + $0x15c0] sm:$0xff] }
 0x272   : > { %4205 = vmatpush.msrb.mxu2 %v3566_v58  ;;  %4225 = vmatpush.msrb.mxu3 %v3598_v59  ;;  %v3496_v7 = vld [vmem:[%s6058_s14 + $0x14b0] sm:$0xff]  ;;  %v3494_v12 = vld [vmem:[%s6058_s14 + $0x14a0] sm:$0xff] }
 0x273   : > { %4166 = vmatpush.msrb.mxu0 %v3500_v60  ;;  %4185 = vmatpush.msrb.mxu1 %v3534_v61  ;;  %v3560_v10 = vld [vmem:[%s6058_s14 + $0x16b0] sm:$0xff]  ;;  %v3558_v14 = vld [vmem:[%s6058_s14 + $0x16a0] sm:$0xff] }
 0x274   : > { %4206 = vmatpush.msrb.mxu2 %v3564_v62  ;;  %4226 = vmatpush.msrb.mxu3 %v3596_v63  ;;  %v3592_v11 = vld [vmem:[%s6058_s14 + $0x17b0] sm:$0xff]  ;;  %v3590_v15 = vld [vmem:[%s6058_s14 + $0x17a0] sm:$0xff]  ;;  %v2833_v63 = vld [vmem:[%s7052_s0 + $0x30] sm:$0x3f] }
 0x275   : > { %4167 = vmatpush.msrb.mxu0 %v3498_v0  ;;  %4186 = vmatpush.msrb.mxu1 %v3532_v1  ;;  %v3528_v13 = vld [vmem:[%s6058_s14 + $0x15b0] sm:$0xff]  ;;  %v3526_v20 = vld [vmem:[%s6058_s14 + $0x15a0] sm:$0xff]  ;;  %3724 = vst [vmem:[#allocation1] ss:$4 sm:$0xff] %v2833_v63 }
 0x276   : > { %4207 = vmatpush.msrb.mxu2 %v3562_v2  ;;  %4227 = vmatpush.msrb.mxu3 %v3594_v6  ;;  %v3492_v16 = vld [vmem:[%s6058_s14 + $0x1490] sm:$0xff]  ;;  %v3490_v28 = vld [vmem:[%s6058_s14 + $0x1480] sm:$0xff] }
 0x277   : > { %4168 = vmatpush.msrb.mxu0 %v3496_v7  ;;  %4187 = vmatpush.msrb.mxu1 %v3530_v9  ;;  %v3556_v21 = vld [vmem:[%s6058_s14 + $0x1690] sm:$0xff]  ;;  %v3554_v30 = vld [vmem:[%s6058_s14 + $0x1680] sm:$0xff] }
 0x278   : > { %4208 = vmatpush.msrb.mxu2 %v3560_v10  ;;  %4228 = vmatpush.msrb.mxu3 %v3592_v11  ;;  %v3588_v27 = vld [vmem:[%s6058_s14 + $0x1790] sm:$0xff]  ;;  %v3586_v31 = vld [vmem:[%s6058_s14 + $0x1780] sm:$0xff] }
 0x279   : > { %4169 = vmatpush.msrb.mxu0 %v3494_v12  ;;  %4188 = vmatpush.msrb.mxu1 %v3528_v13  ;;  %v3524_v29 = vld [vmem:[%s6058_s14 + $0x1590] sm:$0xff]  ;;  %v3522_v33 = vld [vmem:[%s6058_s14 + $0x1580] sm:$0xff]  ;;  %v3720_v13 = vld.sshfl [vmem:[#allocation1 + $0x20] sm:$0xff pattern:$0x73625140] }
 0x27a   : > { %4209 = vmatpush.msrb.mxu2 %v3558_v14  ;;  %4229 = vmatpush.msrb.mxu3 %v3590_v15  ;;  %v3488_v32 = vld [vmem:[%s6058_s14 + $0x1470] sm:$0xff]  ;;  %v3486_v36 = vld [vmem:[%s6058_s14 + $0x1460] sm:$0xff]  ;;  %v3722_v14 = vld.sshfl [vmem:[#allocation1 + $0x30] sm:$0xff pattern:$0x73625140] }
 0x27b   : > { %4170 = vmatpush.msrb.mxu0 %v3492_v16  ;;  %4189 = vmatpush.msrb.mxu1 %v3526_v20  ;;  %v3552_v34 = vld [vmem:[%s6058_s14 + $0x1670] sm:$0xff]  ;;  %v3550_v38 = vld [vmem:[%s6058_s14 + $0x1660] sm:$0xff]  ;;  %v2865_v20 = vld [vmem:[%s6058_s14 + $0xf8] sm:$0xff] }
 0x27c   : > { %4210 = vmatpush.msrb.mxu2 %v3556_v21  ;;  %4230 = vmatpush.msrb.mxu3 %v3588_v27  ;;  %v3584_v35 = vld [vmem:[%s6058_s14 + $0x1770] sm:$0xff]  ;;  %v3582_v43 = vld [vmem:[%s6058_s14 + $0x1760] sm:$0xff] }
 0x27d   : > { %4171 = vmatpush.msrb.mxu0 %v3490_v28  ;;  %4190 = vmatpush.msrb.mxu1 %v3524_v29  ;;  %v3520_v37 = vld [vmem:[%s6058_s14 + $0x1570] sm:$0xff]  ;;  %v3518_v45 = vld [vmem:[%s6058_s14 + $0x1560] sm:$0xff] }
 0x27e   : > { %4211 = vmatpush.msrb.mxu2 %v3554_v30  ;;  %4231 = vmatpush.msrb.mxu3 %v3586_v31  ;;  %v3484_v44 = vld [vmem:[%s6058_s14 + $0x1450] sm:$0xff]  ;;  %v3482_v50 = vld [vmem:[%s6058_s14 + $0x1440] sm:$0xff] }
 0x27f   : > { %4172 = vmatpush.msrb.mxu0 %v3488_v32  ;;  %4191 = vmatpush.msrb.mxu1 %v3522_v33  ;;  %v3548_v46 = vld [vmem:[%s6058_s14 + $0x1650] sm:$0xff]  ;;  %v3546_v52 = vld [vmem:[%s6058_s14 + $0x1640] sm:$0xff]  ;;  %v2863_v32 = vld [vmem:[%s6058_s14 + $0xe8] sm:$0xff] }
 0x280   : > { %4212 = vmatpush.msrb.mxu2 %v3552_v34  ;;  %4232 = vmatpush.msrb.mxu3 %v3584_v35  ;;  %v3580_v47 = vld [vmem:[%s6058_s14 + $0x1750] sm:$0xff]  ;;  %v3578_v53 = vld [vmem:[%s6058_s14 + $0x1740] sm:$0xff] }
 0x281   : > { %4173 = vmatpush.msrb.mxu0 %v3486_v36  ;;  %4192 = vmatpush.msrb.mxu1 %v3520_v37  ;;  %v3516_v51 = vld [vmem:[%s6058_s14 + $0x1550] sm:$0xff]  ;;  %v3514_v57 = vld [vmem:[%s6058_s14 + $0x1540] sm:$0xff]  ;;  %v2861_v36 = vld [vmem:[%s6058_s14 + $0xd8] sm:$0xff] }
 0x282   : > { %4213 = vmatpush.msrb.mxu2 %v3550_v38  ;;  %4233 = vmatpush.msrb.mxu3 %v3582_v43  ;;  %v3480_v56 = vld [vmem:[%s6058_s14 + $0x1430] sm:$0xff]  ;;  %v3478_v60 = vld [vmem:[%s6058_s14 + $0x1420] sm:$0xff] }
 0x283   : > { %4174 = vmatpush.msrb.mxu0 %v3484_v44  ;;  %4193 = vmatpush.msrb.mxu1 %v3518_v45  ;;  %v3544_v58 = vld [vmem:[%s6058_s14 + $0x1630] sm:$0xff]  ;;  %v3542_v62 = vld [vmem:[%s6058_s14 + $0x1620] sm:$0xff]  ;;  %v2859_v44 = vld [vmem:[%s6058_s14 + $0xc8] sm:$0xff] }
 0x284   : > { %4214 = vmatpush.msrb.mxu2 %v3548_v46  ;;  %4234 = vmatpush.msrb.mxu3 %v3580_v47  ;;  %v3576_v59 = vld [vmem:[%s6058_s14 + $0x1730] sm:$0xff]  ;;  %v3574_v0 = vld [vmem:[%s6058_s14 + $0x1720] sm:$0xff] }
 0x285   : > { %4175 = vmatpush.msrb.mxu0 %v3482_v50  ;;  %4194 = vmatpush.msrb.mxu1 %v3516_v51  ;;  %v3512_v61 = vld [vmem:[%s6058_s14 + $0x1530] sm:$0xff]  ;;  %v3510_v2 = vld [vmem:[%s6058_s14 + $0x1520] sm:$0xff]  ;;  %v2857_v50 = vld [vmem:[%s6058_s14 + $0xb8] sm:$0xff] }
 0x286   : > { %4215 = vmatpush.msrb.mxu2 %v3546_v52  ;;  %4235 = vmatpush.msrb.mxu3 %v3578_v53  ;;  %v3476_v1 = vld [vmem:[%s6058_s14 + $0x1410] sm:$0xff]  ;;  %v3474_v9 = vld [vmem:[%s6058_s14 + $0x1400] sm:$0xff] }
 0x287   : > { %4176 = vmatpush.msrb.mxu0 %v3480_v56  ;;  %4195 = vmatpush.msrb.mxu1 %v3514_v57  ;;  %v3540_v6 = vld [vmem:[%s6058_s14 + $0x1610] sm:$0xff]  ;;  %v3538_v11 = vld [vmem:[%s6058_s14 + $0x1600] sm:$0xff]  ;;  %v2855_v56 = vld [vmem:[%s6058_s14 + $0xa8] sm:$0xff] }
 0x288   : > { %4216 = vmatpush.msrb.mxu2 %v3544_v58  ;;  %4236 = vmatpush.msrb.mxu3 %v3576_v59  ;;  %v3572_v7 = vld [vmem:[%s6058_s14 + $0x1710] sm:$0xff]  ;;  %v3570_v12 = vld [vmem:[%s6058_s14 + $0x1700] sm:$0xff] }
 0x289   : > { %4177 = vmatpush.msrb.mxu0 %v3478_v60  ;;  %4196 = vmatpush.msrb.mxu1 %v3512_v61  ;;  %v3508_v10 = vld [vmem:[%s6058_s14 + $0x1510] sm:$0xff]  ;;  %v3678_v16 = vld [vmem:[%s6058_s14 + $0x1a60] sm:$0xf]  ;;  %v2853_v60 = vld [vmem:[%s6058_s14 + $0x98] sm:$0xff] }
 0x28a   : > { %4217 = vmatpush.msrb.mxu2 %v3542_v62  ;;  %4237 = vmatpush.msrb.mxu3 %v3574_v0  ;;  %v3632_v15 = vld [vmem:[%s6058_s14 + $0x18f0] sm:$0xff]  ;;  %v3506_v21 = vld [vmem:[%s6058_s14 + $0x1500] sm:$0xff]  ;;  %v2897_v61 = vld [vmem:[%s6058_s14 + $0x1f8] sm:$0xff] }
 0x28b   : > { %4178 = vmatpush.msrb.mxu0 %v3476_v1  ;;  %4197 = vmatpush.msrb.mxu1 %v3510_v2  ;;  %v3723_v27 = vld.sshfl [vmem:[#allocation1 + $0x38] sm:$0xff pattern:$0x73625140]  ;;  %v3721_v28 = vld.sshfl [vmem:[#allocation1 + $0x28] sm:$0xff pattern:$0x73625140] }
 0x28c   : > { %4218 = vmatpush.msrb.mxu2 %v3540_v6  ;;  %4238 = vmatpush.msrb.mxu3 %v3572_v7  ;;  %v3630_v29 = vld [vmem:[%s6058_s14 + $0x18e0] sm:$0xff]  ;;  %v3664_v30 = vld [vmem:[%s6058_s14 + $0x19f0] sm:$0xff]  ;;  %v2851_v0 = vld [vmem:[%s6058_s14 + $0x88] sm:$0xff] }
 0x28d   : > { %4179 = vmatpush.msrb.mxu0 %v3474_v9  ;;  %4198 = vmatpush.msrb.mxu1 %v3508_v10  ;;  %v3676_v31 = vld [vmem:[%s6058_s14 + $0x1a50] sm:$0xff]  ;;  %v3662_v34 = vld [vmem:[%s6058_s14 + $0x19e0] sm:$0xff]  ;;  %v2895_v1 = vld [vmem:[%s6058_s14 + $0x1e8] sm:$0xff] }
 0x28e   : > { %4219 = vmatpush.msrb.mxu2 %v3538_v11  ;;  %4239 = vmatpush.msrb.mxu3 %v3570_v12  ;;  %v3628_v33 = vld [vmem:[%s6058_s14 + $0x18d0] sm:$0xff]  ;;  %v3674_v35 = vld [vmem:[%s6058_s14 + $0x1a40] sm:$0xff]  ;;  %v2849_v7 = vld [vmem:[%s6058_s14 + $0x78] sm:$0xff] }
 0x28f   : > { %4180 = vmatmul.f32.vlgmr.msrb.gmra.mxu0 %v3720_v13  ;;  %4220 = vmatmul.f32.vlgmr.msrb.gmra.mxu2 %v3722_v14  ;;  %v3626_v37 = vld [vmem:[%s6058_s14 + $0x18c0] sm:$0xff]  ;;  %v3660_v38 = vld [vmem:[%s6058_s14 + $0x19d0] sm:$0xff]  ;;  %v2893_v9 = vld [vmem:[%s6058_s14 + $0x1d8] sm:$0xff] }
 0x290   : > { %4244 = vmatpush.msra.mxu0 %v3632_v15  ;;  %4969 = vmatpush.msk.msra.mxu2 %vm3757_vm0, %v3678_v16  ;;  %v3672_v43 = vld [vmem:[%s6058_s14 + $0x1a30] sm:$0xff]  ;;  %v3658_v46 = vld [vmem:[%s6058_s14 + $0x19c0] sm:$0xff]  ;;  %v2847_v12 = vld [vmem:[%s6058_s14 + $0x68] sm:$0xff] }
 0x291   : > { %4304 = vmatpush.msra.mxu3 %v2865_v20  ;;  %4199 = vmatpush.msrb.mxu1 %v3506_v21  ;;  %v3624_v45 = vld [vmem:[%s6058_s14 + $0x18b0] sm:$0xff]  ;;  %v3670_v47 = vld [vmem:[%s6058_s14 + $0x1a20] sm:$0xff]  ;;  %v2891_v13 = vld [vmem:[%s6058_s14 + $0x1c8] sm:$0xff] }
 0x292   : > { %4240 = vmatmul.f32.vlgmr.msrb.gmra.mxu3 %v3723_v27  ;;  %4200 = vmatmul.f32.vlgmr.msrb.gmra.mxu1 %v3721_v28  ;;  %v3622_v51 = vld [vmem:[%s6058_s14 + $0x18a0] sm:$0xff]  ;;  %v3656_v52 = vld [vmem:[%s6058_s14 + $0x19b0] sm:$0xff]  ;;  %v2845_v16 = vld [vmem:[%s6058_s14 + $0x58] sm:$0xff] }
 0x293   : > { %4245 = vmatpush.msra.mxu0 %v3630_v29  ;;  %4264 = vmatpush.msra.mxu1 %v3664_v30  ;;  %v3668_v53 = vld [vmem:[%s6058_s14 + $0x1a10] sm:$0xff]  ;;  %v3654_v58 = vld [vmem:[%s6058_s14 + $0x19a0] sm:$0xff]  ;;  %v2889_v20 = vld [vmem:[%s6058_s14 + $0x1b8] sm:$0xff] }
 0x294   : > { %4294 = vmatpush.msra.mxu2 %v3676_v31  ;;  %4305 = vmatpush.msra.mxu3 %v2863_v32  ;;  %v3620_v57 = vld [vmem:[%s6058_s14 + $0x1890] sm:$0xff]  ;;  %v3666_v59 = vld [vmem:[%s6058_s14 + $0x1a00] sm:$0xff]  ;;  %v2843_v28 = vld [vmem:[%s6058_s14 + $0x48] sm:$0xff] }
 0x295   : > { %4246 = vmatpush.msra.mxu0 %v3628_v33  ;;  %4265 = vmatpush.msra.mxu1 %v3662_v34  ;;  %v3618_v62 = vld [vmem:[%s6058_s14 + $0x1880] sm:$0xff]  ;;  %v3652_v63 = vld [vmem:[%s6058_s14 + $0x1990] sm:$0xff]  ;;  %v2887_v29 = vld [vmem:[%s6058_s14 + $0x1a8] sm:$0xff] }
 0x296   : > { %4295 = vmatpush.msra.mxu2 %v3674_v35  ;;  %4306 = vmatpush.msra.mxu3 %v2861_v36  ;;  %v3616_v2 = vld [vmem:[%s6058_s14 + $0x1870] sm:$0xff]  ;;  %v3650_v6 = vld [vmem:[%s6058_s14 + $0x1980] sm:$0xff]  ;;  %v2841_v32 = vld [vmem:[%s6058_s14 + $0x38] sm:$0xff] }
 0x297   : > { %4247 = vmatpush.msra.mxu0 %v3626_v37  ;;  %4266 = vmatpush.msra.mxu1 %v3660_v38  ;;  %v3614_v10 = vld [vmem:[%s6058_s14 + $0x1860] sm:$0xff]  ;;  %v3648_v11 = vld [vmem:[%s6058_s14 + $0x1970] sm:$0xff]  ;;  %v2885_v33 = vld [vmem:[%s6058_s14 + $0x198] sm:$0xff] }
 0x298   : > { %4296 = vmatpush.msra.mxu2 %v3672_v43  ;;  %4307 = vmatpush.msra.mxu3 %v2859_v44  ;;  %v3612_v14 = vld [vmem:[%s6058_s14 + $0x1850] sm:$0xff]  ;;  %v3646_v15 = vld [vmem:[%s6058_s14 + $0x1960] sm:$0xff]  ;;  %v2839_v36 = vld [vmem:[%s6058_s14 + $0x28] sm:$0xff] }
 0x299   : > { %4248 = vmatpush.msra.mxu0 %v3624_v45  ;;  %4267 = vmatpush.msra.mxu1 %v3658_v46  ;;  %v3610_v21 = vld [vmem:[%s6058_s14 + $0x1840] sm:$0xff]  ;;  %v3644_v27 = vld [vmem:[%s6058_s14 + $0x1950] sm:$0xff]  ;;  %v2883_v37 = vld [vmem:[%s6058_s14 + $0x188] sm:$0xff] }
 0x29a   : > { %4297 = vmatpush.msra.mxu2 %v3670_v47  ;;  %4308 = vmatpush.msra.mxu3 %v2857_v50  ;;  %v3608_v30 = vld [vmem:[%s6058_s14 + $0x1830] sm:$0xff]  ;;  %v3642_v31 = vld [vmem:[%s6058_s14 + $0x1940] sm:$0xff]  ;;  %v2837_v44 = vld [vmem:[%s6058_s14 + $0x18] sm:$0xff] }
 0x29b   : > { %4249 = vmatpush.msra.mxu0 %v3622_v51  ;;  %4268 = vmatpush.msra.mxu1 %v3656_v52  ;;  %v3606_v34 = vld [vmem:[%s6058_s14 + $0x1820] sm:$0xff]  ;;  %v3640_v35 = vld [vmem:[%s6058_s14 + $0x1930] sm:$0xff]  ;;  %v3727_v45 = vld.sshfl [vmem:[#allocation1 + $0x10] sm:$0xff pattern:$0x73625140] }
 0x29c   : > { %4298 = vmatpush.msra.mxu2 %v3668_v53  ;;  %4309 = vmatpush.msra.mxu3 %v2855_v56  ;;  %v3604_v38 = vld [vmem:[%s6058_s14 + $0x1810] sm:$0xff]  ;;  %v3638_v43 = vld [vmem:[%s6058_s14 + $0x1920] sm:$0xff]  ;;  %v2881_v46 = vld [vmem:[%s6058_s14 + $0x178] sm:$0xff] }
 0x29d   : > { %4250 = vmatpush.msra.mxu0 %v3620_v57  ;;  %4269 = vmatpush.msra.mxu1 %v3654_v58  ;;  %v3602_v47 = vld [vmem:[%s6058_s14 + $0x1800] sm:$0xff]  ;;  %v3636_v50 = vld [vmem:[%s6058_s14 + $0x1910] sm:$0xff]  ;;  %v2835_v51 = vld [vmem:[%s6058_s14 + $0x8] sm:$0xff] }
 0x29e   : > { %4299 = vmatpush.msra.mxu2 %v3666_v59  ;;  %4310 = vmatpush.msra.mxu3 %v2853_v60  ;;  %v3725_v52 = vld.sshfl [vmem:[#allocation1] sm:$0xff pattern:$0x73625140]  ;;  %v3634_v58 = vld [vmem:[%s6058_s14 + $0x1900] sm:$0xff] }
 0x29f   : > { %4251 = vmatpush.msra.mxu0 %v3618_v62  ;;  %4270 = vmatpush.msra.mxu1 %v3652_v63  ;;  %v2879_v53 = vld [vmem:[%s6058_s14 + $0x168] sm:$0xff]  ;;  %v2929_v56 = vld [vmem:[%s6058_s14 + $0x2f8] sm:$0xff]  ;;  %v3726_v60 = vld.sshfl [vmem:[#allocation1 + $0x8] sm:$0xff pattern:$0x73625140] }
 0x2a0   : > { %4324 = vmatpush.msrb.mxu2 %v2897_v61  ;;  %4311 = vmatpush.msra.mxu3 %v2851_v0  ;;  %v2993_v57 = vld [vmem:[%s6058_s14 + $0x4f8] sm:$0xff]  ;;  %v2927_v61 = vld [vmem:[%s6058_s14 + $0x2e8] sm:$0xff] }
 0x2a1   : > { %4252 = vmatpush.msra.mxu0 %v3616_v2  ;;  %4271 = vmatpush.msra.mxu1 %v3650_v6  ;;  %v2877_v59 = vld [vmem:[%s6058_s14 + $0x158] sm:$0xff]  ;;  %v2991_v63 = vld [vmem:[%s6058_s14 + $0x4e8] sm:$0xff] }
 0x2a2   : > { %4325 = vmatpush.msrb.mxu2 %v2895_v1  ;;  %4312 = vmatpush.msra.mxu3 %v2849_v7  ;;  %v2961_v62 = vld [vmem:[%s6058_s14 + $0x3f8] sm:$0xff]  ;;  %v2875_v0 = vld [vmem:[%s6058_s14 + $0x148] sm:$0xff] }
 0x2a3   : > { %4253 = vmatpush.msra.mxu0 %v3614_v10  ;;  %4272 = vmatpush.msra.mxu1 %v3648_v11  ;;  %v2925_v1 = vld [vmem:[%s6058_s14 + $0x2d8] sm:$0xff]  ;;  %v2959_v2 = vld [vmem:[%s6058_s14 + $0x3e8] sm:$0xff] }
 0x2a4   : > { %4326 = vmatpush.msrb.mxu2 %v2893_v9  ;;  %4313 = vmatpush.msra.mxu3 %v2847_v12  ;;  %v2989_v6 = vld [vmem:[%s6058_s14 + $0x4d8] sm:$0xff]  ;;  %v2923_v9 = vld [vmem:[%s6058_s14 + $0x2c8] sm:$0xff] }
 0x2a5   : > { %4254 = vmatpush.msra.mxu0 %v3612_v14  ;;  %4273 = vmatpush.msra.mxu1 %v3646_v15  ;;  %v2873_v7 = vld [vmem:[%s6058_s14 + $0x138] sm:$0xff]  ;;  %v2987_v11 = vld [vmem:[%s6058_s14 + $0x4c8] sm:$0xff] }
 0x2a6   : > { %4327 = vmatpush.msrb.mxu2 %v2891_v13  ;;  %4314 = vmatpush.msra.mxu3 %v2845_v16  ;;  %v2957_v10 = vld [vmem:[%s6058_s14 + $0x3d8] sm:$0xff]  ;;  %v2871_v12 = vld [vmem:[%s6058_s14 + $0x128] sm:$0xff] }
 0x2a7   : > { %4255 = vmatpush.msra.mxu0 %v3610_v21  ;;  %4274 = vmatpush.msra.mxu1 %v3644_v27  ;;  %v2921_v13 = vld [vmem:[%s6058_s14 + $0x2b8] sm:$0xff]  ;;  %v2955_v14 = vld [vmem:[%s6058_s14 + $0x3c8] sm:$0xff] }
 0x2a8   : > { %4328 = vmatpush.msrb.mxu2 %v2889_v20  ;;  %4315 = vmatpush.msra.mxu3 %v2843_v28  ;;  %v2985_v15 = vld [vmem:[%s6058_s14 + $0x4b8] sm:$0xff]  ;;  %v2919_v20 = vld [vmem:[%s6058_s14 + $0x2a8] sm:$0xff] }
 0x2a9   : > { %4256 = vmatpush.msra.mxu0 %v3608_v30  ;;  %4275 = vmatpush.msra.mxu1 %v3642_v31  ;;  %v2869_v16 = vld [vmem:[%s6058_s14 + $0x118] sm:$0xff]  ;;  %v2983_v27 = vld [vmem:[%s6058_s14 + $0x4a8] sm:$0xff] }
 0x2aa   : > { %4329 = vmatpush.msrb.mxu2 %v2887_v29  ;;  %4316 = vmatpush.msra.mxu3 %v2841_v32  ;;  %v2953_v21 = vld [vmem:[%s6058_s14 + $0x3b8] sm:$0xff]  ;;  %v2867_v28 = vld [vmem:[%s6058_s14 + $0x108] sm:$0xff] }
 0x2ab   : > { %4257 = vmatpush.msra.mxu0 %v3606_v34  ;;  %4276 = vmatpush.msra.mxu1 %v3640_v35  ;;  %v2917_v29 = vld [vmem:[%s6058_s14 + $0x298] sm:$0xff]  ;;  %v2951_v30 = vld [vmem:[%s6058_s14 + $0x3a8] sm:$0xff] }
 0x2ac   : > { %4330 = vmatpush.msrb.mxu2 %v2885_v33  ;;  %4317 = vmatpush.msra.mxu3 %v2839_v36  ;;  %v2981_v31 = vld [vmem:[%s6058_s14 + $0x498] sm:$0xff]  ;;  %v2915_v33 = vld [vmem:[%s6058_s14 + $0x288] sm:$0xff] }
 0x2ad   : > { %4258 = vmatpush.msra.mxu0 %v3604_v38  ;;  %4277 = vmatpush.msra.mxu1 %v3638_v43  ;;  %v3025_v32 = vld [vmem:[%s6058_s14 + $0x5f8] sm:$0xff]  ;;  %v2979_v35 = vld [vmem:[%s6058_s14 + $0x488] sm:$0xff] }
 0x2ae   : > { %4331 = vmatpush.msrb.mxu2 %v2883_v37  ;;  %4318 = vmatpush.msra.mxu3 %v2837_v44  ;;  %v2949_v34 = vld [vmem:[%s6058_s14 + $0x398] sm:$0xff]  ;;  %v3023_v36 = vld [vmem:[%s6058_s14 + $0x5e8] sm:$0xff] }
 0x2af   : > { %4970 = vmatmul.msk.f32.vlgmr.msra.gmra.mxu2 %vm3754_vm1, %v3727_v45  ;;  %4259 = vmatpush.msra.mxu0 %v3602_v47  ;;  %v2913_v37 = vld [vmem:[%s6058_s14 + $0x278] sm:$0xff]  ;;  %v2947_v38 = vld [vmem:[%s6058_s14 + $0x388] sm:$0xff] }
 0x2b0   : > { %4332 = vmatpush.msrb.mxu2 %v2881_v46  ;;  %4278 = vmatpush.msra.mxu1 %v3636_v50  ;;  %v2977_v43 = vld [vmem:[%s6058_s14 + $0x478] sm:$0xff]  ;;  %v2911_v45 = vld [vmem:[%s6058_s14 + $0x268] sm:$0xff] }
 0x2b1   : > { %4319 = vmatpush.msra.mxu3 %v2835_v51  ;;  %4260 = vmatmul.f32.vlgmr.msra.gmra.mxu0 %v3725_v52  ;;  %v3021_v44 = vld [vmem:[%s6058_s14 + $0x5d8] sm:$0xff]  ;;  %v2975_v47 = vld [vmem:[%s6058_s14 + $0x468] sm:$0xff] }
 0x2b2   : > { %4333 = vmatpush.msrb.mxu2 %v2879_v53  ;;  %4344 = vmatpush.msrb.mxu0 %v2929_v56  ;;  %v2945_v46 = vld [vmem:[%s6058_s14 + $0x378] sm:$0xff]  ;;  %v3019_v50 = vld [vmem:[%s6058_s14 + $0x5c8] sm:$0xff] }
 0x2b3   : > { %4384 = vmatpush.msrb.mxu3 %v2993_v57  ;;  %4279 = vmatpush.msra.mxu1 %v3634_v58  ;;  %v2909_v51 = vld [vmem:[%s6058_s14 + $0x258] sm:$0xff]  ;;  %v2943_v52 = vld [vmem:[%s6058_s14 + $0x368] sm:$0xff] }
 0x2b4   : > { %4334 = vmatpush.msrb.mxu2 %v2877_v59  ;;  %4280 = vmatmul.f32.vlgmr.msra.gmra.mxu1 %v3726_v60  ;;  %v2973_v53 = vld [vmem:[%s6058_s14 + $0x458] sm:$0xff]  ;;  %v2907_v57 = vld [vmem:[%s6058_s14 + $0x248] sm:$0xff] }
 0x2b5   : > { %4345 = vmatpush.msrb.mxu0 %v2927_v61  ;;  %4364 = vmatpush.msrb.mxu1 %v2961_v62  ;;  %v3017_v56 = vld [vmem:[%s6058_s14 + $0x5b8] sm:$0xff]  ;;  %v2971_v59 = vld [vmem:[%s6058_s14 + $0x448] sm:$0xff] }
 0x2b6   : > { %4385 = vmatpush.msrb.mxu3 %v2991_v63  ;;  %4335 = vmatpush.msrb.mxu2 %v2875_v0  ;;  %v2941_v58 = vld [vmem:[%s6058_s14 + $0x358] sm:$0xff]  ;;  %v3015_v60 = vld [vmem:[%s6058_s14 + $0x5a8] sm:$0xff] }
 0x2b7   : > { %4346 = vmatpush.msrb.mxu0 %v2925_v1  ;;  %4365 = vmatpush.msrb.mxu1 %v2959_v2  ;;  %v2905_v61 = vld [vmem:[%s6058_s14 + $0x238] sm:$0xff]  ;;  %v2939_v62 = vld [vmem:[%s6058_s14 + $0x348] sm:$0xff] }
 0x2b8   : > { %4386 = vmatpush.msrb.mxu3 %v2989_v6  ;;  %4336 = vmatpush.msrb.mxu2 %v2873_v7  ;;  %v2969_v63 = vld [vmem:[%s6058_s14 + $0x438] sm:$0xff]  ;;  %v2903_v1 = vld [vmem:[%s6058_s14 + $0x228] sm:$0xff] }
 0x2b9   : > { %4347 = vmatpush.msrb.mxu0 %v2923_v9  ;;  %4366 = vmatpush.msrb.mxu1 %v2957_v10  ;;  %v3013_v0 = vld [vmem:[%s6058_s14 + $0x598] sm:$0xff]  ;;  %v2967_v6 = vld [vmem:[%s6058_s14 + $0x428] sm:$0xff] }
 0x2ba   : > { %4387 = vmatpush.msrb.mxu3 %v2987_v11  ;;  %4337 = vmatpush.msrb.mxu2 %v2871_v12  ;;  %v2937_v2 = vld [vmem:[%s6058_s14 + $0x338] sm:$0xff]  ;;  %v3011_v7 = vld [vmem:[%s6058_s14 + $0x588] sm:$0xff] }
 0x2bb   : > { %4348 = vmatpush.msrb.mxu0 %v2921_v13  ;;  %4367 = vmatpush.msrb.mxu1 %v2955_v14  ;;  %v2901_v9 = vld [vmem:[%s6058_s14 + $0x218] sm:$0xff]  ;;  %v2935_v10 = vld [vmem:[%s6058_s14 + $0x328] sm:$0xff] }
 0x2bc   : > { %4388 = vmatpush.msrb.mxu3 %v2985_v15  ;;  %4338 = vmatpush.msrb.mxu2 %v2869_v16  ;;  %v2965_v11 = vld [vmem:[%s6058_s14 + $0x418] sm:$0xff]  ;;  %v2899_v13 = vld [vmem:[%s6058_s14 + $0x208] sm:$0xff] }
 0x2bd   : > { %4349 = vmatpush.msrb.mxu0 %v2919_v20  ;;  %4368 = vmatpush.msrb.mxu1 %v2953_v21  ;;  %v3009_v12 = vld [vmem:[%s6058_s14 + $0x578] sm:$0xff]  ;;  %v2963_v15 = vld [vmem:[%s6058_s14 + $0x408] sm:$0xff] }
 0x2be   : > { %4389 = vmatpush.msrb.mxu3 %v2983_v27  ;;  %4339 = vmatpush.msrb.mxu2 %v2867_v28  ;;  %v2933_v14 = vld [vmem:[%s6058_s14 + $0x318] sm:$0xff]  ;;  %v3007_v16 = vld [vmem:[%s6058_s14 + $0x568] sm:$0xff] }
 0x2bf   : > { %4350 = vmatpush.msrb.mxu0 %v2917_v29  ;;  %4369 = vmatpush.msrb.mxu1 %v2951_v30  ;;  %v3057_v20 = vld [vmem:[%s6058_s14 + $0x6f8] sm:$0xff]  ;;  %v2931_v27 = vld [vmem:[%s6058_s14 + $0x308] sm:$0xff] }
 0x2c0   : > { %4390 = vmatpush.msrb.mxu3 %v2981_v31  ;;  %4404 = vmatpush.msra.mxu2 %v3025_v32  ;;  %v3121_v21 = vld [vmem:[%s6058_s14 + $0x8f8] sm:$0xff]  ;;  %v3055_v29 = vld [vmem:[%s6058_s14 + $0x6e8] sm:$0xff] }
 0x2c1   : > { %4351 = vmatpush.msrb.mxu0 %v2915_v33  ;;  %4370 = vmatpush.msrb.mxu1 %v2949_v34  ;;  %v3005_v28 = vld [vmem:[%s6058_s14 + $0x558] sm:$0xff]  ;;  %v3119_v31 = vld [vmem:[%s6058_s14 + $0x8e8] sm:$0xff] }
 0x2c2   : > { %4391 = vmatpush.msrb.mxu3 %v2979_v35  ;;  %4405 = vmatpush.msra.mxu2 %v3023_v36  ;;  %v3089_v30 = vld [vmem:[%s6058_s14 + $0x7f8] sm:$0xff]  ;;  %v3003_v32 = vld [vmem:[%s6058_s14 + $0x548] sm:$0xff] }
 0x2c3   : > { %4352 = vmatpush.msrb.mxu0 %v2913_v37  ;;  %4371 = vmatpush.msrb.mxu1 %v2947_v38  ;;  %v3053_v33 = vld [vmem:[%s6058_s14 + $0x6d8] sm:$0xff]  ;;  %v3087_v34 = vld [vmem:[%s6058_s14 + $0x7e8] sm:$0xff] }
 0x2c4   : > { %4392 = vmatpush.msrb.mxu3 %v2977_v43  ;;  %4406 = vmatpush.msra.mxu2 %v3021_v44  ;;  %v3001_v35 = vld [vmem:[%s6058_s14 + $0x538] sm:$0xff]  ;;  %v3051_v36 = vld [vmem:[%s6058_s14 + $0x6c8] sm:$0xff] }
 0x2c5   : > { %4353 = vmatpush.msrb.mxu0 %v2911_v45  ;;  %4372 = vmatpush.msrb.mxu1 %v2945_v46  ;;  %v3085_v37 = vld [vmem:[%s6058_s14 + $0x7d8] sm:$0xff]  ;;  %v3115_v38 = vld [vmem:[%s6058_s14 + $0x8c8] sm:$0xff] }
 0x2c6   : > { %4393 = vmatpush.msrb.mxu3 %v2975_v47  ;;  %4407 = vmatpush.msra.mxu2 %v3019_v50  ;;  %v2999_v43 = vld [vmem:[%s6058_s14 + $0x528] sm:$0xff]  ;;  %v3049_v44 = vld [vmem:[%s6058_s14 + $0x6b8] sm:$0xff] }
 0x2c7   : > { %4354 = vmatpush.msrb.mxu0 %v2909_v51  ;;  %4373 = vmatpush.msrb.mxu1 %v2943_v52  ;;  %v3083_v45 = vld [vmem:[%s6058_s14 + $0x7c8] sm:$0xff]  ;;  %v3113_v46 = vld [vmem:[%s6058_s14 + $0x8b8] sm:$0xff] }
 0x2c8   : > { %4394 = vmatpush.msrb.mxu3 %v2973_v53  ;;  %4408 = vmatpush.msra.mxu2 %v3017_v56  ;;  %v2997_v47 = vld [vmem:[%s6058_s14 + $0x518] sm:$0xff]  ;;  %v3047_v50 = vld [vmem:[%s6058_s14 + $0x6a8] sm:$0xff] }
 0x2c9   : > { %4355 = vmatpush.msrb.mxu0 %v2907_v57  ;;  %4374 = vmatpush.msrb.mxu1 %v2941_v58  ;;  %v3081_v51 = vld [vmem:[%s6058_s14 + $0x7b8] sm:$0xff]  ;;  %v3111_v52 = vld [vmem:[%s6058_s14 + $0x8a8] sm:$0xff] }
 0x2ca   : > { %4395 = vmatpush.msrb.mxu3 %v2971_v59  ;;  %4409 = vmatpush.msra.mxu2 %v3015_v60  ;;  %v2995_v53 = vld [vmem:[%s6058_s14 + $0x508] sm:$0xff]  ;;  %v3045_v56 = vld [vmem:[%s6058_s14 + $0x698] sm:$0xff] }
 0x2cb   : > { %4356 = vmatpush.msrb.mxu0 %v2905_v61  ;;  %4375 = vmatpush.msrb.mxu1 %v2939_v62  ;;  %v3079_v57 = vld [vmem:[%s6058_s14 + $0x7a8] sm:$0xff]  ;;  %v3109_v58 = vld [vmem:[%s6058_s14 + $0x898] sm:$0xff] }
 0x2cc   : > { %4396 = vmatpush.msrb.mxu3 %v2969_v63  ;;  %4410 = vmatpush.msra.mxu2 %v3013_v0  ;;  %v3153_v59 = vld [vmem:[%s6058_s14 + $0x9f8] sm:$0xff]  ;;  %v3043_v60 = vld [vmem:[%s6058_s14 + $0x688] sm:$0xff] }
 0x2cd   : > { %4357 = vmatpush.msrb.mxu0 %v2903_v1  ;;  %4376 = vmatpush.msrb.mxu1 %v2937_v2  ;;  %v3077_v61 = vld [vmem:[%s6058_s14 + $0x798] sm:$0xff]  ;;  %v3107_v62 = vld [vmem:[%s6058_s14 + $0x888] sm:$0xff] }
 0x2ce   : > { %4397 = vmatpush.msrb.mxu3 %v2967_v6  ;;  %4411 = vmatpush.msra.mxu2 %v3011_v7  ;;  %v3151_v63 = vld [vmem:[%s6058_s14 + $0x9e8] sm:$0xff]  ;;  %v3041_v0 = vld [vmem:[%s6058_s14 + $0x678] sm:$0xff] }
 0x2cf   : > { %4358 = vmatpush.msrb.mxu0 %v2901_v9  ;;  %4377 = vmatpush.msrb.mxu1 %v2935_v10  ;;  %v3075_v1 = vld [vmem:[%s6058_s14 + $0x788] sm:$0xff]  ;;  %v3105_v2 = vld [vmem:[%s6058_s14 + $0x878] sm:$0xff] }
 0x2d0   : > { %4398 = vmatpush.msrb.mxu3 %v2965_v11  ;;  %4412 = vmatpush.msra.mxu2 %v3009_v12  ;;  %v3149_v6 = vld [vmem:[%s6058_s14 + $0x9d8] sm:$0xff]  ;;  %v3039_v7 = vld [vmem:[%s6058_s14 + $0x668] sm:$0xff] }
 0x2d1   : > { %4359 = vmatpush.msrb.mxu0 %v2899_v13  ;;  %4378 = vmatpush.msrb.mxu1 %v2933_v14  ;;  %v3073_v9 = vld [vmem:[%s6058_s14 + $0x778] sm:$0xff]  ;;  %v3103_v10 = vld [vmem:[%s6058_s14 + $0x868] sm:$0xff] }
 0x2d2   : > { %4399 = vmatpush.msrb.mxu3 %v2963_v15  ;;  %4413 = vmatpush.msra.mxu2 %v3007_v16  ;;  %v3037_v11 = vld [vmem:[%s6058_s14 + $0x658] sm:$0xff]  ;;  %v3071_v12 = vld [vmem:[%s6058_s14 + $0x768] sm:$0xff] }
 0x2d3   : > { %4320 = vmatmul.f32.vlgmr.msra.gmra.mxu3 %v6178_v23  ;;  %4424 = vmatpush.msra.mxu0 %v3057_v20  ;;  %v3117_v23 = vld [vmem:[%s6058_s14 + $0x8d8] sm:$0xff]  ;;  %v3035_v14 = vld [vmem:[%s6058_s14 + $0x648] sm:$0xff] }
 0x2d4   : > { %4464 = vmatpush.msra.mxu3 %v3121_v21  ;;  %4379 = vmatpush.msrb.mxu1 %v2931_v27  ;;  %v3101_v13 = vld [vmem:[%s6058_s14 + $0x858] sm:$0xff]  ;;  %v3099_v20 = vld [vmem:[%s6058_s14 + $0x848] sm:$0xff] }
 0x2d5   : > { %4414 = vmatpush.msra.mxu2 %v3005_v28  ;;  %4425 = vmatpush.msra.mxu0 %v3055_v29  ;;  %v3145_v15 = vld [vmem:[%s6058_s14 + $0x9b8] sm:$0xff]  ;;  %v3067_v27 = vld [vmem:[%s6058_s14 + $0x748] sm:$0xff] }
 0x2d6   : > { %4444 = vmatpush.msra.mxu1 %v3089_v30  ;;  %4465 = vmatpush.msra.mxu3 %v3119_v31  ;;  %v3069_v16 = vld [vmem:[%s6058_s14 + $0x758] sm:$0xff]  ;;  %v3031_v29 = vld [vmem:[%s6058_s14 + $0x628] sm:$0xff] }
 0x2d7   : > { %4415 = vmatpush.msra.mxu2 %v3003_v32  ;;  %4426 = vmatpush.msra.mxu0 %v3053_v33  ;;  %v3033_v21 = vld [vmem:[%s6058_s14 + $0x638] sm:$0xff]  ;;  %v3095_v30 = vld [vmem:[%s6058_s14 + $0x828] sm:$0xff] }
 0x2d8   : > { %4445 = vmatpush.msra.mxu1 %v3087_v34  ;;  %4466 = vmatpush.msra.mxu3 %v3117_v23  ;;  %v3097_v28 = vld [vmem:[%s6058_s14 + $0x838] sm:$0xff]  ;;  %v3139_v31 = vld [vmem:[%s6058_s14 + $0x988] sm:$0xff] }
 0x2d9   : > { %4416 = vmatpush.msra.mxu2 %v3001_v35  ;;  %4427 = vmatpush.msra.mxu0 %v3051_v36  ;;  %v3029_v32 = vld [vmem:[%s6058_s14 + $0x618] sm:$0xff]  ;;  %v3063_v33 = vld [vmem:[%s6058_s14 + $0x728] sm:$0xff] }
 0x2da   : > { %4446 = vmatpush.msra.mxu1 %v3085_v37  ;;  %4467 = vmatpush.msra.mxu3 %v3115_v38  ;;  %v3137_v34 = vld [vmem:[%s6058_s14 + $0x978] sm:$0xff]  ;;  %v3027_v23 = vld [vmem:[%s6058_s14 + $0x608] sm:$0xff] }
 0x2db   : > { %4417 = vmatpush.msra.mxu2 %v2999_v43  ;;  %4428 = vmatpush.msra.mxu0 %v3049_v44  ;;  %v3061_v35 = vld [vmem:[%s6058_s14 + $0x718] sm:$0xff]  ;;  %v3091_v36 = vld [vmem:[%s6058_s14 + $0x808] sm:$0xff] }
 0x2dc   : > { %4447 = vmatpush.msra.mxu1 %v3083_v45  ;;  %4468 = vmatpush.msra.mxu3 %v3113_v46  ;;  %v3135_v37 = vld [vmem:[%s6058_s14 + $0x968] sm:$0xff]  ;;  %v3185_v38 = vld [vmem:[%s6058_s14 + $0xaf8] sm:$0xff] }
 0x2dd   : > { %4418 = vmatpush.msra.mxu2 %v2997_v47  ;;  %4429 = vmatpush.msra.mxu0 %v3047_v50  ;;  %v3249_v43 = vld [vmem:[%s6058_s14 + $0xcf8] sm:$0xff]  ;;  %v3059_v44 = vld [vmem:[%s6058_s14 + $0x708] sm:$0xff] }
 0x2de   : > { %4448 = vmatpush.msra.mxu1 %v3081_v51  ;;  %4469 = vmatpush.msra.mxu3 %v3111_v52  ;;  %v3133_v45 = vld [vmem:[%s6058_s14 + $0x958] sm:$0xff]  ;;  %v3183_v46 = vld [vmem:[%s6058_s14 + $0xae8] sm:$0xff] }
 0x2df   : > { %4419 = vmatpush.msra.mxu2 %v2995_v53  ;;  %4430 = vmatpush.msra.mxu0 %v3045_v56  ;;  %v3217_v47 = vld [vmem:[%s6058_s14 + $0xbf8] sm:$0xff]  ;;  %v3247_v50 = vld [vmem:[%s6058_s14 + $0xce8] sm:$0xff] }
 0x2e0   : > { %4449 = vmatpush.msra.mxu1 %v3079_v57  ;;  %4470 = vmatpush.msra.mxu3 %v3109_v58  ;;  %v3131_v51 = vld [vmem:[%s6058_s14 + $0x948] sm:$0xff]  ;;  %v3245_v52 = vld [vmem:[%s6058_s14 + $0xcd8] sm:$0xff] }
 0x2e1   : > { %4340 = vmatmul.f32.vlgmr.msrb.gmra.mxu2 %v6184_v26  ;;  %4431 = vmatpush.msra.mxu0 %v3043_v60  ;;  %v3147_v26 = vld [vmem:[%s6058_s14 + $0x9c8] sm:$0xff]  ;;  %v3129_v53 = vld [vmem:[%s6058_s14 + $0x938] sm:$0xff] }
 0x2e2   : > { %4484 = vmatpush.msrb.mxu2 %v3153_v59  ;;  %4450 = vmatpush.msra.mxu1 %v3077_v61  ;;  %v3179_v56 = vld [vmem:[%s6058_s14 + $0xac8] sm:$0xff]  ;;  %v3213_v57 = vld [vmem:[%s6058_s14 + $0xbd8] sm:$0xff] }
 0x2e3   : > { %4471 = vmatpush.msra.mxu3 %v3107_v62  ;;  %4432 = vmatpush.msra.mxu0 %v3041_v0  ;;  %v3127_v58 = vld [vmem:[%s6058_s14 + $0x928] sm:$0xff]  ;;  %v3177_v59 = vld [vmem:[%s6058_s14 + $0xab8] sm:$0xff] }
 0x2e4   : > { %4485 = vmatpush.msrb.mxu2 %v3151_v63  ;;  %4451 = vmatpush.msra.mxu1 %v3075_v1  ;;  %v3211_v60 = vld [vmem:[%s6058_s14 + $0xbc8] sm:$0xff]  ;;  %v3241_v61 = vld [vmem:[%s6058_s14 + $0xcb8] sm:$0xff] }
 0x2e5   : > { %4472 = vmatpush.msra.mxu3 %v3105_v2  ;;  %4433 = vmatpush.msra.mxu0 %v3039_v7  ;;  %v3125_v62 = vld [vmem:[%s6058_s14 + $0x918] sm:$0xff]  ;;  %v3175_v63 = vld [vmem:[%s6058_s14 + $0xaa8] sm:$0xff] }
 0x2e6   : > { %4486 = vmatpush.msrb.mxu2 %v3149_v6  ;;  %4452 = vmatpush.msra.mxu1 %v3073_v9  ;;  %v3209_v0 = vld [vmem:[%s6058_s14 + $0xbb8] sm:$0xff]  ;;  %v3239_v1 = vld [vmem:[%s6058_s14 + $0xca8] sm:$0xff] }
 0x2e7   : > { %4473 = vmatpush.msra.mxu3 %v3103_v10  ;;  %4434 = vmatpush.msra.mxu0 %v3037_v11  ;;  %v3123_v2 = vld [vmem:[%s6058_s14 + $0x908] sm:$0xff]  ;;  %v3173_v6 = vld [vmem:[%s6058_s14 + $0xa98] sm:$0xff] }
 0x2e8   : > { %4400 = vmatmul.f32.vlgmr.msrb.gmra.mxu3 %v6202_v40  ;;  %4487 = vmatpush.msrb.mxu2 %v3147_v26  ;;  %v3143_v40 = vld [vmem:[%s6058_s14 + $0x9a8] sm:$0xff]  ;;  %v3237_v9 = vld [vmem:[%s6058_s14 + $0xc98] sm:$0xff] }
 0x2e9   : > { %4453 = vmatpush.msra.mxu1 %v3071_v12  ;;  %4474 = vmatpush.msra.mxu3 %v3101_v13  ;;  %v3207_v7 = vld [vmem:[%s6058_s14 + $0xba8] sm:$0xff]  ;;  %v3281_v10 = vld [vmem:[%s6058_s14 + $0xdf8] sm:$0xff] }
 0x2ea   : > { %4360 = vmatmul.f32.vlgmr.msrb.gmra.mxu0 %v6180_v24  ;;  %4420 = vmatmul.f32.vlgmr.msra.gmra.mxu2 %v6206_v42  ;;  %v3141_v24 = vld [vmem:[%s6058_s14 + $0x998] sm:$0xff]  ;;  %v3171_v26 = vld [vmem:[%s6058_s14 + $0xa88] sm:$0xff] }
 0x2eb   : > { %4435 = vmatpush.msra.mxu0 %v3035_v14  ;;  %4488 = vmatpush.msrb.mxu2 %v3145_v15  ;;  %v3065_v42 = vld [vmem:[%s6058_s14 + $0x738] sm:$0xff]  ;;  %v3235_v12 = vld [vmem:[%s6058_s14 + $0xc88] sm:$0xff] }
 0x2ec   : > { %4454 = vmatpush.msra.mxu1 %v3069_v16  ;;  %4475 = vmatpush.msra.mxu3 %v3099_v20  ;;  %v3205_v11 = vld [vmem:[%s6058_s14 + $0xb98] sm:$0xff]  ;;  %v3279_v13 = vld [vmem:[%s6058_s14 + $0xde8] sm:$0xff] }
 0x2ed   : > { %4380 = vmatmul.f32.vlgmr.msrb.gmra.mxu1 %v6182_v25  ;;  %4489 = vmatpush.msrb.mxu2 %v3143_v40  ;;  %v3093_v25 = vld [vmem:[%s6058_s14 + $0x818] sm:$0xff]  ;;  %v3203_v15 = vld [vmem:[%s6058_s14 + $0xb88] sm:$0xff] }
 0x2ee   : > { %4436 = vmatpush.msra.mxu0 %v3033_v21  ;;  %4455 = vmatpush.msra.mxu1 %v3067_v27  ;;  %v3169_v14 = vld [vmem:[%s6058_s14 + $0xa78] sm:$0xff]  ;;  %v3167_v40 = vld [vmem:[%s6058_s14 + $0xa68] sm:$0xff] }
 0x2ef   : > { %4476 = vmatpush.msra.mxu3 %v3097_v28  ;;  %4490 = vmatpush.msrb.mxu2 %v3141_v24  ;;  %v3233_v16 = vld [vmem:[%s6058_s14 + $0xc78] sm:$0xff]  ;;  %v3275_v27 = vld [vmem:[%s6058_s14 + $0xdc8] sm:$0xff] }
 0x2f0   : > { %4437 = vmatpush.msra.mxu0 %v3031_v29  ;;  %4456 = vmatpush.msra.mxu1 %v3065_v42  ;;  %v3277_v20 = vld [vmem:[%s6058_s14 + $0xdd8] sm:$0xff]  ;;  %v3199_v24 = vld [vmem:[%s6058_s14 + $0xb68] sm:$0xff] }
 0x2f1   : > { %4477 = vmatpush.msra.mxu3 %v3095_v30  ;;  %4491 = vmatpush.msrb.mxu2 %v3139_v31  ;;  %v3201_v21 = vld [vmem:[%s6058_s14 + $0xb78] sm:$0xff]  ;;  %v3163_v30 = vld [vmem:[%s6058_s14 + $0xa48] sm:$0xff] }
 0x2f2   : > { %4438 = vmatpush.msra.mxu0 %v3029_v32  ;;  %4457 = vmatpush.msra.mxu1 %v3063_v33  ;;  %v3165_v28 = vld [vmem:[%s6058_s14 + $0xa58] sm:$0xff]  ;;  %v3227_v32 = vld [vmem:[%s6058_s14 + $0xc48] sm:$0xff] }
 0x2f3   : > { %4478 = vmatpush.msra.mxu3 %v3093_v25  ;;  %4492 = vmatpush.msrb.mxu2 %v3137_v34  ;;  %v3229_v29 = vld [vmem:[%s6058_s14 + $0xc58] sm:$0xff]  ;;  %v3271_v33 = vld [vmem:[%s6058_s14 + $0xda8] sm:$0xff] }
 0x2f4   : > { %4439 = vmatpush.msra.mxu0 %v3027_v23  ;;  %4458 = vmatpush.msra.mxu1 %v3061_v35  ;;  %v3273_v42 = vld [vmem:[%s6058_s14 + $0xdb8] sm:$0xff]  ;;  %v3195_v34 = vld [vmem:[%s6058_s14 + $0xb48] sm:$0xff] }
 0x2f5   : > { %4479 = vmatpush.msra.mxu3 %v3091_v36  ;;  %4440 = vmatmul.f32.vlgmr.msra.gmra.mxu0 %v6200_v39  ;;  %v3181_v39 = vld [vmem:[%s6058_s14 + $0xad8] sm:$0xff]  ;;  %v3159_v36 = vld [vmem:[%s6058_s14 + $0xa28] sm:$0xff] }
 0x2f6   : > { %4480 = vmatmul.f32.vlgmr.msra.gmra.mxu3 %v6236_v3  ;;  %4493 = vmatpush.msrb.mxu2 %v3135_v37  ;;  %v3215_v3 = vld [vmem:[%s6058_s14 + $0xbe8] sm:$0xff]  ;;  %v3197_v31 = vld [vmem:[%s6058_s14 + $0xb58] sm:$0xff] }
 0x2f7   : > { %4504 = vmatpush.msrb.mxu0 %v3185_v38  ;;  %4544 = vmatpush.msrb.mxu3 %v3249_v43  ;;  %v3161_v25 = vld [vmem:[%s6058_s14 + $0xa38] sm:$0xff]  ;;  %v3223_v38 = vld [vmem:[%s6058_s14 + $0xc28] sm:$0xff] }
 0x2f8   : > { %4459 = vmatpush.msra.mxu1 %v3059_v44  ;;  %4494 = vmatpush.msrb.mxu2 %v3133_v45  ;;  %v3225_v23 = vld [vmem:[%s6058_s14 + $0xc38] sm:$0xff]  ;;  %v3267_v43 = vld [vmem:[%s6058_s14 + $0xd88] sm:$0xff] }
 0x2f9   : > { %4460 = vmatmul.f32.vlgmr.msra.gmra.mxu1 %v6204_v41  ;;  %4505 = vmatpush.msrb.mxu0 %v3183_v46  ;;  %v3243_v41 = vld [vmem:[%s6058_s14 + $0xcc8] sm:$0xff]  ;;  %v3269_v35 = vld [vmem:[%s6058_s14 + $0xd98] sm:$0xff] }
 0x2fa   : > { %4524 = vmatpush.msrb.mxu1 %v3217_v47  ;;  %4545 = vmatpush.msrb.mxu3 %v3247_v50  ;;  %v3193_v37 = vld [vmem:[%s6058_s14 + $0xb38] sm:$0xff]  ;;  %v3191_v45 = vld [vmem:[%s6058_s14 + $0xb28] sm:$0xff] }
 0x2fb   : > { %4495 = vmatpush.msrb.mxu2 %v3131_v51  ;;  %4506 = vmatpush.msrb.mxu0 %v3181_v39  ;;  %v3157_v44 = vld [vmem:[%s6058_s14 + $0xa18] sm:$0xff]  ;;  %v3155_v50 = vld [vmem:[%s6058_s14 + $0xa08] sm:$0xff] }
 0x2fc   : > { %4525 = vmatpush.msrb.mxu1 %v3215_v3  ;;  %4546 = vmatpush.msrb.mxu3 %v3245_v52  ;;  %v3221_v46 = vld [vmem:[%s6058_s14 + $0xc18] sm:$0xff]  ;;  %v3219_v39 = vld [vmem:[%s6058_s14 + $0xc08] sm:$0xff] }
 0x2fd   : > { %4496 = vmatpush.msrb.mxu2 %v3129_v53  ;;  %4507 = vmatpush.msrb.mxu0 %v3179_v56  ;;  %v3265_v47 = vld [vmem:[%s6058_s14 + $0xd78] sm:$0xff]  ;;  %v3263_v3 = vld [vmem:[%s6058_s14 + $0xd68] sm:$0xff] }
 0x2fe   : > { %4526 = vmatpush.msrb.mxu1 %v3213_v57  ;;  %4547 = vmatpush.msrb.mxu3 %v3243_v41  ;;  %v3189_v51 = vld [vmem:[%s6058_s14 + $0xb18] sm:$0xff]  ;;  %v3187_v56 = vld [vmem:[%s6058_s14 + $0xb08] sm:$0xff] }
 0x2ff   : > { %4497 = vmatpush.msrb.mxu2 %v3127_v58  ;;  %4508 = vmatpush.msrb.mxu0 %v3177_v59  ;;  %v3313_v52 = vld [vmem:[%s6058_s14 + $0xef8] sm:$0xff]  ;;  %v3311_v41 = vld [vmem:[%s6058_s14 + $0xee8] sm:$0xff] }
 0x300   : > { %4527 = vmatpush.msrb.mxu1 %v3211_v60  ;;  %4548 = vmatpush.msrb.mxu3 %v3241_v61  ;;  %v3377_v53 = vld [vmem:[%s6058_s14 + $0x10f8] sm:$0xff]  ;;  %v3375_v59 = vld [vmem:[%s6058_s14 + $0x10e8] sm:$0xff] }
 0x301   : > { %4498 = vmatpush.msrb.mxu2 %v3125_v62  ;;  %4509 = vmatpush.msrb.mxu0 %v3175_v63  ;;  %v3261_v57 = vld [vmem:[%s6058_s14 + $0xd58] sm:$0xff]  ;;  %v3259_v60 = vld [vmem:[%s6058_s14 + $0xd48] sm:$0xff] }
 0x302   : > { %4528 = vmatpush.msrb.mxu1 %v3209_v0  ;;  %4549 = vmatpush.msrb.mxu3 %v3239_v1  ;;  %v3345_v58 = vld [vmem:[%s6058_s14 + $0xff8] sm:$0xff]  ;;  %v3307_v63 = vld [vmem:[%s6058_s14 + $0xec8] sm:$0xff] }
 0x303   : > { %4499 = vmatpush.msrb.mxu2 %v3123_v2  ;;  %4510 = vmatpush.msrb.mxu0 %v3173_v6  ;;  %v3373_v61 = vld [vmem:[%s6058_s14 + $0x10d8] sm:$0xff]  ;;  %v3255_v1 = vld [vmem:[%s6058_s14 + $0xd28] sm:$0xff] }
 0x304   : > { %4529 = vmatpush.msrb.mxu1 %v3207_v7  ;;  %4550 = vmatpush.msrb.mxu3 %v3237_v9  ;;  %v3257_v62 = vld [vmem:[%s6058_s14 + $0xd38] sm:$0xff]  ;;  %v3339_v6 = vld [vmem:[%s6058_s14 + $0xfc8] sm:$0xff] }
 0x305   : > { %4500 = vmatmul.f32.vlgmr.msrb.gmra.mxu2 %v6240_v5  ;;  %4511 = vmatpush.msrb.mxu0 %v3171_v26  ;;  %v3231_v5 = vld [vmem:[%s6058_s14 + $0xc68] sm:$0xff]  ;;  %v3341_v0 = vld [vmem:[%s6058_s14 + $0xfd8] sm:$0xff] }
 0x306   : > { %4564 = vmatpush.msra.mxu2 %v3281_v10  ;;  %4530 = vmatpush.msrb.mxu1 %v3205_v11  ;;  %v3305_v2 = vld [vmem:[%s6058_s14 + $0xeb8] sm:$0xff]  ;;  %v3303_v10 = vld [vmem:[%s6058_s14 + $0xea8] sm:$0xff] }
 0x307   : > { %4551 = vmatpush.msrb.mxu3 %v3235_v12  ;;  %4512 = vmatpush.msrb.mxu0 %v3169_v14  ;;  %v3369_v7 = vld [vmem:[%s6058_s14 + $0x10b8] sm:$0xff]  ;;  %v3367_v11 = vld [vmem:[%s6058_s14 + $0x10a8] sm:$0xff] }
 0x308   : > { %4565 = vmatpush.msra.mxu2 %v3279_v13  ;;  %4531 = vmatpush.msrb.mxu1 %v3203_v15  ;;  %v3253_v9 = vld [vmem:[%s6058_s14 + $0xd18] sm:$0xff]  ;;  %v3251_v12 = vld [vmem:[%s6058_s14 + $0xd08] sm:$0xff] }
 0x309   : > { %4552 = vmatpush.msrb.mxu3 %v3233_v16  ;;  %4513 = vmatpush.msrb.mxu0 %v3167_v40  ;;  %v3337_v26 = vld [vmem:[%s6058_s14 + $0xfb8] sm:$0xff]  ;;  %v3335_v14 = vld [vmem:[%s6058_s14 + $0xfa8] sm:$0xff] }
 0x30a   : > { %4566 = vmatpush.msra.mxu2 %v3277_v20  ;;  %4532 = vmatpush.msrb.mxu1 %v3201_v21  ;;  %v3301_v13 = vld [vmem:[%s6058_s14 + $0xe98] sm:$0xff]  ;;  %v3299_v20 = vld [vmem:[%s6058_s14 + $0xe88] sm:$0xff] }
 0x30b   : > { %4553 = vmatpush.msrb.mxu3 %v3231_v5  ;;  %4514 = vmatpush.msrb.mxu0 %v3165_v28  ;;  %v3365_v15 = vld [vmem:[%s6058_s14 + $0x1098] sm:$0xff]  ;;  %v3363_v21 = vld [vmem:[%s6058_s14 + $0x1088] sm:$0xff] }
 0x30c   : > { %4567 = vmatpush.msra.mxu2 %v3275_v27  ;;  %4533 = vmatpush.msrb.mxu1 %v3199_v24  ;;  %v3409_v16 = vld [vmem:[%s6058_s14 + $0x11f8] sm:$0xff]  ;;  %v3407_v5 = vld [vmem:[%s6058_s14 + $0x11e8] sm:$0xff] }
 0x30d   : > { %4554 = vmatpush.msrb.mxu3 %v3229_v29  ;;  %4515 = vmatpush.msrb.mxu0 %v3163_v30  ;;  %v3333_v40 = vld [vmem:[%s6058_s14 + $0xf98] sm:$0xff]  ;;  %v3331_v28 = vld [vmem:[%s6058_s14 + $0xf88] sm:$0xff] }
 0x30e   : > { %4568 = vmatpush.msra.mxu2 %v3273_v42  ;;  %4534 = vmatpush.msrb.mxu1 %v3197_v31  ;;  %v3297_v27 = vld [vmem:[%s6058_s14 + $0xe78] sm:$0xff]  ;;  %v3295_v42 = vld [vmem:[%s6058_s14 + $0xe68] sm:$0xff] }
 0x30f   : > { %4555 = vmatpush.msrb.mxu3 %v3227_v32  ;;  %4516 = vmatpush.msrb.mxu0 %v3161_v25  ;;  %v3361_v24 = vld [vmem:[%s6058_s14 + $0x1078] sm:$0xff]  ;;  %v3403_v31 = vld [vmem:[%s6058_s14 + $0x11c8] sm:$0xff] }
 0x310   : > { %4569 = vmatpush.msra.mxu2 %v3271_v33  ;;  %4535 = vmatpush.msrb.mxu1 %v3195_v34  ;;  %v3405_v29 = vld [vmem:[%s6058_s14 + $0x11d8] sm:$0xff]  ;;  %v3327_v33 = vld [vmem:[%s6058_s14 + $0xf68] sm:$0xff] }
 0x311   : > { %4556 = vmatpush.msrb.mxu3 %v3225_v23  ;;  %4517 = vmatpush.msrb.mxu0 %v3159_v36  ;;  %v3329_v30 = vld [vmem:[%s6058_s14 + $0xf78] sm:$0xff]  ;;  %v3291_v23 = vld [vmem:[%s6058_s14 + $0xe48] sm:$0xff] }
 0x312   : > { %4570 = vmatpush.msra.mxu2 %v3269_v35  ;;  %4536 = vmatpush.msrb.mxu1 %v3193_v37  ;;  %v3293_v32 = vld [vmem:[%s6058_s14 + $0xe58] sm:$0xff]  ;;  %v3355_v36 = vld [vmem:[%s6058_s14 + $0x1048] sm:$0xff] }
 0x313   : > { %4557 = vmatpush.msrb.mxu3 %v3223_v38  ;;  %4518 = vmatpush.msrb.mxu0 %v3157_v44  ;;  %v3357_v25 = vld [vmem:[%s6058_s14 + $0x1058] sm:$0xff]  ;;  %v3399_v37 = vld [vmem:[%s6058_s14 + $0x11a8] sm:$0xff] }
 0x314   : > { %4571 = vmatpush.msra.mxu2 %v3267_v43  ;;  %4537 = vmatpush.msrb.mxu1 %v3191_v45  ;;  %v3401_v34 = vld [vmem:[%s6058_s14 + $0x11b8] sm:$0xff]  ;;  %v3323_v43 = vld [vmem:[%s6058_s14 + $0xf48] sm:$0xff] }
 0x315   : > { %4558 = vmatpush.msrb.mxu3 %v3221_v46  ;;  %4519 = vmatpush.msrb.mxu0 %v3155_v50  ;;  %v3325_v35 = vld [vmem:[%s6058_s14 + $0xf58] sm:$0xff]  ;;  %v3287_v46 = vld [vmem:[%s6058_s14 + $0xe28] sm:$0xff] }
 0x316   : > { %4572 = vmatpush.msra.mxu2 %v3265_v47  ;;  %4538 = vmatpush.msrb.mxu1 %v3189_v51  ;;  %v3289_v38 = vld [vmem:[%s6058_s14 + $0xe38] sm:$0xff]  ;;  %v3351_v50 = vld [vmem:[%s6058_s14 + $0x1028] sm:$0xff] }
 0x317   : > { %4559 = vmatpush.msrb.mxu3 %v3219_v39  ;;  %4520 = vmatmul.f32.vlgmr.msrb.gmra.mxu0 %v6238_v4  ;;  %v3309_v4 = vld [vmem:[%s6058_s14 + $0xed8] sm:$0xff]  ;;  %v3395_v51 = vld [vmem:[%s6058_s14 + $0x1188] sm:$0xff] }
 0x318   : > { %4560 = vmatmul.f32.vlgmr.msrb.gmra.mxu3 %v6316_v17  ;;  %4573 = vmatpush.msra.mxu2 %v3263_v3  ;;  %v3343_v17 = vld [vmem:[%s6058_s14 + $0xfe8] sm:$0xff]  ;;  %v3353_v44 = vld [vmem:[%s6058_s14 + $0x1038] sm:$0xff] }
 0x319   : > { %4584 = vmatpush.msra.mxu0 %v3313_v52  ;;  %4624 = vmatpush.msra.mxu3 %v3377_v53  ;;  %v3397_v45 = vld [vmem:[%s6058_s14 + $0x1198] sm:$0xff]  ;;  %v3319_v3 = vld [vmem:[%s6058_s14 + $0xf28] sm:$0xff] }
 0x31a   : > { %4539 = vmatpush.msrb.mxu1 %v3187_v56  ;;  %4574 = vmatpush.msra.mxu2 %v3261_v57  ;;  %v3321_v47 = vld [vmem:[%s6058_s14 + $0xf38] sm:$0xff]  ;;  %v3283_v56 = vld [vmem:[%s6058_s14 + $0xe08] sm:$0xff] }
 0x31b   : > { %4540 = vmatmul.f32.vlgmr.msrb.gmra.mxu1 %v6246_v8  ;;  %4585 = vmatpush.msra.mxu0 %v3311_v41  ;;  %v3371_v8 = vld [vmem:[%s6058_s14 + $0x10c8] sm:$0xff]  ;;  %v3285_v39 = vld [vmem:[%s6058_s14 + $0xe18] sm:$0xff] }
 0x31c   : > { %4604 = vmatpush.msra.mxu1 %v3345_v58  ;;  %4625 = vmatpush.msra.mxu3 %v3375_v59  ;;  %v3349_v52 = vld [vmem:[%s6058_s14 + $0x1018] sm:$0xff]  ;;  %v3347_v41 = vld [vmem:[%s6058_s14 + $0x1008] sm:$0xff] }
 0x31d   : > { %4575 = vmatpush.msra.mxu2 %v3259_v60  ;;  %4586 = vmatpush.msra.mxu0 %v3309_v4  ;;  %v3393_v53 = vld [vmem:[%s6058_s14 + $0x1178] sm:$0xff]  ;;  %v3391_v58 = vld [vmem:[%s6058_s14 + $0x1168] sm:$0xff] }
 0x31e   : > { %4605 = vmatpush.msra.mxu1 %v3343_v17  ;;  %4626 = vmatpush.msra.mxu3 %v3373_v61  ;;  %v3317_v57 = vld [vmem:[%s6058_s14 + $0xf18] sm:$0xff]  ;;  %v3315_v4 = vld [vmem:[%s6058_s14 + $0xf08] sm:$0xff] }
 0x31f   : > { %4576 = vmatpush.msra.mxu2 %v3257_v62  ;;  %4587 = vmatpush.msra.mxu0 %v3307_v63  ;;  %v3441_v59 = vld [vmem:[%s6058_s14 + $0x12f8] sm:$0xff]  ;;  %v3439_v61 = vld [vmem:[%s6058_s14 + $0x12e8] sm:$0xff] }
 0x320   : > { %4606 = vmatpush.msra.mxu1 %v3341_v0  ;;  %4627 = vmatpush.msra.mxu3 %v3371_v8  ;;  %v3505_v60 = vld [vmem:[%s6058_s14 + $0x14f8] sm:$0xff]  ;;  %v3503_v63 = vld [vmem:[%s6058_s14 + $0x14e8] sm:$0xff] }
 0x321   : > { %4577 = vmatpush.msra.mxu2 %v3255_v1  ;;  %4588 = vmatpush.msra.mxu0 %v3305_v2  ;;  %v3389_v17 = vld [vmem:[%s6058_s14 + $0x1158] sm:$0xff]  ;;  %v3387_v0 = vld [vmem:[%s6058_s14 + $0x1148] sm:$0xff] }
 0x322   : > { %4607 = vmatpush.msra.mxu1 %v3339_v6  ;;  %4628 = vmatpush.msra.mxu3 %v3369_v7  ;;  %v3473_v62 = vld [vmem:[%s6058_s14 + $0x13f8] sm:$0xff]  ;;  %v3435_v2 = vld [vmem:[%s6058_s14 + $0x12c8] sm:$0xff] }
 0x323   : > { %4578 = vmatpush.msra.mxu2 %v3253_v9  ;;  %4589 = vmatpush.msra.mxu0 %v3303_v10  ;;  %v3501_v8 = vld [vmem:[%s6058_s14 + $0x14d8] sm:$0xff]  ;;  %v3383_v7 = vld [vmem:[%s6058_s14 + $0x1128] sm:$0xff] }
 0x324   : > { %4608 = vmatpush.msra.mxu1 %v3337_v26  ;;  %4629 = vmatpush.msra.mxu3 %v3367_v11  ;;  %v3385_v1 = vld [vmem:[%s6058_s14 + $0x1138] sm:$0xff]  ;;  %v3467_v10 = vld [vmem:[%s6058_s14 + $0x13c8] sm:$0xff] }
 0x325   : > { %4579 = vmatpush.msra.mxu2 %v3251_v12  ;;  %4590 = vmatpush.msra.mxu0 %v3301_v13  ;;  %v3469_v6 = vld [vmem:[%s6058_s14 + $0x13d8] sm:$0xff]  ;;  %v3431_v12 = vld [vmem:[%s6058_s14 + $0x12a8] sm:$0xff] }
 0x326   : > { %4609 = vmatpush.msra.mxu1 %v3335_v14  ;;  %4630 = vmatpush.msra.mxu3 %v3365_v15  ;;  %v3433_v9 = vld [vmem:[%s6058_s14 + $0x12b8] sm:$0xff]  ;;  %v3495_v14 = vld [vmem:[%s6058_s14 + $0x14a8] sm:$0xff] }
 0x327   : > { %4580 = vmatmul.f32.vlgmr.msra.gmra.mxu2 %v6320_v19  ;;  %4591 = vmatpush.msra.mxu0 %v3299_v20  ;;  %v3359_v19 = vld [vmem:[%s6058_s14 + $0x1068] sm:$0xff]  ;;  %v3497_v26 = vld [vmem:[%s6058_s14 + $0x14b8] sm:$0xff] }
 0x328   : > { %4644 = vmatpush.msrb.mxu2 %v3409_v16  ;;  %4610 = vmatpush.msra.mxu1 %v3333_v40  ;;  %v3381_v11 = vld [vmem:[%s6058_s14 + $0x1118] sm:$0xff]  ;;  %v3379_v15 = vld [vmem:[%s6058_s14 + $0x1108] sm:$0xff] }
 0x329   : > { %4631 = vmatpush.msra.mxu3 %v3363_v21  ;;  %4592 = vmatpush.msra.mxu0 %v3297_v27  ;;  %v3465_v13 = vld [vmem:[%s6058_s14 + $0x13b8] sm:$0xff]  ;;  %v3463_v20 = vld [vmem:[%s6058_s14 + $0x13a8] sm:$0xff] }
 0x32a   : > { %4645 = vmatpush.msrb.mxu2 %v3407_v5  ;;  %4611 = vmatpush.msra.mxu1 %v3331_v28  ;;  %v3429_v16 = vld [vmem:[%s6058_s14 + $0x1298] sm:$0xff]  ;;  %v3427_v5 = vld [vmem:[%s6058_s14 + $0x1288] sm:$0xff] }
 0x32b   : > { %4632 = vmatpush.msra.mxu3 %v3361_v24  ;;  %4593 = vmatpush.msra.mxu0 %v3295_v42  ;;  %v3493_v40 = vld [vmem:[%s6058_s14 + $0x1498] sm:$0xff]  ;;  %v3491_v28 = vld [vmem:[%s6058_s14 + $0x1488] sm:$0xff] }
 0x32c   : > { %4646 = vmatpush.msrb.mxu2 %v3405_v29  ;;  %4612 = vmatpush.msra.mxu1 %v3329_v30  ;;  %v3537_v21 = vld [vmem:[%s6058_s14 + $0x15f8] sm:$0xff]  ;;  %v3535_v24 = vld [vmem:[%s6058_s14 + $0x15e8] sm:$0xff] }
 0x32d   : > { %4633 = vmatpush.msra.mxu3 %v3359_v19  ;;  %4594 = vmatpush.msra.mxu0 %v3293_v32  ;;  %v3461_v27 = vld [vmem:[%s6058_s14 + $0x1398] sm:$0xff]  ;;  %v3459_v42 = vld [vmem:[%s6058_s14 + $0x1388] sm:$0xff] }
 0x32e   : > { %4647 = vmatpush.msrb.mxu2 %v3403_v31  ;;  %4613 = vmatpush.msra.mxu1 %v3327_v33  ;;  %v3425_v29 = vld [vmem:[%s6058_s14 + $0x1278] sm:$0xff]  ;;  %v3423_v31 = vld [vmem:[%s6058_s14 + $0x1268] sm:$0xff] }
 0x32f   : > { %4634 = vmatpush.msra.mxu3 %v3357_v25  ;;  %4595 = vmatpush.msra.mxu0 %v3291_v23  ;;  %v3489_v30 = vld [vmem:[%s6058_s14 + $0x1478] sm:$0xff]  ;;  %v3531_v33 = vld [vmem:[%s6058_s14 + $0x15c8] sm:$0xff] }
 0x330   : > { %4648 = vmatpush.msrb.mxu2 %v3401_v34  ;;  %4614 = vmatpush.msra.mxu1 %v3325_v35  ;;  %v3533_v19 = vld [vmem:[%s6058_s14 + $0x15d8] sm:$0xff]  ;;  %v3455_v34 = vld [vmem:[%s6058_s14 + $0x1368] sm:$0xff] }
 0x331   : > { %4635 = vmatpush.msra.mxu3 %v3355_v36  ;;  %4596 = vmatpush.msra.mxu0 %v3289_v38  ;;  %v3457_v32 = vld [vmem:[%s6058_s14 + $0x1378] sm:$0xff]  ;;  %v3419_v36 = vld [vmem:[%s6058_s14 + $0x1248] sm:$0xff] }
 0x332   : > { %4649 = vmatpush.msrb.mxu2 %v3399_v37  ;;  %4615 = vmatpush.msra.mxu1 %v3323_v43  ;;  %v3421_v25 = vld [vmem:[%s6058_s14 + $0x1258] sm:$0xff]  ;;  %v3483_v38 = vld [vmem:[%s6058_s14 + $0x1448] sm:$0xff] }
 0x333   : > { %4636 = vmatpush.msra.mxu3 %v3353_v44  ;;  %4597 = vmatpush.msra.mxu0 %v3287_v46  ;;  %v3485_v23 = vld [vmem:[%s6058_s14 + $0x1458] sm:$0xff]  ;;  %v3527_v43 = vld [vmem:[%s6058_s14 + $0x15a8] sm:$0xff] }
 0x334   : > { %4650 = vmatpush.msrb.mxu2 %v3397_v45  ;;  %4616 = vmatpush.msra.mxu1 %v3321_v47  ;;  %v3529_v35 = vld [vmem:[%s6058_s14 + $0x15b8] sm:$0xff]  ;;  %v3451_v45 = vld [vmem:[%s6058_s14 + $0x1348] sm:$0xff] }
 0x335   : > { %4637 = vmatpush.msra.mxu3 %v3351_v50  ;;  %4598 = vmatpush.msra.mxu0 %v3285_v39  ;;  %v3453_v37 = vld [vmem:[%s6058_s14 + $0x1358] sm:$0xff]  ;;  %v3415_v50 = vld [vmem:[%s6058_s14 + $0x1228] sm:$0xff] }
 0x336   : > { %4651 = vmatpush.msrb.mxu2 %v3395_v51  ;;  %4617 = vmatpush.msra.mxu1 %v3319_v3  ;;  %v3417_v44 = vld [vmem:[%s6058_s14 + $0x1238] sm:$0xff]  ;;  %v3479_v39 = vld [vmem:[%s6058_s14 + $0x1428] sm:$0xff] }
 0x337   : > { %4638 = vmatpush.msra.mxu3 %v3349_v52  ;;  %4599 = vmatpush.msra.mxu0 %v3283_v56  ;;  %v3481_v46 = vld [vmem:[%s6058_s14 + $0x1438] sm:$0xff]  ;;  %v3523_v3 = vld [vmem:[%s6058_s14 + $0x1588] sm:$0xff] }
 0x338   : > { %4652 = vmatpush.msrb.mxu2 %v3393_v53  ;;  %4618 = vmatpush.msra.mxu1 %v3317_v57  ;;  %v3525_v47 = vld [vmem:[%s6058_s14 + $0x1598] sm:$0xff]  ;;  %v3447_v53 = vld [vmem:[%s6058_s14 + $0x1328] sm:$0xff] }
 0x339   : > { %4639 = vmatpush.msra.mxu3 %v3347_v41  ;;  %4600 = vmatmul.f32.vlgmr.msra.gmra.mxu0 %v6318_v18  ;;  %v3437_v18 = vld [vmem:[%s6058_s14 + $0x12d8] sm:$0xff]  ;;  %v3411_v41 = vld [vmem:[%s6058_s14 + $0x1208] sm:$0xff] }
 0x33a   : > { %4640 = vmatmul.f32.vlgmr.msra.gmra.mxu3 %v6445_v48  ;;  %4653 = vmatpush.msrb.mxu2 %v3391_v58  ;;  %v3471_v48 = vld [vmem:[%s6058_s14 + $0x13e8] sm:$0xff]  ;;  %v3449_v51 = vld [vmem:[%s6058_s14 + $0x1338] sm:$0xff] }
 0x33b   : > { %4664 = vmatpush.msrb.mxu0 %v3441_v59  ;;  %4704 = vmatpush.msrb.mxu3 %v3505_v60  ;;  %v3413_v52 = vld [vmem:[%s6058_s14 + $0x1218] sm:$0xff]  ;;  %v3475_v59 = vld [vmem:[%s6058_s14 + $0x1408] sm:$0xff] }
 0x33c   : > { %4619 = vmatpush.msra.mxu1 %v3315_v4  ;;  %4654 = vmatpush.msrb.mxu2 %v3389_v17  ;;  %v3477_v56 = vld [vmem:[%s6058_s14 + $0x1418] sm:$0xff]  ;;  %v3519_v60 = vld [vmem:[%s6058_s14 + $0x1568] sm:$0xff] }
 0x33d   : > { %4620 = vmatmul.f32.vlgmr.msra.gmra.mxu1 %v6326_v22  ;;  %4665 = vmatpush.msrb.mxu0 %v3439_v61  ;;  %v3499_v22 = vld [vmem:[%s6058_s14 + $0x14c8] sm:$0xff]  ;;  %v3521_v57 = vld [vmem:[%s6058_s14 + $0x1578] sm:$0xff] }
 0x33e   : > { %4684 = vmatpush.msrb.mxu1 %v3473_v62  ;;  %4705 = vmatpush.msrb.mxu3 %v3503_v63  ;;  %v3445_v58 = vld [vmem:[%s6058_s14 + $0x1318] sm:$0xff]  ;;  %v3443_v61 = vld [vmem:[%s6058_s14 + $0x1308] sm:$0xff] }
 0x33f   : > { %4655 = vmatpush.msrb.mxu2 %v3387_v0  ;;  %4666 = vmatpush.msrb.mxu0 %v3437_v18  ;;  %v3569_v4 = vld [vmem:[%s6058_s14 + $0x16f8] sm:$0xff]  ;;  %v3567_v0 = vld [vmem:[%s6058_s14 + $0x16e8] sm:$0xff] }
 0x340   : > { %4685 = vmatpush.msrb.mxu1 %v3471_v48  ;;  %4706 = vmatpush.msrb.mxu3 %v3501_v8  ;;  %v3633_v17 = vld [vmem:[%s6058_s14 + $0x18f8] sm:$0xff]  ;;  %v3631_v48 = vld [vmem:[%s6058_s14 + $0x18e8] sm:$0xff] }
 0x341   : > { %4656 = vmatpush.msrb.mxu2 %v3385_v1  ;;  %4667 = vmatpush.msrb.mxu0 %v3435_v2  ;;  %v5034_v62 = vld.sshfl [vmem:[#allocation1 + $0x20] sm:$0xff pattern:$0x73625140] }
 0x342   : > { %4686 = vmatpush.msrb.mxu1 %v3469_v6  ;;  %4707 = vmatpush.msrb.mxu3 %v3499_v22  ;;  %v3517_v63 = vld [vmem:[%s6058_s14 + $0x1558] sm:$0xff]  ;;  %v3515_v8 = vld [vmem:[%s6058_s14 + $0x1548] sm:$0xff] }
 0x343   : > { %4657 = vmatpush.msrb.mxu2 %v3383_v7  ;;  %4668 = vmatpush.msrb.mxu0 %v3433_v9  ;;  %v3601_v18 = vld [vmem:[%s6058_s14 + $0x17f8] sm:$0xff]  ;;  %v3599_v1 = vld [vmem:[%s6058_s14 + $0x17e8] sm:$0xff] }
 0x344   : > { %4687 = vmatpush.msrb.mxu1 %v3467_v10  ;;  %4708 = vmatpush.msrb.mxu3 %v3497_v26  ;;  %v3629_v2 = vld [vmem:[%s6058_s14 + $0x18d8] sm:$0xff]  ;;  %v3563_v22 = vld [vmem:[%s6058_s14 + $0x16c8] sm:$0xff] }
 0x345   : > { %4658 = vmatpush.msrb.mxu2 %v3381_v11  ;;  %4669 = vmatpush.msrb.mxu0 %v3431_v12  ;;  %v3513_v6 = vld [vmem:[%s6058_s14 + $0x1538] sm:$0xff]  ;;  %v3511_v9 = vld [vmem:[%s6058_s14 + $0x1528] sm:$0xff] }
 0x346   : > { %4688 = vmatpush.msrb.mxu1 %v3465_v13  ;;  %4709 = vmatpush.msrb.mxu3 %v3495_v14  ;;  %v3597_v7 = vld [vmem:[%s6058_s14 + $0x17d8] sm:$0xff]  ;;  %v3595_v26 = vld [vmem:[%s6058_s14 + $0x17c8] sm:$0xff] }
 0x347   : > { %4659 = vmatpush.msrb.mxu2 %v3379_v15  ;;  %4670 = vmatpush.msrb.mxu0 %v3429_v16  ;;  %v3561_v10 = vld [vmem:[%s6058_s14 + $0x16b8] sm:$0xff]  ;;  %v3559_v13 = vld [vmem:[%s6058_s14 + $0x16a8] sm:$0xff] }
 0x348   : > { %4689 = vmatpush.msrb.mxu1 %v3463_v20  ;;  %4710 = vmatpush.msrb.mxu3 %v3493_v40  ;;  %v3625_v11 = vld [vmem:[%s6058_s14 + $0x18b8] sm:$0xff]  ;;  %v3623_v15 = vld [vmem:[%s6058_s14 + $0x18a8] sm:$0xff] }
 0x349   : > { %4660 = vmatmul.f32.vlgmr.msrb.gmra.mxu2 %v6457_v55  ;;  %4671 = vmatpush.msrb.mxu0 %v3427_v5  ;;  %v3487_v55 = vld [vmem:[%s6058_s14 + $0x1468] sm:$0xff]  ;;  %v3509_v12 = vld [vmem:[%s6058_s14 + $0x1518] sm:$0xff] }
 0x34a   : > { %4724 = vmatpush.msra.mxu2 %v3537_v21  ;;  %4690 = vmatpush.msrb.mxu1 %v3461_v27  ;;  %v3593_v14 = vld [vmem:[%s6058_s14 + $0x17b8] sm:$0xff]  ;;  %v3507_v16 = vld [vmem:[%s6058_s14 + $0x1508] sm:$0xff] }
 0x34b   : > { %4711 = vmatpush.msrb.mxu3 %v3491_v28  ;;  %4672 = vmatpush.msrb.mxu0 %v3425_v29  ;;  %v3557_v20 = vld [vmem:[%s6058_s14 + $0x1698] sm:$0xff]  ;;  %v3591_v40 = vld [vmem:[%s6058_s14 + $0x17a8] sm:$0xff]  ;;  %v5035_v29 = vld.sshfl [vmem:[#allocation1 + $0x28] sm:$0xff pattern:$0x73625140] }
 0x34c   : > { %4725 = vmatpush.msra.mxu2 %v3535_v24  ;;  %4691 = vmatpush.msrb.mxu1 %v3459_v42  ;;  %v3621_v21 = vld [vmem:[%s6058_s14 + $0x1898] sm:$0xff]  ;;  %v3555_v27 = vld [vmem:[%s6058_s14 + $0x1688] sm:$0xff] }
 0x34d   : > { %4712 = vmatpush.msrb.mxu3 %v3489_v30  ;;  %4673 = vmatpush.msrb.mxu0 %v3423_v31  ;;  %v3665_v5 = vld [vmem:[%s6058_s14 + $0x19f8] sm:$0xff]  ;;  %v3619_v24 = vld [vmem:[%s6058_s14 + $0x1888] sm:$0xff] }
 0x34e   : > { %4726 = vmatpush.msra.mxu2 %v3533_v19  ;;  %4692 = vmatpush.msrb.mxu1 %v3457_v32  ;;  %v3589_v28 = vld [vmem:[%s6058_s14 + $0x1798] sm:$0xff]  ;;  %v3663_v42 = vld [vmem:[%s6058_s14 + $0x19e8] sm:$0xff] }
 0x34f   : > { %4713 = vmatpush.msrb.mxu3 %v3487_v55  ;;  %4674 = vmatpush.msrb.mxu0 %v3421_v25  ;;  %v3553_v30 = vld [vmem:[%s6058_s14 + $0x1678] sm:$0xff]  ;;  %v3587_v19 = vld [vmem:[%s6058_s14 + $0x1788] sm:$0xff] }
 0x350   : > { %4727 = vmatpush.msra.mxu2 %v3531_v33  ;;  %4693 = vmatpush.msrb.mxu1 %v3455_v34  ;;  %v3617_v31 = vld [vmem:[%s6058_s14 + $0x1878] sm:$0xff]  ;;  %v3551_v55 = vld [vmem:[%s6058_s14 + $0x1668] sm:$0xff] }
 0x351   : > { %4714 = vmatpush.msrb.mxu3 %v3485_v23  ;;  %4675 = vmatpush.msrb.mxu0 %v3419_v36  ;;  %v3661_v32 = vld [vmem:[%s6058_s14 + $0x19d8] sm:$0xff]  ;;  %v3615_v25 = vld [vmem:[%s6058_s14 + $0x1868] sm:$0xff] }
 0x352   : > { %4728 = vmatpush.msra.mxu2 %v3529_v35  ;;  %4694 = vmatpush.msrb.mxu1 %v3453_v37  ;;  %v3585_v33 = vld [vmem:[%s6058_s14 + $0x1778] sm:$0xff]  ;;  %v3659_v34 = vld [vmem:[%s6058_s14 + $0x19c8] sm:$0xff] }
 0x353   : > { %4715 = vmatpush.msrb.mxu3 %v3483_v38  ;;  %4676 = vmatpush.msrb.mxu0 %v3417_v44  ;;  %v3549_v23 = vld [vmem:[%s6058_s14 + $0x1658] sm:$0xff]  ;;  %v3583_v35 = vld [vmem:[%s6058_s14 + $0x1768] sm:$0xff] }
 0x354   : > { %4729 = vmatpush.msra.mxu2 %v3527_v43  ;;  %4695 = vmatpush.msrb.mxu1 %v3451_v45  ;;  %v3613_v36 = vld [vmem:[%s6058_s14 + $0x1858] sm:$0xff]  ;;  %v3547_v38 = vld [vmem:[%s6058_s14 + $0x1648] sm:$0xff] }
 0x355   : > { %4716 = vmatpush.msrb.mxu3 %v3481_v46  ;;  %4677 = vmatpush.msrb.mxu0 %v3415_v50  ;;  %v3657_v37 = vld [vmem:[%s6058_s14 + $0x19b8] sm:$0xff]  ;;  %v3611_v44 = vld [vmem:[%s6058_s14 + $0x1848] sm:$0xff] }
 0x356   : > { %4730 = vmatpush.msra.mxu2 %v3525_v47  ;;  %4696 = vmatpush.msrb.mxu1 %v3449_v51  ;;  %v3581_v43 = vld [vmem:[%s6058_s14 + $0x1758] sm:$0xff]  ;;  %v3655_v45 = vld [vmem:[%s6058_s14 + $0x19a8] sm:$0xff] }
 0x357   : > { %4717 = vmatpush.msrb.mxu3 %v3479_v39  ;;  %4678 = vmatpush.msrb.mxu0 %v3413_v52  ;;  %v3545_v46 = vld [vmem:[%s6058_s14 + $0x1638] sm:$0xff]  ;;  %v3579_v47 = vld [vmem:[%s6058_s14 + $0x1748] sm:$0xff] }
 0x358   : > { %4731 = vmatpush.msra.mxu2 %v3523_v3  ;;  %4697 = vmatpush.msrb.mxu1 %v3447_v53  ;;  %v3609_v50 = vld [vmem:[%s6058_s14 + $0x1838] sm:$0xff]  ;;  %v3543_v39 = vld [vmem:[%s6058_s14 + $0x1628] sm:$0xff] }
 0x359   : > { %4718 = vmatpush.msrb.mxu3 %v3477_v56  ;;  %4679 = vmatpush.msrb.mxu0 %v3411_v41  ;;  %v3653_v51 = vld [vmem:[%s6058_s14 + $0x1998] sm:$0xff]  ;;  %v3607_v52 = vld [vmem:[%s6058_s14 + $0x1828] sm:$0xff] }
 0x35a   : > { %4732 = vmatpush.msra.mxu2 %v3521_v57  ;;  %4698 = vmatpush.msrb.mxu1 %v3445_v58  ;;  %v3577_v3 = vld [vmem:[%s6058_s14 + $0x1738] sm:$0xff]  ;;  %v3651_v53 = vld [vmem:[%s6058_s14 + $0x1988] sm:$0xff] }
 0x35b   : > { %4719 = vmatpush.msrb.mxu3 %v3475_v59  ;;  %4680 = vmatmul.f32.vlgmr.msrb.gmra.mxu0 %v6447_v49  ;;  %v3565_v49 = vld [vmem:[%s6058_s14 + $0x16d8] sm:$0xff]  ;;  %v3575_v57 = vld [vmem:[%s6058_s14 + $0x1728] sm:$0xff] }
 0x35c   : > { %4720 = vmatmul.f32.vlgmr.msrb.gmra.mxu3 %v5034_v62  ;;  %4733 = vmatpush.msra.mxu2 %v3519_v60  ;;  %v3541_v56 = vld [vmem:[%s6058_s14 + $0x1618] sm:$0xff]  ;;  %v3539_v59 = vld [vmem:[%s6058_s14 + $0x1608] sm:$0xff] }
 0x35d   : > { %4744 = vmatpush.msra.mxu0 %v3569_v4  ;;  %4784 = vmatpush.msra.mxu3 %v3633_v17  ;;  %v3605_v41 = vld [vmem:[%s6058_s14 + $0x1818] sm:$0xff]  ;;  %v3603_v4 = vld [vmem:[%s6058_s14 + $0x1808] sm:$0xff] }
 0x35e   : > { %4699 = vmatpush.msrb.mxu1 %v3443_v61  ;;  %4734 = vmatpush.msra.mxu2 %v3517_v63  ;;  %v3649_v58 = vld [vmem:[%s6058_s14 + $0x1978] sm:$0xff]  ;;  %v3647_v17 = vld [vmem:[%s6058_s14 + $0x1968] sm:$0xff] }
 0x35f   : > { %4700 = vmatmul.f32.vlgmr.msrb.gmra.mxu1 %v6454_v54  ;;  %4745 = vmatpush.msra.mxu0 %v3567_v0  ;;  %v3627_v54 = vld [vmem:[%s6058_s14 + $0x18c8] sm:$0xff]  ;;  %v3573_v60 = vld [vmem:[%s6058_s14 + $0x1718] sm:$0xff] }
 0x360   : > { %4764 = vmatpush.msra.mxu1 %v3601_v18  ;;  %4785 = vmatpush.msra.mxu3 %v3631_v48  ;;  %v3571_v61 = vld [vmem:[%s6058_s14 + $0x1708] sm:$0xff]  ;;  %v3645_v18 = vld [vmem:[%s6058_s14 + $0x1958] sm:$0xff] }
 0x361   : > { %4735 = vmatpush.msra.mxu2 %v3515_v8  ;;  %4746 = vmatpush.msra.mxu0 %v3565_v49  ;;  %v3679_v62 = vld [vmem:[%s6058_s14 + $0x1a68] sm:$0xf]  ;;  %v3677_v48 = vld [vmem:[%s6058_s14 + $0x1a58] sm:$0xff]  ;;  %v5038_v8 = vld.sshfl [vmem:[#allocation1 + $0x38] sm:$0xff pattern:$0x73625140] }
 0x362   : > { %4765 = vmatpush.msra.mxu1 %v3599_v1  ;;  %4786 = vmatpush.msra.mxu3 %v3629_v2  ;;  %v5036_v63 = vld.sshfl [vmem:[#allocation1 + $0x30] sm:$0xff pattern:$0x73625140]  ;;  %v5037_v0 = vld.sshfl [vmem:[#allocation1] sm:$0xff pattern:$0x73625140] }
 0x363   : > { %4736 = vmatpush.msra.mxu2 %v3513_v6  ;;  %4747 = vmatpush.msra.mxu0 %v3563_v22  ;;  %v3643_v49 = vld [vmem:[%s6058_s14 + $0x1948] sm:$0xff]  ;;  %v3641_v2 = vld [vmem:[%s6058_s14 + $0x1938] sm:$0xff] }
 0x364   : > { %4766 = vmatpush.msra.mxu1 %v3597_v7  ;;  %4787 = vmatpush.msra.mxu3 %v3627_v54  ;;  %v3675_v1 = vld [vmem:[%s6058_s14 + $0x1a48] sm:$0xff]  ;;  %v3673_v6 = vld [vmem:[%s6058_s14 + $0x1a38] sm:$0xff] }
 0x365   : > { %4737 = vmatpush.msra.mxu2 %v3511_v9  ;;  %4748 = vmatpush.msra.mxu0 %v3561_v10  ;;  %v3639_v22 = vld [vmem:[%s6058_s14 + $0x1928] sm:$0xff]  ;;  %v3637_v54 = vld [vmem:[%s6058_s14 + $0x1918] sm:$0xff] }
 0x366   : > { %4767 = vmatpush.msra.mxu1 %v3595_v26  ;;  %4788 = vmatpush.msra.mxu3 %v3625_v11  ;;  %v3671_v7 = vld [vmem:[%s6058_s14 + $0x1a28] sm:$0xff]  ;;  %v3669_v9 = vld [vmem:[%s6058_s14 + $0x1a18] sm:$0xff]  ;;  %v5039_v11 = vld.sshfl [vmem:[#allocation1 + $0x8] sm:$0xff pattern:$0x73625140] }
 0x367   : > { %4738 = vmatpush.msra.mxu2 %v3509_v12  ;;  %4749 = vmatpush.msra.mxu0 %v3559_v13  ;;  %v3635_v10 = vld [vmem:[%s6058_s14 + $0x1908] sm:$0xff]  ;;  %v3821_v13 = vpop.f32.mrf.mxu2 }
 0x368   : > { %4768 = vmatpush.msra.mxu1 %v3593_v14  ;;  %4789 = vmatpush.msra.mxu3 %v3623_v15  ;;  %v3667_v26 = vld [vmem:[%s6058_s14 + $0x1a08] sm:$0xff]  ;;  %v3781_v14 = vpop.f32.mrf.mxu0  ;;  %v3841_v15 = vpop.f32.mrf.mxu3  ;;  %s4968_s14 = sshll.u32 %s7070_s18, 1 }
 0x369   : > { %4739 = vmatpush.msra.mxu2 %v3507_v16  ;;  %4750 = vmatpush.msra.mxu0 %v3557_v20  ;;  %v5040_v12 = vld.sshfl [vmem:[#allocation1 + $0x10] sm:$0xff pattern:$0x73625140]  ;;  %v3801_v16 = vpop.f32.mrf.mxu1  ;;  %s2826_s20 = scalar_lea.vmem %s7056_s4, %s4968_s14 }
 0x36a   : > { %4769 = vmatpush.msra.mxu1 %v3591_v40  ;;  %4790 = vmatpush.msra.mxu3 %v3621_v21 }
 0x36b   : > { %4740 = vmatmul.f32.vlgmr.msra.gmra.mxu2 %v5035_v29  ;;  %4751 = vmatpush.msra.mxu0 %v3555_v27 }
 0x36c   : > { %4804 = vmatpush.msrb.mxu2 %v3665_v5  ;;  %4770 = vmatpush.msra.mxu1 %v3589_v28 }
 0x36d   : > { %4791 = vmatpush.msra.mxu3 %v3619_v24  ;;  %4752 = vmatpush.msra.mxu0 %v3553_v30  ;;  %v3680_v30 = vld [vmem:[%s2816_s10] sm:$0x3] }
 0x36e   : > { %4805 = vmatpush.msrb.mxu2 %v3663_v42  ;;  %4771 = vmatpush.msra.mxu1 %v3587_v19 }
 0x36f   : > { %4792 = vmatpush.msra.mxu3 %v3617_v31  ;;  %4753 = vmatpush.msra.mxu0 %v3551_v55  ;;  %v3901_v20 = vpop.f32.mrf.mxu2 }
 0x370   : > { %4806 = vmatpush.msrb.mxu2 %v3661_v32  ;;  %4772 = vmatpush.msra.mxu1 %v3585_v33  ;;  %v3861_v40 = vpop.f32.mrf.mxu0  ;;  %v3921_v21 = vpop.f32.mrf.mxu3  ;;  %v3682_v32 = vperm.slane %v3680_v30, 0 }
 0x371   : > { %4793 = vmatpush.msra.mxu3 %v3615_v25  ;;  %4754 = vmatpush.msra.mxu0 %v3549_v23  ;;  %v3881_v5 = vpop.f32.mrf.mxu1 }
 0x372   : > { %4807 = vmatpush.msrb.mxu2 %v3659_v34  ;;  %4773 = vmatpush.msra.mxu1 %v3583_v35  ;;  %v3782_v25 = vadd.f32 %v3781_v14, %v3682_v32 }
 0x373   : > { %4794 = vmatpush.msra.mxu3 %v3613_v36  ;;  %4755 = vmatpush.msra.mxu0 %v3547_v38 }
 0x374   : > { %4808 = vmatpush.msrb.mxu2 %v3657_v37  ;;  %4774 = vmatpush.msra.mxu1 %v3581_v43  ;;  %v3802_v35 = vadd.f32 %v3801_v16, %v3782_v25 }
 0x375   : > { %4795 = vmatpush.msra.mxu3 %v3611_v44  ;;  %4756 = vmatpush.msra.mxu0 %v3545_v46 }
 0x376   : > { %4809 = vmatpush.msrb.mxu2 %v3655_v45  ;;  %4775 = vmatpush.msra.mxu1 %v3579_v47  ;;  %v3822_v38 = vadd.f32 %v3821_v13, %v3802_v35 }
 0x377   : > { %4796 = vmatpush.msra.mxu3 %v3609_v50  ;;  %4757 = vmatpush.msra.mxu0 %v3543_v39  ;;  %v3981_v27 = vpop.f32.mrf.mxu2 }
 0x378   : > { %4810 = vmatpush.msrb.mxu2 %v3653_v51  ;;  %4776 = vmatpush.msra.mxu1 %v3577_v3  ;;  %v3941_v28 = vpop.f32.mrf.mxu0  ;;  %v4001_v24 = vpop.f32.mrf.mxu3  ;;  %v3842_v45 = vadd.f32 %v3841_v15, %v3822_v38  ;;  %v3683_v51 = vperm.slane %v3680_v30, 1 }
 0x379   : > { %4797 = vmatpush.msra.mxu3 %v3607_v52  ;;  %4758 = vmatpush.msra.mxu0 %v3541_v56  ;;  %v3961_v29 = vpop.f32.mrf.mxu1 }
 0x37a   : > { %4811 = vmatpush.msrb.mxu2 %v3651_v53  ;;  %4777 = vmatpush.msra.mxu1 %v3575_v57  ;;  %v3862_v50 = vadd.f32 %v3861_v40, %v3842_v45 }
 0x37b   : > { %4798 = vmatpush.msra.mxu3 %v3605_v41  ;;  %4759 = vmatpush.msra.mxu0 %v3539_v59 }
 0x37c   : > { %4812 = vmatpush.msrb.mxu2 %v3649_v58  ;;  %4778 = vmatpush.msra.mxu1 %v3573_v60  ;;  %v3882_v52 = vadd.f32 %v3881_v5, %v3862_v50 }
 0x37d   : > { %4799 = vmatpush.msra.mxu3 %v3603_v4  ;;  %4760 = vmatmul.f32.vlgmr.msra.gmra.mxu0 %v5036_v63 }
 0x37e   : > { %4800 = vmatmul.f32.vlgmr.msra.gmra.mxu3 %v5037_v0  ;;  %4813 = vmatpush.msrb.mxu2 %v3647_v17  ;;  %v3902_v41 = vadd.f32 %v3901_v20, %v3882_v52 }
 0x37f   : > { %4779 = vmatpush.msra.mxu1 %v3571_v61  ;;  %4971 = vmatpush.msk.msrb.mxu0 %vm3757_vm0, %v3679_v62  ;;  %v4061_v42 = vpop.f32.mrf.mxu2 }
 0x380   : > { %4780 = vmatmul.f32.vlgmr.msra.gmra.mxu1 %v5038_v8  ;;  %4814 = vmatpush.msrb.mxu2 %v3645_v18  ;;  %v4021_v19 = vpop.f32.mrf.mxu0  ;;  %v4081_v31 = vpop.f32.mrf.mxu3  ;;  %v3922_v60 = vadd.f32 %v3921_v21, %v3902_v41 }
 0x381   : > { %4834 = vmatpush.msrb.mxu0 %v3677_v48  ;;  %v4041_v55 = vpop.f32.mrf.mxu1 }
 0x382   : > { %4815 = vmatpush.msrb.mxu2 %v3643_v49  ;;  %v3942_v61 = vadd.f32 %v3941_v28, %v3922_v60 }
 0x383   : > { %4835 = vmatpush.msrb.mxu0 %v3675_v1 }
 0x384   : > { %4816 = vmatpush.msrb.mxu2 %v3641_v2  ;;  %v3962_v0 = vadd.f32 %v3961_v29, %v3942_v61 }
 0x385   : > { %4836 = vmatpush.msrb.mxu0 %v3673_v6 }
 0x386   : > { %4817 = vmatpush.msrb.mxu2 %v3639_v22  ;;  %v3982_v18 = vadd.f32 %v3981_v27, %v3962_v0 }
 0x387   : > { %4837 = vmatpush.msrb.mxu0 %v3671_v7  ;;  %v4141_v33 = vpop.f32.mrf.mxu2 }
 0x388   : > { %4818 = vmatpush.msrb.mxu2 %v3637_v54  ;;  %v4101_v34 = vpop.f32.mrf.mxu0  ;;  %v4161_v23 = vpop.f32.mrf.mxu3  ;;  %v4002_v1 = vadd.f32 %v4001_v24, %v3982_v18 }
 0x389   : > { %4838 = vmatpush.msrb.mxu0 %v3669_v9  ;;  %v4121_v36 = vpop.f32.mrf.mxu1 }
 0x38a   : > { %4819 = vmatpush.msrb.mxu2 %v3635_v10  ;;  %v4022_v6 = vadd.f32 %v4021_v19, %v4002_v1 }
 0x38b   : > { %4820 = vmatmul.f32.vlgmr.msrb.gmra.mxu2 %v5039_v11  ;;  %4839 = vmatpush.msrb.mxu0 %v3667_v26 }
 0x38c   : > { %4972 = vmatmul.msk.f32.vlgmr.msrb.gmra.mxu0 %vm3754_vm1, %v5040_v12  ;;  %v4042_v9 = vadd.f32 %v4041_v55, %v4022_v6 }
 0x38e   : > { %v4062_v11 = vadd.f32 %v4061_v42, %v4042_v9 }
 0x38f   : > { %v7018_v37 = vpop.f32.mrf.mxu2 }
 0x390   : > { %v4181_v43 = vpop.f32.mrf.mxu0  ;;  %v7020_v44 = vpop.f32.mrf.mxu3  ;;  %v4082_v15 = vadd.f32 %v4081_v31, %v4062_v11 }
 0x391   : > { %v4201_v46 = vpop.f32.mrf.mxu1 }
 0x392   : > { %v4102_v40 = vadd.f32 %v4101_v34, %v4082_v15 }
 0x394   : > { %v4122_v28 = vadd.f32 %v4121_v36, %v4102_v40 }
 0x396   : > { %v4142_v30 = vadd.f32 %v4141_v33, %v4122_v28 }
 0x397   : > { %v7022_v47 = vpop.f32.mrf.mxu2 }
 0x398   : > { %v7024_v39 = vpop.f32.mrf.mxu0  ;;  %v4321_v3 = vpop.f32.mrf.mxu3  ;;  %v4162_v25 = vadd.f32 %v4161_v23, %v4142_v30 }
 0x399   : > { %v4322_v53 = vadd.f32 %v4321_v3, %v3683_v51  ;;  %v7026_v56 = vpop.f32.mrf.mxu1 }
 0x39a   : > { %v4182_v42 = vadd.f32 %v4181_v43, %v4162_v25 }
 0x39c   : > { %v4202_v51 = vadd.f32 %v4201_v46, %v4182_v42 }
 0x39e   : > { %v4222_v3 = vadd.f32 %v7018_v37, %v4202_v51 }
 0x39f   : > { %v4341_v57 = vpop.f32.mrf.mxu2 }
 0x3a0   : > { %v4342_v58 = vadd.f32 %v4341_v57, %v4322_v53  ;;  %v4361_v59 = vpop.f32.mrf.mxu0  ;;  %v4401_v63 = vpop.f32.mrf.mxu3  ;;  %v4242_v33 = vadd.f32 %v7020_v44, %v4222_v3  ;;  %v4846_v44 = vld [vmem:[%s2821_s13] sm:$0x3] }
 0x3a1   : > { %v4381_v17 = vpop.f32.mrf.mxu1 }
 0x3a2   : > { %v4362_v4 = vadd.f32 %v4361_v59, %v4342_v58  ;;  %v4262_v23 = vadd.f32 %v7024_v39, %v4242_v33 }
 0x3a4   : > { %v4382_v62 = vadd.f32 %v4381_v17, %v4362_v4  ;;  %v4282_v60 = vadd.f32 %v7026_v56, %v4262_v23 }
 0x3a6   : > { %v4402_v48 = vadd.f32 %v4401_v63, %v4382_v62  ;;  %v4302_v17 = vadd.f32 %v7022_v47, %v4282_v60 }
 0x3a7   : > { %v4421_v8 = vpop.f32.mrf.mxu2 }
 0x3a8   : > { %v4441_v49 = vpop.f32.mrf.mxu0  ;;  %v4422_v2 = vadd.f32 %v4421_v8, %v4402_v48  ;;  %v4481_v54 = vpop.f32.mrf.mxu3  ;;  %v4844_v0 = vmax.f32 %v4302_v17, 0.0  ;;  %v4848_v48 = vperm.slane %v4846_v44, 0  ;;  %v4849_v8 = vperm.slane %v4846_v44, 1 }
 0x3a9   : > { %v4461_v7 = vpop.f32.mrf.mxu1 }
 0x3aa   : > { %v4442_v22 = vadd.f32 %v4441_v49, %v4422_v2  ;;  %v4852_v1 = vmul.f32 %v4848_v48, %v4844_v0 }
 0x3ac   : > { %v4462_v10 = vadd.f32 %v4461_v7, %v4442_v22  ;;  %v4855_v6 = vsel %vm4854_vm2, %v4852_v1, 0.0 }
 0x3ae   : > { %v4482_v12 = vadd.f32 %v4481_v54, %v4462_v10 }
 0x3af   : > { %v4501_v26 = vpop.f32.mrf.mxu2 }
 0x3b0   : > { %v4521_v13 = vpop.f32.mrf.mxu0  ;;  %v4502_v14 = vadd.f32 %v4501_v26, %v4482_v12  ;;  %v4561_v21 = vpop.f32.mrf.mxu3 }
 0x3b1   : > { %v4541_v20 = vpop.f32.mrf.mxu1 }
 0x3b2   : > { %v4522_v16 = vadd.f32 %v4521_v13, %v4502_v14 }
 0x3b4   : > { %v4542_v5 = vadd.f32 %v4541_v20, %v4522_v16 }
 0x3b6   : > { %v4562_v24 = vadd.f32 %v4561_v21, %v4542_v5 }
 0x3b7   : > { %v4581_v27 = vpop.f32.mrf.mxu2 }
 0x3b8   : > { %v4601_v29 = vpop.f32.mrf.mxu0  ;;  %v4582_v19 = vadd.f32 %v4581_v27, %v4562_v24 }
 0x3ba   : > { %v4602_v32 = vadd.f32 %v4601_v29, %v4582_v19  ;;  %v4621_v55 = vpop.f32.mrf.mxu1 }
 0x3bc   : > { %v4622_v38 = vadd.f32 %v4621_v55, %v4602_v32 }
 0x3bd   : > { %v4641_v35 = vpop.f32.mrf.mxu3 }
 0x3be   : > { %v4642_v50 = vadd.f32 %v4641_v35, %v4622_v38 }
 0x3cc   : > { %v4661_v45 = vpop.f32.mrf.mxu2 }
 0x3cd   : > { %v4662_v34 = vadd.f32 %v4661_v45, %v4642_v50 }
 0x3d8   : > { %v4681_v31 = vpop.f32.mrf.mxu0 }
 0x3d9   : > { %v4682_v52 = vadd.f32 %v4681_v31, %v4662_v34 }
 0x3dc   : > { %v4701_v36 = vpop.f32.mrf.mxu1 }
 0x3dd   : > { %v4702_v57 = vadd.f32 %v4701_v36, %v4682_v52 }
 0x3df   : > { %v4721_v53 = vpop.f32.mrf.mxu3 }
 0x3e0   : > { %v4722_v58 = vadd.f32 %v4721_v53, %v4702_v57 }
 0x3ee   : > { %v4741_v41 = vpop.f32.mrf.mxu2 }
 0x3ef   : > { %v4742_v59 = vadd.f32 %v4741_v41, %v4722_v58 }
 0x3fa   : > { %v4761_v43 = vpop.f32.mrf.mxu0 }
 0x3fb   : > { %v4762_v4 = vadd.f32 %v4761_v43, %v4742_v59 }
 0x3fd   : > { %v4781_v46 = vpop.f32.mrf.mxu1 }
 0x3fe   : > { %v4782_v61 = vadd.f32 %v4781_v46, %v4762_v4 }
 0x401   : > { %v4801_v37 = vpop.f32.mrf.mxu3 }
 0x402   : > { %v4802_v62 = vadd.f32 %v4801_v37, %v4782_v61 }
 0x409   : > { %v4841_v39 = vpop.f32.mrf.mxu0 }
 0x40e   : > { %v4821_v63 = vpop.f32.mrf.mxu2 }
 0x40f   : > { %v4822_v18 = vadd.f32 %v4821_v63, %v4802_v62 }
 0x411   : > { %v4842_v56 = vadd.f32 %v4841_v39, %v4822_v18 }
 0x413   : > { %v4845_v49 = vmax.f32 %v4842_v56, 0.0 }
 0x415   : > { %v4853_v2 = vmul.f32 %v4849_v8, %v4845_v49 }
 0x417   : > { %v4856_v22 = vsel %vm4854_vm2, %v4853_v2, 0.0 }
 0x418   : > { %v4857_v7 = vadd.f32 %v4856_v22, %v4855_v6 }
 0x41a   : > { %4858 = vadd.xlane.f32.xlu0 %v4857_v7 }
 0x48d   : > { %v4859_v47 = vpop.xlane.xlu0 %4858 }
 0x48e   : > { %4861 = vst.msk [vmem:[%s2826_s20] sm:$0x3] %vm4860_vm3, %v4859_v47 }
 0x48f PF: > { %p11_p12 = scmp.ge.s32.totalorder %s5141_s19, 4   ;;  %s7062_s15 = smov %s5075_s16 }
 0x490   : > { %s7063_s16 = smov %s5150_s22  ;;  %s7064_s17 = smov %s5141_s19 }
 0x491   :  { %13 = sbr.rel (!%p11_p12) target bundleno = 2 (0x2), region = 128 }

</bundles_post_ra>
